<compile_context>
chip_gen: v5e
topology: v5e:2x2
jax: 0.10.0
libtpu: 0.0.40
codegen_flags: <defaults>
</compile_context>

<pallas_src>
import functools

import jax
import jax.numpy as jnp
from jax import lax
from jax.experimental import pallas as pl
from jax.experimental.pallas import tpu as pltpu

EPS = 1e-5          # PyTorch BatchNorm2d default eps
NEG_SLOPE = 0.01    # PyTorch nn.LeakyReLU default negative_slope
LANE = 128          # TPU lane width


def _round_up(x, m):
    return ((x + m - 1) // m) * m


def _bn_lrelu(y, g, b):
    """BatchNorm2d (training mode, biased batch variance) + LeakyReLU, all f32.

    y: (M, F) f32; g, b: (1, F) f32 (zero in any padded feature columns).
    Two-pass stats (mean, then centered variance) avoid E[y^2]-mean^2 cancellation.
    """
    inv_m = 1.0 / y.shape[0]
    mean = jnp.sum(y, axis=0, keepdims=True) * inv_m
    d = y - mean
    var = jnp.sum(d * d, axis=0, keepdims=True) * inv_m
    s = lax.rsqrt(var + EPS) * g          # folded scale (EUP rsqrt)
    z = d * s + b                         # one mul + one add over M x F
    return jnp.maximum(z, NEG_SLOPE * z)  # LeakyReLU as a single max


def _unet_block_kernel(x1p_ref, w1_ref, w2_ref, g1_ref, b1_ref, g2_ref, b2_ref,
                       o_ref, *, n, h, w, f):
    m = n * h * w
    k2 = 9 * f
    k2p = w2_ref.shape[0]

    # ---- stage 1: packed-K conv (single MXU dot) + BN1 + LeakyReLU ----
    y1 = jnp.dot(x1p_ref[...], w1_ref[...],
                 preferred_element_type=jnp.float32)            # (M, F) f32
    a1 = _bn_lrelu(y1, g1_ref[...], b1_ref[...])                # (M, F) f32

    # ---- stage 2: build packed (M, K2p) operand entirely in VMEM ----
    # Neighbour taps via 2 sublane-shifted buffers (x-1 / x+1, zeros at the
    # boundary column baked in by the concat) and h-padded buffers whose dy taps
    # are tile-aligned leading-axis slices.  No halo scratch, no masked stores.
    a1_4d = a1.reshape(n, h, w, f)
    zcol = jnp.zeros((n, h, 1, f), jnp.float32)
    sx = [
        jnp.concatenate([zcol, a1_4d[:, :, :w - 1, :]], axis=2),   # neighbour x-1
        a1_4d,                                                     # x
        jnp.concatenate([a1_4d[:, :, 1:, :], zcol], axis=2),       # neighbour x+1
    ]
    zrow = jnp.zeros((n, 1, w, f), jnp.float32)
    ph = [jnp.concatenate([zrow, s, zrow], axis=1) for s in sx]    # (n, h+2, w, f)

    taps = [ph[dx][:, dy:dy + h] for dy in range(3) for dx in range(3)]
    if k2p > k2:
        taps = taps + [jnp.zeros((n, h, w, k2p - k2), jnp.float32)]
    packed = jnp.concatenate(taps, axis=-1)                        # (n, h, w, K2p)
    packed = packed.reshape(m, k2p).astype(jnp.bfloat16)

    # ---- conv2 (single dot) + BN2 + LeakyReLU, lane-dense (M, Fp) store ----
    y2 = jnp.dot(packed, w2_ref[...],
                 preferred_element_type=jnp.float32)               # (M, Fp) f32
    o_ref[...] = _bn_lrelu(y2, g2_ref[...], b2_ref[...])


def _pack_weight(w_oihw, k_pad, f_pad):
    """PyTorch conv weight (F, C, 3, 3) -> (k_pad, f_pad) bf16.

    K index = (dy*3 + dx)*C + c, matching the tap-concat order used for operands.
    """
    f, c, kh, kw = w_oihw.shape
    wp = jnp.transpose(w_oihw, (2, 3, 1, 0)).reshape(kh * kw * c, f)
    wp = jnp.pad(wp, ((0, k_pad - kh * kw * c), (0, f_pad - f)))
    return wp.astype(jnp.bfloat16)


def _vmem_limit_bytes():
    # Size the scoped-VMEM request per generation (v5e/v6e: 128 MiB physical,
    # v7x: 64 MiB).  This kernel only needs ~2 MiB; ask for a modest slice.
    try:
        cap = pltpu.get_tpu_info().vmem_capacity_bytes
    except Exception:
        cap = 64 * 1024 * 1024
    return int(min(32 * 1024 * 1024, cap // 2))


def unet_block_forward(x_nchw, params):
    """x_nchw: (N, Cin, H, W) f32 -> (N, F, H, W) f32 (matches UNetBlock.forward).

    For chained UNet blocks, prefer keeping activations NHWC end-to-end to drop
    the NCHW<->NHWC transposes; the NCHW API is kept here to match the module.
    """
    w1, g1, b1, w2, g2, b2 = params
    n, cin, h, w = x_nchw.shape
    f = w1.shape[0]
    m = n * h * w
    k1 = _round_up(9 * cin, LANE)       # stage-1 packed K (36 -> 128)
    k2p = _round_up(9 * f, LANE)        # stage-2 packed K (288 -> 384)
    fp = _round_up(f, LANE)             # lane-dense padded output features

    # ---- stage-1 operand: pack the 9 taps into K (tiny wrapper-side prep; the
    # packed (M, k1) bf16 operand is smaller than a channel-padded halo). ----
    x_nhwc = jnp.transpose(x_nchw, (0, 2, 3, 1))
    xp = jnp.pad(x_nhwc, ((0, 0), (1, 1), (1, 1), (0, 0)))
    taps1 = [xp[:, dy:dy + h, dx:dx + w, :] for dy in range(3) for dx in range(3)]
    x1p = jnp.concatenate(taps1, axis=-1).reshape(m, 9 * cin)
    x1p = jnp.pad(x1p, ((0, 0), (0, k1 - 9 * cin))).astype(jnp.bfloat16)

    # ---- packed weights & affine params ----
    w1p = _pack_weight(w1, k1, f)        # (k1, F)   bf16
    w2p = _pack_weight(w2, k2p, fp)      # (k2p, Fp) bf16 (zero rows/cols for pad)
    g1p = g1.astype(jnp.float32).reshape(1, f)
    b1p = b1.astype(jnp.float32).reshape(1, f)
    g2p = jnp.pad(g2.astype(jnp.float32), (0, fp - f)).reshape(1, fp)
    b2p = jnp.pad(b2.astype(jnp.float32), (0, fp - f)).reshape(1, fp)

    kernel = functools.partial(_unet_block_kernel, n=n, h=h, w=w, f=f)

    flops = 2 * m * (k1 * f + k2p * fp)
    bytes_accessed = (x1p.size * 2 + w1p.size * 2 + w2p.size * 2
                      + (2 * f + 2 * fp) * 4 + m * fp * 4)

    out2d = pl.pallas_call(
        kernel,
        out_shape=jax.ShapeDtypeStruct((m, fp), jnp.float32),
        grid=(1,),
        in_specs=[
            pl.BlockSpec((m, k1), lambda i: (0, 0)),
            pl.BlockSpec((k1, f), lambda i: (0, 0)),
            pl.BlockSpec((k2p, fp), lambda i: (0, 0)),
            pl.BlockSpec((1, f), lambda i: (0, 0)),
            pl.BlockSpec((1, f), lambda i: (0, 0)),
            pl.BlockSpec((1, fp), lambda i: (0, 0)),
            pl.BlockSpec((1, fp), lambda i: (0, 0)),
        ],
        out_specs=pl.BlockSpec((m, fp), lambda i: (0, 0)),
        compiler_params=pltpu.CompilerParams(
            dimension_semantics=("arbitrary",),
            vmem_limit_bytes=_vmem_limit_bytes(),
        ),
        cost_estimate=pl.CostEstimate(
            flops=flops, transcendentals=f + fp, bytes_accessed=bytes_accessed),
    )(x1p, w1p, w2p, g1p, b1p, g2p, b2p)

    out = out2d[:, :f].reshape(n, h, w, f)       # drop zero-padded feature lanes
    return jnp.transpose(out, (0, 3, 1, 2))      # back to NCHW (module API)


def _reference_forward(x_nchw, params):
    """Pure-JAX reference at the precision the kernel uses
    (bf16 conv operands, f32 accumulation; BN/affine/LeakyReLU in f32)."""
    w1, g1, b1, w2, g2, b2 = params

    def conv(x, w):
        return lax.conv_general_dilated(
            x.astype(jnp.bfloat16), w.astype(jnp.bfloat16),
            window_strides=(1, 1), padding=((1, 1), (1, 1)),
            dimension_numbers=("NCHW", "OIHW", "NCHW"),
            preferred_element_type=jnp.float32)

    def bn_lrelu(y, g, b):
        mean = jnp.mean(y, axis=(0, 2, 3), keepdims=True)
        var = jnp.mean((y - mean) ** 2, axis=(0, 2, 3), keepdims=True)
        yn = (y - mean) * lax.rsqrt(var + EPS) * g.reshape(1, -1, 1, 1) + b.reshape(1, -1, 1, 1)
        return jnp.where(yn >= 0, yn, NEG_SLOPE * yn)

    out = bn_lrelu(conv(x_nchw, w1), g1, b1)
    out = bn_lrelu(conv(out, w2), g2, b2)
    return out


if __name__ == "__main__":
    # Small shapes consistent with the module: batch=2, in_channels=4, features=32, spatial=16
    N, Cin, H, W, Feat = 2, 4, 16, 16, 32

    key = jax.random.PRNGKey(0)
    kx, kw1, kw2 = jax.random.split(key, 3)

    x = jax.random.normal(kx, (N, Cin, H, W), dtype=jnp.float32)

    # Deterministic parameter init (shapes from UNetBlock.__init__)
    w1 = jax.random.normal(kw1, (Feat, Cin, 3, 3), dtype=jnp.float32) * 0.1   # conv1.weight
    w2 = jax.random.normal(kw2, (Feat, Feat, 3, 3), dtype=jnp.float32) * 0.1  # conv2.weight
    g1 = jnp.ones((Feat,), dtype=jnp.float32)    # norm1.weight
    b1 = jnp.zeros((Feat,), dtype=jnp.float32)   # norm1.bias
    g2 = jnp.ones((Feat,), dtype=jnp.float32)    # norm2.weight
    b2 = jnp.zeros((Feat,), dtype=jnp.float32)   # norm2.bias
    params = (w1, g1, b1, w2, g2, b2)

    fwd = jax.jit(unet_block_forward)
    out = jax.block_until_ready(fwd(x, params))
    assert out.shape == (N, Feat, H, W), out.shape

    ref = jax.block_until_ready(_reference_forward(x, params))
    max_err = float(jnp.max(jnp.abs(out - ref)))
    assert jnp.allclose(out, ref, atol=2e-3, rtol=2e-3), max_err

    print("KERNEL_OK")
</pallas_src>

<mosaic_0001>
module attributes {stable_mosaic.version = 11 : i64} {
  func.func @_unet_block_kernel(%arg0: i32, %arg1: memref<512x128xbf16, #tpu.memory_space<vmem>>, %arg2: memref<128x32xbf16, #tpu.memory_space<vmem>>, %arg3: memref<384x128xbf16, #tpu.memory_space<vmem>>, %arg4: memref<1x32xf32, #tpu.memory_space<vmem>>, %arg5: memref<1x32xf32, #tpu.memory_space<vmem>>, %arg6: memref<1x128xf32, #tpu.memory_space<vmem>>, %arg7: memref<1x128xf32, #tpu.memory_space<vmem>>, %arg8: memref<512x128xf32, #tpu.memory_space<vmem>>) attributes {dimension_semantics = [#tpu.dimension_semantics<arbitrary>], iteration_bounds = array<i64: 1>, scalar_prefetch = 0 : i64, scratch_operands = 0 : i64, tpu.core_type = #tpu.core_type<tc>, window_params = [{pipeline_mode = #tpu.pipeline_mode<synchronous>, transform_indices = @transform_0, window_bounds = array<i64: 512, 128>}, {pipeline_mode = #tpu.pipeline_mode<synchronous>, transform_indices = @transform_1, window_bounds = array<i64: 128, 32>}, {pipeline_mode = #tpu.pipeline_mode<synchronous>, transform_indices = @transform_2, window_bounds = array<i64: 384, 128>}, {pipeline_mode = #tpu.pipeline_mode<synchronous>, transform_indices = @transform_3, window_bounds = array<i64: 1, 32>}, {pipeline_mode = #tpu.pipeline_mode<synchronous>, transform_indices = @transform_4, window_bounds = array<i64: 1, 32>}, {pipeline_mode = #tpu.pipeline_mode<synchronous>, transform_indices = @transform_5, window_bounds = array<i64: 1, 128>}, {pipeline_mode = #tpu.pipeline_mode<synchronous>, transform_indices = @transform_6, window_bounds = array<i64: 1, 128>}, {pipeline_mode = #tpu.pipeline_mode<synchronous>, transform_indices = @transform_7, window_bounds = array<i64: 512, 128>}]} {
    %c0 = arith.constant 0 : index
    %c0_0 = arith.constant 0 : index
    %0 = vector.load %arg1[%c0, %c0_0] : memref<512x128xbf16, #tpu.memory_space<vmem>>, vector<512x128xbf16>
    %c0_1 = arith.constant 0 : index
    %c0_2 = arith.constant 0 : index
    %1 = vector.load %arg2[%c0_1, %c0_2] : memref<128x32xbf16, #tpu.memory_space<vmem>>, vector<128x32xbf16>
    %cst = arith.constant dense<0.000000e+00> : vector<512x32xf32>
    %2 = tpu.matmul %0, %1, %cst {dimension_numbers = #tpu.dot_dimension_numbers<[1], [0], [0], [1], [0, 0, 1, 1], [], []>} : vector<512x128xbf16>, vector<128x32xbf16>, vector<512x32xf32> -> vector<512x32xf32>
    %c0_3 = arith.constant 0 : index
    %c0_4 = arith.constant 0 : index
    %3 = vector.load %arg4[%c0_3, %c0_4] : memref<1x32xf32, #tpu.memory_space<vmem>>, vector<1x32xf32>
    %c0_5 = arith.constant 0 : index
    %c0_6 = arith.constant 0 : index
    %4 = vector.load %arg5[%c0_5, %c0_6] : memref<1x32xf32, #tpu.memory_space<vmem>>, vector<1x32xf32>
    %cst_7 = arith.constant dense<0.000000e+00> : vector<32xf32>
    %5 = vector.multi_reduction <add>, %2, %cst_7 [0] : vector<512x32xf32> to vector<32xf32>
    %6 = vector.shape_cast %5 : vector<32xf32> to vector<1x32xf32>
    %cst_8 = arith.constant 0.001953125 : f32
    %7 = vector.broadcast %cst_8 : f32 to vector<1x32xf32>
    %8 = arith.mulf %6, %7 : vector<1x32xf32>
    %9 = vector.broadcast %8 : vector<1x32xf32> to vector<512x32xf32>
    %10 = arith.subf %2, %9 : vector<512x32xf32>
    %11 = arith.mulf %10, %10 : vector<512x32xf32>
    %cst_9 = arith.constant dense<0.000000e+00> : vector<32xf32>
    %12 = vector.multi_reduction <add>, %11, %cst_9 [0] : vector<512x32xf32> to vector<32xf32>
    %13 = vector.shape_cast %12 : vector<32xf32> to vector<1x32xf32>
    %cst_10 = arith.constant 0.001953125 : f32
    %14 = vector.broadcast %cst_10 : f32 to vector<1x32xf32>
    %15 = arith.mulf %13, %14 : vector<1x32xf32>
    %cst_11 = arith.constant 9.99999974E-6 : f32
    %16 = vector.broadcast %cst_11 : f32 to vector<1x32xf32>
    %17 = arith.addf %15, %16 : vector<1x32xf32>
    %18 = math.rsqrt %17 : vector<1x32xf32>
    %19 = arith.mulf %18, %3 : vector<1x32xf32>
    %20 = vector.broadcast %19 : vector<1x32xf32> to vector<512x32xf32>
    %21 = arith.mulf %10, %20 : vector<512x32xf32>
    %22 = vector.broadcast %4 : vector<1x32xf32> to vector<512x32xf32>
    %23 = arith.addf %21, %22 : vector<512x32xf32>
    %cst_12 = arith.constant 0.00999999977 : f32
    %24 = vector.broadcast %cst_12 : f32 to vector<512x32xf32>
    %25 = arith.mulf %24, %23 : vector<512x32xf32>
    %26 = arith.maximumf %23, %25 : vector<512x32xf32>
    %27 = vector.shape_cast %26 : vector<512x32xf32> to vector<2x16x16x32xf32>
    %cst_13 = arith.constant 0.000000e+00 : f32
    %28 = vector.broadcast %cst_13 : f32 to vector<2x16x1x32xf32>
    %29 = vector.extract_strided_slice %27 {offsets = [0, 0, 0, 0], sizes = [2, 16, 15, 32], strides = [1, 1, 1, 1]} : vector<2x16x16x32xf32> to vector<2x16x15x32xf32>
    %30 = tpu.concatenate %28, %29 in 2 : vector<2x16x1x32xf32>, vector<2x16x15x32xf32> -> vector<2x16x16x32xf32>
    %31 = vector.extract_strided_slice %27 {offsets = [0, 0, 1, 0], sizes = [2, 16, 15, 32], strides = [1, 1, 1, 1]} : vector<2x16x16x32xf32> to vector<2x16x15x32xf32>
    %32 = tpu.concatenate %31, %28 in 2 : vector<2x16x15x32xf32>, vector<2x16x1x32xf32> -> vector<2x16x16x32xf32>
    %cst_14 = arith.constant 0.000000e+00 : f32
    %33 = vector.broadcast %cst_14 : f32 to vector<2x1x16x32xf32>
    %34 = tpu.concatenate %33, %30, %33 in 1 : vector<2x1x16x32xf32>, vector<2x16x16x32xf32>, vector<2x1x16x32xf32> -> vector<2x18x16x32xf32>
    %35 = tpu.concatenate %33, %27, %33 in 1 : vector<2x1x16x32xf32>, vector<2x16x16x32xf32>, vector<2x1x16x32xf32> -> vector<2x18x16x32xf32>
    %36 = tpu.concatenate %33, %32, %33 in 1 : vector<2x1x16x32xf32>, vector<2x16x16x32xf32>, vector<2x1x16x32xf32> -> vector<2x18x16x32xf32>
    %37 = vector.extract_strided_slice %34 {offsets = [0, 0, 0, 0], sizes = [2, 16, 16, 32], strides = [1, 1, 1, 1]} : vector<2x18x16x32xf32> to vector<2x16x16x32xf32>
    %38 = vector.extract_strided_slice %35 {offsets = [0, 0, 0, 0], sizes = [2, 16, 16, 32], strides = [1, 1, 1, 1]} : vector<2x18x16x32xf32> to vector<2x16x16x32xf32>
    %39 = vector.extract_strided_slice %36 {offsets = [0, 0, 0, 0], sizes = [2, 16, 16, 32], strides = [1, 1, 1, 1]} : vector<2x18x16x32xf32> to vector<2x16x16x32xf32>
    %40 = vector.extract_strided_slice %34 {offsets = [0, 1, 0, 0], sizes = [2, 16, 16, 32], strides = [1, 1, 1, 1]} : vector<2x18x16x32xf32> to vector<2x16x16x32xf32>
    %41 = vector.extract_strided_slice %35 {offsets = [0, 1, 0, 0], sizes = [2, 16, 16, 32], strides = [1, 1, 1, 1]} : vector<2x18x16x32xf32> to vector<2x16x16x32xf32>
    %42 = vector.extract_strided_slice %36 {offsets = [0, 1, 0, 0], sizes = [2, 16, 16, 32], strides = [1, 1, 1, 1]} : vector<2x18x16x32xf32> to vector<2x16x16x32xf32>
    %43 = vector.extract_strided_slice %34 {offsets = [0, 2, 0, 0], sizes = [2, 16, 16, 32], strides = [1, 1, 1, 1]} : vector<2x18x16x32xf32> to vector<2x16x16x32xf32>
    %44 = vector.extract_strided_slice %35 {offsets = [0, 2, 0, 0], sizes = [2, 16, 16, 32], strides = [1, 1, 1, 1]} : vector<2x18x16x32xf32> to vector<2x16x16x32xf32>
    %45 = vector.extract_strided_slice %36 {offsets = [0, 2, 0, 0], sizes = [2, 16, 16, 32], strides = [1, 1, 1, 1]} : vector<2x18x16x32xf32> to vector<2x16x16x32xf32>
    %cst_15 = arith.constant 0.000000e+00 : f32
    %46 = vector.broadcast %cst_15 : f32 to vector<2x16x16x96xf32>
    %47 = tpu.concatenate %37, %38, %39, %40, %41, %42, %43, %44, %45, %46 in 3 : vector<2x16x16x32xf32>, vector<2x16x16x32xf32>, vector<2x16x16x32xf32>, vector<2x16x16x32xf32>, vector<2x16x16x32xf32>, vector<2x16x16x32xf32>, vector<2x16x16x32xf32>, vector<2x16x16x32xf32>, vector<2x16x16x32xf32>, vector<2x16x16x96xf32> -> vector<2x16x16x384xf32>
    %48 = vector.shape_cast %47 : vector<2x16x16x384xf32> to vector<512x384xf32>
    %49 = arith.truncf %48 : vector<512x384xf32> to vector<512x384xbf16>
    %c0_16 = arith.constant 0 : index
    %c0_17 = arith.constant 0 : index
    %50 = vector.load %arg3[%c0_16, %c0_17] : memref<384x128xbf16, #tpu.memory_space<vmem>>, vector<384x128xbf16>
    %cst_18 = arith.constant dense<0.000000e+00> : vector<512x128xf32>
    %51 = tpu.matmul %49, %50, %cst_18 {dimension_numbers = #tpu.dot_dimension_numbers<[1], [0], [0], [1], [0, 0, 1, 1], [], []>} : vector<512x384xbf16>, vector<384x128xbf16>, vector<512x128xf32> -> vector<512x128xf32>
    %c0_19 = arith.constant 0 : index
    %c0_20 = arith.constant 0 : index
    %52 = vector.load %arg6[%c0_19, %c0_20] : memref<1x128xf32, #tpu.memory_space<vmem>>, vector<1x128xf32>
    %c0_21 = arith.constant 0 : index
    %c0_22 = arith.constant 0 : index
    %53 = vector.load %arg7[%c0_21, %c0_22] : memref<1x128xf32, #tpu.memory_space<vmem>>, vector<1x128xf32>
    %cst_23 = arith.constant dense<0.000000e+00> : vector<128xf32>
    %54 = vector.multi_reduction <add>, %51, %cst_23 [0] : vector<512x128xf32> to vector<128xf32>
    %55 = vector.shape_cast %54 : vector<128xf32> to vector<1x128xf32>
    %cst_24 = arith.constant 0.001953125 : f32
    %56 = vector.broadcast %cst_24 : f32 to vector<1x128xf32>
    %57 = arith.mulf %55, %56 : vector<1x128xf32>
    %58 = vector.broadcast %57 : vector<1x128xf32> to vector<512x128xf32>
    %59 = arith.subf %51, %58 : vector<512x128xf32>
    %60 = arith.mulf %59, %59 : vector<512x128xf32>
    %cst_25 = arith.constant dense<0.000000e+00> : vector<128xf32>
    %61 = vector.multi_reduction <add>, %60, %cst_25 [0] : vector<512x128xf32> to vector<128xf32>
    %62 = vector.shape_cast %61 : vector<128xf32> to vector<1x128xf32>
    %cst_26 = arith.constant 0.001953125 : f32
    %63 = vector.broadcast %cst_26 : f32 to vector<1x128xf32>
    %64 = arith.mulf %62, %63 : vector<1x128xf32>
    %cst_27 = arith.constant 9.99999974E-6 : f32
    %65 = vector.broadcast %cst_27 : f32 to vector<1x128xf32>
    %66 = arith.addf %64, %65 : vector<1x128xf32>
    %67 = math.rsqrt %66 : vector<1x128xf32>
    %68 = arith.mulf %67, %52 : vector<1x128xf32>
    %69 = vector.broadcast %68 : vector<1x128xf32> to vector<512x128xf32>
    %70 = arith.mulf %59, %69 : vector<512x128xf32>
    %71 = vector.broadcast %53 : vector<1x128xf32> to vector<512x128xf32>
    %72 = arith.addf %70, %71 : vector<512x128xf32>
    %cst_28 = arith.constant 0.00999999977 : f32
    %73 = vector.broadcast %cst_28 : f32 to vector<512x128xf32>
    %74 = arith.mulf %73, %72 : vector<512x128xf32>
    %75 = arith.maximumf %72, %74 : vector<512x128xf32>
    %c0_29 = arith.constant 0 : index
    %c0_30 = arith.constant 0 : index
    %76 = vector.load %arg8[%c0_29, %c0_30] : memref<512x128xf32, #tpu.memory_space<vmem>>, vector<512x128xf32>
    tpu.vector_store %arg8[%c0_29, %c0_30], %75 {strides = array<i32>} : memref<512x128xf32, #tpu.memory_space<vmem>>, vector<512x128xf32>,
    return
  }
  func.func @transform_0(%arg0: i32) -> (i32, i32) {
    %c0_i32 = arith.constant 0 : i32
    %c0_i32_0 = arith.constant 0 : i32
    %c0_i32_1 = arith.constant 0 : i32
    return %c0_i32, %c0_i32_0 : i32, i32
  }
  func.func @transform_1(%arg0: i32) -> (i32, i32) {
    %c0_i32 = arith.constant 0 : i32
    %c0_i32_0 = arith.constant 0 : i32
    %c0_i32_1 = arith.constant 0 : i32
    return %c0_i32, %c0_i32_0 : i32, i32
  }
  func.func @transform_2(%arg0: i32) -> (i32, i32) {
    %c0_i32 = arith.constant 0 : i32
    %c0_i32_0 = arith.constant 0 : i32
    %c0_i32_1 = arith.constant 0 : i32
    return %c0_i32, %c0_i32_0 : i32, i32
  }
  func.func @transform_3(%arg0: i32) -> (i32, i32) {
    %c0_i32 = arith.constant 0 : i32
    %c0_i32_0 = arith.constant 0 : i32
    %c0_i32_1 = arith.constant 0 : i32
    return %c0_i32, %c0_i32_0 : i32, i32
  }
  func.func @transform_4(%arg0: i32) -> (i32, i32) {
    %c0_i32 = arith.constant 0 : i32
    %c0_i32_0 = arith.constant 0 : i32
    %c0_i32_1 = arith.constant 0 : i32
    return %c0_i32, %c0_i32_0 : i32, i32
  }
  func.func @transform_5(%arg0: i32) -> (i32, i32) {
    %c0_i32 = arith.constant 0 : i32
    %c0_i32_0 = arith.constant 0 : i32
    %c0_i32_1 = arith.constant 0 : i32
    return %c0_i32, %c0_i32_0 : i32, i32
  }
  func.func @transform_6(%arg0: i32) -> (i32, i32) {
    %c0_i32 = arith.constant 0 : i32
    %c0_i32_0 = arith.constant 0 : i32
    %c0_i32_1 = arith.constant 0 : i32
    return %c0_i32, %c0_i32_0 : i32, i32
  }
  func.func @transform_7(%arg0: i32) -> (i32, i32) {
    %c0_i32 = arith.constant 0 : i32
    %c0_i32_0 = arith.constant 0 : i32
    %c0_i32_1 = arith.constant 0 : i32
    return %c0_i32, %c0_i32_0 : i32, i32
  }
}

</mosaic_0001>

<bundles_post_ra>
// kernel: unet_block_forward.1
= control target key start
LH: loop header
LB: loop body
LE: loop exit
PB: predicated region body
PF: predicated region fallthrough
CT: control target
= control target key end

     0   :  { %s10943_s0 = inlined_call_operand.vmem [shape: bf16[512,128], index: 0, kind: input, shape index: {}]   ;;  %s10944_s1 = inlined_call_operand.vmem [shape: bf16[128,32], index: 1, kind: input, shape index: {}]   ;;  %s10945_s2 = inlined_call_operand.vmem [shape: bf16[384,128], index: 2, kind: input, shape index: {}]   ;;  %s10946_s3 = inlined_call_operand.vmem [shape: f32[1,32], index: 3, kind: input, shape index: {}]   ;;  %s10947_s4 = inlined_call_operand.vmem [shape: f32[1,32], index: 4, kind: input, shape index: {}]   ;;  %s10948_s5 = inlined_call_operand.vmem [shape: f32[1,128], index: 5, kind: input, shape index: {}]   ;;  %s10949_s6 = inlined_call_operand.vmem [shape: f32[1,128], index: 6, kind: input, shape index: {}]   ;;  %s10950_s7 = inlined_call_operand.hbm [shape: f32[512,128], index: 7, kind: output, shape index: {}]  }
   0x1   :  { %v5054_v0 = vld [vmem:[%s10944_s1 + $0x38] sm:$0xff]  ;;  %v5053_v1 = vld [vmem:[%s10944_s1 + $0x30] sm:$0xff] }
   0x2   :  { %347 = vmatpush.bf16.msra.mxu0 %v5054_v0 }
   0x3   :  { %12 = vsyncpa [#allocation3], 0  ;;  %v5052_v2 = vld [vmem:[%s10944_s1 + $0x28] sm:$0xff]  ;;  %v5051_v3 = vld [vmem:[%s10944_s1 + $0x20] sm:$0xff]  ;;  %vm518_vm0 = vcmask 261120   ;;  %vm1442_vm4 = vcmask 1046528  }
   0x4   :  { %v5050_v4 = vld [vmem:[%s10944_s1 + $0x18] sm:$0xff]  ;;  %v5049_v5 = vld [vmem:[%s10944_s1 + $0x10] sm:$0xff]  ;;  %v5048_v6 = vld [vmem:[%s10944_s1 + $0x8] sm:$0xff]  ;;  %s6040_s25 = smov 32   ;;  %s6041_s26 = smov 64   ;;  %vm1251_vm6 = vcmask 1040384  }
   0x5   :  { %v5047_v7 = vld [vmem:[%s10944_s1] sm:$0xff]  ;;  %v5016_v9 = vld [vmem:[%s10943_s0 + $0x8] sm:$0xff]  ;;  %v5017_v10 = vld [vmem:[%s10943_s0 + $0x10] sm:$0xff]  ;;  %s6042_s27 = smov 96   ;;  %vm2872_vm7 = vcmask 523264   ;;  %vm2934_vm8 = vcmask 785408  }
   0x6   :  { %348 = vmatpush.bf16.msra.mxu0 %v5053_v1  ;;  %v5015_v8 = vld [vmem:[%s10943_s0] sm:$0xff]  ;;  %v5018_v11 = vld [vmem:[%s10943_s0 + $0x18] sm:$0xff]  ;;  %v5020_v13 = vld [vmem:[%s10943_s0 + $0x28] sm:$0xff]  ;;  %s4657_s14 = sshll.u32 %s10950_s7, 4  ;;  %s6045_s15 = smov 128   ;;  %s4658_s14 = int_to_ptr.hbm [resolvable:$true] %s4657_s14 }
   0x7   :  { %v5019_v12 = vld [vmem:[%s10943_s0 + $0x20] sm:$0xff]  ;;  %v5021_v14 = vld [vmem:[%s10943_s0 + $0x30] sm:$0xff]  ;;  %v5022_v15 = vld [vmem:[%s10943_s0 + $0x38] sm:$0xff]  ;;  %s6046_s16 = smov 8  }
   0x8   :  { %v5023_v16 = vld [vmem:[%s10943_s0 + $0x40] sm:$0xff]  ;;  %v5024_v19 = vld [vmem:[%s10943_s0 + $0x48] sm:$0xff]  ;;  %v5025_v22 = vld [vmem:[%s10943_s0 + $0x50] sm:$0xff] }
   0x9   :  { %v5026_v25 = vld [vmem:[%s10943_s0 + $0x58] sm:$0xff]  ;;  %v5027_v28 = vld [vmem:[%s10943_s0 + $0x60] sm:$0xff]  ;;  %v5028_v31 = vld [vmem:[%s10943_s0 + $0x68] sm:$0xff] }
   0xa   :  { %349 = vmatpush.bf16.msra.mxu0 %v5052_v2  ;;  %v5029_v34 = vld [vmem:[%s10943_s0 + $0x70] sm:$0xff]  ;;  %v5030_v37 = vld [vmem:[%s10943_s0 + $0x78] sm:$0xff]  ;;  %v5031_v40 = vld [vmem:[%s10943_s0 + $0x80] sm:$0xff] }
   0xb   :  { %v5032_v43 = vld [vmem:[%s10943_s0 + $0x88] sm:$0xff]  ;;  %v5033_v46 = vld [vmem:[%s10943_s0 + $0x90] sm:$0xff]  ;;  %v5034_v49 = vld [vmem:[%s10943_s0 + $0x98] sm:$0xff] }
   0xc   :  { %v5035_v52 = vld [vmem:[%s10943_s0 + $0xa0] sm:$0xff]  ;;  %v5036_v55 = vld [vmem:[%s10943_s0 + $0xa8] sm:$0xff]  ;;  %v5037_v58 = vld [vmem:[%s10943_s0 + $0xb0] sm:$0xff] }
   0xd   :  { %v5038_v61 = vld [vmem:[%s10943_s0 + $0xb8] sm:$0xff]  ;;  %v5039_v0 = vld [vmem:[%s10943_s0 + $0xc0] sm:$0xff]  ;;  %vm7165_vm5 = vmpackc.low %vm518_vm0, %vm518_vm0 }
   0xe   :  { %350 = vmatpush.bf16.msra.mxu0 %v5051_v3  ;;  %v5040_v3 = vld [vmem:[%s10943_s0 + $0xc8] sm:$0xff] }
  0x12   :  { %351 = vmatpush.bf16.msra.mxu0 %v5050_v4 }
  0x16   :  { %352 = vmatpush.bf16.msra.mxu0 %v5049_v5 }
  0x1a   :  { %353 = vmatpush.bf16.msra.mxu0 %v5048_v6  ;;  %v5041_v6 = vld [vmem:[%s10943_s0 + $0xd0] sm:$0xff] }
  0x1e   :  { %354 = vmatpush.bf16.msra.mxu0 %v5047_v7 }
  0x21   :  { %355 = vmatmul.bf16.vlgmr.msra.gmra.mxu0 %v5015_v8 }
  0x31   :  { %360 = vmatmul.bf16.gmra.mxu0 %v5016_v9  ;;  %v5042_v9 = vld [vmem:[%s10943_s0 + $0xd8] sm:$0xff] }
  0x41   :  { %365 = vmatmul.bf16.gmra.mxu0 %v5017_v10 }
  0x51   :  { %370 = vmatmul.bf16.gmra.mxu0 %v5018_v11 }
  0x61   :  { %375 = vmatmul.bf16.gmra.mxu0 %v5019_v12  ;;  %v5043_v12 = vld [vmem:[%s10943_s0 + $0xe0] sm:$0xff] }
  0x71   :  { %380 = vmatmul.bf16.gmra.mxu0 %v5020_v13 }
  0x81   :  { %385 = vmatmul.bf16.gmra.mxu0 %v5021_v14 }
  0x91   :  { %390 = vmatmul.bf16.gmra.mxu0 %v5022_v15  ;;  %v5044_v15 = vld [vmem:[%s10943_s0 + $0xe8] sm:$0xff] }
  0x9e   :  { %v6138_v17 = vpop.f32.mrf.mxu0 }
  0xa1   :  { %395 = vmatmul.bf16.gmra.mxu0 %v5023_v16 }
  0xa6   :  { %v6140_v18 = vpop.f32.mrf.mxu0 }
  0xae   :  { %v6145_v20 = vpop.f32.mrf.mxu0 }
  0xb1   :  { %400 = vmatmul.bf16.gmra.mxu0 %v5024_v19 }
  0xb6   :  { %v6147_v21 = vpop.f32.mrf.mxu0 }
  0xbe   :  { %v6152_v23 = vpop.f32.mrf.mxu0 }
  0xc1   :  { %405 = vmatmul.bf16.gmra.mxu0 %v5025_v22  ;;  %v5045_v22 = vld [vmem:[%s10943_s0 + $0xf0] sm:$0xff] }
  0xc6   :  { %v6154_v24 = vpop.f32.mrf.mxu0 }
  0xce   :  { %v6159_v26 = vpop.f32.mrf.mxu0 }
  0xd1   :  { %410 = vmatmul.bf16.gmra.mxu0 %v5026_v25 }
  0xd6   :  { %v6161_v27 = vpop.f32.mrf.mxu0 }
  0xde   :  { %v6166_v29 = vpop.f32.mrf.mxu0 }
  0xe1   :  { %415 = vmatmul.bf16.gmra.mxu0 %v5027_v28 }
  0xe6   :  { %v6168_v30 = vpop.f32.mrf.mxu0 }
  0xee   :  { %v6173_v32 = vpop.f32.mrf.mxu0 }
  0xf1   :  { %420 = vmatmul.bf16.gmra.mxu0 %v5028_v31  ;;  %v5046_v31 = vld [vmem:[%s10943_s0 + $0xf8] sm:$0xff] }
  0xf6   :  { %v6175_v33 = vpop.f32.mrf.mxu0 }
  0xfe   :  { %v6180_v35 = vpop.f32.mrf.mxu0 }
 0x101   :  { %425 = vmatmul.bf16.gmra.mxu0 %v5029_v34 }
 0x106   :  { %v6182_v36 = vpop.f32.mrf.mxu0 }
 0x10e   :  { %v6187_v38 = vpop.f32.mrf.mxu0 }
 0x111   :  { %430 = vmatmul.bf16.gmra.mxu0 %v5030_v37 }
 0x116   :  { %v6189_v39 = vpop.f32.mrf.mxu0 }
 0x117   :  { %11270 = vst [vmem:[#allocation5_spill] sm:$0xff] %v6189_v39 }
 0x11e   :  { %v6194_v41 = vpop.f32.mrf.mxu0 }
 0x121   :  { %435 = vmatmul.bf16.gmra.mxu0 %v5031_v40  ;;  %v520_v40 = vsel %vm518_vm0, %v6140_v18, 0.0 }
 0x126   :  { %v6196_v42 = vpop.f32.mrf.mxu0 }
 0x12e   :  { %v6201_v44 = vpop.f32.mrf.mxu0 }
 0x131   :  { %440 = vmatmul.bf16.gmra.mxu0 %v5032_v43  ;;  %v519_v43 = vsel %vm518_vm0, %v6138_v17, 0.0 }
 0x136   :  { %v6203_v45 = vpop.f32.mrf.mxu0 }
 0x137   :  { %11271 = vst [vmem:[#allocation6_spill] sm:$0xff] %v6203_v45 }
 0x13e   :  { %v6208_v47 = vpop.f32.mrf.mxu0 }
 0x141   :  { %445 = vmatmul.bf16.gmra.mxu0 %v5033_v46  ;;  %v522_v46 = vsel %vm518_vm0, %v6145_v20, 0.0 }
 0x146   :  { %v6210_v48 = vpop.f32.mrf.mxu0 }
 0x14e   :  { %v6215_v50 = vpop.f32.mrf.mxu0 }
 0x151   :  { %450 = vmatmul.bf16.gmra.mxu0 %v5034_v49  ;;  %v521_v49 = vadd.f32 %v520_v40, %v519_v43  ;;  %v534_v40 = vsel %vm518_vm0, %v6166_v29, 0.0 }
 0x156   :  { %v6217_v51 = vpop.f32.mrf.mxu0 }
 0x157   :  { %11272 = vst [vmem:[#allocation7_spill] sm:$0xff] %v6217_v51 }
 0x15e   :  { %v6222_v53 = vpop.f32.mrf.mxu0 }
 0x161   :  { %455 = vmatmul.bf16.gmra.mxu0 %v5035_v52  ;;  %v524_v52 = vsel %vm518_vm0, %v6147_v21, 0.0 }
 0x166   :  { %v6224_v54 = vpop.f32.mrf.mxu0 }
 0x16e   :  { %v6229_v56 = vpop.f32.mrf.mxu0 }
 0x171   :  { %460 = vmatmul.bf16.gmra.mxu0 %v5036_v55  ;;  %v523_v55 = vadd.f32 %v522_v46, %v521_v49  ;;  %v536_v46 = vsel %vm518_vm0, %v6168_v30, 0.0 }
 0x176   :  { %v6231_v57 = vpop.f32.mrf.mxu0 }
 0x177   :  { %11273 = vst [vmem:[#allocation8_spill] sm:$0xff] %v6231_v57 }
 0x17e   :  { %v6236_v59 = vpop.f32.mrf.mxu0 }
 0x181   :  { %465 = vmatmul.bf16.gmra.mxu0 %v5037_v58 }
 0x186   :  { %v6238_v60 = vpop.f32.mrf.mxu0 }
 0x18e   :  { %v6243_v62 = vpop.f32.mrf.mxu0 }
 0x191   :  { %470 = vmatmul.bf16.gmra.mxu0 %v5038_v61  ;;  %v526_v61 = vsel %vm518_vm0, %v6152_v23, 0.0 }
 0x196   :  { %v6245_v63 = vpop.f32.mrf.mxu0 }
 0x197   :  { %11274 = vst [vmem:[#allocation9_spill] sm:$0xff] %v6245_v63 }
 0x19e   :  { %v6250_v1 = vpop.f32.mrf.mxu0 }
 0x1a1   :  { %475 = vmatmul.bf16.gmra.mxu0 %v5039_v0  ;;  %v525_v0 = vadd.f32 %v524_v52, %v523_v55  ;;  %v538_v52 = vsel %vm518_vm0, %v6173_v32, 0.0 }
 0x1a6   :  { %v6252_v2 = vpop.f32.mrf.mxu0 }
 0x1ae   :  { %v6257_v4 = vpop.f32.mrf.mxu0 }
 0x1b1   :  { %480 = vmatmul.bf16.gmra.mxu0 %v5040_v3  ;;  %v528_v3 = vsel %vm518_vm0, %v6154_v24, 0.0 }
 0x1b6   :  { %v6259_v5 = vpop.f32.mrf.mxu0 }
 0x1b7   :  { %11275 = vst [vmem:[#allocation10_spill] sm:$0xff] %v6259_v5 }
 0x1be   :  { %v6264_v7 = vpop.f32.mrf.mxu0 }
 0x1c1   :  { %485 = vmatmul.bf16.gmra.mxu0 %v5041_v6  ;;  %v527_v6 = vadd.f32 %v526_v61, %v525_v0  ;;  %v540_v61 = vsel %vm518_vm0, %v6175_v33, 0.0 }
 0x1c6   :  { %v6266_v8 = vpop.f32.mrf.mxu0 }
 0x1ce   :  { %v6271_v10 = vpop.f32.mrf.mxu0 }
 0x1d1   :  { %490 = vmatmul.bf16.gmra.mxu0 %v5042_v9  ;;  %v530_v9 = vsel %vm518_vm0, %v6159_v26, 0.0 }
 0x1d6   :  { %v6273_v11 = vpop.f32.mrf.mxu0 }
 0x1d7   :  { %11276 = vst [vmem:[#allocation11_spill] sm:$0xff] %v6273_v11 }
 0x1de   :  { %v6278_v13 = vpop.f32.mrf.mxu0 }
 0x1e1   :  { %495 = vmatmul.bf16.gmra.mxu0 %v5043_v12  ;;  %v529_v12 = vadd.f32 %v528_v3, %v527_v6  ;;  %v542_v6 = vsel %vm518_vm0, %v6180_v35, 0.0 }
 0x1e6   :  { %v6280_v14 = vpop.f32.mrf.mxu0 }
 0x1ee   :  { %v6285_v16 = vpop.f32.mrf.mxu0 }
 0x1f1   :  { %500 = vmatmul.bf16.gmra.mxu0 %v5044_v15  ;;  %v532_v15 = vsel %vm518_vm0, %v6161_v27, 0.0 }
 0x1f6   :  { %v6287_v19 = vpop.f32.mrf.mxu0 }
 0x1f7   :  { %11277 = vst [vmem:[#allocation12_spill] sm:$0xff] %v6287_v19 }
 0x1fe   :  { %v6292_v25 = vpop.f32.mrf.mxu0 }
 0x201   :  { %505 = vmatmul.bf16.gmra.mxu0 %v5045_v22  ;;  %v531_v22 = vadd.f32 %v530_v9, %v529_v12  ;;  %v544_v12 = vsel %vm518_vm0, %v6182_v36, 0.0 }
 0x203   :  { %v533_v43 = vadd.f32 %v532_v15, %v531_v22  ;;  %v546_v22 = vsel %vm518_vm0, %v6187_v38, 0.0 }
 0x205   :  { %v535_v49 = vadd.f32 %v534_v40, %v533_v43  ;;  %v548_v43 = vsel %vm518_vm0, %v6189_v39, 0.0 }
 0x206   :  { %v6294_v28 = vpop.f32.mrf.mxu0 }
 0x207   :  { %v537_v55 = vadd.f32 %v536_v46, %v535_v49 }
 0x209   :  { %v539_v0 = vadd.f32 %v538_v52, %v537_v55  ;;  %v550_v52 = vsel %vm518_vm0, %v6194_v41, 0.0 }
 0x20b   :  { %v541_v9 = vadd.f32 %v540_v61, %v539_v0  ;;  %v552_v61 = vsel %vm518_vm0, %v6196_v42, 0.0 }
 0x20d   :  { %v543_v15 = vadd.f32 %v542_v6, %v541_v9  ;;  %v554_v6 = vsel %vm518_vm0, %v6201_v44, 0.0 }
 0x20e   :  { %v6299_v34 = vpop.f32.mrf.mxu0 }
 0x20f   :  { %11278 = vst [vmem:[#allocation13_spill] sm:$0xff] %v6299_v34  ;;  %v545_v40 = vadd.f32 %v544_v12, %v543_v15  ;;  %v556_v12 = vsel %vm518_vm0, %v6203_v45, 0.0 }
 0x211   :  { %510 = vmatmul.bf16.gmra.mxu0 %v5046_v31  ;;  %v547_v46 = vadd.f32 %v546_v22, %v545_v40  ;;  %v558_v22 = vsel %vm518_vm0, %v6208_v47, 0.0 }
 0x213   :  { %v549_v55 = vadd.f32 %v548_v43, %v547_v46  ;;  %v560_v43 = vsel %vm518_vm0, %v6210_v48, 0.0 }
 0x215   :  { %v551_v0 = vadd.f32 %v550_v52, %v549_v55  ;;  %v562_v52 = vsel %vm518_vm0, %v6215_v50, 0.0 }
 0x216   :  { %v6301_v37 = vpop.f32.mrf.mxu0 }
 0x217   :  { %v553_v9 = vadd.f32 %v552_v61, %v551_v0  ;;  %v564_v61 = vsel %vm518_vm0, %v6217_v51, 0.0 }
 0x219   :  { %v555_v15 = vadd.f32 %v554_v6, %v553_v9  ;;  %v566_v6 = vsel %vm518_vm0, %v6222_v53, 0.0 }
 0x21b   :  { %v557_v40 = vadd.f32 %v556_v12, %v555_v15  ;;  %v568_v12 = vsel %vm518_vm0, %v6224_v54, 0.0 }
 0x21d   :  { %v559_v46 = vadd.f32 %v558_v22, %v557_v40  ;;  %v570_v22 = vsel %vm518_vm0, %v6229_v56, 0.0 }
 0x21e   :  { %v6311_v58 = vpop.f32.mrf.mxu0 }
 0x21f   :  { %v561_v55 = vadd.f32 %v560_v43, %v559_v46  ;;  %v572_v43 = vsel %vm518_vm0, %v6231_v57, 0.0 }
 0x221   :  { %v563_v0 = vadd.f32 %v562_v52, %v561_v55  ;;  %v574_v52 = vsel %vm518_vm0, %v6236_v59, 0.0 }
 0x223   :  { %v565_v9 = vadd.f32 %v564_v61, %v563_v0  ;;  %v576_v61 = vsel %vm518_vm0, %v6238_v60, 0.0 }
 0x225   :  { %v567_v15 = vadd.f32 %v566_v6, %v565_v9  ;;  %v578_v6 = vsel %vm518_vm0, %v6243_v62, 0.0 }
 0x226   :  { %v6321_v31 = vpop.f32.mrf.mxu0 }
 0x227   :  { %v569_v40 = vadd.f32 %v568_v12, %v567_v15  ;;  %v580_v12 = vsel %vm518_vm0, %v6245_v63, 0.0 }
 0x229   :  { %v571_v46 = vadd.f32 %v570_v22, %v569_v40  ;;  %v582_v22 = vsel %vm518_vm0, %v6250_v1, 0.0 }
 0x22b   :  { %v573_v55 = vadd.f32 %v572_v43, %v571_v46  ;;  %v584_v43 = vsel %vm518_vm0, %v6252_v2, 0.0 }
 0x22d   :  { %v575_v0 = vadd.f32 %v574_v52, %v573_v55  ;;  %v586_v52 = vsel %vm518_vm0, %v6257_v4, 0.0 }
 0x22e   :  { %v6331_v3 = vpop.f32.mrf.mxu0 }
 0x22f   :  { %11279 = vst [vmem:[#allocation14_spill] sm:$0xff] %v6331_v3  ;;  %v577_v9 = vadd.f32 %v576_v61, %v575_v0  ;;  %v588_v61 = vsel %vm518_vm0, %v6259_v5, 0.0 }
 0x231   :  { %v579_v15 = vadd.f32 %v578_v6, %v577_v9  ;;  %v590_v6 = vsel %vm518_vm0, %v6264_v7, 0.0 }
 0x233   :  { %v581_v40 = vadd.f32 %v580_v12, %v579_v15  ;;  %v592_v12 = vsel %vm518_vm0, %v6266_v8, 0.0 }
 0x235   :  { %v583_v46 = vadd.f32 %v582_v22, %v581_v40  ;;  %v594_v22 = vsel %vm518_vm0, %v6271_v10, 0.0 }
 0x236   :  { %v6341_v49 = vpop.f32.mrf.mxu0 }
 0x237   :  { %11280 = vst [vmem:[#allocation15_spill] sm:$0xff] %v6341_v49  ;;  %v585_v55 = vadd.f32 %v584_v43, %v583_v46  ;;  %v596_v43 = vsel %vm518_vm0, %v6273_v11, 0.0 }
 0x239   :  { %v587_v0 = vadd.f32 %v586_v52, %v585_v55  ;;  %v598_v52 = vsel %vm518_vm0, %v6278_v13, 0.0 }
 0x23b   :  { %v589_v9 = vadd.f32 %v588_v61, %v587_v0  ;;  %v600_v61 = vsel %vm518_vm0, %v6280_v14, 0.0 }
 0x23d   :  { %v591_v15 = vadd.f32 %v590_v6, %v589_v9  ;;  %v602_v6 = vsel %vm518_vm0, %v6285_v16, 0.0 }
 0x23e   :  { %v6351_v39 = vpop.f32.mrf.mxu0 }
 0x23f   :  { %11281 = vst [vmem:[#allocation16_spill] sm:$0xff] %v6351_v39  ;;  %v593_v40 = vadd.f32 %v592_v12, %v591_v15  ;;  %v604_v12 = vsel %vm518_vm0, %v6287_v19, 0.0 }
 0x241   :  { %v595_v46 = vadd.f32 %v594_v22, %v593_v40  ;;  %v606_v22 = vsel %vm518_vm0, %v6292_v25, 0.0 }
 0x243   :  { %v597_v55 = vadd.f32 %v596_v43, %v595_v46  ;;  %v608_v43 = vsel %vm518_vm0, %v6294_v28, 0.0 }
 0x245   :  { %v599_v0 = vadd.f32 %v598_v52, %v597_v55  ;;  %v610_v52 = vsel %vm518_vm0, %v6299_v34, 0.0 }
 0x246   :  { %v6361_v45 = vpop.f32.mrf.mxu0 }
 0x247   :  { %11282 = vst [vmem:[#allocation17_spill] sm:$0xff] %v6361_v45  ;;  %v601_v9 = vadd.f32 %v600_v61, %v599_v0  ;;  %v612_v61 = vsel %vm518_vm0, %v6301_v37, 0.0 }
 0x249   :  { %v603_v15 = vadd.f32 %v602_v6, %v601_v9  ;;  %v614_v6 = vsel %vm518_vm0, %v6311_v58, 0.0 }
 0x24b   :  { %v605_v40 = vadd.f32 %v604_v12, %v603_v15  ;;  %v616_v12 = vsel %vm518_vm0, %v6321_v31, 0.0 }
 0x24d   :  { %v607_v46 = vadd.f32 %v606_v22, %v605_v40  ;;  %v618_v22 = vsel %vm518_vm0, %v6331_v3, 0.0 }
 0x24e   :  { %v6371_v51 = vpop.f32.mrf.mxu0 }
 0x24f   :  { %11283 = vst [vmem:[#allocation18_spill] sm:$0xff] %v6371_v51  ;;  %v609_v55 = vadd.f32 %v608_v43, %v607_v46  ;;  %v620_v43 = vsel %vm518_vm0, %v6341_v49, 0.0 }
 0x251   :  { %v611_v0 = vadd.f32 %v610_v52, %v609_v55  ;;  %v622_v52 = vsel %vm518_vm0, %v6351_v39, 0.0 }
 0x253   :  { %v613_v9 = vadd.f32 %v612_v61, %v611_v0  ;;  %v624_v61 = vsel %vm518_vm0, %v6361_v45, 0.0 }
 0x255   :  { %v615_v15 = vadd.f32 %v614_v6, %v613_v9  ;;  %v626_v6 = vsel %vm518_vm0, %v6371_v51, 0.0 }
 0x256   :  { %v6381_v57 = vpop.f32.mrf.mxu0 }
 0x257   :  { %11284 = vst [vmem:[#allocation19_spill] sm:$0xff] %v6381_v57  ;;  %v617_v40 = vadd.f32 %v616_v12, %v615_v15  ;;  %v628_v12 = vsel %vm518_vm0, %v6381_v57, 0.0 }
 0x259   :  { %v619_v46 = vadd.f32 %v618_v22, %v617_v40 }
 0x25b   :  { %v621_v55 = vadd.f32 %v620_v43, %v619_v46 }
 0x25d   :  { %v623_v0 = vadd.f32 %v622_v52, %v621_v55 }
 0x25e   :  { %v6391_v63 = vpop.f32.mrf.mxu0 }
 0x25f   :  { %11285 = vst [vmem:[#allocation20_spill] sm:$0xff] %v6391_v63  ;;  %v625_v9 = vadd.f32 %v624_v61, %v623_v0  ;;  %v630_v22 = vsel %vm518_vm0, %v6391_v63, 0.0 }
 0x261   :  { %v627_v15 = vadd.f32 %v626_v6, %v625_v9 }
 0x263   :  { %v629_v40 = vadd.f32 %v628_v12, %v627_v15 }
 0x265   :  { %v631_v46 = vadd.f32 %v630_v22, %v629_v40 }
 0x266   :  { %v6401_v5 = vpop.f32.mrf.mxu0 }
 0x267   :  { %11286 = vst [vmem:[#allocation21_spill] sm:$0xff] %v6401_v5  ;;  %v632_v43 = vsel %vm518_vm0, %v6401_v5, 0.0 }
 0x268   :  { %v633_v55 = vadd.f32 %v632_v43, %v631_v46 }
 0x26e   :  { %v6411_v11 = vpop.f32.mrf.mxu0 }
 0x26f   :  { %11287 = vst [vmem:[#allocation22_spill] sm:$0xff] %v6411_v11  ;;  %v634_v52 = vsel %vm518_vm0, %v6411_v11, 0.0 }
 0x270   :  { %v635_v61 = vadd.f32 %v634_v52, %v633_v55 }
 0x276   :  { %v503_v19 = vpop.f32.mrf.mxu0 }
 0x277   :  { %v636_v51 = vsel %vm518_vm0, %v503_v19, 0.0 }
 0x278   :  { %v637_v6 = vadd.f32 %v636_v51, %v635_v61 }
 0x27e   :  { %v506_v34 = vpop.f32.mrf.mxu0 }
 0x27f   :  { %v638_v57 = vsel %vm518_vm0, %v506_v34, 0.0 }
 0x280   :  { %v639_v45 = vadd.f32 %v638_v57, %v637_v6 }
 0x286   :  { %v508_v3 = vpop.f32.mrf.mxu0 }
 0x287   :  { %v640_v9 = vsel %vm518_vm0, %v508_v3, 0.0 }
 0x288   :  { %v641_v15 = vadd.f32 %v640_v9, %v639_v45 }
 0x28e   :  { %v511_v0 = vpop.f32.mrf.mxu0 }
 0x28f   :  { %v642_v12 = vsel %vm518_vm0, %v511_v0, 0.0 }
 0x290   :  { %v643_v63 = vadd.f32 %v642_v12, %v641_v15 }
 0x296   :  { %v513_v5 = vpop.f32.mrf.mxu0 }
 0x297   :  { %v644_v22 = vsel %vm518_vm0, %v513_v5, 0.0 }
 0x298   :  { %v645_v40 = vadd.f32 %v644_v22, %v643_v63 }
 0x29a   :  { %v646_v11 = vrot.slane %v645_v40, 4 }
 0x29c   :  { %v647_v43 = vadd.f32 %v646_v11, %v645_v40 }
 0x29e   :  { %v648_v46 = vrot.slane %v647_v43, 2 }
 0x2a0   :  { %v649_v39 = vadd.f32 %v648_v46, %v647_v43 }
 0x2a2   :  { %v650_v52 = vrot.slane %v649_v39, 1 }
 0x2a4   :  { %v651_v55 = vadd.f32 %v650_v52, %v649_v39 }
 0x2a6   :  { %v6448_v49 = vmul.f32 0.001953125, %v651_v55 }
 0x2a8   :  { %v6451_v51 = vsub.f32 %v503_v19, %v6448_v49  ;;  %v6454_v57 = vsub.f32 %v506_v34, %v6448_v49  ;;  %v6457_v45 = vsub.f32 %v508_v3, %v6448_v49  ;;  %v6460_v61 = vsub.f32 %v511_v0, %v6448_v49 }
 0x2a9   :  { %v6463_v63 = vsub.f32 %v513_v5, %v6448_v49  ;;  %v6467_v39 = vsub.f32 %v6138_v17, %v6448_v49  ;;  %v6471_v11 = vsub.f32 %v6140_v18, %v6448_v49  ;;  %v6475_v19 = vsub.f32 %v6145_v20, %v6448_v49 }
 0x2aa   :  { %v6479_v34 = vsub.f32 %v6147_v21, %v6448_v49  ;;  %v6487_v17 = vsub.f32 %v6152_v23, %v6448_v49  ;;  %v6493_v20 = vsub.f32 %v6154_v24, %v6448_v49  ;;  %v6501_v12 = vsub.f32 %v6159_v26, %v6448_v49 }
 0x2ab   :  { %v717_v5 = vmul.f32 %v6467_v39, %v6467_v39  ;;  %v718_v3 = vmul.f32 %v6471_v11, %v6471_v11  ;;  %v719_v18 = vmul.f32 %v6475_v19, %v6475_v19  ;;  %v6508_v24 = vsub.f32 %v6161_v27, %v6448_v49 }
 0x2ac   :  { %v720_v21 = vmul.f32 %v6479_v34, %v6479_v34  ;;  %v721_v23 = vmul.f32 %v6487_v17, %v6487_v17  ;;  %v722_v40 = vmul.f32 %v6493_v20, %v6493_v20  ;;  %v6515_v26 = vsub.f32 %v6166_v29, %v6448_v49 }
 0x2ad   :  { %v781_v0 = vsel %vm518_vm0, %v717_v5, 0.0  ;;  %v782_v6 = vsel %vm518_vm0, %v718_v3, 0.0  ;;  %v784_v15 = vsel %vm518_vm0, %v719_v18, 0.0  ;;  %v723_v52 = vmul.f32 %v6501_v12, %v6501_v12 }
 0x2ae   :  { %v783_v9 = vadd.f32 %v782_v6, %v781_v0  ;;  %v786_v43 = vsel %vm518_vm0, %v720_v21, 0.0  ;;  %v788_v55 = vsel %vm518_vm0, %v721_v23, 0.0  ;;  %v6522_v27 = vsub.f32 %v6168_v30, %v6448_v49 }
 0x2af   :  { %v724_v3 = vmul.f32 %v6508_v24, %v6508_v24  ;;  %v790_v18 = vsel %vm518_vm0, %v722_v40, 0.0  ;;  %v6529_v29 = vsub.f32 %v6173_v32, %v6448_v49  ;;  %v725_v0 = vmul.f32 %v6515_v26, %v6515_v26 }
 0x2b0   :  { %v785_v22 = vadd.f32 %v784_v15, %v783_v9  ;;  %v792_v6 = vsel %vm518_vm0, %v723_v52, 0.0  ;;  %v6536_v30 = vsub.f32 %v6175_v33, %v6448_v49  ;;  %v726_v23 = vmul.f32 %v6522_v27, %v6522_v27 }
 0x2b1   :  { %v794_v15 = vsel %vm518_vm0, %v724_v3, 0.0  ;;  %v6543_v32 = vsub.f32 %v6180_v35, %v6448_v49  ;;  %v727_v40 = vmul.f32 %v6529_v29, %v6529_v29  ;;  %v6550_v33 = vsub.f32 %v6182_v36, %v6448_v49 }
 0x2b2   :  { %v787_v46 = vadd.f32 %v786_v43, %v785_v22  ;;  %v796_v43 = vsel %vm518_vm0, %v725_v0, 0.0  ;;  %v728_v52 = vmul.f32 %v6536_v30, %v6536_v30  ;;  %v6557_v35 = vsub.f32 %v6187_v38, %v6448_v49  ;;  %v11288_v0 = vld [vmem:[#allocation5_spill] sm:$0xff] }
 0x2b3   :  { %v729_v3 = vmul.f32 %v6543_v32, %v6543_v32  ;;  %v6564_v36 = vsub.f32 %v11288_v0, %v6448_v49  ;;  %v6571_v38 = vsub.f32 %v6194_v41, %v6448_v49  ;;  %v6585_v41 = vsub.f32 %v6201_v44, %v6448_v49 }
 0x2b4   :  { %v789_v5 = vadd.f32 %v788_v55, %v787_v46  ;;  %v798_v55 = vsel %vm518_vm0, %v726_v23, 0.0  ;;  %v6599_v44 = vsub.f32 %v6208_v47, %v6448_v49  ;;  %v6613_v47 = vsub.f32 %v6215_v50, %v6448_v49 }
 0x2b5   :  { %v6627_v50 = vsub.f32 %v6222_v53, %v6448_v49  ;;  %v6641_v53 = vsub.f32 %v6229_v56, %v6448_v49  ;;  %v6655_v56 = vsub.f32 %v6236_v59, %v6448_v49  ;;  %v6669_v59 = vsub.f32 %v6243_v62, %v6448_v49 }
 0x2b6   :  { %v791_v21 = vadd.f32 %v790_v18, %v789_v5  ;;  %v800_v18 = vsel %vm518_vm0, %v727_v40, 0.0  ;;  %v6683_v62 = vsub.f32 %v6250_v1, %v6448_v49  ;;  %v6697_v1 = vsub.f32 %v6257_v4, %v6448_v49 }
 0x2b7   :  { %v6711_v4 = vsub.f32 %v6264_v7, %v6448_v49  ;;  %v6725_v7 = vsub.f32 %v6271_v10, %v6448_v49  ;;  %v6739_v10 = vsub.f32 %v6278_v13, %v6448_v49  ;;  %v6753_v13 = vsub.f32 %v6285_v16, %v6448_v49 }
 0x2b8   :  { %v793_v9 = vadd.f32 %v792_v6, %v791_v21  ;;  %v730_v6 = vmul.f32 %v6550_v33, %v6550_v33  ;;  %v6767_v16 = vsub.f32 %v6292_v25, %v6448_v49 }
 0x2b9   :  { %11301 = vst [vmem:[#allocation24_spill] sm:$0xff] %v6725_v7 }
 0x2ba   :  { %v795_v22 = vadd.f32 %v794_v15, %v793_v9  ;;  %v802_v9 = vsel %vm518_vm0, %v728_v52, 0.0  ;;  %v731_v15 = vmul.f32 %v6557_v35, %v6557_v35  ;;  %v806_v52 = vsel %vm518_vm0, %v730_v6, 0.0  ;;  %11304 = vst [vmem:[#allocation25_spill] sm:$0xff] %v6739_v10 }
 0x2bb   :  { %11306 = vst [vmem:[#allocation27_spill] sm:$0xff] %v6753_v13 }
 0x2bc   :  { %v797_v46 = vadd.f32 %v796_v43, %v795_v22  ;;  %v804_v22 = vsel %vm518_vm0, %v729_v3, 0.0  ;;  %v6578_v43 = vsub.f32 %v6196_v42, %v6448_v49  ;;  %v808_v3 = vsel %vm518_vm0, %v731_v15, 0.0  ;;  %11309 = vst [vmem:[#allocation28_spill] sm:$0xff] %v6767_v16 }
 0x2be   :  { %v799_v5 = vadd.f32 %v798_v55, %v797_v46  ;;  %v732_v46 = vmul.f32 %v6564_v36, %v6564_v36  ;;  %v734_v0 = vmul.f32 %v6578_v43, %v6578_v43 }
 0x2c0   :  { %v801_v21 = vadd.f32 %v800_v18, %v799_v5  ;;  %v733_v5 = vmul.f32 %v6571_v38, %v6571_v38  ;;  %v810_v6 = vsel %vm518_vm0, %v732_v46, 0.0  ;;  %v814_v46 = vsel %vm518_vm0, %v734_v0, 0.0 }
 0x2c2   :  { %v803_v23 = vadd.f32 %v802_v9, %v801_v21  ;;  %v11289_v21 = vld [vmem:[#allocation6_spill] sm:$0xff]  ;;  %v812_v15 = vsel %vm518_vm0, %v733_v5, 0.0 }
 0x2c3   :  { %v6592_v42 = vsub.f32 %v11289_v21, %v6448_v49  ;;  %v11290_v21 = vld [vmem:[#allocation7_spill] sm:$0xff]  ;;  %11294 = vst [vmem:[#allocation6_spill] sm:$0xff] %v6683_v62 }
 0x2c4   :  { %v805_v40 = vadd.f32 %v804_v22, %v803_v23  ;;  %v735_v23 = vmul.f32 %v6585_v41, %v6585_v41 }
 0x2c6   :  { %v807_v55 = vadd.f32 %v806_v52, %v805_v40  ;;  %v6606_v40 = vsub.f32 %v6210_v48, %v6448_v49  ;;  %v736_v52 = vmul.f32 %v6592_v42, %v6592_v42  ;;  %v816_v5 = vsel %vm518_vm0, %v735_v23, 0.0 }
 0x2c7   :  { %v6620_v48 = vsub.f32 %v11290_v21, %v6448_v49 }
 0x2c8   :  { %v809_v18 = vadd.f32 %v808_v3, %v807_v55  ;;  %v737_v3 = vmul.f32 %v6599_v44, %v6599_v44  ;;  %v818_v0 = vsel %vm518_vm0, %v736_v52, 0.0 }
 0x2ca   :  { %v811_v9 = vadd.f32 %v810_v6, %v809_v18  ;;  %v738_v6 = vmul.f32 %v6606_v40, %v6606_v40  ;;  %v820_v23 = vsel %vm518_vm0, %v737_v3, 0.0 }
 0x2cc   :  { %v813_v22 = vadd.f32 %v812_v15, %v811_v9  ;;  %v739_v15 = vmul.f32 %v6613_v47, %v6613_v47  ;;  %v822_v52 = vsel %vm518_vm0, %v738_v6, 0.0 }
 0x2ce   :  { %v815_v55 = vadd.f32 %v814_v46, %v813_v22  ;;  %v6634_v46 = vsub.f32 %v6224_v54, %v6448_v49  ;;  %v824_v3 = vsel %vm518_vm0, %v739_v15, 0.0 }
 0x2d0   :  { %v817_v18 = vadd.f32 %v816_v5, %v815_v55  ;;  %v740_v55 = vmul.f32 %v6620_v48, %v6620_v48 }
 0x2d2   :  { %v819_v9 = vadd.f32 %v818_v0, %v817_v18  ;;  %v741_v18 = vmul.f32 %v6627_v50, %v6627_v50  ;;  %v11291_v0 = vld [vmem:[#allocation8_spill] sm:$0xff]  ;;  %v826_v6 = vsel %vm518_vm0, %v740_v55, 0.0 }
 0x2d3   :  { %v6648_v54 = vsub.f32 %v11291_v0, %v6448_v49  ;;  %v745_v0 = vmul.f32 %v6655_v56, %v6655_v56  ;;  %11296 = vst [vmem:[#allocation8_spill] sm:$0xff] %v6697_v1 }
 0x2d4   :  { %v821_v22 = vadd.f32 %v820_v23, %v819_v9  ;;  %v742_v9 = vmul.f32 %v6634_v46, %v6634_v46  ;;  %v828_v15 = vsel %vm518_vm0, %v741_v18, 0.0 }
 0x2d6   :  { %v823_v5 = vadd.f32 %v822_v52, %v821_v22  ;;  %v743_v22 = vmul.f32 %v6641_v53, %v6641_v53  ;;  %v830_v55 = vsel %vm518_vm0, %v742_v9, 0.0 }
 0x2d8   :  { %v825_v21 = vadd.f32 %v824_v3, %v823_v5  ;;  %v6662_v5 = vsub.f32 %v6238_v60, %v6448_v49  ;;  %v744_v3 = vmul.f32 %v6648_v54, %v6648_v54  ;;  %v832_v18 = vsel %vm518_vm0, %v743_v22, 0.0 }
 0x2d9   :  { %v836_v22 = vsel %vm518_vm0, %v745_v0, 0.0 }
 0x2da   :  { %v827_v23 = vadd.f32 %v826_v6, %v825_v21  ;;  %11292 = vst [vmem:[#allocation5_spill] sm:$0xff] %v6662_v5  ;;  %v834_v9 = vsel %vm518_vm0, %v744_v3, 0.0 }
 0x2dc   :  { %v829_v52 = vadd.f32 %v828_v15, %v827_v23  ;;  %v11293_v23 = vld [vmem:[#allocation9_spill] sm:$0xff]  ;;  %v746_v15 = vmul.f32 %v6662_v5, %v6662_v5 }
 0x2dd   :  { %v6676_v60 = vsub.f32 %v11293_v23, %v6448_v49 }
 0x2de   :  { %v831_v21 = vadd.f32 %v830_v55, %v829_v52  ;;  %v747_v55 = vmul.f32 %v6669_v59, %v6669_v59  ;;  %v838_v3 = vsel %vm518_vm0, %v746_v15, 0.0 }
 0x2df   :  { %v748_v23 = vmul.f32 %v6676_v60, %v6676_v60 }
 0x2e0   :  { %v833_v6 = vadd.f32 %v832_v18, %v831_v21  ;;  %v6690_v18 = vsub.f32 %v6252_v2, %v6448_v49  ;;  %v840_v0 = vsel %vm518_vm0, %v747_v55, 0.0 }
 0x2e1   :  { %v842_v15 = vsel %vm518_vm0, %v748_v23, 0.0 }
 0x2e2   :  { %v835_v52 = vadd.f32 %v834_v9, %v833_v6  ;;  %11295 = vst [vmem:[#allocation7_spill] sm:$0xff] %v6690_v18  ;;  %v749_v9 = vmul.f32 %v6683_v62, %v6683_v62  ;;  %v750_v5 = vmul.f32 %v6690_v18, %v6690_v18 }
 0x2e4   :  { %v837_v21 = vadd.f32 %v836_v22, %v835_v52  ;;  %v11297_v22 = vld [vmem:[#allocation10_spill] sm:$0xff]  ;;  %v844_v55 = vsel %vm518_vm0, %v749_v9, 0.0  ;;  %v846_v23 = vsel %vm518_vm0, %v750_v5, 0.0 }
 0x2e5   :  { %v6704_v2 = vsub.f32 %v11297_v22, %v6448_v49  ;;  %11299 = vst [vmem:[#allocation10_spill] sm:$0xff] %v6711_v4 }
 0x2e6   :  { %v839_v6 = vadd.f32 %v838_v3, %v837_v21  ;;  %v751_v3 = vmul.f32 %v6697_v1, %v6697_v1 }
 0x2e7   :  { %11298 = vst [vmem:[#allocation9_spill] sm:$0xff] %v6704_v2  ;;  %v752_v22 = vmul.f32 %v6704_v2, %v6704_v2 }
 0x2e8   :  { %v841_v52 = vadd.f32 %v840_v0, %v839_v6  ;;  %v6718_v0 = vsub.f32 %v6266_v8, %v6448_v49  ;;  %v848_v9 = vsel %vm518_vm0, %v751_v3, 0.0 }
 0x2e9   :  { %v850_v5 = vsel %vm518_vm0, %v752_v22, 0.0 }
 0x2ea   :  { %v843_v21 = vadd.f32 %v842_v15, %v841_v52  ;;  %11300 = vst [vmem:[#allocation23_spill] sm:$0xff] %v6718_v0  ;;  %v753_v15 = vmul.f32 %v6711_v4, %v6711_v4  ;;  %v754_v2 = vmul.f32 %v6718_v0, %v6718_v0 }
 0x2ec   :  { %v845_v6 = vadd.f32 %v844_v55, %v843_v21  ;;  %v11302_v55 = vld [vmem:[#allocation11_spill] sm:$0xff]  ;;  %v852_v3 = vsel %vm518_vm0, %v753_v15, 0.0  ;;  %v854_v22 = vsel %vm518_vm0, %v754_v2, 0.0 }
 0x2ed   :  { %v6732_v8 = vsub.f32 %v11302_v55, %v6448_v49 }
 0x2ee   :  { %v847_v52 = vadd.f32 %v846_v23, %v845_v6  ;;  %v755_v23 = vmul.f32 %v6725_v7, %v6725_v7 }
 0x2ef   :  { %11303 = vst [vmem:[#allocation11_spill] sm:$0xff] %v6732_v8  ;;  %v756_v55 = vmul.f32 %v6732_v8, %v6732_v8 }
 0x2f0   :  { %v849_v21 = vadd.f32 %v848_v9, %v847_v52  ;;  %v6746_v9 = vsub.f32 %v6280_v14, %v6448_v49  ;;  %v856_v15 = vsel %vm518_vm0, %v755_v23, 0.0 }
 0x2f1   :  { %v858_v2 = vsel %vm518_vm0, %v756_v55, 0.0 }
 0x2f2   :  { %v851_v6 = vadd.f32 %v850_v5, %v849_v21  ;;  %11305 = vst [vmem:[#allocation26_spill] sm:$0xff] %v6746_v9  ;;  %v757_v5 = vmul.f32 %v6739_v10, %v6739_v10  ;;  %v758_v8 = vmul.f32 %v6746_v9, %v6746_v9 }
 0x2f4   :  { %v853_v52 = vadd.f32 %v852_v3, %v851_v6  ;;  %v11307_v3 = vld [vmem:[#allocation12_spill] sm:$0xff]  ;;  %v860_v23 = vsel %vm518_vm0, %v757_v5, 0.0  ;;  %v862_v55 = vsel %vm518_vm0, %v758_v8, 0.0 }
 0x2f5   :  { %v6760_v14 = vsub.f32 %v11307_v3, %v6448_v49 }
 0x2f6   :  { %v855_v21 = vadd.f32 %v854_v22, %v853_v52  ;;  %v759_v22 = vmul.f32 %v6753_v13, %v6753_v13  ;;  %v761_v13 = vmul.f32 %v6767_v16, %v6767_v16 }
 0x2f7   :  { %11308 = vst [vmem:[#allocation12_spill] sm:$0xff] %v6760_v14  ;;  %v760_v3 = vmul.f32 %v6760_v14, %v6760_v14 }
 0x2f8   :  { %v857_v6 = vadd.f32 %v856_v15, %v855_v21  ;;  %v6774_v15 = vsub.f32 %v6294_v28, %v6448_v49  ;;  %v864_v5 = vsel %vm518_vm0, %v759_v22, 0.0  ;;  %v6788_v28 = vsub.f32 %v6301_v37, %v6448_v49 }
 0x2f9   :  { %v866_v8 = vsel %vm518_vm0, %v760_v3, 0.0  ;;  %v868_v22 = vsel %vm518_vm0, %v761_v13, 0.0  ;;  %v6802_v37 = vsub.f32 %v6321_v31, %v6448_v49 }
 0x2fa   :  { %v859_v52 = vadd.f32 %v858_v2, %v857_v6  ;;  %11310 = vst [vmem:[#allocation29_spill] sm:$0xff] %v6774_v15  ;;  %v11311_v2 = vld [vmem:[#allocation13_spill] sm:$0xff] }
 0x2fb   :  { %v6781_v25 = vsub.f32 %v11311_v2, %v6448_v49  ;;  %11313 = vst [vmem:[#allocation30_spill] sm:$0xff] %v6788_v28 }
 0x2fc   :  { %v861_v21 = vadd.f32 %v860_v23, %v859_v52  ;;  %v762_v23 = vmul.f32 %v6774_v15, %v6774_v15 }
 0x2fd   :  { %11312 = vst [vmem:[#allocation13_spill] sm:$0xff] %v6781_v25  ;;  %v763_v2 = vmul.f32 %v6781_v25, %v6781_v25 }
 0x2fe   :  { %v863_v6 = vadd.f32 %v862_v55, %v861_v21  ;;  %v6795_v55 = vsub.f32 %v6311_v58, %v6448_v49  ;;  %v870_v3 = vsel %vm518_vm0, %v762_v23, 0.0 }
 0x2ff   :  { %v872_v13 = vsel %vm518_vm0, %v763_v2, 0.0 }
 0x300   :  { %v865_v52 = vadd.f32 %v864_v5, %v863_v6  ;;  %11314 = vst [vmem:[#allocation31_spill] sm:$0xff] %v6795_v55  ;;  %v764_v5 = vmul.f32 %v6788_v28, %v6788_v28  ;;  %v765_v16 = vmul.f32 %v6795_v55, %v6795_v55  ;;  %v766_v28 = vmul.f32 %v6802_v37, %v6802_v37 }
 0x302   :  { %v867_v21 = vadd.f32 %v866_v8, %v865_v52  ;;  %v11315_v8 = vld [vmem:[#allocation14_spill] sm:$0xff]  ;;  %v874_v23 = vsel %vm518_vm0, %v764_v5, 0.0  ;;  %v876_v2 = vsel %vm518_vm0, %v765_v16, 0.0  ;;  %v878_v5 = vsel %vm518_vm0, %v766_v28, 0.0 }
 0x303   :  { %v6809_v58 = vsub.f32 %v11315_v8, %v6448_v49 }
 0x304   :  { %v869_v6 = vadd.f32 %v868_v22, %v867_v21  ;;  %v11316_v22 = vld [vmem:[#allocation15_spill] sm:$0xff] }
 0x305   :  { %v6816_v31 = vsub.f32 %v11316_v22, %v6448_v49  ;;  %v767_v55 = vmul.f32 %v6809_v58, %v6809_v58 }
 0x306   :  { %v871_v52 = vadd.f32 %v870_v3, %v869_v6  ;;  %v11317_v3 = vld [vmem:[#allocation16_spill] sm:$0xff] }
 0x307   :  { %v6823_v8 = vsub.f32 %v11317_v3, %v6448_v49  ;;  %v768_v25 = vmul.f32 %v6816_v31, %v6816_v31  ;;  %v880_v16 = vsel %vm518_vm0, %v767_v55, 0.0 }
 0x308   :  { %v873_v21 = vadd.f32 %v872_v13, %v871_v52  ;;  %v11318_v13 = vld [vmem:[#allocation17_spill] sm:$0xff] }
 0x309   :  { %v6830_v22 = vsub.f32 %v11318_v13, %v6448_v49  ;;  %v769_v15 = vmul.f32 %v6823_v8, %v6823_v8  ;;  %v882_v28 = vsel %vm518_vm0, %v768_v25, 0.0 }
 0x30a   :  { %v875_v6 = vadd.f32 %v874_v23, %v873_v21  ;;  %v11319_v23 = vld [vmem:[#allocation18_spill] sm:$0xff] }
 0x30b   :  { %v6837_v3 = vsub.f32 %v11319_v23, %v6448_v49  ;;  %v770_v14 = vmul.f32 %v6830_v22, %v6830_v22  ;;  %v884_v55 = vsel %vm518_vm0, %v769_v15, 0.0 }
 0x30c   :  { %v877_v52 = vadd.f32 %v876_v2, %v875_v6  ;;  %v11320_v2 = vld [vmem:[#allocation19_spill] sm:$0xff] }
 0x30d   :  { %v6844_v13 = vsub.f32 %v11320_v2, %v6448_v49  ;;  %v771_v9 = vmul.f32 %v6837_v3, %v6837_v3  ;;  %v886_v25 = vsel %vm518_vm0, %v770_v14, 0.0 }
 0x30e   :  { %v879_v21 = vadd.f32 %v878_v5, %v877_v52  ;;  %v11321_v5 = vld [vmem:[#allocation20_spill] sm:$0xff] }
 0x30f   :  { %v6851_v23 = vsub.f32 %v11321_v5, %v6448_v49  ;;  %v772_v10 = vmul.f32 %v6844_v13, %v6844_v13  ;;  %v888_v15 = vsel %vm518_vm0, %v771_v9, 0.0  ;;  %v777_v9 = vmul.f32 %v6454_v57, %v6454_v57 }
 0x310   :  { %v881_v6 = vadd.f32 %v880_v16, %v879_v21  ;;  %v11322_v16 = vld [vmem:[#allocation21_spill] sm:$0xff] }
 0x311   :  { %v6858_v2 = vsub.f32 %v11322_v16, %v6448_v49  ;;  %v773_v7 = vmul.f32 %v6851_v23, %v6851_v23  ;;  %v890_v16 = vsel %vm518_vm0, %v772_v10, 0.0  ;;  %v778_v10 = vmul.f32 %v6457_v45, %v6457_v45 }
 0x312   :  { %v883_v52 = vadd.f32 %v882_v28, %v881_v6  ;;  %v11323_v28 = vld [vmem:[#allocation22_spill] sm:$0xff] }
 0x313   :  { %v6865_v5 = vsub.f32 %v11323_v28, %v6448_v49  ;;  %v776_v49 = vmul.f32 %v6451_v51, %v6451_v51 }
 0x314   :  { %v885_v21 = vadd.f32 %v884_v55, %v883_v52  ;;  %v774_v55 = vmul.f32 %v6858_v2, %v6858_v2 }
 0x315   :  { %v775_v14 = vmul.f32 %v6865_v5, %v6865_v5 }
 0x316   :  { %v887_v6 = vadd.f32 %v886_v25, %v885_v21  ;;  %v892_v21 = vsel %vm518_vm0, %v773_v7, 0.0  ;;  %v894_v28 = vsel %vm518_vm0, %v774_v55, 0.0  ;;  %v900_v7 = vsel %vm518_vm0, %v777_v9, 0.0  ;;  %v5078_v9 = vld [vmem:[%s10945_s2 + $0xb8] sm:$0xff] }
 0x317   :  { %v780_v55 = vmul.f32 %v6463_v63, %v6463_v63  ;;  %3876 = vmatpush.bf16.msra.mxu3 %v5078_v9  ;;  %v5076_v9 = vld [vmem:[%s10945_s2 + $0xa8] sm:$0xff] }
 0x318   :  { %v889_v52 = vadd.f32 %v888_v15, %v887_v6  ;;  %v896_v6 = vsel %vm518_vm0, %v775_v14, 0.0 }
 0x31a   :  { %v891_v0 = vadd.f32 %v890_v16, %v889_v52  ;;  %v898_v52 = vsel %vm518_vm0, %v776_v49, 0.0 }
 0x31c   :  { %v893_v25 = vadd.f32 %v892_v21, %v891_v0  ;;  %v779_v0 = vmul.f32 %v6460_v61, %v6460_v61 }
 0x31e   :  { %v895_v4 = vadd.f32 %v894_v28, %v893_v25  ;;  %v902_v25 = vsel %vm518_vm0, %v778_v10, 0.0 }
 0x320   :  { %v897_v15 = vadd.f32 %v896_v6, %v895_v4  ;;  %v904_v4 = vsel %vm518_vm0, %v779_v0, 0.0  ;;  %v906_v6 = vsel %vm518_vm0, %v780_v55, 0.0  ;;  %v5077_v0 = vld [vmem:[%s10945_s2 + $0xb0] sm:$0xff] }
 0x321   :  { %3877 = vmatpush.bf16.msra.mxu3 %v5077_v0 }
 0x322   :  { %v899_v16 = vadd.f32 %v898_v52, %v897_v15 }
 0x324   :  { %v901_v21 = vadd.f32 %v900_v7, %v899_v16 }
 0x325   :  { %3878 = vmatpush.bf16.msra.mxu3 %v5076_v9 }
 0x326   :  { %v903_v28 = vadd.f32 %v902_v25, %v901_v21 }
 0x328   :  { %v905_v14 = vadd.f32 %v904_v4, %v903_v28  ;;  %v516_v4 = vld [vmem:[%s10946_s3] sm:$0x1] }
 0x32a   :  { %v907_v1 = vadd.f32 %v906_v6, %v905_v14  ;;  %v6905_v6 = vld [vmem:[%s10947_s4] ss:$0 sm:$0xff] }
 0x32c   :  { %v908_v49 = vrot.slane %v907_v1, 4 }
 0x32e   :  { %v909_v15 = vadd.f32 %v908_v49, %v907_v1 }
 0x330   :  { %v910_v52 = vrot.slane %v909_v15, 2 }
 0x332   :  { %v911_v16 = vadd.f32 %v910_v52, %v909_v15 }
 0x334   :  { %v912_v7 = vrot.slane %v911_v16, 1 }
 0x336   :  { %v913_v18 = vadd.f32 %v912_v7, %v911_v16  ;;  %v5075_v16 = vld [vmem:[%s10945_s2 + $0xa0] sm:$0xff] }
 0x337   :  { %3879 = vmatpush.bf16.msra.mxu3 %v5075_v16 }
 0x338   :  { %v914_v62 = vmul.f32 0.001953125, %v913_v18 }
 0x33a   :  { %v915_v10 = vadd.f32 1e-05, %v914_v62 }
 0x33c   :  { %6009 = vrsqrt.f32 %v915_v10  ;;  %vm922_vm2 = vweird.f32 %v915_v10 }
 0x342   :  { %v6010_v21 = vpop.eup %6009 }
 0x343   :  { %v917_v55 = vmul.f32 %v6010_v21, %v915_v10  ;;  %vm923_vm1 = vweird.f32 %v6010_v21 }
 0x344   :  { %vm924_vm3 = vmor %vm922_vm2, %vm923_vm1 }
 0x345   :  { %v918_v1 = vmul.f32 %v6010_v21, %v917_v55 }
 0x347   :  { %v919_v25 = vmul.f32 0.5, %v918_v1 }
 0x349   :  { %v920_v28 = vsub.f32 1.5, %v919_v25 }
 0x34b   :  { %v921_v14 = vmul.f32 %v6010_v21, %v920_v28 }
 0x34d   :  { %v925_v62 = vsel %vm924_vm3, %v6010_v21, %v921_v14 }
 0x34e   :  { %v926_v18 = vmul.f32 %v925_v62, %v516_v4 }
 0x350   :  { %v6907_v49 = vperm.slane %v926_v18, 0  ;;  %v5072_v18 = vld [vmem:[%s10945_s2 + $0x88] sm:$0xff] }
 0x352   :  { %v991_v15 = vmul.f32 %v6907_v49, %v6463_v63  ;;  %v958_v7 = vmul.f32 %v6907_v49, %v6669_v59  ;;  %v959_v10 = vmul.f32 %v6907_v49, %v6676_v60  ;;  %v5074_v63 = vld [vmem:[%s10945_s2 + $0x98] sm:$0xff]  ;;  %v977_v55 = vmul.f32 %v6907_v49, %v6802_v37 }
 0x353   :  { %3880 = vmatpush.bf16.msra.mxu3 %v5074_v63  ;;  %v978_v59 = vmul.f32 %v6907_v49, %v6809_v58  ;;  %v979_v60 = vmul.f32 %v6907_v49, %v6816_v31  ;;  %v980_v1 = vmul.f32 %v6907_v49, %v6823_v8  ;;  %v981_v25 = vmul.f32 %v6907_v49, %v6830_v22  ;;  %v5073_v58 = vld [vmem:[%s10945_s2 + $0x90] sm:$0xff] }
 0x354   :  { %v6912_v52 = vadd.f32 %v6905_v6, %v991_v15  ;;  %v6928_v0 = vadd.f32 %v6905_v6, %v958_v7  ;;  %v6931_v21 = vadd.f32 %v6905_v6, %v959_v10  ;;  %v982_v28 = vmul.f32 %v6907_v49, %v6837_v3 }
 0x355   :  { %v983_v4 = vmul.f32 %v6907_v49, %v6844_v13  ;;  %v984_v37 = vmul.f32 %v6907_v49, %v6851_v23  ;;  %v985_v31 = vmul.f32 %v6907_v49, %v6858_v2  ;;  %v986_v8 = vmul.f32 %v6907_v49, %v6865_v5 }
 0x356   :  { %11324 = vst [vmem:[#allocation14_spill] sm:$0xff] %v6912_v52  ;;  %v987_v22 = vmul.f32 %v6907_v49, %v6451_v51  ;;  %v988_v3 = vmul.f32 %v6907_v49, %v6454_v57  ;;  %v989_v13 = vmul.f32 %v6907_v49, %v6457_v45  ;;  %v990_v23 = vmul.f32 %v6907_v49, %v6460_v61 }
 0x357   :  { %11325 = vst [vmem:[#allocation15_spill] sm:$0xff] %v6928_v0  ;;  %3881 = vmatpush.bf16.msra.mxu3 %v5073_v58  ;;  %v6965_v14 = vadd.f32 %v6905_v6, %v977_v55  ;;  %v6968_v2 = vadd.f32 %v6905_v6, %v978_v59  ;;  %v6971_v5 = vadd.f32 %v6905_v6, %v979_v60  ;;  %v5071_v55 = vld [vmem:[%s10945_s2 + $0x80] sm:$0xff] }
 0x358   :  { %11326 = vst [vmem:[#allocation16_spill] sm:$0xff] %v6931_v21  ;;  %v6974_v51 = vadd.f32 %v6905_v6, %v980_v1  ;;  %v6977_v57 = vadd.f32 %v6905_v6, %v981_v25  ;;  %v6980_v45 = vadd.f32 %v6905_v6, %v982_v28  ;;  %v6983_v61 = vadd.f32 %v6905_v6, %v983_v4 }
 0x359   :  { %v6986_v62 = vadd.f32 %v6905_v6, %v984_v37  ;;  %v6992_v15 = vadd.f32 %v6905_v6, %v985_v31  ;;  %v6995_v9 = vadd.f32 %v6905_v6, %v986_v8  ;;  %v6998_v16 = vadd.f32 %v6905_v6, %v987_v22 }
 0x35a   :  { %11327 = vst [vmem:[#allocation17_spill] sm:$0xff] %v6983_v61  ;;  %v7001_v7 = vadd.f32 %v6905_v6, %v988_v3  ;;  %v7004_v10 = vadd.f32 %v6905_v6, %v989_v13  ;;  %v7007_v63 = vadd.f32 %v6905_v6, %v990_v23  ;;  %v931_v59 = vmul.f32 %v6907_v49, %v6479_v34 }
 0x35b   :  { %11328 = vst [vmem:[#allocation18_spill] sm:$0xff] %v6986_v62  ;;  %3882 = vmatpush.bf16.msra.mxu3 %v5072_v18  ;;  %v932_v60 = vmul.f32 %v6907_v49, %v6487_v17  ;;  %v935_v1 = vmul.f32 %v6907_v49, %v6508_v24  ;;  %v936_v25 = vmul.f32 %v6907_v49, %v6515_v26 }
 0x35c   :  { %11329 = vst [vmem:[#allocation19_spill] sm:$0xff] %v6992_v15  ;;  %v928_v28 = vmul.f32 %v6907_v49, %v6467_v39  ;;  %v930_v4 = vmul.f32 %v6907_v49, %v6475_v19  ;;  %v929_v37 = vmul.f32 %v6907_v49, %v6471_v11  ;;  %v933_v34 = vmul.f32 %v6907_v49, %v6493_v20 }
 0x35d   :  { %11330 = vst [vmem:[#allocation20_spill] sm:$0xff] %v6995_v9  ;;  %v934_v17 = vmul.f32 %v6907_v49, %v6501_v12  ;;  %v937_v24 = vmul.f32 %v6907_v49, %v6522_v27  ;;  %v938_v26 = vmul.f32 %v6907_v49, %v6529_v29  ;;  %v939_v39 = vmul.f32 %v6907_v49, %v6536_v30 }
 0x35e   :  { %11331 = vst [vmem:[#allocation21_spill] sm:$0xff] %v6998_v16  ;;  %v7038_v19 = vmul.f32 %v6907_v49, %v6543_v32  ;;  %v998_v11 = vadd.f32 %v6905_v6, %v931_v59  ;;  %v941_v20 = vmul.f32 %v6907_v49, %v6550_v33  ;;  %v999_v12 = vadd.f32 %v6905_v6, %v932_v60 }
 0x35f   :  { %11332 = vst [vmem:[#allocation22_spill] sm:$0xff] %v7001_v7  ;;  %3883 = vmatpush.bf16.msra.mxu3 %v5071_v55  ;;  %v1002_v58 = vadd.f32 %v6905_v6, %v935_v1  ;;  %v1003_v27 = vadd.f32 %v6905_v6, %v936_v25  ;;  %v942_v29 = vmul.f32 %v6907_v49, %v6557_v35  ;;  %v11360_v7 = vld [vmem:[#allocation12_spill] sm:$0xff] }
 0x360   :  { %11333 = vst [vmem:[#allocation32_spill] sm:$0xff] %v7004_v10  ;;  %v943_v30 = vmul.f32 %v6907_v49, %v6564_v36  ;;  %v995_v32 = vadd.f32 %v6905_v6, %v928_v28  ;;  %v997_v31 = vadd.f32 %v6905_v6, %v930_v4  ;;  %v944_v8 = vmul.f32 %v6907_v49, %v6571_v38 }
 0x361   :  { %11334 = vst [vmem:[#allocation33_spill] sm:$0xff] %v7007_v63  ;;  %v7056_v33 = vmul.f32 %v6907_v49, %v6578_v43  ;;  %v7060_v22 = vmul.f32 %v6907_v49, %v6585_v41  ;;  %v7064_v35 = vmul.f32 %v6907_v49, %v6592_v42  ;;  %v7068_v36 = vmul.f32 %v6907_v49, %v6599_v44 }
 0x362   :  { %v7072_v3 = vmul.f32 %v6907_v49, %v6606_v40  ;;  %v7076_v38 = vmul.f32 %v6907_v49, %v6613_v47  ;;  %v1062_v43 = vmul.f32 0.01, %v998_v11  ;;  %v7080_v41 = vmul.f32 %v6907_v49, %v6620_v48 }
 0x363   :  { %v1063_v13 = vmul.f32 0.01, %v999_v12  ;;  %v1066_v42 = vmul.f32 0.01, %v1002_v58  ;;  %v1067_v23 = vmul.f32 0.01, %v1003_v27  ;;  %v7084_v44 = vmul.f32 %v6907_v49, %v6627_v50 }
 0x364   :  { %v7088_v40 = vmul.f32 %v6907_v49, %v6634_v46  ;;  %v1059_v18 = vmul.f32 0.01, %v995_v32  ;;  %v1061_v55 = vmul.f32 0.01, %v997_v31  ;;  %v7092_v47 = vmul.f32 %v6907_v49, %v6641_v53 }
 0x365   :  { %v7096_v48 = vmul.f32 %v6907_v49, %v6648_v54  ;;  %v7100_v59 = vmul.f32 %v6907_v49, %v6655_v56  ;;  %v996_v50 = vadd.f32 %v6905_v6, %v929_v37  ;;  %v1000_v60 = vadd.f32 %v6905_v6, %v933_v34  ;;  %v11339_v56 = vld [vmem:[#allocation5_spill] sm:$0xff]  ;;  %v11340_v37 = vld [vmem:[#allocation6_spill] sm:$0xff] }
 0x366   :  { %v1001_v46 = vadd.f32 %v6905_v6, %v934_v17  ;;  %v1004_v1 = vadd.f32 %v6905_v6, %v937_v24  ;;  %v1005_v25 = vadd.f32 %v6905_v6, %v938_v26  ;;  %v7107_v53 = vmax.f32 %v998_v11, %v1062_v43  ;;  %v11343_v26 = vld [vmem:[#allocation7_spill] sm:$0xff] }
 0x367   :  { %v7109_v28 = vmax.f32 %v999_v12, %v1063_v13  ;;  %v7111_v54 = vmax.f32 %v1002_v58, %v1066_v42  ;;  %v7113_v4 = vmax.f32 %v1003_v27, %v1067_v23  ;;  %v7117_v52 = vmul.f32 %v6907_v49, %v11339_v56  ;;  %v11344_v12 = vld [vmem:[#allocation8_spill] sm:$0xff]  ;;  %v11345_v27 = vld [vmem:[#allocation9_spill] sm:$0xff] }
 0x368   :  { %11335 = vst [vmem:[#allocation34_spill] sm:$0xff] %v7107_v53  ;;  %v7121_v34 = vmul.f32 %v6907_v49, %v11340_v37  ;;  %v7123_v17 = vmax.f32 %v995_v32, %v1059_v18  ;;  %v7125_v24 = vmax.f32 %v997_v31, %v1061_v55  ;;  %v7129_v11 = vmul.f32 %v6907_v49, %v11343_v26 }
 0x369   :  { %11336 = vst [vmem:[#allocation35_spill] sm:$0xff] %v7109_v28  ;;  %v7133_v58 = vmul.f32 %v6907_v49, %v11344_v12  ;;  %v7137_v43 = vmul.f32 %v6907_v49, %v11345_v27  ;;  %v1060_v13 = vmul.f32 0.01, %v996_v50  ;;  %v7140_v42 = vadd.f32 %v6905_v6, %v939_v39 }
 0x36a   :  { %11337 = vst [vmem:[#allocation36_spill] sm:$0xff] %v7111_v54  ;;  %v1064_v32 = vmul.f32 0.01, %v1000_v60  ;;  %v1065_v23 = vmul.f32 0.01, %v1001_v46  ;;  %v5107_v55 = vpack.i.bf16 %v7113_v4, %v7111_v54  ;;  %v5097_v56 = vpack.i.bf16 %v7109_v28, %v7107_v53 }
 0x36b   :  { %11338 = vst [vmem:[#allocation37_spill] sm:$0xff] %v7113_v4  ;;  %v1068_v31 = vmul.f32 0.01, %v1004_v1  ;;  %v1069_v18 = vmul.f32 0.01, %v1005_v25  ;;  %v10992_v37 = vmov 0.0   ;;  %v1008_v27 = vadd.f32 %v6905_v6, %v941_v20 }
 0x36c   :  { %11341 = vst [vmem:[#allocation5_spill] sm:$0xff] %v7123_v17  ;;  %v5087_v26 = vpack.i.bf16 %v7123_v17, %v10992_v37  ;;  %v1446_v12 = vrot.slane %v7125_v24, 1  ;;  %v1447_v39 = vrot.slane %v7107_v53, 1  ;;  %v1009_v63 = vadd.f32 %v6905_v6, %v942_v29  ;;  %5108 = vrot.lane.b32.xlu2 %v5107_v55, %s6040_s25  ;;  %5098 = vrot.lane.b32.xlu1 %v5097_v56, %s6040_s25 }
 0x36d   :  { %11342 = vst [vmem:[#allocation6_spill] sm:$0xff] %v7125_v24  ;;  %v1010_v21 = vadd.f32 %v6905_v6, %v943_v30  ;;  %v1011_v0 = vadd.f32 %v6905_v6, %v944_v8  ;;  %v7156_v10 = vmax.f32 %v1000_v60, %v1064_v32  ;;  %v7169_v30 = vmax.f32 %v1001_v46, %v1065_v23  ;;  %v11353_v32 = vld [vmem:[#allocation10_spill] sm:$0xff]  ;;  %v11355_v46 = vld [vmem:[#allocation24_spill] sm:$0xff] }
 0x36e   :  { %5088 = vrot.lane.b32.xlu0 %v5087_v26, %s6040_s25  ;;  %v7160_v37 = vsel %vm1442_vm4, %v1446_v12, %v1447_v39  ;;  %v1602_v20 = vsel %vm1442_vm4, %v1447_v39, 0.0  ;;  %v7171_v55 = vmax.f32 %v1004_v1, %v1068_v31  ;;  %v7173_v8 = vmax.f32 %v1005_v25, %v1069_v18  ;;  %v11354_v26 = vld [vmem:[#allocation23_spill] sm:$0xff]  ;;  %v11357_v31 = vld [vmem:[#allocation25_spill] sm:$0xff] }
 0x36f   :  { %11346 = vst [vmem:[#allocation7_spill] sm:$0xff] %v7156_v10  ;;  %v4926_v60 = vpack.c.bf16 %v1602_v20, %v7160_v37  ;;  %v7178_v56 = vmul.f32 %v6907_v49, %v11353_v32  ;;  %v7182_v12 = vmul.f32 %v6907_v49, %v11354_v26  ;;  %v1007_v39 = vadd.f32 %v6905_v6, %v7038_v19  ;;  %v11356_v25 = vld [vmem:[#allocation11_spill] sm:$0xff]  ;;  %v11358_v32 = vld [vmem:[#allocation26_spill] sm:$0xff] }
 0x370   :  { %11347 = vst [vmem:[#allocation8_spill] sm:$0xff] %v7160_v37  ;;  %v7186_v53 = vmax.f32 %v996_v50, %v1060_v13  ;;  %v7190_v1 = vmul.f32 %v6907_v49, %v11355_v46  ;;  %v7194_v23 = vmul.f32 %v6907_v49, %v11356_v25  ;;  %v7198_v18 = vmul.f32 %v6907_v49, %v11357_v31  ;;  %v11359_v19 = vld [vmem:[#allocation27_spill] sm:$0xff] }
 0x371   :  { %11350 = vst [vmem:[#allocation9_spill] sm:$0xff] %v7169_v30  ;;  %v7202_v26 = vmul.f32 %v6907_v49, %v11358_v32  ;;  %4927 = vmatmul.msk.bf16.vlgmr.msra.gmra.mxu3 %vm7165_vm5, %v4926_v60  ;;  %v7208_v50 = vmul.f32 %v6907_v49, %v11359_v19  ;;  %v1070_v13 = vmul.f32 0.01, %v7140_v42  ;;  %v1072_v46 = vmul.f32 0.01, %v1008_v27 }
 0x372   :  { %11351 = vst [vmem:[#allocation38_spill] sm:$0xff] %v7171_v55  ;;  %v1073_v25 = vmul.f32 0.01, %v1009_v63  ;;  %v1074_v37 = vmul.f32 0.01, %v1010_v21  ;;  %v5112_v31 = vpack.i.bf16 %v7173_v8, %v7171_v55  ;;  %v5102_v32 = vpack.i.bf16 %v7169_v30, %v7156_v10 }
 0x373   :  { %11352 = vst [vmem:[#allocation39_spill] sm:$0xff] %v7173_v8  ;;  %v1075_v17 = vmul.f32 0.01, %v1011_v0  ;;  %v1071_v62 = vmul.f32 0.01, %v1007_v39  ;;  %v5092_v60 = vpack.i.bf16 %v7125_v24, %v7186_v53  ;;  %v1449_v61 = vrot.slane %v7109_v28, 1 }
 0x374   :  { %v1450_v19 = vrot.slane %v7156_v10, 1  ;;  %v7221_v16 = vmul.f32 %v6907_v49, %v11360_v7  ;;  %v1012_v9 = vadd.f32 %v6905_v6, %v7056_v33  ;;  %v1013_v15 = vadd.f32 %v6905_v6, %v7060_v22  ;;  %5113 = vrot.lane.b32.xlu2 %v5112_v31, %s6040_s25  ;;  %5103 = vrot.lane.b32.xlu1 %v5102_v32, %s6040_s25 }
 0x375   :  { %v1014_v24 = vadd.f32 %v6905_v6, %v7064_v35  ;;  %v1015_v10 = vadd.f32 %v6905_v6, %v7068_v36  ;;  %v1016_v7 = vadd.f32 %v6905_v6, %v7072_v3  ;;  %v1017_v28 = vadd.f32 %v6905_v6, %v7076_v38 }
 0x376   :  { %5093 = vrot.lane.b32.xlu0 %v5092_v60, %s6040_s25  ;;  %v7238_v33 = vmax.f32 %v1008_v27, %v1072_v46  ;;  %v7240_v22 = vmax.f32 %v1009_v63, %v1073_v25  ;;  %v7242_v31 = vmax.f32 %v1010_v21, %v1074_v37  ;;  %v7244_v32 = vmax.f32 %v1011_v0, %v1075_v17 }
 0x377   :  { %v7248_v35 = vadd.f32 %v6905_v6, %v7080_v41  ;;  %v7251_v36 = vmax.f32 %v7140_v42, %v1070_v13  ;;  %v7253_v3 = vmax.f32 %v1007_v39, %v1071_v62  ;;  %v1451_v38 = vsel %vm1442_vm4, %v1449_v61, %v1450_v19 }
 0x378   :  { %11361 = vst [vmem:[#allocation10_spill] sm:$0xff] %v7238_v33  ;;  %v7258_v27 = vadd.f32 %v6905_v6, %v7084_v44  ;;  %v1020_v21 = vadd.f32 %v6905_v6, %v7088_v40  ;;  %v1021_v0 = vadd.f32 %v6905_v6, %v7092_v47  ;;  %v1022_v63 = vadd.f32 %v6905_v6, %v7096_v48 }
 0x379   :  { %11362 = vst [vmem:[#allocation23_spill] sm:$0xff] %v7240_v22  ;;  %v1023_v41 = vadd.f32 %v6905_v6, %v7100_v59  ;;  %v1078_v62 = vmul.f32 0.01, %v1014_v24  ;;  %v1080_v17 = vmul.f32 0.01, %v1016_v7  ;;  %v5127_v44 = vpack.i.bf16 %v7244_v32, %v7242_v31 }
 0x37a   :  { %11363 = vst [vmem:[#allocation24_spill] sm:$0xff] %v7242_v31  ;;  %v1081_v42 = vmul.f32 0.01, %v1017_v28  ;;  %v1079_v61 = vmul.f32 0.01, %v1015_v10  ;;  %v5122_v37 = vpack.i.bf16 %v7240_v22, %v7238_v33  ;;  %v7272_v40 = vpack.i.bf16 %v1451_v38, %v1602_v20 }
 0x37b   :  { %11364 = vst [vmem:[#allocation11_spill] sm:$0xff] %v7244_v32  ;;  %v1076_v39 = vmul.f32 0.01, %v1012_v9  ;;  %v1077_v47 = vmul.f32 0.01, %v1013_v15  ;;  %v5117_v48 = vpack.i.bf16 %v7253_v3, %v7251_v36  ;;  %v1603_v13 = vsel %vm1442_vm4, %v1450_v19, 0.0 }
 0x37c   :  { %11365 = vst [vmem:[#allocation25_spill] sm:$0xff] %v7251_v36  ;;  %v7279_v59 = vadd.f32 %v6905_v6, %v7117_v52  ;;  %v7283_v46 = vadd.f32 %v6905_v6, %v7121_v34  ;;  %v7287_v25 = vadd.f32 %v6905_v6, %v7129_v11  ;;  %5128 = vrot.lane.b32.xlu2 %v5127_v44, %s6040_s25  ;;  %v1453_v44 = vrot.slane %v7111_v54, 1 }
 0x37d   :  { %11366 = vst [vmem:[#allocation26_spill] sm:$0xff] %v7253_v3  ;;  %5123 = vrot.lane.b32.xlu1 %v5122_v37, %s6040_s25  ;;  %v7293_v20 = vadd.f32 %v6905_v6, %v7133_v58  ;;  %v7295_v60 = vmax.f32 %v1014_v24, %v1078_v62  ;;  %v7297_v52 = vmax.f32 %v1016_v7, %v1080_v17  ;;  %v1082_v58 = vmul.f32 0.01, %v7248_v35 }
 0x37e   :  { %11367 = vst [vmem:[#allocation27_spill] sm:$0xff] %v7272_v40  ;;  %v7299_v19 = vmax.f32 %v1017_v28, %v1081_v42  ;;  %5118 = vrot.lane.b32.xlu0 %v5117_v48, %s6040_s25  ;;  %v7302_v34 = vmax.f32 %v1015_v10, %v1079_v61  ;;  %v4929_v11 = vpack.c.bf16 %v1603_v13, %v1451_v38  ;;  %v1452_v40 = vrot.slane %v7169_v30, 1 }
 0x37f   :  { %11368 = vst [vmem:[#allocation12_spill] sm:$0xff] %v7295_v60  ;;  %v1030_v37 = vadd.f32 %v6905_v6, %v7137_v43  ;;  %v7309_v24 = vmax.f32 %v1012_v9, %v1076_v39  ;;  %v7311_v7 = vmax.f32 %v1013_v15, %v1077_v47  ;;  %v1084_v28 = vmul.f32 0.01, %v1020_v21 }
 0x380   :  { %11369 = vst [vmem:[#allocation40_spill] sm:$0xff] %v7297_v52  ;;  %v1455_v10 = vrot.slane %v7113_v4, 1  ;;  %v1456_v38 = vrot.slane %v7171_v55, 1  ;;  %v1085_v62 = vmul.f32 0.01, %v1021_v0  ;;  %v5142_v43 = vpack.i.bf16 %v7299_v19, %v7297_v52 }
 0x381   :  { %11370 = vst [vmem:[#allocation41_spill] sm:$0xff] %v7299_v19  ;;  %4930 = vmatmul.msk.bf16.gmra.mxu3 %vm7165_vm5, %v4929_v11  ;;  %v1086_v17 = vmul.f32 0.01, %v1022_v63  ;;  %v1087_v42 = vmul.f32 0.01, %v1023_v41  ;;  %v5137_v9 = vpack.i.bf16 %v7302_v34, %v7295_v60  ;;  %v7322_v15 = vsel %vm1442_vm4, %v1452_v40, %v1453_v44 }
 0x382   :  { %11371 = vst [vmem:[#allocation42_spill] sm:$0xff] %v7302_v34  ;;  %v1458_v61 = vrot.slane %v7173_v8, 1  ;;  %v1459_v39 = vrot.slane %v7251_v36, 1  ;;  %v1031_v47 = vadd.f32 %v6905_v6, %v7178_v56  ;;  %v7330_v48 = vadd.f32 %v6905_v6, %v7194_v23 }
 0x383   :  { %11372 = vst [vmem:[#allocation43_spill] sm:$0xff] %v7309_v24  ;;  %v1083_v11 = vmul.f32 0.01, %v7258_v27  ;;  %v5132_v19 = vpack.i.bf16 %v7311_v7, %v7309_v24  ;;  %v7337_v40 = vadd.f32 %v6905_v6, %v7198_v18  ;;  %v7339_v52 = vmax.f32 %v1020_v21, %v1084_v28 }
 0x384   :  { %11373 = vst [vmem:[#allocation44_spill] sm:$0xff] %v7311_v7  ;;  %5143 = vrot.lane.b32.xlu2 %v5142_v43, %s6040_s25  ;;  %v1604_v56 = vsel %vm1442_vm4, %v1453_v44, 0.0  ;;  %v7345_v23 = vsel %vm1442_vm4, %v1455_v10, %v1456_v38  ;;  %v7347_v36 = vmax.f32 %v1021_v0, %v1085_v62  ;;  %v7349_v8 = vmax.f32 %v1022_v63, %v1086_v17 }
 0x385   :  { %11374 = vst [vmem:[#allocation45_spill] sm:$0xff] %v7339_v52  ;;  %5138 = vrot.lane.b32.xlu1 %v5137_v9, %s6040_s25  ;;  %v7351_v34 = vmax.f32 %v1023_v41, %v1087_v42  ;;  %v7355_v18 = vpack.i.bf16 %v7322_v15, %v1603_v13  ;;  %v1088_v21 = vmul.f32 0.01, %v7279_v59  ;;  %v7359_v28 = vmax.f32 %v7248_v35, %v1082_v58 }
 0x386   :  { %11375 = vst [vmem:[#allocation46_spill] sm:$0xff] %v7347_v36  ;;  %5133 = vrot.lane.b32.xlu0 %v5132_v19, %s6040_s25  ;;  %v7362_v44 = vsel %vm1442_vm4, %v1456_v38, 0.0  ;;  %v7365_v0 = vsel %vm1442_vm4, %v1458_v61, %v1459_v39  ;;  %v7368_v63 = vmax.f32 %v7258_v27, %v1083_v11  ;;  %v1461_v41 = vrot.slane %v7253_v3, 1 }
 0x387   :  { %11376 = vst [vmem:[#allocation47_spill] sm:$0xff] %v7349_v8  ;;  %v1462_v19 = vrot.slane %v7238_v33, 1  ;;  %v7373_v13 = vpack.i.bf16 %v7345_v23, %v1604_v56  ;;  %v1036_v35 = vadd.f32 %v6905_v6, %v7202_v26  ;;  %v1092_v58 = vmul.f32 0.01, %v7287_v25 }
 0x388   :  { %11377 = vst [vmem:[#allocation48_spill] sm:$0xff] %v7351_v34  ;;  %v1093_v10 = vmul.f32 0.01, %v7293_v20  ;;  %v1094_v38 = vmul.f32 0.01, %v1030_v37  ;;  %v5157_v27 = vpack.i.bf16 %v7351_v34, %v7349_v8  ;;  %v5152_v17 = vpack.i.bf16 %v7347_v36, %v7339_v52 }
 0x389   :  { %11378 = vst [vmem:[#allocation49_spill] sm:$0xff] %v7359_v28  ;;  %v1095_v62 = vmul.f32 0.01, %v1031_v47  ;;  %v7385_v42 = vpack.i.bf16 %v7365_v0, %v7362_v44  ;;  %v1464_v43 = vrot.slane %v7240_v22, 1  ;;  %v1465_v26 = vrot.slane %v7242_v31, 1 }
 0x38a   :  { %11379 = vst [vmem:[#allocation50_spill] sm:$0xff] %v7368_v63  ;;  %v1467_v9 = vrot.slane %v7244_v32, 1  ;;  %v1091_v11 = vmul.f32 0.01, %v7283_v46  ;;  %v5147_v34 = vpack.i.bf16 %v7368_v63, %v7359_v28  ;;  %v7395_v8 = vsel %vm1442_vm4, %v1459_v39, 0.0 }
 0x38b   :  { %v7398_v36 = vsel %vm1442_vm4, %v1461_v41, %v1462_v19  ;;  %v1037_v52 = vadd.f32 %v6905_v6, %v7208_v50  ;;  %v7403_v31 = vmax.f32 %v7287_v25, %v1092_v58  ;;  %v7406_v32 = vmax.f32 %v7293_v20, %v1093_v10  ;;  %v11385_v10 = vld [vmem:[#allocation29_spill] sm:$0xff] }
 0x38c   :  { %5158 = vrot.lane.b32.xlu2 %v5157_v27, %s6040_s25  ;;  %v7410_v61 = vmax.f32 %v1030_v37, %v1094_v38  ;;  %v7412_v39 = vmax.f32 %v1031_v47, %v1095_v62  ;;  %v4932_v41 = vpack.c.bf16 %v1604_v56, %v7322_v15  ;;  %v7417_v50 = vsel %vm1442_vm4, %v1462_v19, 0.0  ;;  %v11386_v62 = vld [vmem:[#allocation13_spill] sm:$0xff] }
 0x38d   :  { %11380 = vst [vmem:[#allocation51_spill] sm:$0xff] %v7403_v31  ;;  %5153 = vrot.lane.b32.xlu1 %v5152_v17, %s6040_s25  ;;  %v7420_v25 = vsel %vm1442_vm4, %v1464_v43, %v1465_v26  ;;  %v7423_v20 = vsel %vm1442_vm4, %v1465_v26, 0.0  ;;  %v11383_v58 = vrot.slane %v7309_v24, 1  ;;  %v7432_v47 = vpack.i.bf16 %v7398_v36, %v7395_v8  ;;  %v11387_v17 = vld [vmem:[#allocation30_spill] sm:$0xff]  ;;  %v11388_v26 = vld [vmem:[#allocation31_spill] sm:$0xff] }
 0x38e   :  { %11381 = vst [vmem:[#allocation52_spill] sm:$0xff] %v7406_v32  ;;  %5148 = vrot.lane.b32.xlu0 %v5147_v34, %s6040_s25  ;;  %v1032_v34 = vadd.f32 %v6905_v6, %v7182_v12  ;;  %v1033_v15 = vadd.f32 %v6905_v6, %v7190_v1  ;;  %v7439_v56 = vmax.f32 %v7279_v59, %v1088_v21  ;;  %v1098_v1 = vmul.f32 0.01, %v7330_v48 }
 0x38f   :  { %11382 = vst [vmem:[#allocation53_spill] sm:$0xff] %v7412_v39  ;;  %v7428_v37 = vsel %vm1442_vm4, %v1467_v9, %v11383_v58  ;;  %v7442_v19 = vmax.f32 %v7283_v46, %v1091_v11  ;;  %v973_v38 = vmul.f32 %v6907_v49, %v11385_v10  ;;  %v974_v27 = vmul.f32 %v6907_v49, %v11386_v62  ;;  %v11389_v10 = vld [vmem:[#allocation28_spill] sm:$0xff] }
 0x390   :  { %v975_v43 = vmul.f32 %v6907_v49, %v11387_v17  ;;  %v976_v12 = vmul.f32 %v6907_v49, %v11388_v26  ;;  %v1099_v59 = vmul.f32 0.01, %v7337_v40  ;;  %v7458_v46 = vpack.i.bf16 %v7420_v25, %v7417_v50 }
 0x391   :  { %11384 = vst [vmem:[#allocation54_spill] sm:$0xff] %v7442_v19  ;;  %4933 = vmatmul.msk.bf16.gmra.mxu3 %vm7165_vm5, %v4932_v41  ;;  %v7462_v21 = vpack.i.bf16 %v7428_v37, %v7423_v20  ;;  %v1100_v9 = vmul.f32 0.01, %v1036_v35  ;;  %v1101_v11 = vmul.f32 0.01, %v1037_v52  ;;  %v5172_v58 = vpack.i.bf16 %v7412_v39, %v7410_v61 }
 0x392   :  { %v5167_v41 = vpack.i.bf16 %v7406_v32, %v7403_v31  ;;  %v972_v62 = vmul.f32 %v6907_v49, %v11389_v10  ;;  %v1096_v17 = vmul.f32 0.01, %v1032_v34  ;;  %v1097_v26 = vmul.f32 0.01, %v1033_v15 }
 0x393   :  { %v5162_v63 = vpack.i.bf16 %v7442_v19, %v7439_v56  ;;  %v1040_v22 = vadd.f32 %v6905_v6, %v973_v38  ;;  %v1041_v28 = vadd.f32 %v6905_v6, %v974_v27  ;;  %v1042_v39 = vadd.f32 %v6905_v6, %v975_v43 }
 0x394   :  { %5173 = vrot.lane.b32.xlu2 %v5172_v58, %s6040_s25  ;;  %v1043_v31 = vadd.f32 %v6905_v6, %v976_v12  ;;  %v7480_v49 = vmax.f32 %v7330_v48, %v1098_v1  ;;  %v7483_v10 = vmax.f32 %v7337_v40, %v1099_v59  ;;  %v7485_v19 = vmax.f32 %v1036_v35, %v1100_v9 }
 0x395   :  { %5168 = vrot.lane.b32.xlu1 %v5167_v41, %s6040_s25  ;;  %v7487_v58 = vmax.f32 %v1037_v52, %v1101_v11  ;;  %v1038_v38 = vadd.f32 %v6905_v6, %v7221_v16  ;;  %v1039_v27 = vadd.f32 %v6905_v6, %v972_v62  ;;  %v7492_v43 = vmax.f32 %v1032_v34, %v1096_v17 }
 0x396   :  { %5163 = vrot.lane.b32.xlu0 %v5162_v63, %s6040_s25  ;;  %11390 = vst [vmem:[#allocation29_spill] sm:$0xff] %v7480_v49  ;;  %v7494_v12 = vmax.f32 %v1033_v15, %v1097_v26  ;;  %v1104_v63 = vmul.f32 0.01, %v1040_v22  ;;  %v1105_v41 = vmul.f32 0.01, %v1041_v28  ;;  %v5182_v52 = vpack.i.bf16 %v7483_v10, %v7480_v49 }
 0x397   :  { %11391 = vst [vmem:[#allocation13_spill] sm:$0xff] %v7483_v10  ;;  %v1106_v48 = vmul.f32 0.01, %v1042_v39  ;;  %v1107_v1 = vmul.f32 0.01, %v1043_v31  ;;  %v5187_v40 = vpack.i.bf16 %v7487_v58, %v7485_v19  ;;  %v4935_v11 = vpack.c.bf16 %v7362_v44, %v7345_v23 }
 0x398   :  { %11392 = vst [vmem:[#allocation30_spill] sm:$0xff] %v7485_v19  ;;  %v1102_v35 = vmul.f32 0.01, %v1038_v38  ;;  %v1103_v59 = vmul.f32 0.01, %v1039_v27  ;;  %v5177_v16 = vpack.i.bf16 %v7494_v12, %v7492_v43  ;;  %v7504_v6 = vmax.f32 %v1040_v22, %v1104_v63 }
 0x399   :  { %11393 = vst [vmem:[#allocation31_spill] sm:$0xff] %v7487_v58  ;;  %v7507_v34 = vmax.f32 %v1041_v28, %v1105_v41  ;;  %v7509_v15 = vmax.f32 %v1042_v39, %v1106_v48  ;;  %v7511_v9 = vmax.f32 %v1043_v31, %v1107_v1  ;;  %v1110_v22 = vmul.f32 0.01, %v6971_v5 }
 0x39a   :  { %11394 = vst [vmem:[#allocation28_spill] sm:$0xff] %v7492_v43  ;;  %v7515_v62 = vmax.f32 %v1038_v38, %v1102_v35  ;;  %v7517_v17 = vmax.f32 %v1039_v27, %v1103_v59  ;;  %v1111_v26 = vmul.f32 0.01, %v6974_v51  ;;  %v1112_v28 = vmul.f32 0.01, %v6977_v57  ;;  %v11408_v35 = vld [vmem:[#allocation19_spill] sm:$0xff] }
 0x39b   :  { %11395 = vst [vmem:[#allocation55_spill] sm:$0xff] %v7494_v12  ;;  %v1113_v39 = vmul.f32 0.01, %v6980_v45  ;;  %v5202_v31 = vpack.i.bf16 %v7511_v9, %v7509_v15  ;;  %v5197_v23 = vpack.i.bf16 %v7507_v34, %v7504_v6  ;;  %v1108_v44 = vmul.f32 0.01, %v6965_v14 }
 0x39c   :  { %5188 = vrot.lane.b32.xlu2 %v5187_v40, %s6040_s25  ;;  %11396 = vst [vmem:[#allocation56_spill] sm:$0xff] %v7504_v6  ;;  %v1109_v38 = vmul.f32 0.01, %v6968_v2  ;;  %v5192_v27 = vpack.i.bf16 %v7517_v17, %v7515_v62  ;;  %v7537_v63 = vmax.f32 %v6971_v5, %v1110_v22  ;;  %v7540_v41 = vmax.f32 %v6974_v51, %v1111_v26  ;;  %v11411_v51 = vld [vmem:[#allocation22_spill] sm:$0xff] }
 0x39d   :  { %5183 = vrot.lane.b32.xlu1 %v5182_v52, %s6040_s25  ;;  %11397 = vst [vmem:[#allocation57_spill] sm:$0xff] %v7507_v34  ;;  %v7543_v48 = vmax.f32 %v6977_v57, %v1112_v28  ;;  %v7546_v1 = vmax.f32 %v6980_v45, %v1113_v39  ;;  %v7549_v40 = vmax.f32 %v6965_v14, %v1108_v44  ;;  %v1116_v59 = vmul.f32 0.01, %v11408_v35  ;;  %v11412_v28 = vld [vmem:[#allocation17_spill] sm:$0xff]  ;;  %v11413_v39 = vld [vmem:[#allocation18_spill] sm:$0xff] }
 0x39e   :  { %5178 = vrot.lane.b32.xlu0 %v5177_v16, %s6040_s25  ;;  %11398 = vst [vmem:[#allocation58_spill] sm:$0xff] %v7509_v15  ;;  %v7552_v52 = vmax.f32 %v6968_v2, %v1109_v38  ;;  %v11409_v16 = vld [vmem:[#allocation20_spill] sm:$0xff]  ;;  %v1119_v26 = vmul.f32 0.01, %v11411_v51  ;;  %v5212_v45 = vpack.i.bf16 %v7540_v41, %v7537_v63  ;;  %v1114_v14 = vmul.f32 0.01, %v11412_v28 }
 0x39f   :  { %11399 = vst [vmem:[#allocation59_spill] sm:$0xff] %v7511_v9  ;;  %v1117_v5 = vmul.f32 0.01, %v11409_v16  ;;  %v5217_v57 = vpack.i.bf16 %v7546_v1, %v7543_v48  ;;  %v11449_v34 = vld [vmem:[#allocation42_spill] sm:$0xff] }
 0x3a0   :  { %11400 = vst [vmem:[#allocation60_spill] sm:$0xff] %v7515_v62  ;;  %v5207_v2 = vpack.i.bf16 %v7552_v52, %v7549_v40 }
 0x3a1   :  { %11401 = vst [vmem:[#allocation61_spill] sm:$0xff] %v7517_v17  ;;  %4936 = vmatmul.msk.bf16.gmra.mxu3 %vm7165_vm5, %v4935_v11  ;;  %v11410_v11 = vld [vmem:[#allocation21_spill] sm:$0xff]  ;;  %v7573_v44 = vmax.f32 %v11409_v16, %v1117_v5 }
 0x3a2   :  { %11402 = vst [vmem:[#allocation62_spill] sm:$0xff] %v7537_v63  ;;  %v1118_v22 = vmul.f32 0.01, %v11410_v11 }
 0x3a3   :  { %11403 = vst [vmem:[#allocation63_spill] sm:$0xff] %v7540_v41  ;;  %v1471_v41 = vrot.slane %v7295_v60, 1 }
 0x3a4   :  { %5203 = vrot.lane.b32.xlu2 %v5202_v31, %s6040_s25  ;;  %11404 = vst [vmem:[#allocation64_spill] sm:$0xff] %v7543_v48  ;;  %v1115_v31 = vmul.f32 0.01, %v11413_v39  ;;  %v7576_v38 = vmax.f32 %v11410_v11, %v1118_v22  ;;  %v11421_v22 = vld [vmem:[#allocation32_spill] sm:$0xff]  ;;  %v1470_v48 = vrot.slane %v7311_v7, 1 }
 0x3a5   :  { %5198 = vrot.lane.b32.xlu1 %v5197_v23, %s6040_s25  ;;  %11405 = vst [vmem:[#allocation65_spill] sm:$0xff] %v7546_v1  ;;  %v7569_v23 = vmax.f32 %v11408_v35, %v1116_v59  ;;  %v4938_v1 = vpack.c.bf16 %v7395_v8, %v7365_v0  ;;  %v1444_v8 = vrot.slane %v7186_v53, 1  ;;  %v11420_v0 = vld [vmem:[#allocation5_spill] sm:$0xff] }
 0x3a6   :  { %5193 = vrot.lane.b32.xlu0 %v5192_v27, %s6040_s25  ;;  %11406 = vst [vmem:[#allocation66_spill] sm:$0xff] %v7549_v40  ;;  %v7579_v27 = vmax.f32 %v11411_v51, %v1119_v26  ;;  %v7587_v35 = vmax.f32 %v11413_v39, %v1115_v31  ;;  %v1443_v11 = vrot.slane %v11420_v0, 1  ;;  %v1120_v51 = vmul.f32 0.01, %v11421_v22 }
 0x3a7   :  { %11407 = vst [vmem:[#allocation67_spill] sm:$0xff] %v7552_v52  ;;  %v5227_v16 = vpack.i.bf16 %v7573_v44, %v7569_v23  ;;  %v11424_v39 = vmov 0.0   ;;  %v7721_v52 = vsel %vm1442_vm4, %v1470_v48, %v1471_v41  ;;  %v1265_v40 = vrot.slane %v7171_v55, 7 }
 0x3a8   :  { %11414 = vst [vmem:[#allocation19_spill] sm:$0xff] %v7569_v23  ;;  %v5232_v59 = vpack.i.bf16 %v7579_v27, %v7576_v38  ;;  %v1445_v26 = vsel %vm1442_vm4, %v1443_v11, %v1444_v8 }
 0x3a9   :  { %11415 = vst [vmem:[#allocation20_spill] sm:$0xff] %v7573_v44  ;;  %v5242_v31 = vpack.i.bf16 %v1445_v26, %v11424_v39 }
 0x3aa   :  { %11416 = vst [vmem:[#allocation21_spill] sm:$0xff] %v7576_v38 }
 0x3ab   :  { %11417 = vst [vmem:[#allocation22_spill] sm:$0xff] %v7579_v27 }
 0x3ac   :  { %5218 = vrot.lane.b32.xlu2 %v5217_v57, %s6040_s25  ;;  %v7584_v57 = vmax.f32 %v11412_v28, %v1114_v14  ;;  %11419 = vst [vmem:[#allocation18_spill] sm:$0xff] %v7587_v35  ;;  %v11423_v28 = vld [vmem:[#allocation8_spill] sm:$0xff] }
 0x3ad   :  { %5213 = vrot.lane.b32.xlu1 %v5212_v45, %s6040_s25  ;;  %v7606_v45 = vmax.f32 %v11421_v22, %v1120_v51  ;;  %v11428_v22 = vld [vmem:[#allocation34_spill] sm:$0xff] }
 0x3ae   :  { %5208 = vrot.lane.b32.xlu0 %v5207_v2, %s6040_s25  ;;  %11418 = vst [vmem:[#allocation17_spill] sm:$0xff] %v7584_v57  ;;  %v5222_v5 = vpack.i.bf16 %v7587_v35, %v7584_v57  ;;  %v1256_v51 = vrot.slane %v11428_v22, 7  ;;  %v1262_v57 = vrot.slane %v7111_v54, 7 }
 0x3af   :  { %11422 = vst [vmem:[#allocation5_spill] sm:$0xff] %v7606_v45  ;;  %v5237_v2 = vpack.i.bf16 %v1445_v26, %v7606_v45  ;;  %v11433_v45 = vld [vmem:[#allocation7_spill] sm:$0xff] }
 0x3b0   :  { %v1259_v27 = vrot.slane %v11433_v45, 7 }
 0x3b1   :  { %4939 = vmatmul.msk.bf16.gmra.mxu3 %vm7165_vm5, %v4938_v1  ;;  %v1601_v1 = vsel %vm1442_vm4, %v1444_v8, 0.0  ;;  %v11427_v8 = vld [vmem:[#allocation6_spill] sm:$0xff] }
 0x3b2   :  { %v5247_v14 = vpack.i.bf16 %v11423_v28, %v1601_v1  ;;  %v1255_v11 = vrot.slane %v11427_v8, 7 }
 0x3b4   :  { %5233 = vrot.lane.b32.xlu2 %v5232_v59, %s6040_s25  ;;  %v4941_v59 = vpack.c.bf16 %v7417_v50, %v7398_v36  ;;  %v4944_v50 = vpack.c.bf16 %v7423_v20, %v7420_v25  ;;  %v7639_v1 = vsel %vm1251_vm6, %v1255_v11, %v1256_v51  ;;  %v7642_v26 = vsel %vm1251_vm6, 0.0, %v1255_v11 }
 0x3b5   :  { %5228 = vrot.lane.b32.xlu1 %v5227_v16, %s6040_s25  ;;  %v11425_v16 = vld [vmem:[#allocation27_spill] sm:$0xff]  ;;  %v5292_v28 = vpack.i.bf16 %v7639_v1, %v7642_v26  ;;  %v5297_v51 = vpack.i.bf16 %v11428_v22, %v11427_v8 }
 0x3b6   :  { %5223 = vrot.lane.b32.xlu0 %v5222_v5, %s6040_s25 }
 0x3bc   :  { %5248 = vrot.lane.b32.xlu2 %v5247_v14, %s6041_s26 }
 0x3bd   :  { %5243 = vrot.lane.b32.xlu1 %v5242_v31, %s6041_s26  ;;  %v1252_v31 = vrot.slane %v11420_v0, 7 }
 0x3be   :  { %5238 = vrot.lane.b32.xlu0 %v5237_v2, %s6040_s25  ;;  %v1253_v2 = vrot.slane %v7186_v53, 7 }
 0x3c0   :  { %v7657_v20 = vsel %vm1251_vm6, %v1252_v31, %v1253_v2  ;;  %v11432_v2 = vld [vmem:[#allocation35_spill] sm:$0xff] }
 0x3c1   :  { %4942 = vmatmul.msk.bf16.gmra.mxu3 %vm7165_vm5, %v4941_v59  ;;  %v7660_v59 = vsel %vm1251_vm6, 0.0, %v1252_v31  ;;  %v1258_v31 = vrot.slane %v11432_v2, 7 }
 0x3c2   :  { %v5302_v11 = vpack.i.bf16 %v7657_v20, %v7660_v59 }
 0x3c4   :  { %5263 = vrot.lane.b32.xlu2 %v7373_v13, %s6041_s26 }
 0x3c5   :  { %5258 = vrot.lane.b32.xlu1 %v7355_v18, %s6041_s26 }
 0x3c6   :  { %5253 = vrot.lane.b32.xlu0 %v11425_v16, %s6041_s26  ;;  %v7624_v5 = vpop.permute.xlu2 %5108 }
 0x3c7   :  { %11426 = vst [vmem:[#allocation32_spill] sm:$0xff] %v7624_v5 }
 0x3cc   :  { %5278 = vrot.lane.b32.xlu2 %v7458_v46, %s6041_s26 }
 0x3cd   :  { %5273 = vrot.lane.b32.xlu1 %v7432_v47, %s6041_s26 }
 0x3ce   :  { %5268 = vrot.lane.b32.xlu0 %v7385_v42, %s6041_s26  ;;  %v7634_v36 = vpop.permute.xlu2 %5113 }
 0x3cf   :  { %11429 = vst [vmem:[#allocation8_spill] sm:$0xff] %v7634_v36 }
 0x3d1   :  { %4945 = vmatmul.msk.bf16.gmra.mxu3 %vm7165_vm5, %v4944_v50  ;;  %v11431_v50 = vrot.slane %v7309_v24, 1 }
 0x3d4   :  { %5293 = vrot.lane.b32.xlu2 %v5292_v28, %s6041_s26 }
 0x3d5   :  { %5288 = vrot.lane.b32.xlu1 %v5247_v14, %s6040_s25  ;;  %v7669_v14 = vsel %vm1442_vm4, %v11431_v50, 0.0 }
 0x3d6   :  { %5283 = vrot.lane.b32.xlu0 %v7462_v21, %s6041_s26  ;;  %v7654_v25 = vpop.permute.xlu2 %5128  ;;  %v4947_v44 = vpack.c.bf16 %v7669_v14, %v7428_v37  ;;  %v1261_v37 = vrot.slane %v7169_v30, 7 }
 0x3d7   :  { %11430 = vst [vmem:[#allocation27_spill] sm:$0xff] %v7654_v25 }
 0x3dc   :  { %5308 = vrot.lane.b32.xlu2 %v11425_v16, %s6040_s25  ;;  %v7686_v16 = vsel %vm1251_vm6, %v1258_v31, %v1259_v27 }
 0x3dd   :  { %5303 = vrot.lane.b32.xlu1 %v5302_v11, %s6042_s27  ;;  %11434 = vst [vmem:[#allocation6_spill] sm:$0xff] %v7686_v16  ;;  %v7689_v11 = vsel %vm1251_vm6, 0.0, %v1258_v31  ;;  %v7707_v31 = vsel %vm1251_vm6, %v1261_v37, %v1262_v57  ;;  %v7724_v57 = vsel %vm1442_vm4, %v1471_v41, 0.0 }
 0x3de   :  { %5298 = vrot.lane.b32.xlu0 %v5297_v51, %s6042_s27  ;;  %v7677_v38 = vpop.permute.xlu1 %5098  ;;  %11435 = vst [vmem:[#allocation34_spill] sm:$0xff] %v7689_v11  ;;  %v7691_v50 = vpop.permute.xlu2 %5143  ;;  %v5317_v51 = vpack.i.bf16 %v11433_v45, %v11432_v2  ;;  %v5312_v35 = vpack.i.bf16 %v7686_v16, %v7689_v11  ;;  %v4950_v48 = vpack.c.bf16 %v7724_v57, %v7721_v52 }
 0x3df   :  { %11436 = vst [vmem:[#allocation35_spill] sm:$0xff] %v7691_v50  ;;  %v7710_v50 = vsel %vm1251_vm6, 0.0, %v1261_v37  ;;  %v1264_v37 = vrot.slane %v7113_v4, 7 }
 0x3e0   :  { %v7681_v23 = vpop.permute.xlu0 %5088  ;;  %11438 = vst [vmem:[#allocation68_spill] sm:$0xff] %v7707_v31 }
 0x3e1   :  { %4948 = vmatmul.msk.bf16.gmra.mxu3 %vm7165_vm5, %v4947_v44  ;;  %11439 = vst [vmem:[#allocation69_spill] sm:$0xff] %v7710_v50  ;;  %v7739_v41 = vsel %vm1251_vm6, %v1264_v37, %v1265_v40  ;;  %v7742_v25 = vsel %vm1251_vm6, 0.0, %v1264_v37 }
 0x3e2   :  { %11443 = vst [vmem:[#allocation73_spill] sm:$0xff] %v7739_v41 }
 0x3e3   :  { %11444 = vst [vmem:[#allocation74_spill] sm:$0xff] %v7742_v25 }
 0x3e4   :  { %5323 = vrot.lane.b32.xlu2 %v5292_v28, %s6042_s27  ;;  %v5337_v28 = vpack.i.bf16 %v7111_v54, %v7169_v30 }
 0x3e5   :  { %5318 = vrot.lane.b32.xlu1 %v5317_v51, %s6042_s27  ;;  %v5332_v51 = vpack.i.bf16 %v7707_v31, %v7710_v50  ;;  %v1282_v31 = vrot.slane %v11449_v34, 7 }
 0x3e6   :  { %5313 = vrot.lane.b32.xlu0 %v5312_v35, %s6041_s26  ;;  %v7702_v44 = vpop.permute.xlu1 %5103  ;;  %v7718_v63 = vpop.permute.xlu2 %5158 }
 0x3e7   :  { %11437 = vst [vmem:[#allocation7_spill] sm:$0xff] %v7702_v44 }
 0x3e8   :  { %v7704_v27 = vpop.permute.xlu0 %5093  ;;  %11440 = vst [vmem:[#allocation70_spill] sm:$0xff] %v7718_v63 }
 0x3ec   :  { %5338 = vrot.lane.b32.xlu2 %v5337_v28, %s6042_s27  ;;  %v5352_v28 = vpack.i.bf16 %v7739_v41, %v7742_v25  ;;  %v11465_v41 = vld [vmem:[#allocation49_spill] sm:$0xff] }
 0x3ed   :  { %5333 = vrot.lane.b32.xlu1 %v5332_v51, %s6041_s26  ;;  %v1477_v25 = vrot.slane %v11465_v41, 1  ;;  %v1286_v5 = vrot.slane %v11465_v41, 7 }
 0x3ee   :  { %5328 = vrot.lane.b32.xlu0 %v7355_v18, %s6040_s25  ;;  %v7753_v15 = vpop.permute.xlu2 %5173 }
 0x3ef   :  { %v7732_v9 = vpop.permute.xlu1 %5123  ;;  %11446 = vst [vmem:[#allocation76_spill] sm:$0xff] %v7753_v15 }
 0x3f0   :  { %11441 = vst [vmem:[#allocation71_spill] sm:$0xff] %v7732_v9  ;;  %v7736_v63 = vpop.permute.xlu0 %5118  ;;  %v11450_v9 = vld [vmem:[#allocation40_spill] sm:$0xff] }
 0x3f1   :  { %11442 = vst [vmem:[#allocation72_spill] sm:$0xff] %v7736_v63  ;;  %4951 = vmatmul.msk.bf16.gmra.mxu3 %vm7165_vm5, %v4950_v48  ;;  %v1473_v48 = vrot.slane %v11449_v34, 1  ;;  %v1474_v6 = vrot.slane %v11450_v9, 1  ;;  %v1283_v50 = vrot.slane %v11450_v9, 7 }
 0x3f3   :  { %v7767_v63 = vsel %vm1442_vm4, %v1473_v48, %v1474_v6 }
 0x3f4   :  { %v7748_v18 = vpop.f32.mrf.mxu3  ;;  %5353 = vrot.lane.b32.xlu2 %v5352_v28, %s6041_s26 }
 0x3f5   :  { %11445 = vst [vmem:[#allocation75_spill] sm:$0xff] %v7748_v18  ;;  %5348 = vrot.lane.b32.xlu1 %v7373_v13, %s6040_s25  ;;  %v5357_v18 = vpack.i.bf16 %v7171_v55, %v7113_v4  ;;  %v7770_v13 = vsel %vm1442_vm4, %v1474_v6, 0.0 }
 0x3f6   :  { %5343 = vrot.lane.b32.xlu0 %v5312_v35, %s6042_s27  ;;  %v11452_v35 = vld [vmem:[#allocation39_spill] sm:$0xff]  ;;  %v4953_v48 = vpack.c.bf16 %v7770_v13, %v7767_v63  ;;  %v7782_v62 = vpop.permute.xlu2 %5188 }
 0x3f7   :  { %v7756_v40 = vpop.permute.xlu1 %5138  ;;  %v1267_v15 = vrot.slane %v11452_v35, 7  ;;  %11455 = vst [vmem:[#allocation81_spill] sm:$0xff] %v7782_v62  ;;  %v1270_v62 = vrot.slane %v7253_v3, 7 }
 0x3f8   :  { %11447 = vst [vmem:[#allocation77_spill] sm:$0xff] %v7756_v40  ;;  %v7758_v37 = vpop.permute.xlu0 %5133  ;;  %v11453_v40 = vld [vmem:[#allocation25_spill] sm:$0xff] }
 0x3f9   :  { %11448 = vst [vmem:[#allocation78_spill] sm:$0xff] %v7758_v37  ;;  %v1268_v37 = vrot.slane %v11453_v40, 7 }
 0x3fc   :  { %v7762_v17 = vpop.f32.mrf.mxu3  ;;  %5368 = vrot.lane.b32.xlu2 %v7385_v42, %s6040_s25  ;;  %v7789_v42 = vsel %vm1251_vm6, %v1267_v15, %v1268_v37 }
 0x3fd   :  { %11451 = vst [vmem:[#allocation79_spill] sm:$0xff] %v7762_v17  ;;  %5363 = vrot.lane.b32.xlu1 %v5332_v51, %s6042_s27  ;;  %v7792_v51 = vsel %vm1251_vm6, 0.0, %v1267_v15 }
 0x3fe   :  { %5358 = vrot.lane.b32.xlu0 %v5357_v18, %s6042_s27  ;;  %11457 = vst [vmem:[#allocation83_spill] sm:$0xff] %v7789_v42  ;;  %v5377_v18 = vpack.i.bf16 %v11453_v40, %v11452_v35  ;;  %v5372_v58 = vpack.i.bf16 %v7789_v42, %v7792_v51  ;;  %v11464_v42 = vld [vmem:[#allocation41_spill] sm:$0xff]  ;;  %v7817_v35 = vpop.permute.xlu2 %5203  ;;  %v11469_v40 = vld [vmem:[#allocation24_spill] sm:$0xff] }
 0x3ff   :  { %v7778_v17 = vpop.permute.xlu1 %5153  ;;  %11458 = vst [vmem:[#allocation84_spill] sm:$0xff] %v7792_v51  ;;  %v1476_v51 = vrot.slane %v11464_v42, 1  ;;  %v1274_v19 = vrot.slane %v11469_v40, 7 }
 0x400   :  { %11454 = vst [vmem:[#allocation80_spill] sm:$0xff] %v7778_v17  ;;  %v7784_v6 = vpop.permute.xlu0 %5148 }
 0x401   :  { %11456 = vst [vmem:[#allocation82_spill] sm:$0xff] %v7784_v6  ;;  %4954 = vmatmul.msk.bf16.gmra.mxu3 %vm7165_vm5, %v4953_v48  ;;  %v1271_v6 = vrot.slane %v7238_v33, 7 }
 0x402   :  { %11466 = vst [vmem:[#allocation90_spill] sm:$0xff] %v7817_v35 }
 0x403   :  { %v7810_v48 = vsel %vm1251_vm6, %v1270_v62, %v1271_v6  ;;  %v7826_v6 = vsel %vm1442_vm4, %v1476_v51, %v1477_v25 }
 0x404   :  { %v7796_v17 = vpop.f32.mrf.mxu3  ;;  %5383 = vrot.lane.b32.xlu2 %v5352_v28, %s6042_s27  ;;  %11462 = vst [vmem:[#allocation88_spill] sm:$0xff] %v7810_v48  ;;  %v5397_v28 = vpack.i.bf16 %v7238_v33, %v7253_v3 }
 0x405   :  { %11459 = vst [vmem:[#allocation85_spill] sm:$0xff] %v7796_v17  ;;  %5378 = vrot.lane.b32.xlu1 %v5377_v18, %s6042_s27  ;;  %v7813_v17 = vsel %vm1251_vm6, 0.0, %v1270_v62  ;;  %v7829_v62 = vsel %vm1442_vm4, %v1477_v25, 0.0 }
 0x406   :  { %5373 = vrot.lane.b32.xlu0 %v5372_v58, %s6041_s26  ;;  %11463 = vst [vmem:[#allocation89_spill] sm:$0xff] %v7813_v17  ;;  %v5392_v18 = vpack.i.bf16 %v7810_v48, %v7813_v17  ;;  %v4956_v51 = vpack.c.bf16 %v7829_v62, %v7826_v6 }
 0x407   :  { %v7805_v15 = vpop.permute.xlu1 %5168 }
 0x408   :  { %11460 = vst [vmem:[#allocation86_spill] sm:$0xff] %v7805_v15  ;;  %v7807_v37 = vpop.permute.xlu0 %5163 }
 0x409   :  { %11461 = vst [vmem:[#allocation87_spill] sm:$0xff] %v7807_v37  ;;  %v11468_v37 = vld [vmem:[#allocation23_spill] sm:$0xff] }
 0x40a   :  { %v1273_v36 = vrot.slane %v11468_v37, 7 }
 0x40c   :  { %v7823_v15 = vpop.f32.mrf.mxu3  ;;  %5398 = vrot.lane.b32.xlu2 %v5397_v28, %s6042_s27  ;;  %v7844_v25 = vsel %vm1251_vm6, %v1273_v36, %v1274_v19  ;;  %v7847_v48 = vsel %vm1251_vm6, 0.0, %v1273_v36  ;;  %v5062_v19 = vld [vmem:[%s10945_s2 + $0x38] sm:$0xff] }
 0x40d   :  { %11467 = vst [vmem:[#allocation91_spill] sm:$0xff] %v7823_v15  ;;  %5393 = vrot.lane.b32.xlu1 %v5392_v18, %s6041_s26  ;;  %v5412_v28 = vpack.i.bf16 %v7844_v25, %v7847_v48  ;;  %v5070_v36 = vld [vmem:[%s10945_s2 + $0x78] sm:$0xff]  ;;  %3538 = vmatpush.bf16.msra.mxu1 %v5062_v19  ;;  %v11481_v19 = vld [vmem:[#allocation11_spill] sm:$0xff] }
 0x40e   :  { %5388 = vrot.lane.b32.xlu0 %v7432_v47, %s6040_s25  ;;  %11472 = vst [vmem:[#allocation94_spill] sm:$0xff] %v7844_v25  ;;  %v7853_v47 = vpop.permute.xlu2 %5218  ;;  %v11479_v25 = vld [vmem:[#allocation45_spill] sm:$0xff]  ;;  %3707 = vmatpush.bf16.msra.mxu2 %v5070_v36  ;;  %v1276_v36 = vrot.slane %v11481_v19, 7 }
 0x40f   :  { %v7837_v35 = vpop.permute.xlu1 %5183  ;;  %11473 = vst [vmem:[#allocation95_spill] sm:$0xff] %v7847_v48  ;;  %v1480_v48 = vrot.slane %v11479_v25, 1 }
 0x410   :  { %11470 = vst [vmem:[#allocation92_spill] sm:$0xff] %v7837_v35  ;;  %v7841_v15 = vpop.permute.xlu0 %5178 }
 0x411   :  { %11471 = vst [vmem:[#allocation93_spill] sm:$0xff] %v7841_v15  ;;  %4957 = vmatmul.msk.bf16.gmra.mxu3 %vm7165_vm5, %v4956_v51  ;;  %v7887_v33 = vsel %vm1442_vm4, %v1480_v48, 0.0 }
 0x412   :  { %11474 = vst [vmem:[#allocation96_spill] sm:$0xff] %v7853_v47 }
 0x414   :  { %v7855_v35 = vpop.f32.mrf.mxu3  ;;  %5413 = vrot.lane.b32.xlu2 %v5412_v28, %s6041_s26 }
 0x415   :  { %11475 = vst [vmem:[#allocation97_spill] sm:$0xff] %v7855_v35  ;;  %5408 = vrot.lane.b32.xlu1 %v7458_v46, %s6040_s25  ;;  %v11478_v35 = vld [vmem:[#allocation50_spill] sm:$0xff]  ;;  %v5061_v46 = vld [vmem:[%s10945_s2 + $0x30] sm:$0xff] }
 0x416   :  { %5403 = vrot.lane.b32.xlu0 %v5372_v58, %s6042_s27  ;;  %v1479_v15 = vrot.slane %v11478_v35, 1  ;;  %v5069_v58 = vld [vmem:[%s10945_s2 + $0x70] sm:$0xff]  ;;  %3539 = vmatpush.bf16.msra.mxu1 %v5061_v46  ;;  %v7894_v3 = vpop.permute.xlu2 %5233 }
 0x417   :  { %v7867_v51 = vpop.permute.xlu1 %5198  ;;  %3708 = vmatpush.bf16.msra.mxu2 %v5069_v58  ;;  %11482 = vst [vmem:[#allocation101_spill] sm:$0xff] %v7894_v3  ;;  %v7915_v58 = vsel %vm1251_vm6, 0.0, %v1276_v36  ;;  %v5059_v3 = vld [vmem:[%s10945_s2 + $0x20] sm:$0xff] }
 0x418   :  { %11476 = vst [vmem:[#allocation98_spill] sm:$0xff] %v7867_v51  ;;  %v7869_v47 = vpop.permute.xlu0 %5193  ;;  %v5417_v51 = vpack.i.bf16 %v11469_v40, %v11468_v37 }
 0x419   :  { %11477 = vst [vmem:[#allocation99_spill] sm:$0xff] %v7869_v47  ;;  %v7884_v47 = vsel %vm1442_vm4, %v1479_v15, %v1480_v48  ;;  %v5060_v15 = vld [vmem:[%s10945_s2 + $0x28] sm:$0xff] }
 0x41a   :  { %v5068_v48 = vld [vmem:[%s10945_s2 + $0x68] sm:$0xff]  ;;  %3540 = vmatpush.bf16.msra.mxu1 %v5060_v15  ;;  %11486 = vst [vmem:[#allocation105_spill] sm:$0xff] %v7915_v58  ;;  %v5437_v15 = vpack.i.bf16 %v7309_v24, %v11481_v19 }
 0x41b   :  { %3709 = vmatpush.bf16.msra.mxu2 %v5068_v48 }
 0x41c   :  { %v7879_v17 = vpop.f32.mrf.mxu3  ;;  %5428 = vrot.lane.b32.xlu2 %v7462_v21, %s6040_s25  ;;  %v4959_v21 = vpack.c.bf16 %v7887_v33, %v7884_v47 }
 0x41d   :  { %11480 = vst [vmem:[#allocation100_spill] sm:$0xff] %v7879_v17  ;;  %5423 = vrot.lane.b32.xlu1 %v5392_v18, %s6042_s27  ;;  %v1277_v17 = vrot.slane %v7309_v24, 7  ;;  %v11493_v24 = vld [vmem:[#allocation47_spill] sm:$0xff] }
 0x41e   :  { %5418 = vrot.lane.b32.xlu0 %v5417_v51, %s6042_s27  ;;  %3541 = vmatpush.bf16.msra.mxu1 %v5059_v3  ;;  %v1483_v37 = vrot.slane %v11493_v24, 1 }
 0x41f   :  { %v7903_v46 = vpop.permute.xlu1 %5213  ;;  %v7912_v51 = vsel %vm1251_vm6, %v1276_v36, %v1277_v17  ;;  %v1280_v36 = vrot.slane %v7295_v60, 7 }
 0x420   :  { %11483 = vst [vmem:[#allocation102_spill] sm:$0xff] %v7903_v46  ;;  %v7907_v18 = vpop.permute.xlu0 %5208  ;;  %v5067_v46 = vld [vmem:[%s10945_s2 + $0x60] sm:$0xff]  ;;  %v5432_v17 = vpack.i.bf16 %v7912_v51, %v7915_v58 }
 0x421   :  { %11484 = vst [vmem:[#allocation103_spill] sm:$0xff] %v7907_v18  ;;  %4960 = vmatmul.msk.bf16.gmra.mxu3 %vm7165_vm5, %v4959_v21  ;;  %v1279_v21 = vrot.slane %v7311_v7, 7  ;;  %3710 = vmatpush.bf16.msra.mxu2 %v5067_v46  ;;  %v5058_v18 = vld [vmem:[%s10945_s2 + $0x18] sm:$0xff] }
 0x422   :  { %11485 = vst [vmem:[#allocation104_spill] sm:$0xff] %v7912_v51  ;;  %v7942_v51 = vpop.permute.xlu2 %5248  ;;  %3542 = vmatpush.bf16.msra.mxu1 %v5058_v18 }
 0x423   :  { %v7950_v46 = vsel %vm1251_vm6, 0.0, %v1279_v21 }
 0x424   :  { %v7925_v48 = vpop.f32.mrf.mxu3  ;;  %5443 = vrot.lane.b32.xlu2 %v5412_v28, %s6042_s27  ;;  %v7947_v28 = vsel %vm1251_vm6, %v1279_v21, %v1280_v36  ;;  %11491 = vst [vmem:[#allocation110_spill] sm:$0xff] %v7950_v46  ;;  %v5457_v36 = vpack.i.bf16 %v7295_v60, %v7311_v7  ;;  %v5447_v21 = vpack.i.bf16 %v7721_v52, %v7669_v14 }
 0x425   :  { %11487 = vst [vmem:[#allocation106_spill] sm:$0xff] %v7925_v48  ;;  %5438 = vrot.lane.b32.xlu1 %v5437_v15, %s6042_s27  ;;  %v5066_v48 = vld [vmem:[%s10945_s2 + $0x58] sm:$0xff]  ;;  %v11492_v15 = vld [vmem:[#allocation46_spill] sm:$0xff]  ;;  %v5452_v40 = vpack.i.bf16 %v7947_v28, %v7950_v46  ;;  %v5055_v46 = vld [vmem:[%s10945_s2] sm:$0xff] }
 0x426   :  { %5433 = vrot.lane.b32.xlu0 %v5432_v17, %s6041_s26  ;;  %11490 = vst [vmem:[#allocation109_spill] sm:$0xff] %v7947_v28  ;;  %v1482_v19 = vrot.slane %v11492_v15, 1  ;;  %3711 = vmatpush.bf16.msra.mxu2 %v5066_v48  ;;  %v7972_v48 = vsel %vm1442_vm4, %v1483_v37, 0.0  ;;  %v5063_v28 = vld [vmem:[%s10945_s2 + $0x40] sm:$0xff] }
 0x427   :  { %v7940_v58 = vpop.permute.xlu1 %5228 }
 0x428   :  { %11488 = vst [vmem:[#allocation107_spill] sm:$0xff] %v7940_v58  ;;  %v7944_v3 = vpop.permute.xlu0 %5223  ;;  %v5057_v58 = vld [vmem:[%s10945_s2 + $0x10] sm:$0xff]  ;;  %v7969_v18 = vsel %vm1442_vm4, %v1482_v19, %v1483_v37  ;;  %v5056_v19 = vld [vmem:[%s10945_s2 + $0x8] sm:$0xff] }
 0x429   :  { %11489 = vst [vmem:[#allocation108_spill] sm:$0xff] %v7944_v3  ;;  %v5065_v3 = vld [vmem:[%s10945_s2 + $0x50] sm:$0xff]  ;;  %3543 = vmatpush.bf16.msra.mxu1 %v5057_v58  ;;  %v5064_v37 = vld [vmem:[%s10945_s2 + $0x48] sm:$0xff]  ;;  %v4962_v58 = vpack.c.bf16 %v7972_v48, %v7969_v18 }
 0x42a   :  { %3712 = vmatpush.bf16.msra.mxu2 %v5065_v3  ;;  %v8005_v60 = vpop.permute.xlu2 %5263 }
 0x42b   :  { %11498 = vst [vmem:[#allocation113_spill] sm:$0xff] %v8005_v60 }
 0x42c   :  { %v7966_v10 = vpop.f32.mrf.mxu3  ;;  %5458 = vrot.lane.b32.xlu2 %v5457_v36, %s6042_s27  ;;  %v7992_v36 = vsel %vm1251_vm6, %v1282_v31, %v1283_v50 }
 0x42d   :  { %11494 = vst [vmem:[#allocation46_spill] sm:$0xff] %v7966_v10  ;;  %5453 = vrot.lane.b32.xlu1 %v5452_v40, %s6041_s26  ;;  %3544 = vmatpush.bf16.msra.mxu1 %v5056_v19 }
 0x42e   :  { %5448 = vrot.lane.b32.xlu0 %v5447_v21, %s6040_s25  ;;  %11496 = vst [vmem:[#allocation111_spill] sm:$0xff] %v7992_v36  ;;  %v7995_v21 = vsel %vm1251_vm6, 0.0, %v1282_v31  ;;  %3713 = vmatpush.bf16.msra.mxu2 %v5064_v37  ;;  %v5472_v31 = vpack.i.bf16 %v7767_v63, %v7724_v57  ;;  %v1285_v37 = vrot.slane %v11464_v42, 7 }
 0x42f   :  { %v7985_v10 = vpop.permute.xlu1 %5243  ;;  %11497 = vst [vmem:[#allocation112_spill] sm:$0xff] %v7995_v21  ;;  %v5477_v50 = vpack.i.bf16 %v7992_v36, %v7995_v21  ;;  %v11501_v21 = vld [vmem:[#allocation48_spill] sm:$0xff] }
 0x430   :  { %v7989_v3 = vpop.permute.xlu0 %5238  ;;  %v8022_v36 = vsel %vm1251_vm6, 0.0, %v1285_v37  ;;  %v1485_v4 = vrot.slane %v11501_v21, 1 }
 0x431   :  { %11495 = vst [vmem:[#allocation47_spill] sm:$0xff] %v7989_v3  ;;  %4963 = vmatmul.msk.bf16.gmra.mxu3 %vm7165_vm5, %v4962_v58  ;;  %3545 = vmatpush.bf16.msra.mxu1 %v5055_v46 }
 0x432   :  { %3714 = vmatpush.bf16.msra.mxu2 %v5063_v28  ;;  %v5482_v28 = vpack.i.bf16 %v8022_v36, %v7669_v14  ;;  %v8028_v46 = vpop.permute.xlu2 %5278  ;;  %v11504_v14 = vld [vmem:[#allocation15_spill] sm:$0xff] }
 0x433   :  { %11502 = vst [vmem:[#allocation48_spill] sm:$0xff] %v8028_v46  ;;  %v1089_v49 = vmul.f32 0.01, %v11504_v14  ;;  %v11505_v46 = vld [vmem:[#allocation16_spill] sm:$0xff] }
 0x434   :  { %v8011_v19 = vpop.f32.mrf.mxu3  ;;  %5478 = vrot.lane.b32.xlu2 %v5477_v50, %s6041_s26  ;;  %v1090_v12 = vmul.f32 0.01, %v11505_v46 }
 0x435   :  { %11499 = vst [vmem:[#allocation114_spill] sm:$0xff] %v8011_v19  ;;  %5473 = vrot.lane.b32.xlu1 %v5472_v31, %s6040_s25  ;;  %v1486_v19 = vrot.slane %v7439_v56, 1 }
 0x436   :  { %5463 = vrot.lane.b32.xlu0 %v5432_v17, %s6042_s27  ;;  %v5467_v17 = vpack.i.bf16 %v11450_v9, %v11449_v34 }
 0x437   :  { %v8017_v58 = vpop.permute.xlu1 %5258  ;;  %v8035_v31 = vsel %vm1442_vm4, %v1485_v4, %v1486_v19  ;;  %v8038_v60 = vsel %vm1442_vm4, %v1486_v19, 0.0  ;;  %v8053_v19 = vsel %vm1251_vm6, %v1285_v37, %v1286_v5  ;;  %v5497_v5 = vpack.i.bf16 %v7826_v6, %v7770_v13 }
 0x438   :  { %11500 = vst [vmem:[#allocation115_spill] sm:$0xff] %v8017_v58  ;;  %v8019_v7 = vpop.permute.xlu0 %5253  ;;  %v4965_v4 = vpack.c.bf16 %v8038_v60, %v8035_v31  ;;  %v5502_v9 = vpack.i.bf16 %v7721_v52, %v8053_v19 }
 0x43a   :  { %v5294_v37 = vpop.permute.xlu2 %5293 }
 0x43b   :  { %v5295_v11 = vunpack.i.l.bf16 %v5294_v37  ;;  %v5296_v30 = vunpack.i.h.bf16 %v5294_v37 }
 0x43c   :  { %v8030_v55 = vpop.f32.mrf.mxu3  ;;  %5488 = vrot.lane.b32.xlu2 %v5452_v40, %s6042_s27  ;;  %v8058_v40 = vmax.f32 %v11504_v14, %v1089_v49  ;;  %v1288_v49 = vrot.slane %v11478_v35, 7 }
 0x43d   :  { %11503 = vst [vmem:[#allocation116_spill] sm:$0xff] %v8030_v55  ;;  %5483 = vrot.lane.b32.xlu1 %v5482_v28, %s6041_s26  ;;  %v8061_v28 = vmax.f32 %v11505_v46, %v1090_v12 }
 0x43e   :  { %5468 = vrot.lane.b32.xlu0 %v5467_v17, %s6042_s27  ;;  %v5492_v17 = vpack.i.bf16 %v11465_v41, %v11464_v42  ;;  %v1488_v12 = vrot.slane %v8058_v40, 1  ;;  %v5090_v42 = vunpack.i.l.bf16 %v7681_v23  ;;  %v5241_v41 = vunpack.i.h.bf16 %v7989_v3 }
 0x43f   :  { %v8046_v55 = vpop.permute.xlu1 %5273  ;;  %v1489_v46 = vrot.slane %v8061_v28, 1 }
 0x440   :  { %11506 = vst [vmem:[#allocation15_spill] sm:$0xff] %v8046_v55  ;;  %v8050_v34 = vpop.permute.xlu0 %5268 }
 0x441   :  { %11507 = vst [vmem:[#allocation16_spill] sm:$0xff] %v8050_v34  ;;  %4966 = vmatmul.msk.bf16.gmra.mxu3 %vm7165_vm5, %v4965_v4  ;;  %v5522_v4 = vpack.i.bf16 %v7884_v47, %v7829_v62 }
 0x444   :  { %v8067_v55 = vpop.f32.mrf.mxu3  ;;  %5493 = vrot.lane.b32.xlu2 %v5492_v17, %s6042_s27  ;;  %v8084_v17 = vsel %vm1251_vm6, 0.0, %v1288_v49 }
 0x445   :  { %11508 = vst [vmem:[#allocation117_spill] sm:$0xff] %v8067_v55  ;;  %5503 = vrot.lane.b32.xlu1 %v5502_v9, %s6041_s26  ;;  %v8087_v9 = vsel %vm1442_vm4, %v1488_v12, %v1489_v46  ;;  %v1291_v55 = vrot.slane %v11492_v15, 7  ;;  %v5507_v16 = vpack.i.bf16 %v8084_v17, %v7724_v57  ;;  %v8102_v12 = vunpack.i.l.bf16 %v7985_v10 }
 0x446   :  { %5498 = vrot.lane.b32.xlu0 %v5497_v5, %s6040_s25  ;;  %v1289_v5 = vrot.slane %v11479_v25, 7  ;;  %v2811_v57 = vsel %vm518_vm0, 0.0, %v5090_v42 }
 0x447   :  { %v8077_v14 = vpop.permute.xlu1 %5288 }
 0x448   :  { %v8079_v52 = vpop.permute.xlu0 %5283  ;;  %v5290_v34 = vunpack.i.l.bf16 %v8077_v14 }
 0x449   :  { %11509 = vst [vmem:[#allocation118_spill] sm:$0xff] %v8079_v52  ;;  %v8095_v52 = vsel %vm1442_vm4, %v1489_v46, 0.0  ;;  %v8110_v46 = vsel %vm1251_vm6, 0.0, %v1291_v55 }
 0x44a   :  { %11510 = vst [vmem:[#allocation119_spill] sm:$0xff] %v8095_v52  ;;  %v4968_v3 = vpack.c.bf16 %v8095_v52, %v8087_v9  ;;  %v3000_v54 = vsel %vm518_vm0, %v7186_v53, %v5290_v34  ;;  %v8122_v52 = vpop.permute.xlu2 %5308  ;;  %v8128_v53 = vsel %vm2872_vm7, %v2811_v57, %v8102_v12 }
 0x44b   :  { %11512 = vst [vmem:[#allocation121_spill] sm:$0xff] %v8128_v53 }
 0x44c   :  { %v8097_v39 = vpop.f32.mrf.mxu3  ;;  %5523 = vrot.lane.b32.xlu2 %v5522_v4, %s6040_s25 }
 0x44d   :  { %11511 = vst [vmem:[#allocation120_spill] sm:$0xff] %v8097_v39  ;;  %5513 = vrot.lane.b32.xlu1 %v5477_v50, %s6042_s27  ;;  %v5517_v39 = vpack.i.bf16 %v11479_v25, %v11478_v35  ;;  %v8118_v50 = vsel %vm1251_vm6, %v1288_v49, %v1289_v5 }
 0x44e   :  { %5508 = vrot.lane.b32.xlu0 %v5507_v16, %s6041_s26  ;;  %v2999_v16 = vsel %vm518_vm0, %v11420_v0, %v5241_v41  ;;  %v3064_v0 = vsel %vm2872_vm7, %v3000_v54, %v5296_v30  ;;  %v1292_v30 = vrot.slane %v11493_v24, 7 }
 0x44f   :  { %v5304_v4 = vpop.permute.xlu1 %5303  ;;  %v3063_v34 = vsel %vm2872_vm7, %v2999_v16, %v5295_v11  ;;  %v5527_v11 = vpack.i.bf16 %v7767_v63, %v8118_v50  ;;  %v5537_v16 = vpack.i.bf16 %v8053_v19, %v8022_v36 }
 0x450   :  { %v5299_v58 = vpop.permute.xlu0 %5298  ;;  %v5306_v44 = vunpack.i.h.bf16 %v5304_v4  ;;  %v5305_v43 = vunpack.i.l.bf16 %v5304_v4 }
 0x451   :  { %v5301_v35 = vunpack.i.h.bf16 %v5299_v58  ;;  %v5300_v25 = vunpack.i.l.bf16 %v5299_v58  ;;  %4969 = vmatmul.msk.bf16.gmra.mxu3 %vm7165_vm5, %v4968_v3  ;;  %v5532_v58 = vpack.i.bf16 %v8110_v46, %v7770_v13  ;;  %v8150_v13 = vsel %vm1251_vm6, %v1291_v55, %v1292_v30 }
 0x452   :  { %v2935_v41 = vsel %vm2934_vm8, %v8128_v53, %v5305_v43  ;;  %v2936_v42 = vsel %vm2934_vm8, %v8128_v53, %v5306_v44  ;;  %v5310_v43 = vunpack.i.l.bf16 %v8122_v52  ;;  %v5324_v63 = vpop.permute.xlu2 %5323  ;;  %v1294_v55 = vrot.slane %v11501_v21, 7 }
 0x453   :  { %v3127_v3 = vsel %vm2934_vm8, %v3063_v34, %v5300_v25  ;;  %v3128_v49 = vsel %vm2934_vm8, %v3064_v0, %v5301_v35  ;;  %v3251_v37 = vpack.c.bf16 %v2936_v42, %v2935_v41  ;;  %v5291_v35 = vunpack.i.h.bf16 %v8077_v14 }
 0x454   :  { %v8140_v5 = vpop.f32.mrf.mxu3  ;;  %v3252_v54 = vpack.c.bf16 %v3128_v49, %v3127_v3  ;;  %5533 = vrot.lane.b32.xlu2 %v5532_v58, %s6041_s26  ;;  %v5552_v34 = vpack.i.bf16 %v7826_v6, %v8150_v13  ;;  %v5547_v0 = vpack.i.bf16 %v7969_v18, %v7887_v33  ;;  %v5095_v41 = vunpack.i.l.bf16 %v7704_v27 }
 0x455   :  { %11513 = vst [vmem:[#allocation122_spill] sm:$0xff] %v8140_v5  ;;  %5518 = vrot.lane.b32.xlu1 %v5517_v39, %s6042_s27  ;;  %3546 = vmatmul.bf16.vlgmr.msra.gmra.mxu1 %v3251_v37  ;;  %v5091_v39 = vunpack.i.h.bf16 %v7681_v23  ;;  %v5250_v14 = vunpack.i.l.bf16 %v7942_v51  ;;  %v5246_v42 = vunpack.i.h.bf16 %v7985_v10  ;;  %v3002_v58 = vsel %vm518_vm0, %v11428_v22, %v5310_v43 }
 0x456   :  { %5528 = vrot.lane.b32.xlu0 %v5527_v11, %s6041_s26  ;;  %3715 = vmatmul.bf16.vlgmr.msra.gmra.mxu2 %v3252_v54  ;;  %v5326_v3 = vunpack.i.h.bf16 %v5324_v63  ;;  %v3001_v23 = vsel %vm518_vm0, %v11427_v8, %v5291_v35  ;;  %v5325_v11 = vunpack.i.l.bf16 %v5324_v63  ;;  %v8176_v22 = vsel %vm1251_vm6, 0.0, %v1294_v55 }
 0x457   :  { %v5319_v4 = vpop.permute.xlu1 %5318  ;;  %v2812_v8 = vsel %vm518_vm0, %v7660_v59, %v5091_v39  ;;  %v2813_v30 = vsel %vm518_vm0, %v7657_v20, %v5095_v41  ;;  %v5562_v20 = vpack.i.bf16 %v8118_v50, %v8084_v17  ;;  %v5542_v39 = vpack.i.bf16 %v11493_v24, %v11492_v15 }
 0x458   :  { %v5314_v44 = vpop.permute.xlu0 %5313  ;;  %v5321_v49 = vunpack.i.h.bf16 %v5319_v4  ;;  %v5320_v6 = vunpack.i.l.bf16 %v5319_v4  ;;  %v2874_v35 = vsel %vm2872_vm7, %v2812_v8, %v5246_v42  ;;  %v2875_v63 = vsel %vm2872_vm7, %v2813_v30, %v5250_v14 }
 0x459   :  { %v5316_v25 = vunpack.i.h.bf16 %v5314_v44  ;;  %v5315_v57 = vunpack.i.l.bf16 %v5314_v44  ;;  %v11169_v44 = vmov 0.0|0.0   ;;  %v2937_v4 = vsel %vm2934_vm8, %v2874_v35, %v5325_v11 }
 0x45a   :  { %v2938_v59 = vsel %vm2934_vm8, %v2875_v63, %v5326_v3  ;;  %v1494_v3 = vrot.slane %v7406_v32, 1  ;;  %v8216_v30 = vpack.i.bf16 %v8035_v31, %v7972_v48  ;;  %v1297_v35 = vrot.slane %v8058_v40, 7 }
 0x45b   :  { %v3065_v10 = vsel %vm2872_vm7, %v3001_v23, %v5315_v57  ;;  %v3066_v54 = vsel %vm2872_vm7, %v3002_v58, %v5316_v25  ;;  %v3254_v41 = vpack.c.bf16 %v2938_v59, %v2937_v4  ;;  %v1495_v23 = vrot.slane %v7410_v61, 1 }
 0x45c   :  { %v8168_v37 = vpop.f32.mrf.mxu3  ;;  %5553 = vrot.lane.b32.xlu2 %v5552_v34, %s6041_s26  ;;  %v3129_v25 = vsel %vm2934_vm8, %v3065_v10, %v5320_v6  ;;  %v3130_v57 = vsel %vm2934_vm8, %v3066_v54, %v5321_v49  ;;  %v5311_v49 = vunpack.i.h.bf16 %v8122_v52  ;;  %v5567_v10 = vpack.i.bf16 %v7439_v56, %v11501_v21 }
 0x45d   :  { %11514 = vst [vmem:[#allocation123_spill] sm:$0xff] %v8168_v37  ;;  %5548 = vrot.lane.b32.xlu1 %v5547_v0, %s6040_s25  ;;  %v3255_v34 = vpack.c.bf16 %v3130_v57, %v3129_v25  ;;  %v1295_v0 = vrot.slane %v7439_v56, 7  ;;  %v5100_v52 = vunpack.i.l.bf16 %v7677_v38  ;;  %v5096_v63 = vunpack.i.h.bf16 %v7704_v27  ;;  %v5339_v25 = vpop.permute.xlu2 %5338 }
 0x45e   :  { %5538 = vrot.lane.b32.xlu0 %v5537_v16, %s6042_s27  ;;  %v5557_v16 = vpack.i.bf16 %v8176_v22, %v7829_v62  ;;  %v8224_v57 = vsel %vm1442_vm4, %v1494_v3, %v1495_v23  ;;  %v5251_v4 = vunpack.i.h.bf16 %v7942_v51  ;;  %v3003_v48 = vsel %vm518_vm0, %v11432_v2, %v5311_v49 }
 0x45f   :  { %v5334_v42 = vpop.permute.xlu1 %5333  ;;  %v8205_v62 = vsel %vm1251_vm6, %v1294_v55, %v1295_v0  ;;  %v5340_v51 = vunpack.i.l.bf16 %v5339_v25  ;;  %v2815_v0 = vsel %vm518_vm0, %v7639_v1, %v5100_v52  ;;  %v5597_v1 = vpack.i.bf16 %v8087_v9, %v8038_v60  ;;  %v11517_v9 = vld [vmem:[#allocation53_spill] sm:$0xff] }
 0x460   :  { %v8182_v43 = vpop.permute.xlu0 %5328  ;;  %v5336_v6 = vunpack.i.h.bf16 %v5334_v42  ;;  %v5335_v11 = vunpack.i.l.bf16 %v5334_v42  ;;  %v5577_v55 = vpack.i.bf16 %v7884_v47, %v8205_v62  ;;  %v5255_v47 = vunpack.i.l.bf16 %v8019_v7 }
 0x461   :  { %3959 = vmatmul.bf16.gmra.mxu3 %v11169_v44  ;;  %v5330_v14 = vunpack.i.l.bf16 %v8182_v43 }
 0x462   :  { %v3067_v59 = vsel %vm2872_vm7, %v3003_v48, %v5335_v11  ;;  %v2877_v3 = vsel %vm2872_vm7, %v2815_v0, %v5255_v47  ;;  %v5587_v11 = vpack.i.bf16 %v8150_v13, %v8110_v46 }
 0x463   :  { %v3004_v54 = vsel %vm518_vm0, %v11433_v45, %v5330_v14  ;;  %v8227_v45 = vsel %vm1442_vm4, %v1495_v23, 0.0  ;;  %v3131_v23 = vsel %vm2934_vm8, %v3067_v59, %v5340_v51  ;;  %v11519_v59 = vld [vmem:[#allocation54_spill] sm:$0xff] }
 0x464   :  { %5563 = vrot.lane.b32.xlu2 %v5562_v20, %s6042_s27  ;;  %v8202_v58 = vpop.f32.mrf.mxu3  ;;  %v3068_v20 = vsel %vm2872_vm7, %v3004_v54, %v5336_v6  ;;  %v4971_v2 = vpack.c.bf16 %v8227_v45, %v8224_v57 }
 0x465   :  { %5558 = vrot.lane.b32.xlu1 %v5557_v16, %s6041_s26  ;;  %11515 = vst [vmem:[#allocation124_spill] sm:$0xff] %v8202_v58  ;;  %3551 = vmatmul.bf16.gmra.mxu1 %v3254_v41  ;;  %v5341_v16 = vunpack.i.h.bf16 %v5339_v25  ;;  %v5354_v52 = vpop.permute.xlu2 %5353  ;;  %v11518_v25 = vld [vmem:[#allocation28_spill] sm:$0xff] }
 0x466   :  { %5543 = vrot.lane.b32.xlu0 %v5542_v39, %s6042_s27  ;;  %3720 = vmatmul.bf16.gmra.mxu2 %v3255_v34  ;;  %v8242_v39 = vsel %vm1251_vm6, 0.0, %v1297_v35  ;;  %v2814_v34 = vsel %vm518_vm0, %v7642_v26, %v5096_v63  ;;  %v1497_v63 = vrot.slane %v11517_v9, 1 }
 0x467   :  { %v8248_v41 = vpop.permute.xlu1 %5348  ;;  %v2876_v42 = vsel %vm2872_vm7, %v2814_v34, %v5251_v4  ;;  %v3132_v49 = vsel %vm2934_vm8, %v3068_v20, %v5341_v16  ;;  %v1498_v4 = vrot.slane %v11518_v25, 1  ;;  %v1491_v20 = vrot.slane %v11519_v59, 1 }
 0x468   :  { %v5344_v8 = vpop.permute.xlu0 %5343  ;;  %v3258_v54 = vpack.c.bf16 %v3132_v49, %v3131_v23  ;;  %v5350_v47 = vunpack.i.l.bf16 %v8248_v41  ;;  %v11523_v49 = vld [vmem:[#allocation115_spill] sm:$0xff] }
 0x469   :  { %v5346_v31 = vunpack.i.h.bf16 %v5344_v8  ;;  %v5345_v27 = vunpack.i.l.bf16 %v5344_v8  ;;  %v1298_v8 = vrot.slane %v8061_v28, 7  ;;  %v8285_v34 = vsel %vm1442_vm4, %v1497_v63, %v1498_v4 }
 0x46b   :  { %v2939_v26 = vsel %vm2934_vm8, %v2876_v42, %v5345_v27  ;;  %v2940_v6 = vsel %vm2934_vm8, %v2877_v3, %v5346_v31  ;;  %v8273_v48 = vsel %vm1251_vm6, %v1297_v35, %v1298_v8  ;;  %v5592_v27 = vpack.i.bf16 %v8061_v28, %v8058_v40  ;;  %v11522_v3 = vld [vmem:[#allocation7_spill] sm:$0xff] }
 0x46c   :  { %5568 = vrot.lane.b32.xlu2 %v5567_v10, %s6042_s27  ;;  %v8250_v14 = vpop.f32.mrf.mxu3  ;;  %v5582_v10 = vpack.i.bf16 %v8242_v39, %v7887_v33  ;;  %v5331_v33 = vunpack.i.h.bf16 %v8182_v43  ;;  %v8288_v35 = vsel %vm1442_vm4, %v1498_v4, 0.0  ;;  %v11521_v43 = vld [vmem:[#allocation51_spill] sm:$0xff]  ;;  %v5101_v42 = vunpack.i.h.bf16 %v7677_v38 }
 0x46d   :  { %5578 = vrot.lane.b32.xlu1 %v5577_v55, %s6041_s26  ;;  %11516 = vst [vmem:[#allocation125_spill] sm:$0xff] %v8250_v14  ;;  %v3257_v55 = vpack.c.bf16 %v2940_v6, %v2939_v26  ;;  %v1492_v0 = vrot.slane %v11521_v43, 1  ;;  %v5105_v23 = vunpack.i.l.bf16 %v11522_v3  ;;  %v5260_v26 = vunpack.i.l.bf16 %v11523_v49 }
 0x46e   :  { %5573 = vrot.lane.b32.xlu0 %v8216_v30, %s6040_s25  ;;  %v5256_v6 = vunpack.i.h.bf16 %v8019_v7  ;;  %v5356_v38 = vunpack.i.h.bf16 %v5354_v52  ;;  %v4974_v7 = vpack.c.bf16 %v8288_v35, %v8285_v34 }
 0x46f   :  { %v5364_v16 = vpop.permute.xlu1 %5363 }
 0x470   :  { %v5359_v31 = vpop.permute.xlu0 %5358  ;;  %v5366_v63 = vunpack.i.h.bf16 %v5364_v16  ;;  %v5365_v4 = vunpack.i.l.bf16 %v5364_v16 }
 0x471   :  { %4972 = vmatmul.msk.bf16.gmra.mxu3 %vm7165_vm5, %v4971_v2  ;;  %v5602_v2 = vpack.i.bf16 %v7969_v18, %v8273_v48  ;;  %v11525_v18 = vld [vmem:[#allocation36_spill] sm:$0xff]  ;;  %v5360_v8 = vunpack.i.l.bf16 %v5359_v31 }
 0x474   :  { %5598 = vrot.lane.b32.xlu2 %v5597_v1, %s6040_s25  ;;  %v8280_v51 = vpop.f32.mrf.mxu3  ;;  %v11524_v1 = vld [vmem:[#allocation9_spill] sm:$0xff] }
 0x475   :  { %5588 = vrot.lane.b32.xlu1 %v5587_v11, %s6042_s27  ;;  %3556 = vmatmul.bf16.gmra.mxu1 %v3257_v55  ;;  %11520 = vst [vmem:[#allocation54_spill] sm:$0xff] %v8280_v51  ;;  %v3005_v11 = vsel %vm518_vm0, %v11524_v1, %v5331_v33  ;;  %v5355_v55 = vunpack.i.l.bf16 %v5354_v52  ;;  %v8306_v33 = vsel %vm1442_vm4, %v1491_v20, %v1492_v0  ;;  %v11527_v1 = vld [vmem:[#allocation6_spill] sm:$0xff] }
 0x476   :  { %5583 = vrot.lane.b32.xlu0 %v5582_v10, %s6041_s26  ;;  %3725 = vmatmul.bf16.gmra.mxu2 %v3258_v54  ;;  %v3006_v10 = vsel %vm518_vm0, %v11525_v18, %v5350_v47  ;;  %v5361_v54 = vunpack.i.h.bf16 %v5359_v31  ;;  %v11526_v47 = vld [vmem:[#allocation34_spill] sm:$0xff]  ;;  %v8314_v18 = vpop.permute.xlu2 %5368 }
 0x477   :  { %v2816_v31 = vsel %vm518_vm0, %v11526_v47, %v5101_v42  ;;  %v3070_v52 = vsel %vm2872_vm7, %v3006_v10, %v5356_v38  ;;  %v11528_v10 = vmov 0.0   ;;  %v11536_v51 = vld [vmem:[#allocation38_spill] sm:$0xff] }
 0x478   :  { %v2878_v16 = vsel %vm2872_vm7, %v2816_v31, %v5256_v6  ;;  %v3134_v42 = vsel %vm2934_vm8, %v3070_v52, %v5361_v54  ;;  %v5622_v38 = vpack.i.bf16 %v8242_v39, %v11528_v10  ;;  %v5612_v6 = vpack.i.bf16 %v8205_v62, %v8176_v22 }
 0x479   :  { %v2941_v47 = vsel %vm2934_vm8, %v2878_v16, %v5365_v4  ;;  %v11532_v4 = vld [vmem:[#allocation55_spill] sm:$0xff]  ;;  %v5632_v52 = vpack.i.bf16 %v7406_v32, %v8273_v48  ;;  %v5370_v16 = vunpack.i.l.bf16 %v8314_v18  ;;  %v1300_v10 = vrot.slane %v11519_v59, 7 }
 0x47b   :  { %v3008_v14 = vsel %vm518_vm0, %v11536_v51, %v5370_v16 }
 0x47c   :  { %5608 = vrot.lane.b32.xlu2 %v8216_v30, %s6041_s26  ;;  %v2817_v30 = vsel %vm518_vm0, %v11527_v1, %v5105_v23  ;;  %v8331_v31 = vpop.f32.mrf.mxu3  ;;  %v1500_v1 = vrot.slane %v11532_v4, 1 }
 0x47d   :  { %5593 = vrot.lane.b32.xlu1 %v5592_v27, %s6042_s27  ;;  %v3069_v27 = vsel %vm2872_vm7, %v3005_v11, %v5355_v55  ;;  %v2879_v20 = vsel %vm2872_vm7, %v2817_v30, %v5260_v26  ;;  %v1303_v11 = vrot.slane %v7406_v32, 7  ;;  %v11529_v55 = vld [vmem:[#allocation119_spill] sm:$0xff]  ;;  %11530 = vst [vmem:[#allocation51_spill] sm:$0xff] %v8331_v31  ;;  %v11533_v30 = vld [vmem:[#allocation29_spill] sm:$0xff]  ;;  %v5261_v31 = vunpack.i.h.bf16 %v11523_v49 }
 0x47e   :  { %5603 = vrot.lane.b32.xlu0 %v5602_v2, %s6041_s26  ;;  %v3133_v2 = vsel %vm2934_vm8, %v3069_v27, %v5360_v8  ;;  %v2942_v23 = vsel %vm2934_vm8, %v2879_v20, %v5366_v63  ;;  %v8337_v8 = vsel %vm1442_vm4, %v1492_v0, 0.0  ;;  %v5374_v63 = vpop.permute.xlu0 %5373  ;;  %v1501_v27 = vrot.slane %v11533_v30, 1 }
 0x47f   :  { %v3261_v26 = vpack.c.bf16 %v3134_v42, %v3133_v2  ;;  %v3260_v54 = vpack.c.bf16 %v2942_v23, %v2941_v47  ;;  %v8340_v39 = vsel %vm1251_vm6, 0.0, %v1303_v11  ;;  %v5351_v20 = vunpack.i.h.bf16 %v8248_v41  ;;  %v5379_v23 = vpop.permute.xlu1 %5378 }
 0x480   :  { %11531 = vst [vmem:[#allocation7_spill] sm:$0xff] %v8340_v39  ;;  %v5637_v0 = vpack.i.bf16 %v8224_v57, %v8337_v8  ;;  %v5627_v2 = vpack.i.bf16 %v8340_v39, %v8038_v60  ;;  %v5376_v42 = vunpack.i.h.bf16 %v5374_v63  ;;  %v5375_v47 = vunpack.i.l.bf16 %v5374_v63  ;;  %v11535_v63 = vld [vmem:[#allocation113_spill] sm:$0xff] }
 0x481   :  { %4975 = vmatmul.msk.bf16.gmra.mxu3 %vm7165_vm5, %v4974_v7  ;;  %v5617_v7 = vpack.i.bf16 %v8306_v33, %v11529_v55  ;;  %v5384_v55 = vpop.permute.xlu2 %5383  ;;  %v8355_v48 = vsel %vm1442_vm4, %v1500_v1, %v1501_v27  ;;  %v1304_v41 = vrot.slane %v7410_v61, 7  ;;  %v5265_v44 = vunpack.i.l.bf16 %v11535_v63  ;;  %v11537_v1 = vld [vmem:[#allocation37_spill] sm:$0xff] }
 0x482   :  { %v3007_v58 = vsel %vm518_vm0, %v11537_v1, %v5351_v20  ;;  %v5380_v37 = vunpack.i.l.bf16 %v5379_v23  ;;  %v5386_v5 = vunpack.i.h.bf16 %v5384_v55  ;;  %v5385_v32 = vunpack.i.l.bf16 %v5384_v55 }
 0x483   :  { %v3072_v49 = vsel %vm2872_vm7, %v3008_v14, %v5376_v42  ;;  %v8383_v20 = vsel %vm1251_vm6, 0.0, %v1300_v10 }
 0x484   :  { %5623 = vrot.lane.b32.xlu2 %v5622_v38, %s6042_s27  ;;  %v1301_v38 = vrot.slane %v11521_v43, 7  ;;  %v8375_v53 = vpop.f32.mrf.mxu3  ;;  %11540 = vst [vmem:[#allocation36_spill] sm:$0xff] %v8383_v20 }
 0x485   :  { %5618 = vrot.lane.b32.xlu1 %v5617_v7, %s6040_s25  ;;  %3561 = vmatmul.bf16.gmra.mxu1 %v3260_v54  ;;  %v8358_v7 = vsel %vm1442_vm4, %v1501_v27, 0.0  ;;  %v5106_v54 = vunpack.i.h.bf16 %v11522_v3  ;;  %v5381_v27 = vunpack.i.h.bf16 %v5379_v23  ;;  %v3071_v3 = vsel %vm2872_vm7, %v3007_v58, %v5375_v47  ;;  %11538 = vst [vmem:[#allocation115_spill] sm:$0xff] %v8375_v53  ;;  %v11543_v58 = vld [vmem:[#allocation69_spill] sm:$0xff] }
 0x486   :  { %5613 = vrot.lane.b32.xlu0 %v5612_v6, %s6042_s27  ;;  %3730 = vmatmul.bf16.gmra.mxu2 %v3261_v26  ;;  %v1306_v6 = vrot.slane %v11517_v9, 7  ;;  %v11534_v26 = vld [vmem:[#allocation32_spill] sm:$0xff]  ;;  %v4977_v51 = vpack.c.bf16 %v8358_v7, %v8355_v48  ;;  %v8380_v16 = vsel %vm1251_vm6, %v1300_v10, %v1301_v38  ;;  %v8395_v47 = vpop.permute.xlu0 %5388 }
 0x487   :  { %v5110_v60 = vunpack.i.l.bf16 %v11534_v26  ;;  %11539 = vst [vmem:[#allocation9_spill] sm:$0xff] %v8380_v16  ;;  %v2818_v14 = vsel %vm518_vm0, %v11543_v58, %v5106_v54  ;;  %v3136_v38 = vsel %vm2934_vm8, %v3072_v49, %v5381_v27  ;;  %v5647_v54 = vpack.i.bf16 %v8383_v20, %v7410_v61  ;;  %v11546_v27 = vld [vmem:[#allocation13_spill] sm:$0xff]  ;;  %v11547_v49 = vld [vmem:[#allocation30_spill] sm:$0xff] }
 0x488   :  { %v2880_v23 = vsel %vm2872_vm7, %v2818_v14, %v5261_v31  ;;  %v1504_v58 = vrot.slane %v11547_v49, 1  ;;  %v5371_v14 = vunpack.i.h.bf16 %v8314_v18  ;;  %v1309_v18 = vrot.slane %v11532_v4, 7 }
 0x489   :  { %v2943_v55 = vsel %vm2934_vm8, %v2880_v23, %v5385_v32 }
 0x48c   :  { %5638 = vrot.lane.b32.xlu2 %v5637_v0, %s6040_s25  ;;  %v8389_v0 = vsel %vm1251_vm6, 0.0, %v1306_v6 }
 0x48d   :  { %5633 = vrot.lane.b32.xlu1 %v5632_v52, %s6042_s27  ;;  %v8386_v52 = vsel %vm1251_vm6, %v1303_v11, %v1304_v41  ;;  %11542 = vst [vmem:[#allocation6_spill] sm:$0xff] %v8389_v0  ;;  %v3135_v11 = vsel %vm2934_vm8, %v3071_v3, %v5380_v37  ;;  %v1503_v3 = vrot.slane %v11546_v27, 1 }
 0x48e   :  { %5628 = vrot.lane.b32.xlu0 %v5627_v2, %s6041_s26  ;;  %11541 = vst [vmem:[#allocation34_spill] sm:$0xff] %v8386_v52  ;;  %v11544_v2 = vld [vmem:[#allocation68_spill] sm:$0xff]  ;;  %v5642_v1 = vpack.i.bf16 %v8389_v0, %v8386_v52  ;;  %v3264_v31 = vpack.c.bf16 %v3136_v38, %v3135_v11  ;;  %v5399_v11 = vpop.permute.xlu2 %5398  ;;  %v11549_v38 = vld [vmem:[#allocation25_spill] sm:$0xff] }
 0x48f   :  { %v2819_v42 = vsel %vm518_vm0, %v11544_v2, %v5110_v60  ;;  %v5652_v60 = vpack.i.bf16 %v11517_v9, %v8380_v16  ;;  %v8422_v2 = vpop.f32.mrf.mxu3  ;;  %v5400_v9 = vunpack.i.l.bf16 %v5399_v11 }
 0x490   :  { %v2881_v10 = vsel %vm2872_vm7, %v2819_v42, %v5265_v44  ;;  %v1307_v44 = vrot.slane %v11518_v25, 7  ;;  %11548 = vst [vmem:[#allocation32_spill] sm:$0xff] %v8422_v2  ;;  %v11552_v2 = vld [vmem:[#allocation39_spill] sm:$0xff] }
 0x491   :  { %4978 = vmatmul.msk.bf16.gmra.mxu3 %vm7165_vm5, %v4977_v51  ;;  %v2944_v41 = vsel %vm2934_vm8, %v2881_v10, %v5386_v5  ;;  %v5394_v51 = vpop.permute.xlu1 %5393  ;;  %v5390_v5 = vunpack.i.l.bf16 %v8395_v47  ;;  %v5667_v10 = vpack.i.bf16 %v8340_v39, %v11518_v25  ;;  %v3009_v53 = vsel %vm518_vm0, %v11552_v2, %v5371_v14  ;;  %v11554_v2 = vld [vmem:[#allocation74_spill] sm:$0xff] }
 0x492   :  { %v3263_v32 = vpack.c.bf16 %v2944_v41, %v2943_v55  ;;  %v8417_v37 = vsel %vm1251_vm6, %v1306_v6, %v1307_v44  ;;  %v5396_v42 = vunpack.i.h.bf16 %v5394_v51  ;;  %v5395_v23 = vunpack.i.l.bf16 %v5394_v51  ;;  %v5404_v41 = vpop.permute.xlu0 %5403 }
 0x493   :  { %11545 = vst [vmem:[#allocation119_spill] sm:$0xff] %v8417_v37  ;;  %v3010_v55 = vsel %vm518_vm0, %v11549_v38, %v5390_v5  ;;  %v5657_v6 = vpack.i.bf16 %v8285_v34, %v8227_v45  ;;  %v8436_v44 = vsel %vm1442_vm4, %v1503_v3, %v1504_v58  ;;  %v8439_v51 = vsel %vm1442_vm4, %v1504_v58, 0.0  ;;  %v11551_v5 = vld [vmem:[#allocation16_spill] sm:$0xff] }
 0x494   :  { %5653 = vrot.lane.b32.xlu2 %v5652_v60, %s6042_s27  ;;  %v5662_v60 = vpack.i.bf16 %v8306_v33, %v8417_v37  ;;  %v5270_v38 = vunpack.i.l.bf16 %v11551_v5  ;;  %v5406_v33 = vunpack.i.h.bf16 %v5404_v41  ;;  %v3073_v3 = vsel %vm2872_vm7, %v3009_v53, %v5395_v23 }
 0x495   :  { %5648 = vrot.lane.b32.xlu1 %v5647_v54, %s6042_s27  ;;  %3566 = vmatmul.bf16.gmra.mxu1 %v3263_v32  ;;  %v5111_v54 = vunpack.i.h.bf16 %v11534_v26  ;;  %v5266_v32 = vunpack.i.h.bf16 %v11535_v63  ;;  %v5405_v26 = vunpack.i.l.bf16 %v5404_v41  ;;  %v3074_v58 = vsel %vm2872_vm7, %v3010_v55, %v5396_v42  ;;  %v11555_v41 = vld [vmem:[#allocation73_spill] sm:$0xff] }
 0x496   :  { %5643 = vrot.lane.b32.xlu0 %v5642_v1, %s6041_s26  ;;  %3735 = vmatmul.bf16.gmra.mxu2 %v3264_v31  ;;  %v11550_v1 = vld [vmem:[#allocation8_spill] sm:$0xff]  ;;  %v5401_v39 = vunpack.i.h.bf16 %v5399_v11  ;;  %v4980_v25 = vpack.c.bf16 %v8439_v51, %v8436_v44  ;;  %v8455_v14 = vsel %vm1251_vm6, 0.0, %v1309_v18  ;;  %v3137_v23 = vsel %vm2934_vm8, %v3073_v3, %v5400_v9 }
 0x497   :  { %v5115_v31 = vunpack.i.l.bf16 %v11550_v1  ;;  %11553 = vst [vmem:[#allocation113_spill] sm:$0xff] %v8455_v14  ;;  %v8469_v20 = vpop.f32.mrf.mxu3 }
 0x498   :  { %v3138_v11 = vsel %vm2934_vm8, %v3074_v58, %v5401_v39  ;;  %11556 = vst [vmem:[#allocation38_spill] sm:$0xff] %v8469_v20  ;;  %v1310_v39 = vrot.slane %v11533_v30, 7  ;;  %v11558_v58 = vld [vmem:[#allocation31_spill] sm:$0xff] }
 0x499   :  { %v8450_v63 = vpop.permute.xlu1 %5408  ;;  %v3267_v9 = vpack.c.bf16 %v3138_v11, %v3137_v23  ;;  %v5692_v11 = vpack.i.bf16 %v8389_v0, %v11533_v30 }
 0x49c   :  { %5668 = vrot.lane.b32.xlu2 %v5667_v10, %s6042_s27  ;;  %v2820_v10 = vsel %vm518_vm0, %v11554_v2, %v5111_v54  ;;  %v5682_v54 = vpack.i.bf16 %v8355_v48, %v8288_v35  ;;  %v1506_v2 = vrot.slane %v11558_v58, 1 }
 0x49d   :  { %5663 = vrot.lane.b32.xlu1 %v5662_v60, %s6041_s26  ;;  %v2882_v53 = vsel %vm2872_vm7, %v2820_v10, %v5266_v32  ;;  %v5672_v32 = vpack.i.bf16 %v8455_v14, %v8337_v8  ;;  %v11559_v8 = vld [vmem:[#allocation60_spill] sm:$0xff] }
 0x49e   :  { %5658 = vrot.lane.b32.xlu0 %v5657_v6, %s6040_s25  ;;  %v2821_v6 = vsel %vm518_vm0, %v11555_v41, %v5115_v31  ;;  %v2945_v55 = vsel %vm2934_vm8, %v2882_v53, %v5405_v26  ;;  %v1312_v31 = vrot.slane %v11546_v27, 7  ;;  %v5419_v26 = vpop.permute.xlu0 %5418  ;;  %v1507_v10 = vrot.slane %v11559_v8, 1 }
 0x49f   :  { %v2883_v42 = vsel %vm2872_vm7, %v2821_v6, %v5270_v38  ;;  %v5414_v38 = vpop.permute.xlu2 %5413  ;;  %v8488_v41 = vsel %vm1251_vm6, %v1309_v18, %v1310_v39  ;;  %v5391_v6 = vunpack.i.h.bf16 %v8395_v47  ;;  %v5410_v53 = vunpack.i.l.bf16 %v8450_v63 }
 0x4a0   :  { %v2946_v60 = vsel %vm2934_vm8, %v2883_v42, %v5406_v33  ;;  %v8483_v3 = vsel %vm1251_vm6, 0.0, %v1312_v31  ;;  %11560 = vst [vmem:[#allocation69_spill] sm:$0xff] %v8488_v41  ;;  %v8502_v18 = vsel %vm1442_vm4, %v1507_v10, 0.0  ;;  %v1313_v47 = vrot.slane %v11547_v49, 7 }
 0x4a1   :  { %4981 = vmatmul.msk.bf16.gmra.mxu3 %vm7165_vm5, %v4980_v25  ;;  %v5677_v25 = vpack.i.bf16 %v11532_v4, %v8386_v52  ;;  %v3266_v33 = vpack.c.bf16 %v2946_v60, %v2945_v55  ;;  %11557 = vst [vmem:[#allocation37_spill] sm:$0xff] %v8483_v3  ;;  %v5424_v42 = vpop.permute.xlu1 %5423  ;;  %v5697_v23 = vpack.i.bf16 %v8483_v3, %v8227_v45  ;;  %v5271_v39 = vunpack.i.h.bf16 %v11551_v5 }
 0x4a2   :  { %v5687_v55 = vpack.i.bf16 %v8224_v57, %v8488_v41  ;;  %v8499_v60 = vsel %vm1442_vm4, %v1506_v2, %v1507_v10  ;;  %v11564_v57 = vld [vmem:[#allocation10_spill] sm:$0xff]  ;;  %v5421_v4 = vunpack.i.h.bf16 %v5419_v26  ;;  %v5420_v0 = vunpack.i.l.bf16 %v5419_v26  ;;  %v8513_v10 = vpop.f32.mrf.mxu3 }
 0x4a3   :  { %v3012_v2 = vsel %vm518_vm0, %v11564_v57, %v5410_v53  ;;  %11565 = vst [vmem:[#allocation68_spill] sm:$0xff] %v8513_v10  ;;  %v5415_v30 = vunpack.i.l.bf16 %v5414_v38  ;;  %v5426_v52 = vunpack.i.h.bf16 %v5424_v42  ;;  %v5425_v16 = vunpack.i.l.bf16 %v5424_v42  ;;  %v11568_v57 = vld [vmem:[#allocation83_spill] sm:$0xff] }
 0x4a4   :  { %5683 = vrot.lane.b32.xlu2 %v5682_v54, %s6040_s25  ;;  %v5116_v54 = vunpack.i.h.bf16 %v11550_v1  ;;  %v5416_v1 = vunpack.i.h.bf16 %v5414_v38  ;;  %v8523_v53 = vsel %vm1251_vm6, %v1312_v31, %v1313_v47 }
 0x4a5   :  { %5678 = vrot.lane.b32.xlu1 %v5677_v25, %s6042_s27  ;;  %3571 = vmatmul.bf16.gmra.mxu1 %v3266_v33  ;;  %v11561_v25 = vld [vmem:[#allocation72_spill] sm:$0xff]  ;;  %v11563_v33 = vld [vmem:[#allocation26_spill] sm:$0xff]  ;;  %11566 = vst [vmem:[#allocation25_spill] sm:$0xff] %v8523_v53 }
 0x4a6   :  { %5673 = vrot.lane.b32.xlu0 %v5672_v32, %s6041_s26  ;;  %3740 = vmatmul.bf16.gmra.mxu2 %v3267_v9  ;;  %v5120_v32 = vunpack.i.l.bf16 %v11561_v25  ;;  %v11562_v9 = vld [vmem:[#allocation15_spill] sm:$0xff]  ;;  %v3011_v20 = vsel %vm518_vm0, %v11563_v33, %v5391_v6  ;;  %v4983_v6 = vpack.c.bf16 %v8502_v18, %v8499_v60  ;;  %v5434_v26 = vpop.permute.xlu0 %5433  ;;  %v11567_v33 = vld [vmem:[#allocation84_spill] sm:$0xff]  ;;  %v3076_v42 = vsel %vm2872_vm7, %v3012_v2, %v5416_v1 }
 0x4a7   :  { %v5275_v45 = vunpack.i.l.bf16 %v11562_v9  ;;  %v8518_v5 = vpop.permute.xlu2 %5428  ;;  %v3075_v38 = vsel %vm2872_vm7, %v3011_v20, %v5415_v30  ;;  %v3140_v47 = vsel %vm2934_vm8, %v3076_v42, %v5421_v4  ;;  %v5712_v30 = vpack.i.bf16 %v8285_v34, %v8523_v53  ;;  %v11570_v34 = vld [vmem:[#allocation61_spill] sm:$0xff] }
 0x4a8   :  { %v3139_v31 = vsel %vm2934_vm8, %v3075_v38, %v5420_v0  ;;  %v5707_v20 = vpack.i.bf16 %v8436_v44, %v8358_v7  ;;  %v11571_v0 = vld [vmem:[#allocation56_spill] sm:$0xff]  ;;  %v5435_v38 = vunpack.i.l.bf16 %v5434_v26 }
 0x4a9   :  { %v3270_v2 = vpack.c.bf16 %v3140_v47, %v3139_v31  ;;  %v5717_v31 = vpack.i.bf16 %v8455_v14, %v11547_v49 }
 0x4ac   :  { %5698 = vrot.lane.b32.xlu2 %v5697_v23, %s6041_s26  ;;  %v2822_v23 = vsel %vm518_vm0, %v11567_v33, %v5116_v54 }
 0x4ad   :  { %5693 = vrot.lane.b32.xlu1 %v5692_v11, %s6042_s27  ;;  %v2823_v11 = vsel %vm518_vm0, %v11568_v57, %v5120_v32  ;;  %v5439_v32 = vpop.permute.xlu1 %5438  ;;  %v5411_v57 = vunpack.i.h.bf16 %v8450_v63  ;;  %v1316_v63 = vrot.slane %v11559_v8, 7 }
 0x4ae   :  { %5688 = vrot.lane.b32.xlu0 %v5687_v55, %s6041_s26  ;;  %v2884_v55 = vsel %vm2872_vm7, %v2822_v23, %v5271_v39  ;;  %v2885_v10 = vsel %vm2872_vm7, %v2823_v11, %v5275_v45  ;;  %v5702_v39 = vpack.i.bf16 %v11546_v27, %v8417_v37  ;;  %v1315_v45 = vrot.slane %v11558_v58, 7  ;;  %v8558_v42 = vpop.permute.xlu0 %5448  ;;  %v11591_v37 = vld [vmem:[#allocation94_spill] sm:$0xff] }
 0x4af   :  { %v2947_v54 = vsel %vm2934_vm8, %v2884_v55, %v5425_v16  ;;  %v2948_v33 = vsel %vm2934_vm8, %v2885_v10, %v5426_v52  ;;  %v8549_v16 = vpop.f32.mrf.mxu3  ;;  %v1509_v52 = vrot.slane %v11570_v34, 1  ;;  %v1510_v10 = vrot.slane %v11571_v0, 1  ;;  %v5444_v23 = vpop.permute.xlu2 %5443 }
 0x4b0   :  { %v3269_v4 = vpack.c.bf16 %v2948_v33, %v2947_v54  ;;  %11569 = vst [vmem:[#allocation8_spill] sm:$0xff] %v8549_v16  ;;  %v8554_v1 = vsel %vm1251_vm6, 0.0, %v1315_v45  ;;  %v5436_v11 = vunpack.i.h.bf16 %v5434_v26  ;;  %v5727_v55 = vpack.i.bf16 %v11558_v58, %v8488_v41  ;;  %v11573_v26 = vld [vmem:[#allocation71_spill] sm:$0xff]  ;;  %v11575_v16 = vld [vmem:[#allocation24_spill] sm:$0xff] }
 0x4b1   :  { %4984 = vmatmul.msk.bf16.gmra.mxu3 %vm7165_vm5, %v4983_v6  ;;  %11572 = vst [vmem:[#allocation16_spill] sm:$0xff] %v8554_v1  ;;  %v5430_v6 = vunpack.i.l.bf16 %v8518_v5  ;;  %v5722_v47 = vpack.i.bf16 %v8554_v1, %v8288_v35  ;;  %v8567_v54 = vsel %vm1442_vm4, %v1509_v52, %v1510_v10  ;;  %v8570_v33 = vsel %vm1442_vm4, %v1510_v10, 0.0  ;;  %v11576_v35 = vld [vmem:[#allocation23_spill] sm:$0xff] }
 0x4b2   :  { %v3013_v52 = vsel %vm518_vm0, %v11576_v35, %v5411_v57  ;;  %v5441_v14 = vunpack.i.h.bf16 %v5439_v32  ;;  %v5440_v27 = vunpack.i.l.bf16 %v5439_v32  ;;  %v5446_v41 = vunpack.i.h.bf16 %v5444_v23  ;;  %v11578_v32 = vld [vmem:[#allocation89_spill] sm:$0xff] }
 0x4b3   :  { %v3014_v58 = vsel %vm518_vm0, %v11575_v16, %v5430_v6  ;;  %v4986_v16 = vpack.c.bf16 %v8570_v33, %v8567_v54  ;;  %v8591_v6 = vsel %vm1251_vm6, %v1315_v45, %v1316_v63 }
 0x4b4   :  { %5713 = vrot.lane.b32.xlu2 %v5712_v30, %s6041_s26  ;;  %v5125_v30 = vunpack.i.l.bf16 %v11573_v26  ;;  %v3078_v49 = vsel %vm2872_vm7, %v3014_v58, %v5436_v11  ;;  %11577 = vst [vmem:[#allocation39_spill] sm:$0xff] %v8591_v6 }
 0x4b5   :  { %5708 = vrot.lane.b32.xlu1 %v5707_v20, %s6040_s25  ;;  %3576 = vmatmul.bf16.gmra.mxu1 %v3269_v4  ;;  %v5121_v20 = vunpack.i.h.bf16 %v11561_v25  ;;  %v5276_v4 = vunpack.i.h.bf16 %v11562_v9  ;;  %v8581_v10 = vpop.permute.xlu1 %5453  ;;  %v5445_v25 = vunpack.i.l.bf16 %v5444_v23  ;;  %v3077_v9 = vsel %vm2872_vm7, %v3013_v52, %v5435_v38 }
 0x4b6   :  { %5703 = vrot.lane.b32.xlu0 %v5702_v39, %s6042_s27  ;;  %3745 = vmatmul.bf16.gmra.mxu2 %v3270_v2  ;;  %v11574_v39 = vld [vmem:[#allocation48_spill] sm:$0xff]  ;;  %v3141_v11 = vsel %vm2934_vm8, %v3077_v9, %v5440_v27  ;;  %v3142_v45 = vsel %vm2934_vm8, %v3078_v49, %v5441_v14  ;;  %v5464_v52 = vpop.permute.xlu0 %5463  ;;  %v1318_v27 = vrot.slane %v11570_v34, 7  ;;  %v5450_v14 = vunpack.i.l.bf16 %v8558_v42 }
 0x4b7   :  { %v5280_v2 = vunpack.i.l.bf16 %v11574_v39  ;;  %v2824_v57 = vsel %vm518_vm0, %v11578_v32, %v5121_v20  ;;  %v8597_v35 = vpop.f32.mrf.mxu3  ;;  %v5459_v63 = vpop.permute.xlu2 %5458  ;;  %v5737_v20 = vpack.i.bf16 %v8355_v48, %v8591_v6 }
 0x4b8   :  { %11580 = vst [vmem:[#allocation74_spill] sm:$0xff] %v8597_v35  ;;  %v2886_v23 = vsel %vm2872_vm7, %v2824_v57, %v5276_v4  ;;  %v5732_v4 = vpack.i.bf16 %v8499_v60, %v8439_v51  ;;  %v8621_v48 = vsel %vm1251_vm6, 0.0, %v1318_v27  ;;  %v5431_v57 = vunpack.i.h.bf16 %v8518_v5  ;;  %v11588_v35 = vld [vmem:[#allocation11_spill] sm:$0xff] }
 0x4b9   :  { %v2949_v38 = vsel %vm2934_vm8, %v2886_v23, %v5445_v25  ;;  %11581 = vst [vmem:[#allocation73_spill] sm:$0xff] %v8621_v48  ;;  %v11582_v25 = vld [vmem:[#allocation57_spill] sm:$0xff]  ;;  %v5757_v23 = vpack.i.bf16 %v8567_v54, %v8502_v18 }
 0x4ba   :  { %v1512_v9 = vrot.slane %v11582_v25, 1  ;;  %v1321_v5 = vrot.slane %v11582_v25, 7 }
 0x4bc   :  { %5728 = vrot.lane.b32.xlu2 %v5727_v55, %s6042_s27  ;;  %v11579_v55 = vld [vmem:[#allocation88_spill] sm:$0xff] }
 0x4bd   :  { %5723 = vrot.lane.b32.xlu1 %v5722_v47, %s6041_s26  ;;  %v2825_v47 = vsel %vm518_vm0, %v11579_v55, %v5125_v30  ;;  %v5742_v30 = vpack.i.bf16 %v8483_v3, %v11559_v8  ;;  %v5456_v55 = vunpack.i.h.bf16 %v8581_v10  ;;  %v5465_v3 = vunpack.i.l.bf16 %v5464_v52 }
 0x4be   :  { %5718 = vrot.lane.b32.xlu0 %v5717_v31, %s6042_s27  ;;  %v2887_v58 = vsel %vm2872_vm7, %v2825_v47, %v5280_v2  ;;  %v3273_v2 = vpack.c.bf16 %v3142_v45, %v3141_v11  ;;  %v5455_v47 = vunpack.i.l.bf16 %v8581_v10  ;;  %v11584_v11 = vld [vmem:[#allocation43_spill] sm:$0xff]  ;;  %v5460_v8 = vunpack.i.l.bf16 %v5459_v63 }
 0x4bf   :  { %v2950_v31 = vsel %vm2934_vm8, %v2887_v58, %v5446_v41  ;;  %v8618_v41 = vpop.permute.xlu1 %5473  ;;  %v5752_v58 = vpack.i.bf16 %v11570_v34, %v8523_v53  ;;  %v3016_v45 = vsel %vm518_vm0, %v11584_v11, %v5450_v14  ;;  %v5281_v14 = vunpack.i.h.bf16 %v11574_v39  ;;  %v11587_v11 = vld [vmem:[#allocation118_spill] sm:$0xff]  ;;  %v8652_v34 = vpop.permute.xlu2 %5478 }
 0x4c0   :  { %v3272_v49 = vpack.c.bf16 %v2950_v31, %v2949_v38  ;;  %v8634_v38 = vpop.f32.mrf.mxu3  ;;  %v5747_v31 = vpack.i.bf16 %v8621_v48, %v8358_v7  ;;  %v3015_v7 = vsel %vm518_vm0, %v11588_v35, %v5431_v57  ;;  %v3080_v39 = vsel %vm2872_vm7, %v3016_v45, %v5456_v55 }
 0x4c1   :  { %4987 = vmatmul.msk.bf16.gmra.mxu3 %vm7165_vm5, %v4986_v16  ;;  %v11583_v16 = vld [vmem:[#allocation58_spill] sm:$0xff]  ;;  %11585 = vst [vmem:[#allocation72_spill] sm:$0xff] %v8634_v38  ;;  %v5285_v38 = vunpack.i.l.bf16 %v11587_v11  ;;  %v5461_v53 = vunpack.i.h.bf16 %v5459_v63  ;;  %v8664_v57 = vsel %vm1251_vm6, 0.0, %v1321_v5 }
 0x4c2   :  { %v1513_v32 = vrot.slane %v11583_v16, 1  ;;  %11589 = vst [vmem:[#allocation15_spill] sm:$0xff] %v8664_v57 }
 0x4c4   :  { %5743 = vrot.lane.b32.xlu2 %v5742_v30, %s6042_s27  ;;  %v1319_v30 = vrot.slane %v11571_v0, 7 }
 0x4c5   :  { %5738 = vrot.lane.b32.xlu1 %v5737_v20, %s6041_s26  ;;  %3581 = vmatmul.bf16.gmra.mxu1 %v3272_v49  ;;  %v11586_v20 = vld [vmem:[#allocation27_spill] sm:$0xff]  ;;  %v8646_v49 = vsel %vm1442_vm4, %v1513_v32, 0.0 }
 0x4c6   :  { %5733 = vrot.lane.b32.xlu0 %v5732_v4, %s6040_s25  ;;  %3750 = vmatmul.bf16.gmra.mxu2 %v3273_v2  ;;  %v5130_v10 = vunpack.i.l.bf16 %v11586_v20  ;;  %v5126_v4 = vunpack.i.h.bf16 %v11573_v26  ;;  %v8643_v2 = vsel %vm1442_vm4, %v1512_v9, %v1513_v32  ;;  %v5466_v26 = vunpack.i.h.bf16 %v5464_v52  ;;  %v8656_v9 = vpop.permute.xlu0 %5468  ;;  %v11590_v52 = vld [vmem:[#allocation95_spill] sm:$0xff] }
 0x4c7   :  { %v3079_v32 = vsel %vm2872_vm7, %v3015_v7, %v5455_v47  ;;  %v4989_v35 = vpack.c.bf16 %v8646_v49, %v8643_v2  ;;  %v8673_v47 = vpop.permute.xlu1 %5483 }
 0x4c8   :  { %v3143_v45 = vsel %vm2934_vm8, %v3079_v32, %v5460_v8  ;;  %v8690_v8 = vpop.f32.mrf.mxu3 }
 0x4c9   :  { %11592 = vst [vmem:[#allocation26_spill] sm:$0xff] %v8690_v8 }
 0x4cc   :  { %5758 = vrot.lane.b32.xlu2 %v5757_v23, %s6040_s25  ;;  %v8667_v23 = vsel %vm1251_vm6, %v1318_v27, %v1319_v30  ;;  %v3144_v27 = vsel %vm2934_vm8, %v3080_v39, %v5461_v53  ;;  %v11595_v39 = vld [vmem:[#allocation66_spill] sm:$0xff] }
 0x4cd   :  { %5753 = vrot.lane.b32.xlu1 %v5752_v58, %s6042_s27  ;;  %v2826_v58 = vsel %vm518_vm0, %v11590_v52, %v5126_v4  ;;  %v1516_v52 = vrot.slane %v11595_v39, 1 }
 0x4ce   :  { %5748 = vrot.lane.b32.xlu0 %v5747_v31, %s6041_s26  ;;  %v2827_v31 = vsel %vm518_vm0, %v11591_v37, %v5130_v10  ;;  %v2888_v63 = vsel %vm2872_vm7, %v2826_v58, %v5281_v14  ;;  %v5772_v37 = vpack.i.bf16 %v8664_v57, %v8439_v51  ;;  %v5767_v10 = vpack.i.bf16 %v8554_v1, %v11571_v0  ;;  %v5489_v51 = vpop.permute.xlu2 %5488  ;;  %v8695_v53 = vpop.permute.xlu0 %5498 }
 0x4cf   :  { %v2889_v55 = vsel %vm2872_vm7, %v2827_v31, %v5285_v38  ;;  %v2951_v30 = vsel %vm2934_vm8, %v2888_v63, %v5465_v3  ;;  %v5762_v14 = vpack.i.bf16 %v8436_v44, %v8667_v23  ;;  %v1322_v38 = vrot.slane %v11583_v16, 7  ;;  %v11594_v44 = vld [vmem:[#allocation59_spill] sm:$0xff] }
 0x4d0   :  { %v2952_v4 = vsel %vm2934_vm8, %v2889_v55, %v5466_v26  ;;  %v1515_v32 = vrot.slane %v11594_v44, 1  ;;  %v5451_v58 = vunpack.i.h.bf16 %v8558_v42  ;;  %v5475_v31 = vunpack.i.l.bf16 %v8618_v41  ;;  %v11596_v55 = vld [vmem:[#allocation78_spill] sm:$0xff] }
 0x4d1   :  { %4990 = vmatmul.msk.bf16.gmra.mxu3 %vm7165_vm5, %v4989_v35  ;;  %v3276_v35 = vpack.c.bf16 %v3144_v27, %v3143_v45  ;;  %v3275_v3 = vpack.c.bf16 %v2952_v4, %v2951_v30  ;;  %v8698_v26 = vsel %vm1251_vm6, %v1321_v5, %v1322_v38  ;;  %v5135_v45 = vunpack.i.l.bf16 %v11596_v55  ;;  %v8708_v4 = vpop.permute.xlu1 %5503 }
 0x4d2   :  { %v3547_v7 = vpop.f32.mrf.mxu1  ;;  %11593 = vst [vmem:[#allocation10_spill] sm:$0xff] %v8698_v26  ;;  %v5782_v27 = vpack.i.bf16 %v8643_v2, %v8570_v33  ;;  %v5485_v30 = vunpack.i.l.bf16 %v8673_v47  ;;  %v8721_v38 = vsel %vm1442_vm4, %v1516_v52, 0.0  ;;  %v5490_v1 = vunpack.i.l.bf16 %v5489_v51 }
 0x4d4   :  { %5773 = vrot.lane.b32.xlu2 %v5772_v37, %s6041_s26  ;;  %v5787_v37 = vpack.i.bf16 %v8499_v60, %v8698_v26  ;;  %v5471_v60 = vunpack.i.h.bf16 %v8656_v9 }
 0x4d5   :  { %5768 = vrot.lane.b32.xlu1 %v5767_v10, %s6042_s27  ;;  %3586 = vmatmul.bf16.gmra.mxu1 %v3275_v3  ;;  %v1324_v10 = vrot.slane %v11594_v44, 7  ;;  %v11598_v3 = vld [vmem:[#allocation44_spill] sm:$0xff] }
 0x4d6   :  { %5763 = vrot.lane.b32.xlu0 %v5762_v14, %s6041_s26  ;;  %3755 = vmatmul.bf16.gmra.mxu2 %v3276_v35  ;;  %v5777_v14 = vpack.i.bf16 %v11582_v25, %v8591_v6  ;;  %v8718_v35 = vsel %vm1442_vm4, %v1515_v32, %v1516_v52  ;;  %v3017_v8 = vsel %vm518_vm0, %v11598_v3, %v5451_v58  ;;  %v5131_v32 = vunpack.i.h.bf16 %v11586_v20  ;;  %v11600_v58 = vld [vmem:[#allocation104_spill] sm:$0xff]  ;;  %v8748_v6 = vpop.permute.xlu2 %5493 }
 0x4d7   :  { %v5481_v25 = vunpack.i.h.bf16 %v8652_v34  ;;  %v5480_v52 = vunpack.i.l.bf16 %v8652_v34  ;;  %v2829_v3 = vsel %vm518_vm0, %v11600_v58, %v5135_v45 }
 0x4d8   :  { %v2891_v20 = vsel %vm2872_vm7, %v2829_v3, %v5485_v30  ;;  %v11604_v30 = vld [vmem:[#allocation105_spill] sm:$0xff] }
 0x4d9   :  { %v3716_v63 = vpop.f32.mrf.mxu2  ;;  %v3081_v34 = vsel %vm2872_vm7, %v3017_v8, %v5480_v52 }
 0x4da   :  { %v8710_v5 = vadd.f32 %v3716_v63, %v3547_v7  ;;  %v3549_v42 = vpop.f32.mrf.mxu1  ;;  %v11599_v7 = vld [vmem:[#allocation12_spill] sm:$0xff] }
 0x4db   :  { %v3018_v63 = vsel %vm518_vm0, %v11599_v7, %v5475_v31  ;;  %v5286_v31 = vunpack.i.h.bf16 %v11587_v11  ;;  %v8738_v7 = vpop.f32.mrf.mxu3 }
 0x4dc   :  { %11597 = vst [vmem:[#allocation84_spill] sm:$0xff] %v8710_v5  ;;  %v5470_v5 = vunpack.i.l.bf16 %v8656_v9  ;;  %5788 = vrot.lane.b32.xlu2 %v5787_v37, %s6041_s26  ;;  %v4992_v9 = vpack.c.bf16 %v8721_v38, %v8718_v35  ;;  %v5491_v37 = vunpack.i.h.bf16 %v5489_v51  ;;  %v2828_v51 = vsel %vm518_vm0, %v11604_v30, %v5131_v32  ;;  %v5514_v32 = vpop.permute.xlu1 %5513  ;;  %v11608_v30 = vld [vmem:[#allocation77_spill] sm:$0xff] }
 0x4dd   :  { %5783 = vrot.lane.b32.xlu1 %v5782_v27, %s6040_s25  ;;  %11601 = vst [vmem:[#allocation83_spill] sm:$0xff] %v8738_v7  ;;  %v8743_v27 = vsel %vm1251_vm6, 0.0, %v1324_v10  ;;  %v8754_v7 = vpop.permute.xlu0 %5508  ;;  %v2890_v52 = vsel %vm2872_vm7, %v2828_v51, %v5286_v31  ;;  %v5140_v51 = vunpack.i.l.bf16 %v11608_v30 }
 0x4de   :  { %5778 = vrot.lane.b32.xlu0 %v5777_v14, %s6042_s27  ;;  %11602 = vst [vmem:[#allocation71_spill] sm:$0xff] %v8743_v27  ;;  %v3082_v14 = vsel %vm2872_vm7, %v3018_v63, %v5481_v25  ;;  %v3145_v11 = vsel %vm2934_vm8, %v3081_v34, %v5470_v5  ;;  %v2954_v8 = vsel %vm2934_vm8, %v2891_v20, %v5491_v37  ;;  %v11605_v37 = vld [vmem:[#allocation67_spill] sm:$0xff]  ;;  %v11606_v34 = vld [vmem:[#allocation62_spill] sm:$0xff] }
 0x4df   :  { %v3146_v58 = vsel %vm2934_vm8, %v3082_v14, %v5471_v60  ;;  %v5802_v25 = vpack.i.bf16 %v11594_v44, %v8667_v23  ;;  %v5797_v63 = vpack.i.bf16 %v8743_v27, %v8502_v18  ;;  %v5792_v60 = vpack.i.bf16 %v8621_v48, %v11583_v16 }
 0x4e0   :  { %v3279_v3 = vpack.c.bf16 %v3146_v58, %v3145_v11  ;;  %v5500_v18 = vunpack.i.l.bf16 %v8695_v53  ;;  %v1519_v14 = vrot.slane %v11606_v34, 1  ;;  %v5817_v58 = vpack.i.bf16 %v8664_v57, %v11595_v39  ;;  %v11612_v57 = vld [vmem:[#allocation42_spill] sm:$0xff] }
 0x4e1   :  { %v3718_v45 = vpop.f32.mrf.mxu2  ;;  %4993 = vmatmul.msk.bf16.gmra.mxu3 %vm7165_vm5, %v4992_v9  ;;  %v1325_v9 = vrot.slane %v11595_v39, 7 }
 0x4e2   :  { %v8756_v0 = vadd.f32 %v3718_v45, %v3549_v42  ;;  %v3552_v5 = vpop.f32.mrf.mxu1  ;;  %v2953_v42 = vsel %vm2934_vm8, %v2890_v52, %v5490_v1  ;;  %v1518_v1 = vrot.slane %v11605_v37, 1  ;;  %v5476_v52 = vunpack.i.h.bf16 %v8618_v41 }
 0x4e3   :  { %v3278_v20 = vpack.c.bf16 %v2954_v8, %v2953_v42  ;;  %v8775_v31 = vsel %vm1251_vm6, %v1324_v10, %v1325_v9  ;;  %v8779_v45 = vpop.f32.mrf.mxu3  ;;  %v5505_v8 = vunpack.i.l.bf16 %v8708_v4  ;;  %v5807_v10 = vpack.i.bf16 %v8718_v35, %v8646_v49 }
 0x4e4   :  { %11603 = vst [vmem:[#allocation48_spill] sm:$0xff] %v8756_v0  ;;  %5803 = vrot.lane.b32.xlu2 %v5802_v25, %s6042_s27  ;;  %v5812_v9 = vpack.i.bf16 %v8567_v54, %v8775_v31  ;;  %v8805_v41 = vsel %vm1442_vm4, %v1519_v14, 0.0  ;;  %v5516_v54 = vunpack.i.h.bf16 %v5514_v32  ;;  %v3019_v44 = vsel %vm518_vm0, %v11612_v57, %v5476_v52  ;;  %v8818_v39 = vpop.permute.xlu1 %5518 }
 0x4e5   :  { %5798 = vrot.lane.b32.xlu1 %v5797_v63, %s6041_s26  ;;  %3591 = vmatmul.bf16.gmra.mxu1 %v3278_v20  ;;  %11607 = vst [vmem:[#allocation24_spill] sm:$0xff] %v8779_v45  ;;  %v8789_v63 = vpop.permute.xlu2 %5523  ;;  %v5136_v20 = vunpack.i.h.bf16 %v11596_v55  ;;  %v5515_v55 = vunpack.i.l.bf16 %v5514_v32  ;;  %v11613_v32 = vld [vmem:[#allocation110_spill] sm:$0xff] }
 0x4e6   :  { %5793 = vrot.lane.b32.xlu0 %v5792_v60, %s6042_s27  ;;  %3760 = vmatmul.bf16.gmra.mxu2 %v3279_v3  ;;  %v11610_v60 = vld [vmem:[#allocation40_spill] sm:$0xff]  ;;  %v5510_v3 = vunpack.i.l.bf16 %v8754_v7 }
 0x4e7   :  { %v3020_v42 = vsel %vm518_vm0, %v11610_v60, %v5500_v18  ;;  %v1327_v18 = vrot.slane %v11605_v37, 7  ;;  %v5506_v60 = vunpack.i.h.bf16 %v8708_v4 }
 0x4e9   :  { %v3721_v11 = vpop.f32.mrf.mxu2 }
 0x4ea   :  { %v8785_v25 = vadd.f32 %v3721_v11, %v3552_v5  ;;  %v5486_v5 = vunpack.i.h.bf16 %v8673_v47  ;;  %v8799_v11 = vpop.permute.xlu0 %5528  ;;  %v3554_v45 = vpop.f32.mrf.mxu1  ;;  %v11611_v47 = vld [vmem:[#allocation109_spill] sm:$0xff] }
 0x4eb   :  { %v2831_v0 = vsel %vm518_vm0, %v11611_v47, %v5140_v51  ;;  %v8827_v51 = vsel %vm1251_vm6, 0.0, %v1327_v18  ;;  %v11615_v47 = vld [vmem:[#allocation63_spill] sm:$0xff] }
 0x4ec   :  { %11609 = vst [vmem:[#allocation23_spill] sm:$0xff] %v8785_v25  ;;  %v8802_v25 = vsel %vm1442_vm4, %v1518_v1, %v1519_v14  ;;  %5818 = vrot.lane.b32.xlu2 %v5817_v58, %s6042_s27  ;;  %v3084_v1 = vsel %vm2872_vm7, %v3020_v42, %v5505_v8  ;;  %v5496_v14 = vunpack.i.h.bf16 %v8748_v6  ;;  %v2893_v58 = vsel %vm2872_vm7, %v2831_v0, %v5510_v3 }
 0x4ed   :  { %5813 = vrot.lane.b32.xlu1 %v5812_v9, %s6041_s26  ;;  %v4995_v4 = vpack.c.bf16 %v8805_v41, %v8802_v25  ;;  %v3083_v9 = vsel %vm2872_vm7, %v3019_v44, %v5486_v5  ;;  %11614 = vst [vmem:[#allocation89_spill] sm:$0xff] %v8827_v51  ;;  %v5495_v8 = vunpack.i.l.bf16 %v8748_v6  ;;  %v1330_v0 = vrot.slane %v11615_v47, 7 }
 0x4ee   :  { %5808 = vrot.lane.b32.xlu0 %v5807_v10, %s6040_s25  ;;  %v2830_v10 = vsel %vm518_vm0, %v11613_v32, %v5136_v20  ;;  %v3148_v52 = vsel %vm2934_vm8, %v3084_v1, %v5496_v14  ;;  %v2956_v44 = vsel %vm2934_vm8, %v2893_v58, %v5516_v54  ;;  %v1328_v5 = vrot.slane %v11606_v34, 7  ;;  %v8840_v32 = vpop.f32.mrf.mxu3 }
 0x4ef   :  { %v2892_v57 = vsel %vm2872_vm7, %v2830_v10, %v5506_v60  ;;  %11617 = vst [vmem:[#allocation58_spill] sm:$0xff] %v8840_v32  ;;  %v5832_v6 = vpack.i.bf16 %v8802_v25, %v8721_v38  ;;  %v5827_v60 = vpack.i.bf16 %v11605_v37, %v8698_v26  ;;  %v3147_v1 = vsel %vm2934_vm8, %v3083_v9, %v5495_v8  ;;  %v11618_v8 = vld [vmem:[#allocation64_spill] sm:$0xff]  ;;  %v11620_v32 = vld [vmem:[#allocation35_spill] sm:$0xff] }
 0x4f0   :  { %v2955_v20 = vsel %vm2934_vm8, %v2892_v57, %v5515_v55  ;;  %v8849_v55 = vpop.permute.xlu2 %5533  ;;  %v8855_v10 = vsel %vm1251_vm6, %v1327_v18, %v1328_v5  ;;  %v8858_v9 = vsel %vm1251_vm6, 0.0, %v1330_v0  ;;  %v5525_v57 = vunpack.i.l.bf16 %v8789_v63  ;;  %v11625_v26 = vld [vmem:[#allocation111_spill] sm:$0xff] }
 0x4f1   :  { %v3723_v42 = vpop.f32.mrf.mxu2  ;;  %4996 = vmatmul.msk.bf16.gmra.mxu3 %vm7165_vm5, %v4995_v4  ;;  %v3282_v4 = vpack.c.bf16 %v3148_v52, %v3147_v1  ;;  %v3281_v54 = vpack.c.bf16 %v2956_v44, %v2955_v20  ;;  %v1331_v52 = vrot.slane %v11618_v8, 7  ;;  %v8864_v20 = vpop.permute.xlu1 %5548  ;;  %v5847_v18 = vpack.i.bf16 %v8858_v9, %v8646_v49 }
 0x4f2   :  { %v8835_v3 = vadd.f32 %v3723_v42, %v3554_v45  ;;  %v3557_v14 = vpop.f32.mrf.mxu1  ;;  %v5822_v45 = vpack.i.bf16 %v8827_v51, %v8570_v33  ;;  %v5539_v58 = vpop.permute.xlu0 %5538  ;;  %v1521_v33 = vrot.slane %v11615_v47, 1  ;;  %v1522_v42 = vrot.slane %v11618_v8, 1 }
 0x4f3   :  { %v5837_v5 = vpack.i.bf16 %v8643_v2, %v8855_v10  ;;  %v5501_v1 = vunpack.i.h.bf16 %v8695_v53  ;;  %v5511_v2 = vunpack.i.h.bf16 %v8754_v7  ;;  %v5535_v53 = vunpack.i.l.bf16 %v8849_v55 }
 0x4f4   :  { %11616 = vst [vmem:[#allocation88_spill] sm:$0xff] %v8835_v3  ;;  %5833 = vrot.lane.b32.xlu2 %v5832_v6, %s6040_s25  ;;  %v5530_v6 = vunpack.i.l.bf16 %v8799_v11  ;;  %v5531_v37 = vunpack.i.h.bf16 %v8799_v11 }
 0x4f5   :  { %5828 = vrot.lane.b32.xlu1 %v5827_v60, %s6042_s27  ;;  %3596 = vmatmul.bf16.gmra.mxu1 %v3281_v54  ;;  %v8880_v54 = vsel %vm1442_vm4, %v1522_v42, 0.0 }
 0x4f6   :  { %5823 = vrot.lane.b32.xlu0 %v5822_v45, %s6041_s26  ;;  %3765 = vmatmul.bf16.gmra.mxu2 %v3282_v4  ;;  %v5842_v45 = vpack.i.bf16 %v8743_v27, %v11606_v34  ;;  %v8877_v4 = vsel %vm1442_vm4, %v1521_v33, %v1522_v42  ;;  %v5521_v33 = vunpack.i.h.bf16 %v8818_v39  ;;  %v5520_v27 = vunpack.i.l.bf16 %v8818_v39  ;;  %v8891_v42 = vpop.f32.mrf.mxu3 }
 0x4f7   :  { %11622 = vst [vmem:[#allocation27_spill] sm:$0xff] %v8891_v42  ;;  %v5540_v34 = vunpack.i.l.bf16 %v5539_v58  ;;  %v4998_v39 = vpack.c.bf16 %v8880_v54, %v8877_v4  ;;  %v8904_v42 = vsel %vm1251_vm6, %v1330_v0, %v1331_v52 }
 0x4f9   :  { %v3726_v44 = vpop.f32.mrf.mxu2 }
 0x4fa   :  { %v8867_v60 = vadd.f32 %v3726_v44, %v3557_v14  ;;  %v5145_v14 = vunpack.i.l.bf16 %v11620_v32  ;;  %v5141_v44 = vunpack.i.h.bf16 %v11608_v30  ;;  %v3559_v3 = vpop.f32.mrf.mxu1  ;;  %v5541_v30 = vunpack.i.h.bf16 %v5539_v58 }
 0x4fc   :  { %11619 = vst [vmem:[#allocation43_spill] sm:$0xff] %v8867_v60  ;;  %v11621_v60 = vld [vmem:[#allocation49_spill] sm:$0xff]  ;;  %5848 = vrot.lane.b32.xlu2 %v5847_v18, %s6041_s26  ;;  %v8906_v18 = vpop.permute.xlu0 %5543 }
 0x4fd   :  { %v3022_v49 = vsel %vm518_vm0, %v11621_v60, %v5525_v57  ;;  %5843 = vrot.lane.b32.xlu1 %v5842_v45, %s6042_s27  ;;  %v8897_v57 = vpop.permute.xlu2 %5553  ;;  %v11623_v60 = vld [vmem:[#allocation41_spill] sm:$0xff]  ;;  %v11624_v45 = vld [vmem:[#allocation112_spill] sm:$0xff] }
 0x4fe   :  { %5838 = vrot.lane.b32.xlu0 %v5837_v5, %s6041_s26  ;;  %v3086_v7 = vsel %vm2872_vm7, %v3022_v49, %v5530_v6  ;;  %v3021_v11 = vsel %vm518_vm0, %v11623_v60, %v5501_v1  ;;  %v2832_v58 = vsel %vm518_vm0, %v11624_v45, %v5141_v44  ;;  %v2833_v5 = vsel %vm518_vm0, %v11625_v26, %v5145_v14  ;;  %v8923_v14 = vpop.permute.xlu1 %5558 }
 0x4ff   :  { %v3085_v6 = vsel %vm2872_vm7, %v3021_v11, %v5511_v2  ;;  %v2894_v1 = vsel %vm2872_vm7, %v2832_v58, %v5531_v37  ;;  %v2895_v60 = vsel %vm2872_vm7, %v2833_v5, %v5535_v53  ;;  %v3150_v52 = vsel %vm2934_vm8, %v3086_v7, %v5521_v33  ;;  %v11627_v11 = vld [vmem:[#allocation65_spill] sm:$0xff]  ;;  %v8935_v33 = vpop.f32.mrf.mxu3 }
 0x500   :  { %v3149_v0 = vsel %vm2934_vm8, %v3085_v6, %v5520_v27  ;;  %v2957_v44 = vsel %vm2934_vm8, %v2894_v1, %v5540_v34  ;;  %v2958_v26 = vsel %vm2934_vm8, %v2895_v60, %v5541_v30  ;;  %v5862_v2 = vpack.i.bf16 %v8718_v35, %v8904_v42  ;;  %11628 = vst [vmem:[#allocation11_spill] sm:$0xff] %v8935_v33  ;;  %v11629_v7 = vld [vmem:[#allocation17_spill] sm:$0xff] }
 0x501   :  { %v3728_v49 = vpop.f32.mrf.mxu2  ;;  %4999 = vmatmul.msk.bf16.gmra.mxu3 %vm7165_vm5, %v4998_v39  ;;  %v5857_v37 = vpack.i.bf16 %v8877_v4, %v8805_v41  ;;  %v1333_v53 = vrot.slane %v11627_v11, 7  ;;  %v5852_v27 = vpack.i.bf16 %v11615_v47, %v8775_v31  ;;  %v3284_v34 = vpack.c.bf16 %v2958_v26, %v2957_v44 }
 0x502   :  { %v8919_v48 = vadd.f32 %v3728_v49, %v3559_v3  ;;  %v3562_v39 = vpop.f32.mrf.mxu1  ;;  %v3285_v3 = vpack.c.bf16 %v3150_v52, %v3149_v0  ;;  %v1524_v30 = vrot.slane %v11627_v11, 1  ;;  %v1525_v45 = vrot.slane %v11629_v7, 1  ;;  %v11630_v49 = vld [vmem:[#allocation82_spill] sm:$0xff] }
 0x503   :  { %v8938_v35 = vsel %vm1251_vm6, 0.0, %v1333_v53  ;;  %v5550_v5 = vunpack.i.l.bf16 %v8864_v20  ;;  %v5150_v1 = vunpack.i.l.bf16 %v11630_v49  ;;  %v1334_v60 = vrot.slane %v11629_v7, 7 }
 0x504   :  { %11626 = vst [vmem:[#allocation118_spill] sm:$0xff] %v8919_v48  ;;  %5863 = vrot.lane.b32.xlu2 %v5862_v2, %s6041_s26  ;;  %v8945_v0 = vpop.permute.xlu0 %5573  ;;  %v5526_v44 = vunpack.i.h.bf16 %v8789_v63  ;;  %v5560_v26 = vunpack.i.l.bf16 %v8923_v14  ;;  %v5877_v2 = vpack.i.bf16 %v11627_v11, %v8855_v10  ;;  %v8959_v33 = vsel %vm1442_vm4, %v1524_v30, %v1525_v45  ;;  %v11632_v63 = vld [vmem:[#allocation45_spill] sm:$0xff] }
 0x505   :  { %5858 = vrot.lane.b32.xlu1 %v5857_v37, %s6040_s25  ;;  %3601 = vmatmul.bf16.gmra.mxu1 %v3284_v34  ;;  %v5564_v58 = vpop.permute.xlu2 %5563  ;;  %v5872_v37 = vpack.i.bf16 %v8938_v35, %v8721_v38  ;;  %v5867_v34 = vpack.i.bf16 %v8827_v51, %v11618_v8  ;;  %v5545_v48 = vunpack.i.l.bf16 %v8906_v18  ;;  %v8974_v30 = vsel %vm1251_vm6, %v1333_v53, %v1334_v60 }
 0x506   :  { %5853 = vrot.lane.b32.xlu0 %v5852_v27, %s6042_s27  ;;  %3770 = vmatmul.bf16.gmra.mxu2 %v3285_v3  ;;  %v5536_v27 = vunpack.i.h.bf16 %v8849_v55  ;;  %v8968_v38 = vpop.permute.xlu1 %5578  ;;  %v5146_v55 = vunpack.i.h.bf16 %v11620_v32  ;;  %v5556_v11 = vunpack.i.h.bf16 %v8897_v57  ;;  %v5566_v60 = vunpack.i.h.bf16 %v5564_v58 }
 0x507   :  { %v8988_v47 = vpop.f32.mrf.mxu3 }
 0x508   :  { %11634 = vst [vmem:[#allocation94_spill] sm:$0xff] %v8988_v47 }
 0x509   :  { %v3731_v6 = vpop.f32.mrf.mxu2 }
 0x50a   :  { %v8947_v52 = vadd.f32 %v3731_v6, %v3562_v39  ;;  %v3564_v3 = vpop.f32.mrf.mxu1  ;;  %v8962_v39 = vsel %vm1442_vm4, %v1525_v45, 0.0  ;;  %v3024_v6 = vsel %vm518_vm0, %v11632_v63, %v5550_v5  ;;  %v5555_v45 = vunpack.i.l.bf16 %v8897_v57  ;;  %v11633_v63 = vld [vmem:[#allocation50_spill] sm:$0xff] }
 0x50b   :  { %v2835_v5 = vsel %vm518_vm0, %v8053_v19, %v5150_v1  ;;  %v5001_v32 = vpack.c.bf16 %v8962_v39, %v8959_v33 }
 0x50c   :  { %11631 = vst [vmem:[#allocation95_spill] sm:$0xff] %v8947_v52  ;;  %v5546_v52 = vunpack.i.h.bf16 %v8906_v18  ;;  %5878 = vrot.lane.b32.xlu2 %v5877_v2, %s6042_s27  ;;  %v3023_v18 = vsel %vm518_vm0, %v11633_v63, %v5526_v44  ;;  %v2897_v2 = vsel %vm2872_vm7, %v2835_v5, %v5560_v26  ;;  %v3088_v51 = vsel %vm2872_vm7, %v3024_v6, %v5555_v45 }
 0x50d   :  { %5873 = vrot.lane.b32.xlu1 %v5872_v37, %s6041_s26  ;;  %v3087_v53 = vsel %vm2872_vm7, %v3023_v18, %v5536_v27  ;;  %v5565_v37 = vunpack.i.l.bf16 %v5564_v58  ;;  %v2834_v44 = vsel %vm518_vm0, %v8022_v36, %v5146_v55  ;;  %v2960_v27 = vsel %vm2934_vm8, %v2897_v2, %v5566_v60  ;;  %v11636_v55 = vld [vmem:[#allocation18_spill] sm:$0xff]  ;;  %v11638_v60 = vld [vmem:[#allocation20_spill] sm:$0xff] }
 0x50e   :  { %5868 = vrot.lane.b32.xlu0 %v5867_v34, %s6042_s27  ;;  %v3151_v1 = vsel %vm2934_vm8, %v3087_v53, %v5545_v48  ;;  %v3152_v57 = vsel %vm2934_vm8, %v3088_v51, %v5546_v52  ;;  %v2896_v58 = vsel %vm2872_vm7, %v2834_v44, %v5556_v11  ;;  %v9000_v34 = vpop.permute.xlu2 %5568  ;;  %v5892_v6 = vpack.i.bf16 %v8858_v9, %v11629_v7  ;;  %v9008_v51 = vpop.permute.xlu0 %5583  ;;  %v11637_v11 = vld [vmem:[#allocation19_spill] sm:$0xff] }
 0x50f   :  { %v5882_v45 = vpack.i.bf16 %v8959_v33, %v8880_v54  ;;  %v5887_v48 = vpack.i.bf16 %v8802_v25, %v8974_v30  ;;  %v2959_v52 = vsel %vm2934_vm8, %v2896_v58, %v5565_v37  ;;  %v1527_v5 = vrot.slane %v11636_v55, 1 }
 0x510   :  { %v1528_v63 = vrot.slane %v11637_v11, 1  ;;  %v1336_v18 = vrot.slane %v11636_v55, 7  ;;  %v3287_v2 = vpack.c.bf16 %v2960_v27, %v2959_v52  ;;  %v5575_v25 = vunpack.i.l.bf16 %v8945_v0 }
 0x511   :  { %v3733_v19 = vpop.f32.mrf.mxu2  ;;  %5002 = vmatmul.msk.bf16.gmra.mxu3 %vm7165_vm5, %v5001_v32  ;;  %v5589_v32 = vpop.permute.xlu1 %5588  ;;  %v5580_v27 = vunpack.i.l.bf16 %v8968_v38  ;;  %v5585_v52 = vunpack.i.l.bf16 %v9008_v51 }
 0x512   :  { %v8996_v26 = vadd.f32 %v3733_v19, %v3564_v3  ;;  %v3567_v36 = vpop.f32.mrf.mxu1  ;;  %v3288_v3 = vpack.c.bf16 %v3152_v57, %v3151_v1  ;;  %v9019_v53 = vsel %vm1442_vm4, %v1527_v5, %v1528_v63  ;;  %v9023_v19 = vsel %vm1251_vm6, 0.0, %v1336_v18  ;;  %v11639_v57 = vld [vmem:[#allocation80_spill] sm:$0xff] }
 0x513   :  { %v5155_v44 = vunpack.i.l.bf16 %v11639_v57  ;;  %v5907_v5 = vpack.i.bf16 %v9019_v53, %v8962_v39  ;;  %v5897_v37 = vpack.i.bf16 %v9023_v19, %v8805_v41  ;;  %v5591_v47 = vunpack.i.h.bf16 %v5589_v32 }
 0x514   :  { %11635 = vst [vmem:[#allocation78_spill] sm:$0xff] %v8996_v26  ;;  %5893 = vrot.lane.b32.xlu2 %v5892_v6, %s6042_s27  ;;  %v5902_v6 = vpack.i.bf16 %v11636_v55, %v8904_v42  ;;  %v5590_v41 = vunpack.i.l.bf16 %v5589_v32 }
 0x515   :  { %5888 = vrot.lane.b32.xlu1 %v5887_v48, %s6041_s26  ;;  %3606 = vmatmul.bf16.gmra.mxu1 %v3287_v2  ;;  %v3026_v48 = vsel %vm518_vm0, %v11493_v24, %v5575_v25  ;;  %v5151_v2 = vunpack.i.h.bf16 %v11630_v49  ;;  %v1337_v24 = vrot.slane %v11637_v11, 7 }
 0x516   :  { %5883 = vrot.lane.b32.xlu0 %v5882_v45, %s6040_s25  ;;  %3775 = vmatmul.bf16.gmra.mxu2 %v3288_v3  ;;  %v5551_v45 = vunpack.i.h.bf16 %v8864_v20  ;;  %v9035_v3 = vpop.f32.mrf.mxu3  ;;  %v9044_v20 = vsel %vm1442_vm4, %v1528_v63, 0.0  ;;  %v9047_v25 = vpop.permute.xlu2 %5598  ;;  %v3090_v49 = vsel %vm2872_vm7, %v3026_v48, %v5580_v27  ;;  %v5571_v63 = vunpack.i.h.bf16 %v9000_v34 }
 0x517   :  { %11641 = vst [vmem:[#allocation12_spill] sm:$0xff] %v9035_v3  ;;  %v5581_v3 = vunpack.i.h.bf16 %v8968_v38  ;;  %v11642_v27 = vrot.slane %v11638_v60, 7 }
 0x518   :  { %v3025_v38 = vsel %vm518_vm0, %v11492_v15, %v5551_v45  ;;  %v5570_v15 = vunpack.i.l.bf16 %v9000_v34  ;;  %v5917_v34 = vpack.i.bf16 %v8938_v35, %v11637_v11 }
 0x519   :  { %v3736_v1 = vpop.f32.mrf.mxu2  ;;  %v9077_v48 = vpop.permute.xlu1 %5593 }
 0x51a   :  { %v9027_v58 = vadd.f32 %v3736_v1, %v3567_v36  ;;  %v5561_v36 = vunpack.i.h.bf16 %v8923_v14  ;;  %v3569_v1 = vpop.f32.mrf.mxu1  ;;  %v2837_v14 = vsel %vm518_vm0, %v8118_v50, %v5155_v44  ;;  %v9067_v50 = vsel %vm1251_vm6, 0.0, %v11642_v27 }
 0x51b   :  { %v9073_v44 = vsel %vm1251_vm6, %v1336_v18, %v1337_v24  ;;  %v5922_v18 = vpack.i.bf16 %v9067_v50, %v8880_v54 }
 0x51c   :  { %11640 = vst [vmem:[#allocation44_spill] sm:$0xff] %v9027_v58  ;;  %5908 = vrot.lane.b32.xlu2 %v5907_v5, %s6040_s25  ;;  %v9055_v58 = vpop.permute.xlu0 %5603  ;;  %v2899_v5 = vsel %vm2872_vm7, %v2837_v14, %v5585_v52  ;;  %v3089_v32 = vsel %vm2872_vm7, %v3025_v38, %v5561_v36  ;;  %v3154_v14 = vsel %vm2934_vm8, %v3090_v49, %v5571_v63  ;;  %v1530_v63 = vrot.slane %v11638_v60, 1 }
 0x51d   :  { %5903 = vrot.lane.b32.xlu1 %v5902_v6, %s6042_s27  ;;  %v5004_v6 = vpack.c.bf16 %v9044_v20, %v9019_v53  ;;  %v5912_v49 = vpack.i.bf16 %v8877_v4, %v9073_v44  ;;  %v11646_v4 = vrot.slane %v11638_v60, 7 }
 0x51e   :  { %5898 = vrot.lane.b32.xlu0 %v5897_v37, %s6041_s26  ;;  %v2836_v37 = vsel %vm518_vm0, %v8084_v17, %v5151_v2  ;;  %v2962_v17 = vsel %vm2934_vm8, %v2899_v5, %v5591_v47  ;;  %v11644_v2 = vld [vmem:[#allocation21_spill] sm:$0xff]  ;;  %v9096_v47 = vpop.f32.mrf.mxu3  ;;  %v9101_v5 = vpop.permute.xlu2 %5608 }
 0x51f   :  { %v2898_v45 = vsel %vm2872_vm7, %v2836_v37, %v5581_v3  ;;  %v3153_v3 = vsel %vm2934_vm8, %v3089_v32, %v5570_v15  ;;  %v1340_v24 = vrot.slane %v11644_v2, 7  ;;  %11645 = vst [vmem:[#allocation105_spill] sm:$0xff] %v9096_v47  ;;  %v5600_v32 = vunpack.i.l.bf16 %v9047_v25 }
 0x520   :  { %v2961_v36 = vsel %vm2934_vm8, %v2898_v45, %v5590_v41  ;;  %v1531_v41 = vrot.slane %v11644_v2, 1  ;;  %v5586_v47 = vunpack.i.h.bf16 %v9008_v51 }
 0x521   :  { %v3738_v52 = vpop.f32.mrf.mxu2  ;;  %5005 = vmatmul.msk.bf16.gmra.mxu3 %vm7165_vm5, %v5004_v6  ;;  %v3290_v54 = vpack.c.bf16 %v2962_v17, %v2961_v36  ;;  %v9106_v6 = vsel %vm1251_vm6, %v11646_v4, %v1340_v24  ;;  %v5927_v36 = vpack.i.bf16 %v11638_v60, %v8974_v30  ;;  %v11647_v17 = vld [vmem:[#allocation22_spill] sm:$0xff]  ;;  %v3028_v4 = vsel %vm518_vm0, %v7439_v56, %v5600_v32 }
 0x522   :  { %v9082_v27 = vadd.f32 %v3738_v52, %v3569_v1  ;;  %v3572_v38 = vpop.f32.mrf.mxu1  ;;  %v3291_v1 = vpack.c.bf16 %v3154_v14, %v3153_v3  ;;  %v9110_v15 = vsel %vm1442_vm4, %v1530_v63, %v1531_v41  ;;  %v5605_v52 = vunpack.i.l.bf16 %v9055_v58  ;;  %v9119_v3 = vpop.permute.xlu1 %5618  ;;  %v11649_v63 = vld [vmem:[#allocation70_spill] sm:$0xff] }
 0x523   :  { %v5937_v14 = vpack.i.bf16 %v8959_v33, %v9106_v6  ;;  %v5156_v33 = vunpack.i.h.bf16 %v11639_v57 }
 0x524   :  { %11643 = vst [vmem:[#allocation104_spill] sm:$0xff] %v9082_v27  ;;  %5923 = vrot.lane.b32.xlu2 %v5922_v18, %s6041_s26  ;;  %v5614_v37 = vpop.permute.xlu0 %5613  ;;  %v1342_v18 = vrot.slane %v11647_v17, 7  ;;  %v5610_v27 = vunpack.i.l.bf16 %v9101_v5  ;;  %v3092_v57 = vsel %vm2872_vm7, %v3028_v4, %v5605_v52 }
 0x525   :  { %5918 = vrot.lane.b32.xlu1 %v5917_v34, %s6042_s27  ;;  %3611 = vmatmul.bf16.gmra.mxu1 %v3290_v54  ;;  %v5576_v34 = vunpack.i.h.bf16 %v8945_v0  ;;  %v5160_v54 = vunpack.i.l.bf16 %v11649_v63  ;;  %v5615_v26 = vunpack.i.l.bf16 %v5614_v37  ;;  %v2838_v52 = vsel %vm518_vm0, %v8110_v46, %v5156_v33 }
 0x526   :  { %5913 = vrot.lane.b32.xlu0 %v5912_v49, %s6041_s26  ;;  %3780 = vmatmul.bf16.gmra.mxu2 %v3291_v1  ;;  %v5932_v49 = vpack.i.bf16 %v9110_v15, %v9044_v20  ;;  %v9126_v1 = vsel %vm1442_vm4, %v1531_v41, 0.0  ;;  %v5616_v41 = vunpack.i.h.bf16 %v5614_v37  ;;  %v9143_v51 = vpop.f32.mrf.mxu3  ;;  %v9153_v37 = vsel %vm1251_vm6, 0.0, %v1342_v18 }
 0x527   :  { %v3027_v56 = vsel %vm518_vm0, %v11501_v21, %v5576_v34  ;;  %11650 = vst [vmem:[#allocation40_spill] sm:$0xff] %v9143_v51  ;;  %v5947_v4 = vpack.i.bf16 %v9153_v37, %v8962_v39 }
 0x528   :  { %v3091_v32 = vsel %vm2872_vm7, %v3027_v56, %v5586_v47 }
 0x529   :  { %v3741_v45 = vpop.f32.mrf.mxu2 }
 0x52a   :  { %v9121_v24 = vadd.f32 %v3741_v45, %v3572_v38  ;;  %v3574_v0 = vpop.f32.mrf.mxu1  ;;  %v5606_v38 = vunpack.i.h.bf16 %v9055_v58  ;;  %v5596_v45 = vunpack.i.h.bf16 %v9077_v48  ;;  %v5007_v58 = vpack.c.bf16 %v9126_v1, %v9110_v15 }
 0x52c   :  { %11648 = vst [vmem:[#allocation77_spill] sm:$0xff] %v9121_v24  ;;  %v5595_v24 = vunpack.i.l.bf16 %v9077_v48  ;;  %5938 = vrot.lane.b32.xlu2 %v5937_v14, %s6041_s26  ;;  %v2839_v48 = vsel %vm518_vm0, %v8150_v13, %v5160_v54  ;;  %v2900_v21 = vsel %vm2872_vm7, %v2838_v52, %v5606_v38  ;;  %v3156_v47 = vsel %vm2934_vm8, %v3092_v57, %v5596_v45  ;;  %v11651_v45 = vld [vmem:[#allocation5_spill] sm:$0xff] }
 0x52d   :  { %5933 = vrot.lane.b32.xlu1 %v5932_v49, %s6040_s25  ;;  %v2901_v14 = vsel %vm2872_vm7, %v2839_v48, %v5610_v27  ;;  %v9163_v49 = vpop.permute.xlu0 %5628  ;;  %v2963_v46 = vsel %vm2934_vm8, %v2900_v21, %v5615_v26  ;;  %v5952_v27 = vpack.i.bf16 %v11647_v17, %v9073_v44  ;;  %v1343_v57 = vrot.slane %v11651_v45, 7  ;;  %v9177_v26 = vpop.permute.xlu1 %5633 }
 0x52e   :  { %5928 = vrot.lane.b32.xlu0 %v5927_v36, %s6042_s27  ;;  %v9156_v36 = vpop.permute.xlu2 %5623  ;;  %v3155_v13 = vsel %vm2934_vm8, %v3091_v32, %v5595_v24  ;;  %v2964_v54 = vsel %vm2934_vm8, %v2901_v14, %v5616_v41  ;;  %v5942_v24 = vpack.i.bf16 %v9023_v19, %v11644_v2  ;;  %v1533_v41 = vrot.slane %v11647_v17, 1  ;;  %v9191_v21 = vpop.f32.mrf.mxu3 }
 0x52f   :  { %v3294_v56 = vpack.c.bf16 %v3156_v47, %v3155_v13  ;;  %v1534_v39 = vrot.slane %v11651_v45, 1  ;;  %v5620_v32 = vunpack.i.l.bf16 %v9119_v3  ;;  %v9186_v52 = vsel %vm1251_vm6, %v1342_v18, %v1343_v57  ;;  %11653 = vst [vmem:[#allocation109_spill] sm:$0xff] %v9191_v21  ;;  %v11654_v47 = vld [vmem:[#allocation87_spill] sm:$0xff] }
 0x530   :  { %v5601_v18 = vunpack.i.h.bf16 %v9047_v25  ;;  %v5630_v57 = vunpack.i.l.bf16 %v9163_v49  ;;  %v9233_v51 = vunpack.i.l.bf16 %v9156_v36 }
 0x531   :  { %v3743_v34 = vpop.f32.mrf.mxu2  ;;  %5008 = vmatmul.msk.bf16.gmra.mxu3 %vm7165_vm5, %v5007_v58  ;;  %v11652_v58 = vld [vmem:[#allocation33_spill] sm:$0xff]  ;;  %v9194_v13 = vsel %vm1442_vm4, %v1533_v41, %v1534_v39  ;;  %v11656_v41 = vld [vmem:[#allocation14_spill] sm:$0xff] }
 0x532   :  { %v9167_v33 = vadd.f32 %v3743_v34, %v3574_v0  ;;  %v3577_v38 = vpop.f32.mrf.mxu1  ;;  %v1121_v48 = vmul.f32 0.01, %v11652_v58  ;;  %v3293_v0 = vpack.c.bf16 %v2964_v54, %v2963_v46  ;;  %v5165_v46 = vunpack.i.l.bf16 %v11654_v47 }
 0x534   :  { %5953 = vrot.lane.b32.xlu2 %v5952_v27, %s6042_s27  ;;  %v9189_v14 = vmax.f32 %v11652_v58, %v1121_v48  ;;  %v5967_v27 = vpack.i.bf16 %v9067_v50, %v11651_v45  ;;  %v5962_v58 = vpack.i.bf16 %v9019_v53, %v9186_v52  ;;  %v2841_v53 = vsel %vm518_vm0, %v8205_v62, %v5165_v46 }
 0x535   :  { %5948 = vrot.lane.b32.xlu1 %v5947_v4, %s6041_s26  ;;  %3616 = vmatmul.bf16.gmra.mxu1 %v3293_v0  ;;  %v9202_v4 = vsel %vm1442_vm4, %v1534_v39, 0.0  ;;  %v5957_v0 = vpack.i.bf16 %v9194_v13, %v9126_v1  ;;  %v1122_v39 = vmul.f32 0.01, %v11656_v41  ;;  %v5626_v62 = vunpack.i.h.bf16 %v9156_v36 }
 0x536   :  { %5943 = vrot.lane.b32.xlu0 %v5942_v24, %s6042_s27  ;;  %3785 = vmatmul.bf16.gmra.mxu2 %v3294_v56  ;;  %v9205_v24 = vpop.permute.xlu2 %5638  ;;  %v3030_v56 = vsel %vm518_vm0, %v8061_v28, %v5620_v32  ;;  %v5010_v28 = vpack.c.bf16 %v9202_v4, %v9194_v13  ;;  %v1345_v25 = vrot.slane %v9189_v14, 7  ;;  %v5161_v32 = vunpack.i.h.bf16 %v11649_v63 }
 0x537   :  { %v3094_v21 = vsel %vm2872_vm7, %v3030_v56, %v8102_v12  ;;  %v2903_v63 = vsel %vm2872_vm7, %v2841_v53, %v5630_v57  ;;  %v9240_v46 = vmax.f32 %v11656_v41, %v1122_v39  ;;  %v9257_v39 = vpop.f32.mrf.mxu3 }
 0x538   :  { %11657 = vst [vmem:[#allocation110_spill] sm:$0xff] %v9257_v39 }
 0x539   :  { %v3746_v34 = vpop.f32.mrf.mxu2 }
 0x53a   :  { %v9197_v54 = vadd.f32 %v3746_v34, %v3577_v38  ;;  %v9212_v38 = vpop.permute.xlu0 %5643  ;;  %v3579_v48 = vpop.f32.mrf.mxu1  ;;  %v5635_v34 = vunpack.i.l.bf16 %v9177_v26 }
 0x53c   :  { %11655 = vst [vmem:[#allocation42_spill] sm:$0xff] %v9197_v54  ;;  %5968 = vrot.lane.b32.xlu2 %v5967_v27, %s6042_s27  ;;  %v3029_v27 = vsel %vm518_vm0, %v8058_v40, %v5601_v18  ;;  %v9236_v54 = vpop.permute.xlu1 %5648  ;;  %v9245_v40 = vsel %vm1251_vm6, 0.0, %v1345_v25  ;;  %v2840_v18 = vsel %vm518_vm0, %v8176_v22, %v5161_v32  ;;  %v2966_v36 = vsel %vm2934_vm8, %v2903_v63, %v5635_v34 }
 0x53d   :  { %5963 = vrot.lane.b32.xlu1 %v5962_v58, %s6041_s26  ;;  %v5611_v58 = vunpack.i.h.bf16 %v9101_v5  ;;  %v3158_v5 = vsel %vm2934_vm8, %v3094_v21, %v9233_v51  ;;  %v3093_v57 = vsel %vm2872_vm7, %v3029_v27, %v8102_v12  ;;  %v5972_v22 = vpack.i.bf16 %v9245_v40, %v9044_v20 }
 0x53e   :  { %5958 = vrot.lane.b32.xlu0 %v5957_v0, %s6040_s25  ;;  %v3157_v21 = vsel %vm2934_vm8, %v3093_v57, %v9233_v51  ;;  %v9266_v34 = vpop.permute.xlu2 %5653  ;;  %v1536_v20 = vrot.slane %v9189_v14, 1 }
 0x53f   :  { %v2902_v41 = vsel %vm2872_vm7, %v2840_v18, %v5611_v58  ;;  %v3297_v32 = vpack.c.bf16 %v3158_v5, %v3157_v21  ;;  %v1346_v58 = vrot.slane %v9240_v46, 7  ;;  %v5987_v21 = vpack.i.bf16 %v9153_v37, %v9240_v46 }
 0x541   :  { %v3748_v0 = vpop.f32.mrf.mxu2  ;;  %5011 = vmatmul.msk.bf16.gmra.mxu3 %vm7165_vm5, %v5010_v28  ;;  %v5977_v28 = vpack.i.bf16 %v9189_v14, %v9106_v6  ;;  %v9281_v57 = vsel %vm1251_vm6, %v1345_v25, %v1346_v58 }
 0x542   :  { %v9251_v56 = vadd.f32 %v3748_v0, %v3579_v48  ;;  %v3582_v53 = vpop.f32.mrf.mxu1  ;;  %v2965_v48 = vsel %vm2934_vm8, %v2902_v41, %v5626_v62  ;;  %v9272_v63 = vpop.permute.xlu0 %5658  ;;  %v1537_v62 = vrot.slane %v9240_v46, 1  ;;  %v5640_v0 = vunpack.i.l.bf16 %v9205_v24 }
 0x543   :  { %v3296_v27 = vpack.c.bf16 %v2966_v36, %v2965_v48  ;;  %v5645_v36 = vunpack.i.l.bf16 %v9212_v38 }
 0x544   :  { %2378 = vrot.lane.b32.xlu2 %v9202_v4, %s6040_s25  ;;  %v9278_v5 = vpop.permute.xlu1 %5663  ;;  %v1632_v25 = vsel %vm1442_vm4, %v1537_v62, 0.0  ;;  %v3032_v58 = vsel %vm518_vm0, %v11521_v43, %v5640_v0  ;;  %v5655_v0 = vunpack.i.l.bf16 %v9266_v34 }
 0x545   :  { %5978 = vrot.lane.b32.xlu1 %v5977_v28, %s6042_s27  ;;  %3621 = vmatmul.bf16.gmra.mxu1 %v3296_v27  ;;  %v5621_v28 = vunpack.i.h.bf16 %v9119_v3  ;;  %v1538_v27 = vsel %vm1442_vm4, %v1536_v20, %v1537_v62  ;;  %v3096_v3 = vsel %vm2872_vm7, %v3032_v58, %v5645_v36  ;;  %v5636_v20 = vunpack.i.h.bf16 %v9177_v26  ;;  %v11659_v36 = vld [vmem:[#allocation121_spill] sm:$0xff] }
 0x546   :  { %5973 = vrot.lane.b32.xlu0 %v5972_v22, %s6041_s26  ;;  %3790 = vmatmul.bf16.gmra.mxu2 %v3297_v32  ;;  %v5631_v22 = vunpack.i.h.bf16 %v9163_v49  ;;  %v5982_v32 = vpack.i.bf16 %v9110_v15, %v9281_v57  ;;  %v5651_v15 = vunpack.i.h.bf16 %v9236_v54  ;;  %v9305_v49 = vpop.permute.xlu2 %5668  ;;  %v5013_v62 = vpack.c.bf16 %v1632_v25, %v1538_v27 }
 0x547   :  { %v3031_v43 = vsel %vm518_vm0, %v11519_v59, %v5621_v28  ;;  %v5997_v26 = vpack.i.bf16 %v9202_v4, %v9194_v13  ;;  %v5992_v28 = vpack.i.bf16 %v1632_v25, %v1538_v27  ;;  %v2968_v29 = vsel %vm2934_vm8, %v11659_v36, %v5655_v0  ;;  %v11661_v25 = vld [vmem:[#allocation86_spill] sm:$0xff] }
 0x548   :  { %v5641_v0 = vunpack.i.h.bf16 %v9205_v24  ;;  %v11662_v24 = vld [vmem:[#allocation9_spill] sm:$0xff] }
 0x549   :  { %v3751_v18 = vpop.f32.mrf.mxu2 }
 0x54a   :  { %v9284_v41 = vadd.f32 %v3751_v18, %v3582_v53  ;;  %v3584_v48 = vpop.f32.mrf.mxu1  ;;  %v5650_v53 = vunpack.i.l.bf16 %v9236_v54  ;;  %v9297_v18 = vpop.f32.mrf.mxu3 }
 0x54b   :  { %11658 = vst [vmem:[#allocation64_spill] sm:$0xff] %v9297_v18  ;;  %v9312_v18 = vpop.permute.xlu0 %5673 }
 0x54c   :  { %1963 = vrot.lane.b32.xlu2 %v9126_v1, %s6041_s26  ;;  %v3095_v1 = vsel %vm2872_vm7, %v3031_v43, %v5631_v22  ;;  %v3160_v54 = vsel %vm2934_vm8, %v3096_v3, %v5650_v53  ;;  %v9319_v58 = vpop.permute.xlu1 %5678  ;;  %v5170_v3 = vunpack.i.l.bf16 %v11661_v25 }
 0x54d   :  { %5988 = vrot.lane.b32.xlu1 %v5987_v21, %s6042_s27  ;;  %v3159_v22 = vsel %vm2934_vm8, %v3095_v1, %v5636_v20 }
 0x54e   :  { %5983 = vrot.lane.b32.xlu0 %v5982_v32, %s6041_s26  ;;  %v2967_v32 = vsel %vm2934_vm8, %v11659_v36, %v5651_v15  ;;  %v9335_v4 = vpop.permute.xlu2 %5683  ;;  %v5665_v15 = vunpack.i.l.bf16 %v9278_v5  ;;  %v5166_v36 = vunpack.i.h.bf16 %v11654_v47  ;;  %v11663_v47 = vld [vmem:[#allocation52_spill] sm:$0xff] }
 0x54f   :  { %v3299_v53 = vpack.c.bf16 %v2968_v29, %v2967_v32  ;;  %v5646_v32 = vunpack.i.h.bf16 %v9212_v38  ;;  %v3033_v38 = vsel %vm518_vm0, %v11663_v47, %v5641_v0  ;;  %v5671_v0 = vunpack.i.h.bf16 %v9305_v49 }
 0x551   :  { %v3753_v21 = vpop.f32.mrf.mxu2  ;;  %5014 = vmatmul.msk.bf16.gmra.mxu3 %vm7165_vm5, %v5013_v62  ;;  %v3300_v62 = vpack.c.bf16 %v3160_v54, %v3159_v22  ;;  %v5666_v22 = vunpack.i.h.bf16 %v9278_v5 }
 0x552   :  { %v9321_v59 = vadd.f32 %v3753_v21, %v3584_v48  ;;  %v3587_v43 = vpop.f32.mrf.mxu1  ;;  %v5660_v48 = vunpack.i.l.bf16 %v9272_v63  ;;  %v9333_v13 = vpop.f32.mrf.mxu3  ;;  %v5675_v21 = vunpack.i.l.bf16 %v9312_v18 }
 0x553   :  { %11660 = vst [vmem:[#allocation35_spill] sm:$0xff] %v9333_v13  ;;  %v9339_v20 = vpop.permute.xlu0 %5688 }
 0x554   :  { %5998 = vrot.lane.b32.xlu2 %v5997_v26, %s6041_s26  ;;  %v3034_v1 = vsel %vm518_vm0, %v7410_v61, %v5660_v48  ;;  %v9352_v29 = vpop.permute.xlu1 %5693  ;;  %v3097_v48 = vsel %vm2872_vm7, %v3033_v38, %v5646_v32 }
 0x555   :  { %5993 = vrot.lane.b32.xlu1 %v5992_v28, %s6040_s25  ;;  %3626 = vmatmul.bf16.gmra.mxu1 %v3299_v53  ;;  %v6002_v28 = vpack.i.bf16 %v9281_v57, %v9245_v40  ;;  %v3098_v61 = vsel %vm2872_vm7, %v3034_v1, %v5665_v15  ;;  %v5670_v53 = vunpack.i.l.bf16 %v9305_v49  ;;  %v11664_v57 = vld [vmem:[#allocation36_spill] sm:$0xff]  ;;  %v5685_v49 = vunpack.i.l.bf16 %v9335_v4 }
 0x556   :  { %2184 = vrot.lane.b32.xlu0 %v9186_v52, %s6042_s27  ;;  %3795 = vmatmul.bf16.gmra.mxu2 %v3300_v62  ;;  %v2843_v62 = vsel %vm518_vm0, %v11662_v24, %v5170_v3  ;;  %v2842_v5 = vsel %vm518_vm0, %v11664_v57, %v5166_v36  ;;  %v11666_v24 = vmov 0.0|0.0   ;;  %v9376_v36 = vpop.permute.xlu2 %5698  ;;  %v5696_v13 = vunpack.i.h.bf16 %v9352_v29 }
 0x557   :  { %v2905_v40 = vsel %vm2872_vm7, %v2843_v62, %v5675_v21  ;;  %v2904_v3 = vsel %vm2872_vm7, %v2842_v5, %v5666_v22  ;;  %v11668_v5 = vld [vmem:[#allocation76_spill] sm:$0xff] }
 0x558   :  { %v2969_v62 = vsel %vm2934_vm8, %v2904_v3, %v5671_v0  ;;  %v5676_v3 = vunpack.i.h.bf16 %v9312_v18  ;;  %v5700_v0 = vunpack.i.l.bf16 %v9376_v36  ;;  %v5681_v18 = vunpack.i.h.bf16 %v9319_v58 }
 0x559   :  { %v3756_v27 = vpop.f32.mrf.mxu2 }
 0x55a   :  { %v9345_v54 = vadd.f32 %v3756_v27, %v3587_v43  ;;  %v3589_v26 = vpop.f32.mrf.mxu1  ;;  %v5680_v43 = vunpack.i.l.bf16 %v9319_v58  ;;  %v5656_v27 = vunpack.i.h.bf16 %v9266_v34  ;;  %v9368_v15 = vpop.f32.mrf.mxu3 }
 0x55b   :  { %11665 = vst [vmem:[#allocation49_spill] sm:$0xff] %v9368_v15  ;;  %v9379_v34 = vpop.permute.xlu0 %5703  ;;  %v11672_v15 = vld [vmem:[#allocation7_spill] sm:$0xff] }
 0x55c   :  { %v2970_v21 = vsel %vm2934_vm8, %v2905_v40, %v5680_v43  ;;  %v3161_v32 = vsel %vm2934_vm8, %v3097_v48, %v5656_v27  ;;  %v5690_v43 = vunpack.i.l.bf16 %v9339_v20  ;;  %v5661_v40 = vunpack.i.h.bf16 %v9272_v63 }
 0x55d   :  { %v3302_v57 = vpack.c.bf16 %v2970_v21, %v2969_v62  ;;  %v5175_v48 = vunpack.i.l.bf16 %v11668_v5  ;;  %v5171_v27 = vunpack.i.h.bf16 %v11661_v25  ;;  %v5705_v63 = vunpack.i.l.bf16 %v9379_v34 }
 0x55e   :  { %6003 = vrot.lane.b32.xlu0 %v6002_v28, %s6042_s27  ;;  %v3162_v28 = vsel %vm2934_vm8, %v3098_v61, %v5670_v53  ;;  %v9382_v61 = vpop.permute.xlu1 %5708  ;;  %v5714_v21 = vpop.permute.xlu2 %5713 }
 0x55f   :  { %v3303_v38 = vpack.c.bf16 %v3162_v28, %v3161_v32  ;;  %v11669_v28 = vld [vmem:[#allocation28_spill] sm:$0xff]  ;;  %v5691_v32 = vunpack.i.h.bf16 %v9339_v20  ;;  %v2844_v20 = vsel %vm518_vm0, %v11672_v15, %v5171_v27 }
 0x561   :  { %v3758_v1 = vpop.f32.mrf.mxu2  ;;  %4039 = vmatmul.bf16.gmra.mxu3 %v11666_v24  ;;  %v3036_v24 = vsel %vm518_vm0, %v11669_v28, %v5685_v49 }
 0x562   :  { %v9373_v47 = vadd.f32 %v3758_v1, %v3589_v26  ;;  %v3592_v22 = vpop.f32.mrf.mxu1  ;;  %v3100_v62 = vsel %vm2872_vm7, %v3036_v24, %v5690_v43  ;;  %v2906_v24 = vsel %vm2872_vm7, %v2844_v20, %v5691_v32  ;;  %v11676_v20 = vld [vmem:[#allocation29_spill] sm:$0xff] }
 0x563   :  { %v2971_v15 = vsel %vm2934_vm8, %v2906_v24, %v5696_v13  ;;  %v5176_v13 = vunpack.i.h.bf16 %v11668_v5  ;;  %v11678_v5 = vld [vmem:[#allocation6_spill] sm:$0xff] }
 0x565   :  { %3631 = vmatmul.bf16.gmra.mxu1 %v3302_v57  ;;  %v11670_v57 = vld [vmem:[#allocation53_spill] sm:$0xff] }
 0x566   :  { %3800 = vmatmul.bf16.gmra.mxu2 %v3303_v38  ;;  %v5719_v38 = vpop.permute.xlu0 %5718  ;;  %v3035_v25 = vsel %vm518_vm0, %v11670_v57, %v5661_v40  ;;  %v9410_v39 = vpop.permute.xlu1 %5723 }
 0x567   :  { %v3099_v28 = vsel %vm2872_vm7, %v3035_v25, %v5676_v3  ;;  %v5710_v25 = vunpack.i.l.bf16 %v9382_v61  ;;  %v5720_v24 = vunpack.i.l.bf16 %v5719_v38 }
 0x568   :  { %v3163_v3 = vsel %vm2934_vm8, %v3099_v28, %v5681_v18  ;;  %v5716_v28 = vunpack.i.h.bf16 %v5714_v21 }
 0x569   :  { %v3761_v26 = vpop.f32.mrf.mxu2 }
 0x56a   :  { %v9386_v53 = vadd.f32 %v3761_v26, %v3592_v22  ;;  %v3594_v1 = vpop.f32.mrf.mxu1  ;;  %v5695_v22 = vunpack.i.l.bf16 %v9352_v29  ;;  %v11671_v26 = vld [vmem:[#allocation34_spill] sm:$0xff] }
 0x56b   :  { %v2845_v49 = vsel %vm518_vm0, %v11671_v26, %v5175_v48 }
 0x56c   :  { %11667 = vst [vmem:[#allocation41_spill] sm:$0xff] %v9386_v53  ;;  %v2907_v43 = vsel %vm2872_vm7, %v2845_v49, %v5700_v0  ;;  %v3164_v40 = vsel %vm2934_vm8, %v3100_v62, %v5695_v22  ;;  %v9418_v0 = vpop.permute.xlu2 %5728  ;;  %v5725_v62 = vunpack.i.l.bf16 %v9410_v39  ;;  %v5686_v49 = vunpack.i.h.bf16 %v9335_v4 }
 0x56d   :  { %v2972_v48 = vsel %vm2934_vm8, %v2907_v43, %v5705_v63  ;;  %v3306_v27 = vpack.c.bf16 %v3164_v40, %v3163_v3  ;;  %v3038_v43 = vsel %vm518_vm0, %v11676_v20, %v5710_v25  ;;  %v5701_v40 = vunpack.i.h.bf16 %v9376_v36  ;;  %v11679_v25 = vld [vmem:[#allocation55_spill] sm:$0xff] }
 0x56e   :  { %v3305_v29 = vpack.c.bf16 %v2972_v48, %v2971_v15  ;;  %v9420_v32 = vpop.permute.xlu0 %5733  ;;  %v5739_v63 = vpop.permute.xlu1 %5738  ;;  %v5715_v48 = vunpack.i.l.bf16 %v5714_v21  ;;  %v5721_v3 = vunpack.i.h.bf16 %v5719_v38  ;;  %v11677_v15 = vld [vmem:[#allocation119_spill] sm:$0xff]  ;;  %v5730_v4 = vunpack.i.l.bf16 %v9418_v0 }
 0x56f   :  { %v3037_v20 = vsel %vm518_vm0, %v11679_v25, %v5686_v49  ;;  %v5740_v25 = vunpack.i.l.bf16 %v5739_v63 }
 0x571   :  { %v3763_v53 = vpop.f32.mrf.mxu2 }
 0x572   :  { %v9413_v58 = vadd.f32 %v3763_v53, %v3594_v1  ;;  %v3597_v57 = vpop.f32.mrf.mxu1  ;;  %v11674_v53 = vld [vmem:[#allocation93_spill] sm:$0xff] }
 0x573   :  { %v5180_v1 = vunpack.i.l.bf16 %v11674_v53 }
 0x574   :  { %11673 = vst [vmem:[#allocation112_spill] sm:$0xff] %v9413_v58  ;;  %v5744_v21 = vpop.permute.xlu2 %5743 }
 0x575   :  { %3636 = vmatmul.bf16.gmra.mxu1 %v3305_v29 }
 0x576   :  { %3805 = vmatmul.bf16.gmra.mxu2 %v3306_v27  ;;  %v2847_v27 = vsel %vm518_vm0, %v11677_v15, %v5180_v1  ;;  %v9445_v15 = vpop.permute.xlu0 %5748 }
 0x577   :  { %v2909_v29 = vsel %vm2872_vm7, %v2847_v27, %v5725_v62 }
 0x579   :  { %v3766_v22 = vpop.f32.mrf.mxu2 }
 0x57a   :  { %v9425_v18 = vadd.f32 %v3766_v22, %v3597_v57  ;;  %v3599_v26 = vpop.f32.mrf.mxu1  ;;  %v5706_v57 = vunpack.i.h.bf16 %v9379_v34  ;;  %v2846_v22 = vsel %vm518_vm0, %v11678_v5, %v5176_v13  ;;  %v3101_v34 = vsel %vm2872_vm7, %v3037_v20, %v5701_v40  ;;  %v9452_v5 = vpop.permute.xlu1 %5753  ;;  %v11681_v40 = vld [vmem:[#allocation92_spill] sm:$0xff] }
 0x57b   :  { %v2908_v36 = vsel %vm2872_vm7, %v2846_v22, %v5716_v28  ;;  %v2974_v13 = vsel %vm2934_vm8, %v2909_v29, %v5730_v4  ;;  %v5185_v22 = vunpack.i.l.bf16 %v11681_v40  ;;  %v5750_v20 = vunpack.i.l.bf16 %v9445_v15 }
 0x57c   :  { %11675 = vst [vmem:[#allocation111_spill] sm:$0xff] %v9425_v18  ;;  %v3102_v18 = vsel %vm2872_vm7, %v3038_v43, %v5715_v48  ;;  %v2973_v62 = vsel %vm2934_vm8, %v2908_v36, %v5721_v3  ;;  %v3165_v43 = vsel %vm2934_vm8, %v3101_v34, %v5706_v57  ;;  %v9458_v29 = vpop.permute.xlu2 %5758  ;;  %v11683_v57 = vld [vmem:[#allocation30_spill] sm:$0xff]  ;;  %v5181_v36 = vunpack.i.h.bf16 %v11674_v53 }
 0x57d   :  { %v3166_v1 = vsel %vm2934_vm8, %v3102_v18, %v5720_v24  ;;  %v3308_v28 = vpack.c.bf16 %v2974_v13, %v2973_v62  ;;  %v5735_v18 = vunpack.i.l.bf16 %v9420_v32  ;;  %v5741_v62 = vunpack.i.h.bf16 %v5739_v63 }
 0x57e   :  { %v3309_v49 = vpack.c.bf16 %v3166_v1, %v3165_v43  ;;  %v5764_v1 = vpop.permute.xlu0 %5763  ;;  %v11684_v43 = vld [vmem:[#allocation69_spill] sm:$0xff]  ;;  %v5731_v63 = vunpack.i.h.bf16 %v9418_v0 }
 0x57f   :  { %v3040_v4 = vsel %vm518_vm0, %v11683_v57, %v5735_v18 }
 0x580   :  { %v3104_v13 = vsel %vm2872_vm7, %v3040_v4, %v5740_v25 }
 0x581   :  { %v3768_v38 = vpop.f32.mrf.mxu2 }
 0x582   :  { %v9449_v27 = vadd.f32 %v3768_v38, %v3599_v26  ;;  %v3602_v48 = vpop.f32.mrf.mxu1  ;;  %v5711_v26 = vunpack.i.h.bf16 %v9382_v61  ;;  %v5726_v38 = vunpack.i.h.bf16 %v9410_v39  ;;  %v5745_v61 = vunpack.i.l.bf16 %v5744_v21  ;;  %v5769_v57 = vpop.permute.xlu1 %5768  ;;  %v11686_v39 = vld [vmem:[#allocation113_spill] sm:$0xff] }
 0x584   :  { %11680 = vst [vmem:[#allocation17_spill] sm:$0xff] %v9449_v27 }
 0x585   :  { %3641 = vmatmul.bf16.gmra.mxu1 %v3308_v28  ;;  %v11685_v28 = vld [vmem:[#allocation13_spill] sm:$0xff] }
 0x586   :  { %3810 = vmatmul.bf16.gmra.mxu2 %v3309_v49  ;;  %v5755_v49 = vunpack.i.l.bf16 %v9452_v5  ;;  %v3039_v18 = vsel %vm518_vm0, %v11685_v28, %v5711_v26  ;;  %v9486_v0 = vpop.permute.xlu0 %5778 }
 0x587   :  { %v3103_v53 = vsel %vm2872_vm7, %v3039_v18, %v5726_v38  ;;  %v9484_v18 = vpop.permute.xlu2 %5773 }
 0x589   :  { %v3771_v24 = vpop.f32.mrf.mxu2 }
 0x58a   :  { %v9456_v3 = vadd.f32 %v3771_v24, %v3602_v48  ;;  %v3604_v34 = vpop.f32.mrf.mxu1  ;;  %v2849_v48 = vsel %vm518_vm0, %v11684_v43, %v5185_v22  ;;  %v3168_v22 = vsel %vm2934_vm8, %v3104_v13, %v5745_v61  ;;  %v5746_v43 = vunpack.i.h.bf16 %v5744_v21  ;;  %v9489_v21 = vpop.permute.xlu1 %5783  ;;  %v11689_v61 = vld [vmem:[#allocation81_spill] sm:$0xff] }
 0x58b   :  { %v2911_v24 = vsel %vm2872_vm7, %v2849_v48, %v5750_v20  ;;  %v3167_v20 = vsel %vm2934_vm8, %v3103_v53, %v5731_v63  ;;  %v5186_v53 = vunpack.i.h.bf16 %v11681_v40  ;;  %v5756_v40 = vunpack.i.h.bf16 %v9452_v5 }
 0x58c   :  { %11682 = vst [vmem:[#allocation82_spill] sm:$0xff] %v9456_v3  ;;  %v2848_v3 = vsel %vm518_vm0, %v11686_v39, %v5181_v36  ;;  %v2976_v26 = vsel %vm2934_vm8, %v2911_v24, %v5755_v49  ;;  %v3312_v28 = vpack.c.bf16 %v3168_v22, %v3167_v20  ;;  %v5736_v49 = vunpack.i.h.bf16 %v9420_v32  ;;  %v11691_v32 = vld [vmem:[#allocation31_spill] sm:$0xff] }
 0x58d   :  { %v2910_v25 = vsel %vm2872_vm7, %v2848_v3, %v5741_v62  ;;  %v5760_v3 = vunpack.i.l.bf16 %v9458_v29  ;;  %v5765_v62 = vunpack.i.l.bf16 %v5764_v1  ;;  %v5190_v24 = vunpack.i.l.bf16 %v11689_v61 }
 0x58e   :  { %v2975_v38 = vsel %vm2934_vm8, %v2910_v25, %v5746_v43  ;;  %v5751_v39 = vunpack.i.h.bf16 %v9445_v15  ;;  %v11690_v25 = vld [vmem:[#allocation60_spill] sm:$0xff]  ;;  %v5775_v22 = vunpack.i.l.bf16 %v9484_v18  ;;  %v5766_v43 = vunpack.i.h.bf16 %v5764_v1 }
 0x58f   :  { %v3311_v36 = vpack.c.bf16 %v2976_v26, %v2975_v38  ;;  %v5770_v26 = vunpack.i.l.bf16 %v5769_v57  ;;  %v5789_v38 = vpop.permute.xlu2 %5788  ;;  %v5771_v1 = vunpack.i.h.bf16 %v5769_v57 }
 0x591   :  { %v3773_v4 = vpop.f32.mrf.mxu2 }
 0x592   :  { %v9479_v27 = vadd.f32 %v3773_v4, %v3604_v34  ;;  %v3607_v48 = vpop.f32.mrf.mxu1  ;;  %v3042_v4 = vsel %vm518_vm0, %v11690_v25, %v5760_v3  ;;  %v11693_v3 = vld [vmem:[#allocation37_spill] sm:$0xff] }
 0x593   :  { %v3106_v20 = vsel %vm2872_vm7, %v3042_v4, %v5765_v62  ;;  %v2850_v25 = vsel %vm518_vm0, %v11693_v3, %v5186_v53  ;;  %v11696_v3 = vld [vmem:[#allocation56_spill] sm:$0xff] }
 0x594   :  { %11687 = vst [vmem:[#allocation45_spill] sm:$0xff] %v9479_v27  ;;  %v2912_v4 = vsel %vm2872_vm7, %v2850_v25, %v5766_v43  ;;  %v3170_v58 = vsel %vm2934_vm8, %v3106_v20, %v5770_v26  ;;  %v5785_v43 = vunpack.i.l.bf16 %v9489_v21 }
 0x595   :  { %3646 = vmatmul.bf16.gmra.mxu1 %v3311_v36  ;;  %v11692_v36 = vld [vmem:[#allocation25_spill] sm:$0xff]  ;;  %v2977_v53 = vsel %vm2934_vm8, %v2912_v4, %v5771_v1  ;;  %v5776_v4 = vunpack.i.h.bf16 %v9484_v18 }
 0x596   :  { %3815 = vmatmul.bf16.gmra.mxu2 %v3312_v28  ;;  %v3041_v28 = vsel %vm518_vm0, %v11691_v32, %v5736_v49  ;;  %v2851_v15 = vsel %vm518_vm0, %v11692_v36, %v5190_v24  ;;  %v9516_v32 = vpop.permute.xlu1 %5798  ;;  %v5191_v36 = vunpack.i.h.bf16 %v11689_v61  ;;  %v3044_v25 = vsel %vm518_vm0, %v11696_v3, %v5785_v43  ;;  %v11699_v3 = vld [vmem:[#allocation61_spill] sm:$0xff] }
 0x597   :  { %v2913_v62 = vsel %vm2872_vm7, %v2851_v15, %v5775_v22  ;;  %v9520_v22 = vpop.permute.xlu2 %5803 }
 0x599   :  { %v3776_v34 = vpop.f32.mrf.mxu2 }
 0x59a   :  { %v9491_v13 = vadd.f32 %v3776_v34, %v3607_v48  ;;  %v3609_v63 = vpop.f32.mrf.mxu1  ;;  %v5780_v48 = vunpack.i.l.bf16 %v9486_v0  ;;  %v3105_v34 = vsel %vm2872_vm7, %v3041_v28, %v5751_v39 }
 0x59b   :  { %v3169_v24 = vsel %vm2934_vm8, %v3105_v34, %v5756_v40  ;;  %v5800_v40 = vunpack.i.l.bf16 %v9516_v32  ;;  %v5791_v34 = vunpack.i.h.bf16 %v5789_v38 }
 0x59c   :  { %11688 = vst [vmem:[#allocation50_spill] sm:$0xff] %v9491_v13  ;;  %v5794_v13 = vpop.permute.xlu0 %5793  ;;  %v2978_v5 = vsel %vm2934_vm8, %v2913_v62, %v5780_v48  ;;  %v3315_v57 = vpack.c.bf16 %v3170_v58, %v3169_v24  ;;  %v5761_v58 = vunpack.i.h.bf16 %v9458_v29 }
 0x59d   :  { %v3314_v28 = vpack.c.bf16 %v2978_v5, %v2977_v53  ;;  %v5795_v1 = vunpack.i.l.bf16 %v5794_v13  ;;  %v5790_v5 = vunpack.i.l.bf16 %v5789_v38  ;;  %v5796_v24 = vunpack.i.h.bf16 %v5794_v13  ;;  %v11697_v53 = vld [vmem:[#allocation39_spill] sm:$0xff] }
 0x59e   :  { %v5814_v62 = vpop.permute.xlu1 %5813 }
 0x59f   :  { %v3108_v43 = vsel %vm2872_vm7, %v3044_v25, %v5790_v5 }
 0x5a0   :  { %v3172_v38 = vsel %vm2934_vm8, %v3108_v43, %v5795_v1 }
 0x5a1   :  { %v3778_v27 = vpop.f32.mrf.mxu2 }
 0x5a2   :  { %v9513_v49 = vadd.f32 %v3778_v27, %v3609_v63  ;;  %v3612_v39 = vpop.f32.mrf.mxu1  ;;  %v11694_v27 = vld [vmem:[#allocation99_spill] sm:$0xff] }
 0x5a3   :  { %v5195_v63 = vunpack.i.l.bf16 %v11694_v27  ;;  %v5196_v43 = vunpack.i.h.bf16 %v11694_v27 }
 0x5a4   :  { %v9524_v20 = vpop.permute.xlu0 %5808 }
 0x5a5   :  { %3651 = vmatmul.bf16.gmra.mxu1 %v3314_v28  ;;  %v11698_v28 = vld [vmem:[#allocation16_spill] sm:$0xff] }
 0x5a6   :  { %3820 = vmatmul.bf16.gmra.mxu2 %v3315_v57  ;;  %v5781_v57 = vunpack.i.h.bf16 %v9486_v0  ;;  %v2852_v29 = vsel %vm518_vm0, %v11698_v28, %v5191_v36  ;;  %v9555_v1 = vpop.permute.xlu1 %5828 }
 0x5a7   :  { %v2914_v18 = vsel %vm2872_vm7, %v2852_v29, %v5791_v34  ;;  %v5810_v34 = vunpack.i.l.bf16 %v9524_v20 }
 0x5a9   :  { %v3781_v26 = vpop.f32.mrf.mxu2 }
 0x5aa   :  { %v9526_v48 = vadd.f32 %v3781_v26, %v3612_v39  ;;  %v3614_v15 = vpop.f32.mrf.mxu1  ;;  %v2853_v39 = vsel %vm518_vm0, %v11697_v53, %v5195_v63  ;;  %v5805_v26 = vunpack.i.l.bf16 %v9520_v22  ;;  %v5819_v53 = vpop.permute.xlu2 %5818 }
 0x5ab   :  { %v2915_v61 = vsel %vm2872_vm7, %v2853_v39, %v5800_v40  ;;  %v2979_v40 = vsel %vm2934_vm8, %v2914_v18, %v5796_v24  ;;  %v5815_v24 = vunpack.i.l.bf16 %v5814_v62 }
 0x5ac   :  { %11695 = vst [vmem:[#allocation18_spill] sm:$0xff] %v9526_v48  ;;  %v3043_v48 = vsel %vm518_vm0, %v11699_v3, %v5761_v58  ;;  %v2980_v36 = vsel %vm2934_vm8, %v2915_v61, %v5805_v26  ;;  %v9552_v25 = vpop.permute.xlu0 %5823  ;;  %v5786_v61 = vunpack.i.h.bf16 %v9489_v21  ;;  %v5801_v3 = vunpack.i.h.bf16 %v9516_v32 }
 0x5ad   :  { %v3107_v63 = vsel %vm2872_vm7, %v3043_v48, %v5776_v4  ;;  %v3317_v28 = vpack.c.bf16 %v2980_v36, %v2979_v40  ;;  %v5825_v26 = vunpack.i.l.bf16 %v9552_v25  ;;  %v5830_v21 = vunpack.i.l.bf16 %v9555_v1 }
 0x5ae   :  { %v3171_v39 = vsel %vm2934_vm8, %v3107_v63, %v5781_v57  ;;  %v3046_v57 = vsel %vm518_vm0, %v11583_v16, %v5810_v34  ;;  %v11701_v16 = vld [vmem:[#allocation57_spill] sm:$0xff] }
 0x5af   :  { %v3318_v58 = vpack.c.bf16 %v3172_v38, %v3171_v39  ;;  %v5816_v38 = vunpack.i.h.bf16 %v5814_v62  ;;  %v3110_v63 = vsel %vm2872_vm7, %v3046_v57, %v5815_v24  ;;  %v5820_v39 = vunpack.i.l.bf16 %v5819_v53 }
 0x5b0   :  { %v5806_v62 = vunpack.i.h.bf16 %v9520_v22  ;;  %v5821_v24 = vunpack.i.h.bf16 %v5819_v53 }
 0x5b1   :  { %v3783_v13 = vpop.f32.mrf.mxu2 }
 0x5b2   :  { %v9547_v0 = vadd.f32 %v3783_v13, %v3614_v15  ;;  %v3617_v5 = vpop.f32.mrf.mxu1  ;;  %v11700_v15 = vld [vmem:[#allocation98_spill] sm:$0xff]  ;;  %v9566_v13 = vpop.permute.xlu2 %5833 }
 0x5b3   :  { %v5200_v4 = vunpack.i.l.bf16 %v11700_v15 }
 0x5b4   :  { %v5839_v36 = vpop.permute.xlu0 %5838 }
 0x5b5   :  { %3656 = vmatmul.bf16.gmra.mxu1 %v3317_v28  ;;  %v2855_v40 = vsel %vm518_vm0, %v8667_v23, %v5200_v4  ;;  %v3174_v4 = vsel %vm2934_vm8, %v3110_v63, %v5820_v39  ;;  %v5835_v63 = vunpack.i.l.bf16 %v9566_v13 }
 0x5b6   :  { %3825 = vmatmul.bf16.gmra.mxu2 %v3318_v58  ;;  %v2917_v27 = vsel %vm2872_vm7, %v2855_v40, %v5825_v26  ;;  %v11702_v58 = vld [vmem:[#allocation73_spill] sm:$0xff] }
 0x5b7   :  { %v2854_v28 = vsel %vm518_vm0, %v11702_v58, %v5196_v43  ;;  %v5201_v58 = vunpack.i.h.bf16 %v11700_v15  ;;  %v11708_v15 = vld [vmem:[#allocation10_spill] sm:$0xff] }
 0x5b8   :  { %v2916_v34 = vsel %vm2872_vm7, %v2854_v28, %v5816_v38  ;;  %v5826_v28 = vunpack.i.h.bf16 %v9552_v25 }
 0x5b9   :  { %v3786_v48 = vpop.f32.mrf.mxu2 }
 0x5ba   :  { %v9558_v29 = vadd.f32 %v3786_v48, %v3617_v5  ;;  %v3619_v18 = vpop.f32.mrf.mxu1  ;;  %v3045_v5 = vsel %vm518_vm0, %v11701_v16, %v5786_v61  ;;  %v5844_v48 = vpop.permute.xlu1 %5843  ;;  %v2982_v61 = vsel %vm2934_vm8, %v2917_v27, %v5830_v21  ;;  %v5811_v21 = vunpack.i.h.bf16 %v9524_v20  ;;  %v11705_v27 = vld [vmem:[#allocation90_spill] sm:$0xff] }
 0x5bb   :  { %v3109_v32 = vsel %vm2872_vm7, %v3045_v5, %v5801_v3  ;;  %v2981_v3 = vsel %vm2934_vm8, %v2916_v34, %v5821_v24  ;;  %v9586_v22 = vpop.permute.xlu2 %5848  ;;  %v11706_v34 = vld [vmem:[#allocation66_spill] sm:$0xff]  ;;  %v5841_v24 = vunpack.i.h.bf16 %v5839_v36 }
 0x5bc   :  { %v3173_v26 = vsel %vm2934_vm8, %v3109_v32, %v5806_v62  ;;  %v3320_v43 = vpack.c.bf16 %v2982_v61, %v2981_v3  ;;  %v9588_v38 = vpop.permute.xlu0 %5853  ;;  %v5205_v32 = vunpack.i.l.bf16 %v11705_v27  ;;  %v5845_v61 = vunpack.i.l.bf16 %v5844_v48 }
 0x5bd   :  { %v3321_v16 = vpack.c.bf16 %v3174_v4, %v3173_v26  ;;  %v5850_v4 = vunpack.i.l.bf16 %v9586_v22  ;;  %v5855_v20 = vunpack.i.l.bf16 %v9588_v38 }
 0x5be   :  { %v2857_v25 = vsel %vm518_vm0, %v11708_v15, %v5205_v32 }
 0x5c1   :  { %v3788_v23 = vpop.f32.mrf.mxu2 }
 0x5c2   :  { %v9581_v57 = vadd.f32 %v3788_v23, %v3619_v18  ;;  %v3622_v40 = vpop.f32.mrf.mxu1  ;;  %v5840_v18 = vunpack.i.l.bf16 %v5839_v36  ;;  %v9594_v5 = vpop.permute.xlu1 %5858  ;;  %v3048_v23 = vsel %vm518_vm0, %v11706_v34, %v5835_v63  ;;  %v5846_v34 = vunpack.i.h.bf16 %v5844_v48 }
 0x5c3   :  { %v2919_v36 = vsel %vm2872_vm7, %v2857_v25, %v5850_v4 }
 0x5c4   :  { %11703 = vst [vmem:[#allocation19_spill] sm:$0xff] %v9581_v57  ;;  %v3112_v26 = vsel %vm2872_vm7, %v3048_v23, %v5840_v18 }
 0x5c5   :  { %3661 = vmatmul.bf16.gmra.mxu1 %v3320_v43  ;;  %v3176_v57 = vsel %vm2934_vm8, %v3112_v26, %v5845_v61  ;;  %v11710_v61 = vld [vmem:[#allocation103_spill] sm:$0xff] }
 0x5c6   :  { %3830 = vmatmul.bf16.gmra.mxu2 %v3321_v16  ;;  %v5831_v16 = vunpack.i.h.bf16 %v9555_v1  ;;  %v2984_v1 = vsel %vm2934_vm8, %v2919_v36, %v5855_v20  ;;  %v5210_v26 = vunpack.i.l.bf16 %v11710_v61 }
 0x5c9   :  { %v3791_v53 = vpop.f32.mrf.mxu2 }
 0x5ca   :  { %v9591_v39 = vadd.f32 %v3791_v53, %v3622_v40  ;;  %v3624_v62 = vpop.f32.mrf.mxu1  ;;  %v11707_v40 = vld [vmem:[#allocation59_spill] sm:$0xff]  ;;  %v9620_v48 = vpop.permute.xlu1 %5873 }
 0x5cb   :  { %v3047_v3 = vsel %vm518_vm0, %v11707_v40, %v5811_v21  ;;  %v11709_v53 = vld [vmem:[#allocation15_spill] sm:$0xff]  ;;  %v5869_v21 = vpop.permute.xlu0 %5868  ;;  %v5875_v20 = vunpack.i.l.bf16 %v9620_v48 }
 0x5cc   :  { %11704 = vst [vmem:[#allocation20_spill] sm:$0xff] %v9591_v39  ;;  %v3111_v43 = vsel %vm2872_vm7, %v3047_v3, %v5826_v28  ;;  %v2856_v63 = vsel %vm518_vm0, %v11709_v53, %v5201_v58  ;;  %v5864_v39 = vpop.permute.xlu2 %5863  ;;  %v5836_v53 = vunpack.i.h.bf16 %v9566_v13 }
 0x5cd   :  { %v2918_v18 = vsel %vm2872_vm7, %v2856_v63, %v5841_v24  ;;  %v3175_v32 = vsel %vm2934_vm8, %v3111_v43, %v5831_v16  ;;  %v5860_v24 = vunpack.i.l.bf16 %v9594_v5  ;;  %v5206_v16 = vunpack.i.h.bf16 %v11705_v27 }
 0x5ce   :  { %v2983_v3 = vsel %vm2934_vm8, %v2918_v18, %v5846_v34  ;;  %v3324_v58 = vpack.c.bf16 %v3176_v57, %v3175_v32  ;;  %v5866_v63 = vunpack.i.h.bf16 %v5864_v39  ;;  %v11712_v34 = vld [vmem:[#allocation62_spill] sm:$0xff]  ;;  %v5870_v18 = vunpack.i.l.bf16 %v5869_v21 }
 0x5cf   :  { %v3323_v4 = vpack.c.bf16 %v2984_v1, %v2983_v3  ;;  %v3050_v36 = vsel %vm518_vm0, %v11712_v34, %v5860_v24  ;;  %v5865_v1 = vunpack.i.l.bf16 %v5864_v39  ;;  %v5871_v32 = vunpack.i.h.bf16 %v5869_v21  ;;  %v11714_v34 = vld [vmem:[#allocation67_spill] sm:$0xff] }
 0x5d0   :  { %v5856_v3 = vunpack.i.h.bf16 %v9588_v38 }
 0x5d1   :  { %v3793_v23 = vpop.f32.mrf.mxu2  ;;  %v3114_v24 = vsel %vm2872_vm7, %v3050_v36, %v5865_v1 }
 0x5d2   :  { %v9615_v40 = vadd.f32 %v3793_v23, %v3624_v62  ;;  %v3627_v28 = vpop.f32.mrf.mxu1  ;;  %v5851_v23 = vunpack.i.h.bf16 %v9586_v22  ;;  %v3049_v22 = vsel %vm518_vm0, %v11714_v34, %v5836_v53  ;;  %v5211_v34 = vunpack.i.h.bf16 %v11710_v61 }
 0x5d3   :  { %v9630_v43 = vpop.permute.xlu0 %5883 }
 0x5d4   :  { %v9626_v25 = vpop.permute.xlu2 %5878  ;;  %v3113_v38 = vsel %vm2872_vm7, %v3049_v22, %v5851_v23  ;;  %v11715_v23 = vld [vmem:[#allocation102_spill] sm:$0xff]  ;;  %v5876_v22 = vunpack.i.h.bf16 %v9620_v48  ;;  %v11717_v48 = vld [vmem:[#allocation89_spill] sm:$0xff] }
 0x5d5   :  { %3666 = vmatmul.bf16.gmra.mxu1 %v3323_v4  ;;  %v11713_v4 = vld [vmem:[#allocation71_spill] sm:$0xff] }
 0x5d6   :  { %3835 = vmatmul.bf16.gmra.mxu2 %v3324_v58  ;;  %v5889_v58 = vpop.permute.xlu1 %5888  ;;  %v2858_v13 = vsel %vm518_vm0, %v11713_v4, %v5206_v16 }
 0x5d7   :  { %v2920_v39 = vsel %vm2872_vm7, %v2858_v13, %v5866_v63  ;;  %v5885_v63 = vunpack.i.l.bf16 %v9630_v43  ;;  %v5215_v13 = vunpack.i.l.bf16 %v11715_v23 }
 0x5d9   :  { %v3796_v15 = vpop.f32.mrf.mxu2 }
 0x5da   :  { %v9624_v62 = vadd.f32 %v3796_v15, %v3627_v28  ;;  %v3629_v57 = vpop.f32.mrf.mxu1  ;;  %v2859_v28 = vsel %vm518_vm0, %v8775_v31, %v5210_v26  ;;  %v5880_v15 = vunpack.i.l.bf16 %v9626_v25  ;;  %v3178_v31 = vsel %vm2934_vm8, %v3114_v24, %v5870_v18 }
 0x5db   :  { %v2921_v27 = vsel %vm2872_vm7, %v2859_v28, %v5875_v20  ;;  %v2985_v20 = vsel %vm2934_vm8, %v2920_v39, %v5871_v32  ;;  %v3177_v28 = vsel %vm2934_vm8, %v3113_v38, %v5856_v3  ;;  %v9654_v53 = vpop.permute.xlu0 %5898  ;;  %v5890_v32 = vunpack.i.l.bf16 %v5889_v58 }
 0x5dc   :  { %11711 = vst [vmem:[#allocation80_spill] sm:$0xff] %v9624_v62  ;;  %v2986_v16 = vsel %vm2934_vm8, %v2921_v27, %v5880_v15  ;;  %v3327_v36 = vpack.c.bf16 %v3178_v31, %v3177_v28  ;;  %v5894_v1 = vpop.permute.xlu2 %5893  ;;  %v5861_v3 = vunpack.i.h.bf16 %v9594_v5  ;;  %v3052_v27 = vsel %vm518_vm0, %v11618_v8, %v5885_v63  ;;  %v9670_v31 = vpop.f32.mrf.mxu3  ;;  %v11716_v8 = vld [vmem:[#allocation63_spill] sm:$0xff] }
 0x5dd   :  { %v3326_v62 = vpack.c.bf16 %v2986_v16, %v2985_v20  ;;  %v5900_v15 = vunpack.i.l.bf16 %v9654_v53  ;;  %v5891_v39 = vunpack.i.h.bf16 %v5889_v58  ;;  %v3116_v38 = vsel %vm2872_vm7, %v3052_v27, %v5890_v32 }
 0x5de   :  { %v9657_v18 = vpop.permute.xlu1 %5903  ;;  %v5895_v20 = vunpack.i.l.bf16 %v5894_v1  ;;  %v3051_v28 = vsel %vm518_vm0, %v11716_v8, %v5861_v3  ;;  %v2860_v58 = vsel %vm518_vm0, %v11717_v48, %v5211_v34  ;;  %v5896_v32 = vunpack.i.h.bf16 %v5894_v1  ;;  %v11719_v48 = vld [vmem:[#allocation96_spill] sm:$0xff] }
 0x5df   :  { %v5905_v5 = vunpack.i.l.bf16 %v9657_v18  ;;  %v2922_v63 = vsel %vm2872_vm7, %v2860_v58, %v5891_v39  ;;  %v5220_v58 = vunpack.i.l.bf16 %v11719_v48 }
 0x5e0   :  { %v2987_v34 = vsel %vm2934_vm8, %v2922_v63, %v5896_v32 }
 0x5e1   :  { %v3798_v21 = vpop.f32.mrf.mxu2 }
 0x5e2   :  { %v9649_v26 = vadd.f32 %v3798_v21, %v3629_v57  ;;  %v3632_v4 = vpop.f32.mrf.mxu1  ;;  %v2861_v21 = vsel %vm518_vm0, %v8855_v10, %v5215_v13  ;;  %v3180_v13 = vsel %vm2934_vm8, %v3116_v38, %v5895_v20 }
 0x5e3   :  { %v2923_v61 = vsel %vm2872_vm7, %v2861_v21, %v5900_v15  ;;  %v5914_v10 = vpop.permute.xlu0 %5913 }
 0x5e4   :  { %v9674_v16 = vpop.permute.xlu2 %5908  ;;  %v2988_v3 = vsel %vm2934_vm8, %v2923_v61, %v5905_v5  ;;  %v5886_v61 = vunpack.i.h.bf16 %v9630_v43  ;;  %v5916_v32 = vunpack.i.h.bf16 %v5914_v10 }
 0x5e5   :  { %3671 = vmatmul.bf16.gmra.mxu1 %v3326_v62  ;;  %v5910_v39 = vunpack.i.l.bf16 %v9674_v16 }
 0x5e6   :  { %3840 = vmatmul.bf16.gmra.mxu2 %v3327_v36  ;;  %v5881_v36 = vunpack.i.h.bf16 %v9626_v25  ;;  %v5919_v8 = vpop.permute.xlu1 %5918  ;;  %v9690_v25 = vpop.f32.mrf.mxu3 }
 0x5e7   :  { %11718 = vst [vmem:[#allocation21_spill] sm:$0xff] %v9690_v25 }
 0x5e9   :  { %v3801_v57 = vpop.f32.mrf.mxu2 }
 0x5ea   :  { %v9660_v24 = vadd.f32 %v3801_v57, %v3632_v4  ;;  %v3634_v62 = vpop.f32.mrf.mxu1  ;;  %v3115_v4 = vsel %vm2872_vm7, %v3051_v28, %v5876_v22  ;;  %v3329_v28 = vpack.c.bf16 %v2988_v3, %v2987_v34  ;;  %v5920_v3 = vunpack.i.l.bf16 %v5919_v8  ;;  %v11720_v34 = vld [vmem:[#allocation65_spill] sm:$0xff] }
 0x5eb   :  { %v3179_v15 = vsel %vm2934_vm8, %v3115_v4, %v5881_v36  ;;  %v9695_v20 = vpop.permute.xlu0 %5928  ;;  %v5216_v4 = vunpack.i.h.bf16 %v11715_v23  ;;  %v5901_v36 = vunpack.i.h.bf16 %v9654_v53  ;;  %v5906_v23 = vunpack.i.h.bf16 %v9657_v18 }
 0x5ec   :  { %v3330_v22 = vpack.c.bf16 %v3180_v13, %v3179_v15  ;;  %v9693_v38 = vpop.permute.xlu2 %5923  ;;  %v5930_v43 = vunpack.i.l.bf16 %v9695_v20  ;;  %v2863_v53 = vsel %vm518_vm0, %v8904_v42, %v5220_v58 }
 0x5ed   :  { %v5925_v13 = vunpack.i.l.bf16 %v9693_v38 }
 0x5ee   :  { %v9706_v15 = vpop.permute.xlu1 %5933 }
 0x5f1   :  { %v3803_v57 = vpop.f32.mrf.mxu2 }
 0x5f2   :  { %v9685_v27 = vadd.f32 %v3803_v57, %v3634_v62  ;;  %v3637_v21 = vpop.f32.mrf.mxu1  ;;  %v5915_v62 = vunpack.i.l.bf16 %v5914_v10  ;;  %v3054_v57 = vsel %vm518_vm0, %v11629_v7, %v5910_v39  ;;  %v2862_v7 = vsel %vm518_vm0, %v8858_v9, %v5216_v4 }
 0x5f3   :  { %v2925_v39 = vsel %vm2872_vm7, %v2863_v53, %v5925_v13  ;;  %v5944_v9 = vpop.permute.xlu0 %5943 }
 0x5f4   :  { %v2990_v18 = vsel %vm2934_vm8, %v2925_v39, %v5930_v43  ;;  %v5939_v42 = vpop.permute.xlu2 %5938 }
 0x5f5   :  { %3676 = vmatmul.bf16.gmra.mxu1 %v3329_v28  ;;  %v5921_v28 = vunpack.i.h.bf16 %v5919_v8 }
 0x5f6   :  { %3845 = vmatmul.bf16.gmra.mxu2 %v3330_v22  ;;  %v3053_v22 = vsel %vm518_vm0, %v11720_v34, %v5886_v61  ;;  %v9724_v61 = vpop.f32.mrf.mxu3 }
 0x5f7   :  { %v3117_v10 = vsel %vm2872_vm7, %v3053_v22, %v5901_v36 }
 0x5f8   :  { %v3181_v58 = vsel %vm2934_vm8, %v3117_v10, %v5906_v23  ;;  %v5221_v23 = vunpack.i.h.bf16 %v11719_v48  ;;  %v5911_v10 = vunpack.i.h.bf16 %v9674_v16  ;;  %v5931_v48 = vunpack.i.h.bf16 %v9695_v20 }
 0x5f9   :  { %v3806_v1 = vpop.f32.mrf.mxu2 }
 0x5fa   :  { %v9697_v5 = vadd.f32 %v3806_v1, %v3637_v21  ;;  %v3639_v63 = vpop.f32.mrf.mxu1  ;;  %v3118_v21 = vsel %vm2872_vm7, %v3054_v57, %v5915_v62  ;;  %v2924_v1 = vsel %vm2872_vm7, %v2862_v7, %v5916_v32  ;;  %v9728_v32 = vpop.permute.xlu1 %5948  ;;  %v2864_v16 = vsel %vm518_vm0, %v8938_v35, %v5221_v23 }
 0x5fb   :  { %v3182_v57 = vsel %vm2934_vm8, %v3118_v21, %v5920_v3  ;;  %v2989_v8 = vsel %vm2934_vm8, %v2924_v1, %v5921_v28  ;;  %v11721_v21 = vld [vmem:[#allocation108_spill] sm:$0xff]  ;;  %v5950_v22 = vunpack.i.l.bf16 %v9728_v32  ;;  %v5941_v28 = vunpack.i.h.bf16 %v5939_v42 }
 0x5fc   :  { %v3333_v36 = vpack.c.bf16 %v3182_v57, %v3181_v58  ;;  %v3332_v13 = vpack.c.bf16 %v2990_v18, %v2989_v8  ;;  %v5225_v43 = vunpack.i.l.bf16 %v11721_v21  ;;  %v5954_v39 = vpop.permute.xlu2 %5953  ;;  %v5926_v18 = vunpack.i.h.bf16 %v9693_v38  ;;  %v9744_v8 = vpop.permute.xlu0 %5958 }
 0x5fd   :  { %v5940_v58 = vunpack.i.l.bf16 %v5939_v42 }
 0x5fe   :  { %v9736_v7 = vpop.f32.mrf.mxu3  ;;  %v2865_v57 = vsel %vm518_vm0, %v8974_v30, %v5225_v43  ;;  %v2926_v30 = vsel %vm2872_vm7, %v2864_v16, %v5941_v28 }
 0x601   :  { %v3808_v62 = vpop.f32.mrf.mxu2 }
 0x602   :  { %v9721_v25 = vadd.f32 %v3808_v62, %v3639_v63  ;;  %v3642_v4 = vpop.f32.mrf.mxu1  ;;  %v5935_v63 = vunpack.i.l.bf16 %v9706_v15  ;;  %v5945_v62 = vunpack.i.l.bf16 %v5944_v9  ;;  %v5964_v38 = vpop.permute.xlu1 %5963 }
 0x603   :  { %v5965_v16 = vunpack.i.l.bf16 %v5964_v38 }
 0x604   :  { %v3056_v1 = vsel %vm518_vm0, %v11637_v11, %v5935_v63  ;;  %v3055_v63 = vsel %vm518_vm0, %v11636_v55, %v5911_v10  ;;  %v5960_v10 = vunpack.i.l.bf16 %v9744_v8  ;;  %v5974_v28 = vpop.permute.xlu0 %5973 }
 0x605   :  { %3681 = vmatmul.bf16.gmra.mxu1 %v3332_v13  ;;  %v5955_v13 = vunpack.i.l.bf16 %v5954_v39  ;;  %v3120_v11 = vsel %vm2872_vm7, %v3056_v1, %v5940_v58  ;;  %v5969_v58 = vpop.permute.xlu2 %5968 }
 0x606   :  { %3850 = vmatmul.bf16.gmra.mxu2 %v3333_v36  ;;  %v2927_v36 = vsel %vm2872_vm7, %v2865_v57, %v5950_v22  ;;  %v9761_v55 = vpop.f32.mrf.mxu3 }
 0x607   :  { %v2992_v35 = vsel %vm2934_vm8, %v2927_v36, %v5955_v13  ;;  %v5936_v36 = vunpack.i.h.bf16 %v9706_v15  ;;  %v5975_v13 = vunpack.i.l.bf16 %v5974_v28 }
 0x609   :  { %v3811_v3 = vpop.f32.mrf.mxu2  ;;  %v3057_v15 = vsel %vm518_vm0, %v11638_v60, %v5936_v36 }
 0x60a   :  { %v9732_v34 = vadd.f32 %v3811_v3, %v3642_v4  ;;  %v3644_v53 = vpop.f32.mrf.mxu1  ;;  %v5946_v4 = vunpack.i.h.bf16 %v5944_v9  ;;  %v3184_v9 = vsel %vm2934_vm8, %v3120_v11, %v5945_v62  ;;  %v3119_v3 = vsel %vm2872_vm7, %v3055_v63, %v5926_v18  ;;  %v11722_v18 = vld [vmem:[#allocation107_spill] sm:$0xff]  ;;  %v5979_v11 = vpop.permute.xlu1 %5978 }
 0x60b   :  { %v3183_v22 = vsel %vm2934_vm8, %v3119_v3, %v5931_v48  ;;  %v3058_v48 = vsel %vm518_vm0, %v11644_v2, %v5960_v10  ;;  %v5226_v63 = vunpack.i.h.bf16 %v11721_v21  ;;  %v5971_v10 = vunpack.i.h.bf16 %v5969_v58 }
 0x60c   :  { %v2991_v43 = vsel %vm2934_vm8, %v2926_v30, %v5946_v4  ;;  %v3336_v1 = vpack.c.bf16 %v3184_v9, %v3183_v22  ;;  %v5951_v30 = vunpack.i.h.bf16 %v9728_v32  ;;  %v5966_v9 = vunpack.i.h.bf16 %v5964_v38 }
 0x60d   :  { %v3335_v57 = vpack.c.bf16 %v2992_v35, %v2991_v43  ;;  %v3122_v43 = vsel %vm2872_vm7, %v3058_v48, %v5965_v16  ;;  %v5980_v35 = vunpack.i.l.bf16 %v5979_v11  ;;  %v5970_v22 = vunpack.i.l.bf16 %v5969_v58  ;;  %v2379_v16 = vpop.permute.xlu2 %2378 }
 0x60e   :  { %v3121_v21 = vsel %vm2872_vm7, %v3057_v15, %v5951_v30  ;;  %v9781_v32 = vpop.f32.mrf.mxu3  ;;  %v5956_v38 = vunpack.i.h.bf16 %v5954_v39  ;;  %v5976_v15 = vunpack.i.h.bf16 %v5974_v28 }
 0x611   :  { %v3813_v42 = vpop.f32.mrf.mxu2 }
 0x612   :  { %v9756_v20 = vadd.f32 %v3813_v42, %v3644_v53  ;;  %v3647_v23 = vpop.f32.mrf.mxu1  ;;  %v5230_v53 = vunpack.i.l.bf16 %v11722_v18 }
 0x614   :  { %v2867_v3 = vsel %vm518_vm0, %v9073_v44, %v5230_v53  ;;  %v3185_v53 = vsel %vm2934_vm8, %v3121_v21, %v5956_v38 }
 0x615   :  { %3686 = vmatmul.bf16.gmra.mxu1 %v3335_v57  ;;  %v2929_v2 = vsel %vm2872_vm7, %v2867_v3, %v5975_v13  ;;  %v3186_v57 = vsel %vm2934_vm8, %v3122_v43, %v5970_v22  ;;  %v5984_v13 = vpop.permute.xlu0 %5983  ;;  %v11723_v43 = vld [vmem:[#allocation101_spill] sm:$0xff]  ;;  %v5231_v22 = vunpack.i.h.bf16 %v11722_v18 }
 0x616   :  { %3855 = vmatmul.bf16.gmra.mxu2 %v3336_v1  ;;  %v2994_v60 = vsel %vm2934_vm8, %v2929_v2, %v5980_v35  ;;  %v3339_v48 = vpack.c.bf16 %v3186_v57, %v3185_v53  ;;  %v5985_v30 = vunpack.i.l.bf16 %v5984_v13  ;;  %v9792_v58 = vpop.f32.mrf.mxu3  ;;  %v5235_v35 = vunpack.i.l.bf16 %v11723_v43 }
 0x617   :  { %v5986_v21 = vunpack.i.h.bf16 %v5984_v13 }
 0x618   :  { %v2869_v28 = vsel %vm518_vm0, %v9106_v6, %v5235_v35 }
 0x619   :  { %v3816_v62 = vpop.f32.mrf.mxu2 }
 0x61a   :  { %v9765_v4 = vadd.f32 %v3816_v62, %v3647_v23  ;;  %v3649_v42 = vpop.f32.mrf.mxu1  ;;  %v2866_v23 = vsel %vm518_vm0, %v9023_v19, %v5226_v63 }
 0x61b   :  { %v2928_v1 = vsel %vm2872_vm7, %v2866_v23, %v5966_v9  ;;  %v5989_v9 = vpop.permute.xlu1 %5988  ;;  %v3060_v23 = vsel %vm518_vm0, %v11651_v45, %v2379_v16 }
 0x61c   :  { %v2993_v19 = vsel %vm2934_vm8, %v2928_v1, %v5971_v10  ;;  %v5990_v38 = vunpack.i.l.bf16 %v5989_v9  ;;  %v1964_v1 = vpop.permute.xlu2 %1963  ;;  %v5981_v10 = vunpack.i.h.bf16 %v5979_v11  ;;  %v5991_v53 = vunpack.i.h.bf16 %v5989_v9 }
 0x61d   :  { %v3338_v63 = vpack.c.bf16 %v2994_v60, %v2993_v19  ;;  %v2185_v60 = vpop.permute.xlu0 %2184  ;;  %v2931_v45 = vsel %vm2872_vm7, %v2869_v28, %v1964_v1  ;;  %v11724_v1 = vld [vmem:[#allocation47_spill] sm:$0xff] }
 0x621   :  { %v3818_v44 = vpop.f32.mrf.mxu2 }
 0x622   :  { %v9785_v62 = vadd.f32 %v3818_v44, %v3649_v42  ;;  %v3652_v36 = vpop.f32.mrf.mxu1  ;;  %v5961_v42 = vunpack.i.h.bf16 %v9744_v8  ;;  %v3124_v44 = vsel %vm2872_vm7, %v3060_v23, %v5985_v30  ;;  %v2868_v8 = vsel %vm518_vm0, %v9067_v50, %v5231_v22 }
 0x623   :  { %v2930_v16 = vsel %vm2872_vm7, %v2868_v8, %v5986_v21  ;;  %v3188_v19 = vsel %vm2934_vm8, %v3124_v44, %v5990_v38  ;;  %v5994_v13 = vpop.permute.xlu1 %5993  ;;  %v5236_v38 = vunpack.i.h.bf16 %v11723_v43  ;;  %v5240_v44 = vunpack.i.l.bf16 %v11724_v1  ;;  %v11728_v1 = vld [vmem:[#allocation75_spill] sm:$0xff] }
 0x624   :  { %v3059_v57 = vsel %vm518_vm0, %v11647_v17, %v5961_v42  ;;  %v2996_v17 = vsel %vm2934_vm8, %v2931_v45, %v2185_v60  ;;  %v2995_v50 = vsel %vm2934_vm8, %v2930_v16, %v5991_v53  ;;  %v5996_v9 = vunpack.i.h.bf16 %v5994_v13  ;;  %v5999_v22 = vpop.permute.xlu2 %5998 }
 0x625   :  { %3691 = vmatmul.bf16.gmra.mxu1 %v3338_v63  ;;  %v3123_v18 = vsel %vm2872_vm7, %v3059_v57, %v5976_v15  ;;  %v3341_v30 = vpack.c.bf16 %v2996_v17, %v2995_v50  ;;  %v5995_v42 = vunpack.i.l.bf16 %v5994_v13  ;;  %v6004_v21 = vpop.permute.xlu0 %6003  ;;  %v6000_v60 = vunpack.i.l.bf16 %v5999_v22 }
 0x626   :  { %3860 = vmatmul.bf16.gmra.mxu2 %v3339_v48  ;;  %v3187_v48 = vsel %vm2934_vm8, %v3123_v18, %v5981_v10  ;;  %v6001_v10 = vunpack.i.h.bf16 %v5999_v22  ;;  %v6006_v8 = vunpack.i.h.bf16 %v6004_v21  ;;  %v6005_v28 = vunpack.i.l.bf16 %v6004_v21 }
 0x627   :  { %v3342_v63 = vpack.c.bf16 %v3188_v19, %v3187_v48  ;;  %v3061_v23 = vsel %vm518_vm0, %v9189_v14, %v5995_v42  ;;  %v2870_v14 = vsel %vm518_vm0, %v9153_v37, %v5236_v38  ;;  %v2871_v43 = vsel %vm518_vm0, %v9186_v52, %v5240_v44  ;;  %v11727_v38 = vld [vmem:[#allocation84_spill] sm:$0xff] }
 0x628   :  { %v3125_v18 = vsel %vm2872_vm7, %v3061_v23, %v8102_v12  ;;  %v2932_v45 = vsel %vm2872_vm7, %v2870_v14, %v6000_v60  ;;  %v2933_v16 = vsel %vm2872_vm7, %v2871_v43, %v6001_v10  ;;  %v11726_v23 = vld [vmem:[#allocation79_spill] sm:$0xff]  ;;  %v9859_v44 = vadd.f32 %v11728_v1, %v11727_v38  ;;  %v11730_v10 = vld [vmem:[#allocation85_spill] sm:$0xff]  ;;  %v11739_v38 = vld [vmem:[#allocation78_spill] sm:$0xff] }
 0x629   :  { %v3821_v39 = vpop.f32.mrf.mxu2  ;;  %v3189_v19 = vsel %vm2934_vm8, %v3125_v18, %v9233_v51  ;;  %v2997_v48 = vsel %vm2934_vm8, %v2932_v45, %v6005_v28  ;;  %v2998_v37 = vsel %vm2934_vm8, %v2933_v16, %v6006_v8  ;;  %v11731_v18 = vld [vmem:[#allocation88_spill] sm:$0xff]  ;;  %v11733_v16 = vld [vmem:[#allocation43_spill] sm:$0xff]  ;;  %v11740_v1 = vld [vmem:[#allocation46_spill] sm:$0xff] }
 0x62a   :  { %v9790_v3 = vadd.f32 %v3821_v39, %v3652_v36  ;;  %v3654_v2 = vpop.f32.mrf.mxu1  ;;  %v9815_v39 = vpop.f32.mrf.mxu3  ;;  %v3344_v52 = vpack.c.bf16 %v2998_v37, %v2997_v48 }
 0x631   :  { %v3823_v36 = vpop.f32.mrf.mxu2 }
 0x632   :  { %v9811_v11 = vadd.f32 %v3823_v36, %v3654_v2  ;;  %v3657_v6 = vpop.f32.mrf.mxu1  ;;  %v3062_v2 = vsel %vm518_vm0, %v9240_v46, %v5996_v9  ;;  %v9829_v46 = vpop.f32.mrf.mxu3 }
 0x633   :  { %v3126_v53 = vsel %vm2872_vm7, %v3062_v2, %v8102_v12  ;;  %v11725_v2 = vld [vmem:[#allocation48_spill] sm:$0xff] }
 0x634   :  { %v3190_v17 = vsel %vm2934_vm8, %v3126_v53, %v9233_v51  ;;  %v9855_v21 = vadd.f32 %v11726_v23, %v11725_v2  ;;  %v11732_v53 = vld [vmem:[#allocation91_spill] sm:$0xff] }
 0x635   :  { %3696 = vmatmul.bf16.gmra.mxu1 %v3341_v30  ;;  %v3345_v13 = vpack.c.bf16 %v3190_v17, %v3189_v19  ;;  %v9869_v14 = vadd.f32 %v11732_v53, %v11731_v18  ;;  %v11743_v18 = vld [vmem:[#allocation114_spill] sm:$0xff] }
 0x636   :  { %3865 = vmatmul.bf16.gmra.mxu2 %v3342_v63  ;;  %v4047_v28 = vadd.f32 %v9855_v21, %v9859_v44 }
 0x639   :  { %v3826_v35 = vpop.f32.mrf.mxu2 }
 0x63a   :  { %v9817_v15 = vadd.f32 %v3826_v35, %v3657_v6  ;;  %v3659_v57 = vpop.f32.mrf.mxu1  ;;  %v9845_v6 = vpop.f32.mrf.mxu3 }
 0x641   :  { %v3828_v36 = vpop.f32.mrf.mxu2 }
 0x642   :  { %v9841_v12 = vadd.f32 %v3828_v36, %v3659_v57  ;;  %v3662_v50 = vpop.f32.mrf.mxu1  ;;  %v9851_v51 = vpop.f32.mrf.mxu3  ;;  %v11729_v57 = vld [vmem:[#allocation23_spill] sm:$0xff]  ;;  %v11734_v36 = vld [vmem:[#allocation97_spill] sm:$0xff] }
 0x643   :  { %v9863_v60 = vadd.f32 %v11730_v10, %v11729_v57  ;;  %v9876_v19 = vadd.f32 %v11734_v36, %v11733_v16  ;;  %v9893_v57 = vadd.f32 %v11740_v1, %v11739_v38  ;;  %v11745_v36 = vld [vmem:[#allocation104_spill] sm:$0xff] }
 0x644   :  { %v11751_v38 = vld [vmem:[#allocation120_spill] sm:$0xff] }
 0x645   :  { %3701 = vmatmul.bf16.gmra.mxu1 %v3344_v52  ;;  %v4048_v45 = vadd.f32 %v4047_v28, %v9863_v60  ;;  %11741 = vst [vmem:[#allocation22_spill] sm:$0xff] %v9893_v57  ;;  %v11742_v28 = vld [vmem:[#allocation44_spill] sm:$0xff]  ;;  %v9915_v1 = vadd.f32 %v11751_v38, %v9167_v33 }
 0x646   :  { %3870 = vmatmul.bf16.gmra.mxu2 %v3345_v13  ;;  %v11736_v13 = vld [vmem:[#allocation100_spill] sm:$0xff]  ;;  %v9900_v53 = vadd.f32 %v11743_v18, %v11742_v28  ;;  %v11753_v18 = vld [vmem:[#allocation42_spill] sm:$0xff] }
 0x647   :  { %v4049_v37 = vadd.f32 %v4048_v45, %v9869_v14  ;;  %11752 = vst [vmem:[#allocation87_spill] sm:$0xff] %v9915_v1  ;;  %v11758_v33 = vld [vmem:[#allocation124_spill] sm:$0xff] }
 0x648   :  { %11744 = vst [vmem:[#allocation70_spill] sm:$0xff] %v9900_v53  ;;  %v9932_v38 = vadd.f32 %v11758_v33, %v9284_v41  ;;  %v11764_v33 = vld [vmem:[#allocation51_spill] sm:$0xff] }
 0x649   :  { %v3831_v63 = vpop.f32.mrf.mxu2 }
 0x64a   :  { %v9847_v30 = vadd.f32 %v3831_v63, %v3662_v50  ;;  %v3664_v9 = vpop.f32.mrf.mxu1  ;;  %v9878_v48 = vpop.f32.mrf.mxu3  ;;  %v11735_v50 = vld [vmem:[#allocation118_spill] sm:$0xff]  ;;  %v4050_v63 = vadd.f32 %v4049_v37, %v9876_v19  ;;  %v11746_v37 = vld [vmem:[#allocation116_spill] sm:$0xff]  ;;  %11759 = vst [vmem:[#allocation86_spill] sm:$0xff] %v9932_v38 }
 0x64b   :  { %v9883_v52 = vadd.f32 %v11736_v13, %v11735_v50  ;;  %v9905_v50 = vadd.f32 %v11746_v37, %v11745_v36  ;;  %v11754_v36 = vld [vmem:[#allocation122_spill] sm:$0xff] }
 0x64c   :  { %v9922_v37 = vadd.f32 %v11754_v36, %v11753_v18  ;;  %v11760_v18 = vld [vmem:[#allocation125_spill] sm:$0xff] }
 0x64d   :  { %v4051_v23 = vadd.f32 %v4050_v63, %v9883_v52  ;;  %11747 = vst [vmem:[#allocation5_spill] sm:$0xff] %v9905_v50  ;;  %v9939_v36 = vadd.f32 %v11760_v18, %v9321_v59  ;;  %v11767_v59 = vld [vmem:[#allocation115_spill] sm:$0xff] }
 0x64e   :  { %11755 = vst [vmem:[#allocation14_spill] sm:$0xff] %v9922_v37 }
 0x64f   :  { %11761 = vst [vmem:[#allocation9_spill] sm:$0xff] %v9939_v36 }
 0x651   :  { %v3833_v42 = vpop.f32.mrf.mxu2 }
 0x652   :  { %v9849_v35 = vadd.f32 %v3833_v42, %v3664_v9  ;;  %v3667_v22 = vpop.f32.mrf.mxu1  ;;  %v11737_v9 = vld [vmem:[#allocation95_spill] sm:$0xff]  ;;  %v11738_v42 = vld [vmem:[#allocation106_spill] sm:$0xff]  ;;  %v4015_v13 = vpop.f32.mrf.mxu3 }
 0x659   :  { %v3836_v8 = vpop.f32.mrf.mxu2 }
 0x65a   :  { %v9871_v43 = vadd.f32 %v3836_v8, %v3667_v22  ;;  %v3669_v17 = vpop.f32.mrf.mxu1  ;;  %v9888_v22 = vadd.f32 %v11738_v42, %v11737_v9  ;;  %v11748_v9 = vld [vmem:[#allocation77_spill] sm:$0xff] }
 0x65b   :  { %v11749_v42 = vld [vmem:[#allocation117_spill] sm:$0xff] }
 0x65c   :  { %v4052_v8 = vadd.f32 %v4051_v23, %v9888_v22 }
 0x65e   :  { %v4053_v16 = vadd.f32 %v4052_v8, %v9893_v57 }
 0x660   :  { %v4054_v63 = vadd.f32 %v4053_v16, %v9900_v53 }
 0x661   :  { %v3838_v2 = vpop.f32.mrf.mxu2 }
 0x662   :  { %v9895_v10 = vadd.f32 %v3838_v2, %v3669_v17  ;;  %v3672_v45 = vpop.f32.mrf.mxu1  ;;  %v9910_v17 = vadd.f32 %v11749_v42, %v11748_v9  ;;  %v4055_v23 = vadd.f32 %v4054_v63, %v9905_v50  ;;  %v11756_v9 = vld [vmem:[#allocation123_spill] sm:$0xff] }
 0x663   :  { %v9927_v42 = vadd.f32 %v11756_v9, %v9251_v56  ;;  %v11762_v9 = vld [vmem:[#allocation54_spill] sm:$0xff] }
 0x664   :  { %11750 = vst [vmem:[#allocation33_spill] sm:$0xff] %v9910_v17  ;;  %v4056_v8 = vadd.f32 %v4055_v23, %v9910_v17 }
 0x665   :  { %11757 = vst [vmem:[#allocation121_spill] sm:$0xff] %v9927_v42 }
 0x666   :  { %v4057_v53 = vadd.f32 %v4056_v8, %v9915_v1  ;;  %v9951_v1 = vadd.f32 %v11764_v33, %v9373_v47  ;;  %v11772_v47 = vld [vmem:[#allocation111_spill] sm:$0xff]  ;;  %v11773_v33 = vld [vmem:[#allocation38_spill] sm:$0xff] }
 0x668   :  { %v4058_v63 = vadd.f32 %v4057_v53, %v9922_v37  ;;  %v9946_v53 = vadd.f32 %v11762_v9, %v9345_v54  ;;  %11765 = vst [vmem:[#allocation36_spill] sm:$0xff] %v9951_v1 }
 0x669   :  { %v3841_v2 = vpop.f32.mrf.mxu2 }
 0x66a   :  { %v9917_v28 = vadd.f32 %v3841_v2, %v3672_v45  ;;  %v3674_v16 = vpop.f32.mrf.mxu1  ;;  %v9934_v45 = vpop.f32.mrf.mxu3  ;;  %v4059_v23 = vadd.f32 %v4058_v63, %v9927_v42  ;;  %11763 = vst [vmem:[#allocation52_spill] sm:$0xff] %v9946_v53  ;;  %v11766_v42 = vld [vmem:[#allocation41_spill] sm:$0xff] }
 0x66b   :  { %v9956_v18 = vadd.f32 %v11767_v59, %v11766_v42 }
 0x66c   :  { %v4060_v56 = vadd.f32 %v4059_v23, %v9932_v38  ;;  %v11769_v23 = vld [vmem:[#allocation112_spill] sm:$0xff] }
 0x66d   :  { %11768 = vst [vmem:[#allocation76_spill] sm:$0xff] %v9956_v18  ;;  %v11770_v38 = vld [vmem:[#allocation32_spill] sm:$0xff] }
 0x66e   :  { %v4061_v41 = vadd.f32 %v4060_v56, %v9939_v36  ;;  %v9961_v54 = vadd.f32 %v11770_v38, %v11769_v23  ;;  %v9968_v36 = vadd.f32 %v11773_v33, %v11772_v47  ;;  %v11778_v38 = vld [vmem:[#allocation82_spill] sm:$0xff] }
 0x670   :  { %v4062_v63 = vadd.f32 %v4061_v41, %v9946_v53  ;;  %11771 = vst [vmem:[#allocation28_spill] sm:$0xff] %v9961_v54 }
 0x671   :  { %v3843_v2 = vpop.f32.mrf.mxu2  ;;  %11774 = vst [vmem:[#allocation53_spill] sm:$0xff] %v9968_v36 }
 0x672   :  { %v9941_v8 = vadd.f32 %v3843_v2, %v3674_v16  ;;  %v3677_v37 = vpop.f32.mrf.mxu1  ;;  %v4063_v2 = vadd.f32 %v4062_v63, %v9951_v1  ;;  %v9963_v17 = vpop.f32.mrf.mxu3  ;;  %v11775_v63 = vld [vmem:[#allocation17_spill] sm:$0xff]  ;;  %v11776_v1 = vld [vmem:[#allocation68_spill] sm:$0xff] }
 0x673   :  { %v9977_v53 = vadd.f32 %v11776_v1, %v11775_v63 }
 0x674   :  { %v4064_v56 = vadd.f32 %v4063_v2, %v9956_v18  ;;  %v11785_v18 = vld [vmem:[#allocation72_spill] sm:$0xff] }
 0x675   :  { %11777 = vst [vmem:[#allocation34_spill] sm:$0xff] %v9977_v53 }
 0x676   :  { %v4065_v59 = vadd.f32 %v4064_v56, %v9961_v54  ;;  %v11784_v54 = vld [vmem:[#allocation50_spill] sm:$0xff] }
 0x677   :  { %v9994_v1 = vadd.f32 %v11785_v18, %v11784_v54  ;;  %v11792_v54 = vld [vmem:[#allocation24_spill] sm:$0xff] }
 0x679   :  { %v3846_v16 = vpop.f32.mrf.mxu2  ;;  %11786 = vst [vmem:[#allocation29_spill] sm:$0xff] %v9994_v1 }
 0x67a   :  { %v3847_v9 = vadd.f32 %v3846_v16, %v3677_v37  ;;  %v9972_v42 = vpop.f32.mrf.mxu1  ;;  %v4066_v37 = vadd.f32 %v4065_v59, %v9968_v36  ;;  %v11779_v16 = vld [vmem:[#allocation8_spill] sm:$0xff]  ;;  %v9998_v59 = vpop.f32.mrf.mxu3 }
 0x67b   :  { %v9982_v23 = vadd.f32 %v11779_v16, %v11778_v38  ;;  %v11787_v16 = vld [vmem:[#allocation26_spill] sm:$0xff] }
 0x67c   :  { %v9970_v41 = vadd.f32 %v4015_v13, %v3847_v9  ;;  %v4067_v47 = vadd.f32 %v4066_v37, %v9977_v53  ;;  %v11781_v13 = vld [vmem:[#allocation45_spill] sm:$0xff]  ;;  %v11782_v9 = vld [vmem:[#allocation74_spill] sm:$0xff]  ;;  %v10003_v36 = vadd.f32 %v11787_v16, %v9513_v49 }
 0x67d   :  { %11780 = vst [vmem:[#allocation7_spill] sm:$0xff] %v9982_v23  ;;  %v9989_v33 = vadd.f32 %v11782_v9, %v11781_v13  ;;  %v11789_v13 = vld [vmem:[#allocation18_spill] sm:$0xff]  ;;  %v11790_v9 = vld [vmem:[#allocation83_spill] sm:$0xff] }
 0x67e   :  { %v4068_v56 = vadd.f32 %v4067_v47, %v9982_v23  ;;  %11788 = vst [vmem:[#allocation119_spill] sm:$0xff] %v10003_v36  ;;  %v10008_v53 = vadd.f32 %v11790_v9, %v11789_v13  ;;  %v10015_v23 = vadd.f32 %v11792_v54, %v9547_v0  ;;  %v11796_v13 = vld [vmem:[#allocation19_spill] sm:$0xff]  ;;  %v11799_v0 = vld [vmem:[#allocation20_spill] sm:$0xff] }
 0x67f   :  { %11783 = vst [vmem:[#allocation93_spill] sm:$0xff] %v9989_v33  ;;  %v11797_v9 = vld [vmem:[#allocation27_spill] sm:$0xff] }
 0x680   :  { %v4069_v38 = vadd.f32 %v4068_v56, %v9989_v33  ;;  %11791 = vst [vmem:[#allocation6_spill] sm:$0xff] %v10008_v53  ;;  %v11794_v33 = vld [vmem:[#allocation58_spill] sm:$0xff]  ;;  %v11800_v54 = vld [vmem:[#allocation11_spill] sm:$0xff] }
 0x681   :  { %v9984_v2 = vpop.f32.mrf.mxu2  ;;  %11793 = vst [vmem:[#allocation55_spill] sm:$0xff] %v10015_v23  ;;  %v10020_v49 = vadd.f32 %v11794_v33, %v9558_v29  ;;  %v11801_v33 = vld [vmem:[#allocation94_spill] sm:$0xff] }
 0x682   :  { %v9996_v63 = vpop.f32.mrf.mxu1  ;;  %v4070_v37 = vadd.f32 %v4069_v38, %v9994_v1  ;;  %v10027_v1 = vadd.f32 %v11797_v9, %v11796_v13  ;;  %v10029_v50 = vpop.f32.mrf.mxu3  ;;  %v11803_v13 = vld [vmem:[#allocation80_spill] sm:$0xff] }
 0x683   :  { %11795 = vst [vmem:[#allocation92_spill] sm:$0xff] %v10020_v49  ;;  %v11804_v9 = vld [vmem:[#allocation12_spill] sm:$0xff] }
 0x684   :  { %v4071_v18 = vadd.f32 %v4070_v37, %v10003_v36  ;;  %11798 = vst [vmem:[#allocation30_spill] sm:$0xff] %v10027_v1  ;;  %v10034_v36 = vadd.f32 %v11800_v54, %v11799_v0  ;;  %v11806_v0 = vld [vmem:[#allocation105_spill] sm:$0xff] }
 0x685   :  { %v10051_v54 = vadd.f32 %v11806_v0, %v9649_v26  ;;  %v11810_v26 = vld [vmem:[#allocation110_spill] sm:$0xff] }
 0x686   :  { %v4072_v56 = vadd.f32 %v4071_v18, %v10008_v53  ;;  %v10041_v53 = vadd.f32 %v11801_v33, %v9615_v40  ;;  %v10068_v0 = vadd.f32 %v11810_v26, %v9697_v5 }
 0x687   :  { %11807 = vst [vmem:[#allocation113_spill] sm:$0xff] %v10051_v54 }
 0x688   :  { %v4073_v38 = vadd.f32 %v4072_v56, %v10015_v23  ;;  %11802 = vst [vmem:[#allocation69_spill] sm:$0xff] %v10041_v53  ;;  %v10046_v23 = vadd.f32 %v11804_v9, %v11803_v13  ;;  %v11809_v13 = vld [vmem:[#allocation109_spill] sm:$0xff] }
 0x689   :  { %v10010_v47 = vpop.f32.mrf.mxu2  ;;  %v10063_v9 = vadd.f32 %v11809_v13, %v9685_v27  ;;  %v11813_v13 = vld [vmem:[#allocation49_spill] sm:$0xff] }
 0x68a   :  { %v10022_v16 = vpop.f32.mrf.mxu1  ;;  %v4074_v37 = vadd.f32 %v4073_v38, %v10020_v49  ;;  %11805 = vst [vmem:[#allocation13_spill] sm:$0xff] %v10046_v23  ;;  %v10058_v40 = vpop.f32.mrf.mxu3  ;;  %v10083_v5 = vadd.f32 %v11813_v13, %v9756_v20  ;;  %v10098_v20 = vadd.f32 %v9724_v61, %v9790_v3  ;;  %v10113_v61 = vadd.f32 %v9781_v32, %v9841_v12 }
 0x68c   :  { %v4075_v29 = vadd.f32 %v4074_v37, %v10027_v1  ;;  %v11808_v37 = vld [vmem:[#allocation40_spill] sm:$0xff] }
 0x68d   :  { %v10056_v1 = vadd.f32 %v11808_v37, %v9660_v24  ;;  %v11811_v24 = vld [vmem:[#allocation64_spill] sm:$0xff] }
 0x68e   :  { %v4076_v56 = vadd.f32 %v4075_v29, %v10034_v36  ;;  %v10073_v37 = vadd.f32 %v11811_v24, %v9721_v25  ;;  %v10088_v25 = vadd.f32 %v9670_v31, %v9765_v4  ;;  %v10103_v31 = vadd.f32 %v9736_v7, %v9811_v11 }
 0x68f   :  { %v10118_v7 = vadd.f32 %v9792_v58, %v9847_v30  ;;  %v10133_v58 = vadd.f32 %v9845_v6, %v9895_v10  ;;  %v3852_v10 = vadd.f32 %v10010_v47, %v9996_v63 }
 0x690   :  { %v4077_v38 = vadd.f32 %v4076_v56, %v10041_v53 }
 0x691   :  { %v10036_v18 = vpop.f32.mrf.mxu2 }
 0x692   :  { %v3687_v57 = vpop.f32.mrf.mxu1  ;;  %v4078_v49 = vadd.f32 %v4077_v38, %v10046_v23  ;;  %v4030_v26 = vpop.f32.mrf.mxu3 }
 0x694   :  { %v4079_v33 = vadd.f32 %v4078_v49, %v10051_v54  ;;  %v11812_v49 = vld [vmem:[#allocation35_spill] sm:$0xff] }
 0x695   :  { %v10078_v54 = vadd.f32 %v11812_v49, %v9732_v34  ;;  %v11814_v34 = vld [vmem:[#allocation21_spill] sm:$0xff] }
 0x696   :  { %v4080_v56 = vadd.f32 %v4079_v33, %v10056_v1  ;;  %v10093_v49 = vadd.f32 %v11814_v34, %v9785_v62 }
 0x698   :  { %v4081_v23 = vadd.f32 %v4080_v56, %v10063_v9 }
 0x699   :  { %v3856_v29 = vpop.f32.mrf.mxu2 }
 0x69a   :  { %v3689_v38 = vpop.f32.mrf.mxu1  ;;  %v4082_v53 = vadd.f32 %v4081_v23, %v10068_v0  ;;  %v4032_v34 = vpop.f32.mrf.mxu3 }
 0x69c   :  { %v4083_v33 = vadd.f32 %v4082_v53, %v10073_v37 }
 0x69e   :  { %v4084_v56 = vadd.f32 %v4083_v33, %v10078_v54 }
 0x6a0   :  { %v4085_v23 = vadd.f32 %v4084_v56, %v10083_v5  ;;  %v10108_v56 = vadd.f32 %v9761_v55, %v9817_v15  ;;  %v10123_v55 = vadd.f32 %v9815_v39, %v9849_v35  ;;  %v10138_v39 = vadd.f32 %v9851_v51, %v9917_v28 }
 0x6a1   :  { %v3858_v27 = vpop.f32.mrf.mxu2  ;;  %v3854_v28 = vadd.f32 %v10036_v18, %v10022_v16 }
 0x6a2   :  { %v3692_v24 = vpop.f32.mrf.mxu1  ;;  %v4086_v53 = vadd.f32 %v4085_v23, %v10088_v25  ;;  %v4035_v30 = vpop.f32.mrf.mxu3  ;;  %v3859_v47 = vadd.f32 %v3858_v27, %v3689_v38 }
 0x6a3   :  { %v10162_v63 = vadd.f32 %v9998_v59, %v3854_v28 }
 0x6a4   :  { %v4087_v33 = vadd.f32 %v4086_v53, %v10093_v49 }
 0x6a6   :  { %v4088_v4 = vadd.f32 %v4087_v33, %v10098_v20  ;;  %v10128_v33 = vadd.f32 %v9829_v46, %v9871_v43  ;;  %v10143_v46 = vadd.f32 %v9878_v48, %v9941_v8  ;;  %v3849_v43 = vadd.f32 %v9984_v2, %v9972_v42 }
 0x6a7   :  { %v10158_v8 = vadd.f32 %v9963_v17, %v3852_v10  ;;  %v3857_v42 = vadd.f32 %v3856_v29, %v3687_v57  ;;  %v10170_v17 = vadd.f32 %v10058_v40, %v3859_v47 }
 0x6a8   :  { %v4089_v23 = vadd.f32 %v4088_v4, %v10103_v31  ;;  %v10152_v51 = vadd.f32 %v9934_v45, %v3849_v43 }
 0x6a9   :  { %v3861_v13 = vpop.f32.mrf.mxu2 }
 0x6aa   :  { %v3694_v62 = vpop.f32.mrf.mxu1  ;;  %v4090_v3 = vadd.f32 %v4089_v23, %v10108_v56  ;;  %v4037_v2 = vpop.f32.mrf.mxu3  ;;  %v3862_v16 = vadd.f32 %v3861_v13, %v3692_v24 }
 0x6ac   :  { %v4091_v53 = vadd.f32 %v4090_v3, %v10113_v61  ;;  %v10173_v43 = vadd.f32 %v4030_v26, %v3862_v16 }
 0x6ae   :  { %v4092_v15 = vadd.f32 %v4091_v53, %v10118_v7 }
 0x6b0   :  { %v4093_v12 = vadd.f32 %v4092_v15, %v10123_v55 }
 0x6b1   :  { %v3863_v11 = vpop.f32.mrf.mxu2 }
 0x6b2   :  { %v3697_v32 = vpop.f32.mrf.mxu1  ;;  %v4094_v4 = vadd.f32 %v4093_v12, %v10128_v33  ;;  %v3864_v57 = vadd.f32 %v3863_v11, %v3694_v62 }
 0x6b4   :  { %v4095_v23 = vadd.f32 %v4094_v4, %v10133_v58  ;;  %v10166_v4 = vadd.f32 %v10029_v50, %v3857_v42  ;;  %v4033_v10 = vadd.f32 %v4032_v34, %v3864_v57 }
 0x6b6   :  { %v4096_v6 = vadd.f32 %v4095_v23, %v10138_v39 }
 0x6b8   :  { %v4097_v53 = vadd.f32 %v4096_v6, %v10143_v46  ;;  %v4040_v6 = vpop.f32.mrf.mxu3 }
 0x6b9   :  { %v3866_v35 = vpop.f32.mrf.mxu2 }
 0x6ba   :  { %v3699_v3 = vpop.f32.mrf.mxu1  ;;  %v4098_v48 = vadd.f32 %v4097_v53, %v9970_v41  ;;  %v3867_v59 = vadd.f32 %v3866_v35, %v3697_v32 }
 0x6bc   :  { %v4099_v12 = vadd.f32 %v4098_v48, %v10152_v51  ;;  %v4036_v13 = vadd.f32 %v4035_v30, %v3867_v59 }
 0x6be   :  { %v4100_v45 = vadd.f32 %v4099_v12, %v10158_v8 }
 0x6c0   :  { %v4101_v18 = vadd.f32 %v4100_v45, %v10162_v63  ;;  %v4042_v47 = vpop.f32.mrf.mxu3 }
 0x6c1   :  { %v3868_v15 = vpop.f32.mrf.mxu2 }
 0x6c2   :  { %v3702_v29 = vpop.f32.mrf.mxu1  ;;  %v4102_v23 = vadd.f32 %v4101_v18, %v10166_v4  ;;  %v3869_v50 = vadd.f32 %v3868_v15, %v3699_v3 }
 0x6c4   :  { %v4103_v27 = vadd.f32 %v4102_v23, %v10170_v17  ;;  %v4038_v40 = vadd.f32 %v4037_v2, %v3869_v50 }
 0x6c6   :  { %v4104_v24 = vadd.f32 %v4103_v27, %v10173_v43 }
 0x6c8   :  { %v4105_v28 = vadd.f32 %v4104_v24, %v4033_v10 }
 0x6c9   :  { %v3871_v38 = vpop.f32.mrf.mxu2 }
 0x6ca   :  { %v3872_v53 = vadd.f32 %v3871_v38, %v3702_v29  ;;  %v4106_v48 = vadd.f32 %v4105_v28, %v4036_v13  ;;  %v3704_v11 = vpop.f32.mrf.mxu1 }
 0x6cc   :  { %v4041_v62 = vadd.f32 %v4040_v6, %v3872_v53  ;;  %v4107_v12 = vadd.f32 %v4106_v48, %v4038_v40 }
 0x6ce   :  { %v4108_v32 = vadd.f32 %v4107_v12, %v4041_v62  ;;  %v11826_v12 = vld [vmem:[#allocation70_spill] sm:$0xff] }
 0x6d1   :  { %v3873_v42 = vpop.f32.mrf.mxu2 }
 0x6d2   :  { %v3874_v26 = vadd.f32 %v3873_v42, %v3704_v11 }
 0x6d4   :  { %v4043_v35 = vadd.f32 %v4042_v47, %v3874_v26 }
 0x6d6   :  { %v4109_v45 = vadd.f32 %v4108_v32, %v4043_v35  ;;  %v11828_v32 = vld [vmem:[#allocation5_spill] sm:$0xff] }
 0x6d8   :  { %v4110_v16 = vrot.slane %v4109_v45, 4 }
 0x6da   :  { %v4111_v18 = vadd.f32 %v4110_v16, %v4109_v45 }
 0x6dc   :  { %v4112_v34 = vrot.slane %v4111_v18, 2 }
 0x6de   :  { %v4113_v3 = vadd.f32 %v4112_v34, %v4111_v18  ;;  %v11830_v18 = vld [vmem:[#allocation33_spill] sm:$0xff] }
 0x6e0   :  { %v4114_v15 = vrot.slane %v4113_v3, 1 }
 0x6e2   :  { %v4115_v57 = vadd.f32 %v4114_v15, %v4113_v3 }
 0x6e4   :  { %v10177_v30 = vmul.f32 0.001953125, %v4115_v57  ;;  %v11832_v57 = vld [vmem:[#allocation87_spill] sm:$0xff] }
 0x6e6   :  { %v10180_v2 = vsub.f32 %v4033_v10, %v10177_v30  ;;  %v10183_v29 = vsub.f32 %v4036_v13, %v10177_v30  ;;  %v10186_v23 = vsub.f32 %v4038_v40, %v10177_v30  ;;  %v10189_v59 = vsub.f32 %v4041_v62, %v10177_v30  ;;  %v11824_v62 = vld [vmem:[#allocation22_spill] sm:$0xff] }
 0x6e7   :  { %v10192_v6 = vsub.f32 %v4043_v35, %v10177_v30  ;;  %v10196_v38 = vsub.f32 %v9859_v44, %v10177_v30  ;;  %v10200_v27 = vsub.f32 %v9855_v21, %v10177_v30  ;;  %v10204_v10 = vsub.f32 %v9863_v60, %v10177_v30 }
 0x6e8   :  { %11815 = vst [vmem:[#allocation81_spill] sm:$0xff] %v10186_v23  ;;  %v10212_v13 = vsub.f32 %v9869_v14, %v10177_v30  ;;  %v10216_v44 = vsub.f32 %v9876_v19, %v10177_v30  ;;  %v10222_v60 = vsub.f32 %v9883_v52, %v10177_v30  ;;  %v10228_v14 = vsub.f32 %v9888_v22, %v10177_v30 }
 0x6e9   :  { %11816 = vst [vmem:[#allocation60_spill] sm:$0xff] %v10189_v59  ;;  %v4181_v50 = vmul.f32 %v10196_v38, %v10196_v38  ;;  %v4182_v24 = vmul.f32 %v10200_v27, %v10200_v27  ;;  %v4183_v21 = vmul.f32 %v10204_v10, %v10204_v10  ;;  %v10234_v11 = vsub.f32 %v11824_v62, %v10177_v30 }
 0x6ea   :  { %11817 = vst [vmem:[#allocation31_spill] sm:$0xff] %v10196_v38  ;;  %v4184_v28 = vmul.f32 %v10212_v13, %v10212_v13  ;;  %v4185_v19 = vmul.f32 %v10216_v44, %v10216_v44  ;;  %v4186_v52 = vmul.f32 %v10222_v60, %v10222_v60  ;;  %v10240_v26 = vsub.f32 %v11826_v12, %v10177_v30  ;;  %v11838_v12 = vld [vmem:[#allocation86_spill] sm:$0xff] }
 0x6eb   :  { %11818 = vst [vmem:[#allocation25_spill] sm:$0xff] %v10200_v27  ;;  %v4245_v53 = vadd.f32 %v4182_v24, %v4181_v50  ;;  %v4187_v22 = vmul.f32 %v10228_v14, %v10228_v14  ;;  %v10246_v35 = vsub.f32 %v11828_v32, %v10177_v30  ;;  %v4188_v45 = vmul.f32 %v10234_v11, %v10234_v11 }
 0x6ec   :  { %11819 = vst [vmem:[#allocation37_spill] sm:$0xff] %v10204_v10  ;;  %v10252_v34 = vsub.f32 %v11830_v18, %v10177_v30  ;;  %v4189_v3 = vmul.f32 %v10240_v26, %v10240_v26  ;;  %v10258_v50 = vsub.f32 %v11832_v57, %v10177_v30 }
 0x6ed   :  { %11820 = vst [vmem:[#allocation99_spill] sm:$0xff] %v10212_v13  ;;  %v4246_v40 = vadd.f32 %v4245_v53, %v4183_v21  ;;  %v4190_v24 = vmul.f32 %v10246_v35, %v10246_v35  ;;  %v11834_v53 = vld [vmem:[#allocation14_spill] sm:$0xff] }
 0x6ee   :  { %11821 = vst [vmem:[#allocation56_spill] sm:$0xff] %v10216_v44 }
 0x6ef   :  { %11822 = vst [vmem:[#allocation39_spill] sm:$0xff] %v10222_v60  ;;  %v4247_v48 = vadd.f32 %v4246_v40, %v4184_v28  ;;  %v10264_v28 = vsub.f32 %v11834_v53, %v10177_v30  ;;  %v4191_v40 = vmul.f32 %v10252_v34, %v10252_v34  ;;  %v11844_v53 = vld [vmem:[#allocation36_spill] sm:$0xff]  ;;  %v4240_v60 = vmul.f32 %v10180_v2, %v10180_v2 }
 0x6f0   :  { %11823 = vst [vmem:[#allocation16_spill] sm:$0xff] %v10228_v14 }
 0x6f1   :  { %11825 = vst [vmem:[#allocation61_spill] sm:$0xff] %v10234_v11  ;;  %v4248_v42 = vadd.f32 %v4247_v48, %v4185_v19  ;;  %v11836_v48 = vld [vmem:[#allocation121_spill] sm:$0xff] }
 0x6f2   :  { %11827 = vst [vmem:[#allocation98_spill] sm:$0xff] %v10240_v26  ;;  %v10270_v62 = vsub.f32 %v11836_v48, %v10177_v30 }
 0x6f3   :  { %v4249_v47 = vadd.f32 %v4248_v42, %v4186_v52  ;;  %11829 = vst [vmem:[#allocation57_spill] sm:$0xff] %v10246_v35  ;;  %v4192_v52 = vmul.f32 %v10258_v50, %v10258_v50 }
 0x6f4   :  { %11831 = vst [vmem:[#allocation73_spill] sm:$0xff] %v10252_v34  ;;  %v4194_v18 = vmul.f32 %v10270_v62, %v10270_v62 }
 0x6f5   :  { %v4250_v16 = vadd.f32 %v4249_v47, %v4187_v22  ;;  %11833 = vst [vmem:[#allocation90_spill] sm:$0xff] %v10258_v50  ;;  %v10276_v22 = vsub.f32 %v11838_v12, %v10177_v30  ;;  %v4193_v47 = vmul.f32 %v10264_v28, %v10264_v28 }
 0x6f6   :  { %11835 = vst [vmem:[#allocation66_spill] sm:$0xff] %v10264_v28 }
 0x6f7   :  { %v4251_v15 = vadd.f32 %v4250_v16, %v4188_v45  ;;  %11837 = vst [vmem:[#allocation59_spill] sm:$0xff] %v10270_v62  ;;  %v11840_v45 = vld [vmem:[#allocation9_spill] sm:$0xff] }
 0x6f8   :  { %11839 = vst [vmem:[#allocation10_spill] sm:$0xff] %v10276_v22  ;;  %v10282_v16 = vsub.f32 %v11840_v45, %v10177_v30 }
 0x6f9   :  { %v4252_v21 = vadd.f32 %v4251_v15, %v4189_v3  ;;  %v11842_v15 = vld [vmem:[#allocation52_spill] sm:$0xff] }
 0x6fa   :  { %11841 = vst [vmem:[#allocation15_spill] sm:$0xff] %v10282_v16  ;;  %v10288_v57 = vsub.f32 %v11842_v15, %v10177_v30  ;;  %v11848_v15 = vld [vmem:[#allocation53_spill] sm:$0xff] }
 0x6fb   :  { %v4253_v19 = vadd.f32 %v4252_v21, %v4190_v24  ;;  %v4195_v24 = vmul.f32 %v10276_v22, %v10276_v22 }
 0x6fc   :  { %11843 = vst [vmem:[#allocation103_spill] sm:$0xff] %v10288_v57  ;;  %v4197_v12 = vmul.f32 %v10288_v57, %v10288_v57 }
 0x6fd   :  { %v4254_v42 = vadd.f32 %v4253_v19, %v4191_v40  ;;  %v10294_v40 = vsub.f32 %v11844_v53, %v10177_v30  ;;  %v4196_v19 = vmul.f32 %v10282_v16, %v10282_v16  ;;  %v10312_v53 = vsub.f32 %v11848_v15, %v10177_v30  ;;  %v11851_v15 = vld [vmem:[#allocation93_spill] sm:$0xff] }
 0x6fe   :  { %v10330_v16 = vsub.f32 %v11851_v15, %v10177_v30  ;;  %v11854_v15 = vld [vmem:[#allocation6_spill] sm:$0xff] }
 0x6ff   :  { %v4255_v32 = vadd.f32 %v4254_v42, %v4192_v52  ;;  %11845 = vst [vmem:[#allocation62_spill] sm:$0xff] %v10294_v40  ;;  %v11846_v52 = vld [vmem:[#allocation76_spill] sm:$0xff]  ;;  %v10348_v28 = vsub.f32 %v11854_v15, %v10177_v30  ;;  %v11857_v15 = vld [vmem:[#allocation30_spill] sm:$0xff] }
 0x700   :  { %v10300_v42 = vsub.f32 %v11846_v52, %v10177_v30  ;;  %v11849_v52 = vld [vmem:[#allocation34_spill] sm:$0xff]  ;;  %v10366_v35 = vsub.f32 %v11857_v15, %v10177_v30  ;;  %v11859_v15 = vld [vmem:[#allocation13_spill] sm:$0xff] }
 0x701   :  { %v4256_v3 = vadd.f32 %v4255_v32, %v4193_v47  ;;  %v11847_v32 = vld [vmem:[#allocation28_spill] sm:$0xff]  ;;  %v10318_v57 = vsub.f32 %v11849_v52, %v10177_v30  ;;  %v11852_v52 = vld [vmem:[#allocation29_spill] sm:$0xff]  ;;  %v10384_v11 = vsub.f32 %v11859_v15, %v10177_v30  ;;  %v10402_v15 = vsub.f32 %v10063_v9, %v10177_v30 }
 0x702   :  { %v10306_v45 = vsub.f32 %v11847_v32, %v10177_v30  ;;  %v11850_v32 = vld [vmem:[#allocation7_spill] sm:$0xff]  ;;  %v10336_v22 = vsub.f32 %v11852_v52, %v10177_v30 }
 0x703   :  { %v4257_v21 = vadd.f32 %v4256_v3, %v4194_v18  ;;  %v4198_v18 = vmul.f32 %v10294_v40, %v10294_v40  ;;  %v10324_v40 = vsub.f32 %v11850_v32, %v10177_v30  ;;  %v11853_v32 = vld [vmem:[#allocation119_spill] sm:$0xff]  ;;  %v4216_v9 = vmul.f32 %v10402_v15, %v10402_v15 }
 0x704   :  { %v10342_v62 = vsub.f32 %v11853_v32, %v10177_v30  ;;  %v11855_v52 = vld [vmem:[#allocation55_spill] sm:$0xff]  ;;  %v11856_v32 = vld [vmem:[#allocation92_spill] sm:$0xff] }
 0x705   :  { %v4258_v48 = vadd.f32 %v4257_v21, %v4195_v24  ;;  %v4199_v24 = vmul.f32 %v10300_v42, %v10300_v42  ;;  %v10354_v50 = vsub.f32 %v11855_v52, %v10177_v30  ;;  %v10360_v34 = vsub.f32 %v11856_v32, %v10177_v30  ;;  %v11858_v32 = vld [vmem:[#allocation69_spill] sm:$0xff] }
 0x706   :  { %v10372_v52 = vsub.f32 %v10034_v36, %v10177_v30  ;;  %v10378_v26 = vsub.f32 %v11858_v32, %v10177_v30  ;;  %v10396_v32 = vsub.f32 %v10056_v1, %v10177_v30 }
 0x707   :  { %v4259_v47 = vadd.f32 %v4258_v48, %v4196_v19  ;;  %v4200_v19 = vmul.f32 %v10306_v45, %v10306_v45 }
 0x708   :  { %v4211_v36 = vmul.f32 %v10372_v52, %v10372_v52  ;;  %v4215_v1 = vmul.f32 %v10396_v32, %v10396_v32 }
 0x709   :  { %v4260_v3 = vadd.f32 %v4259_v47, %v4197_v12  ;;  %v4201_v12 = vmul.f32 %v10312_v53, %v10312_v53 }
 0x70b   :  { %v4261_v21 = vadd.f32 %v4260_v3, %v4198_v18  ;;  %v4202_v18 = vmul.f32 %v10318_v57, %v10318_v57 }
 0x70d   :  { %v4262_v48 = vadd.f32 %v4261_v21, %v4199_v24  ;;  %v4203_v24 = vmul.f32 %v10324_v40, %v10324_v40 }
 0x70f   :  { %v4263_v47 = vadd.f32 %v4262_v48, %v4200_v19  ;;  %v4204_v19 = vmul.f32 %v10330_v16, %v10330_v16 }
 0x711   :  { %v4264_v3 = vadd.f32 %v4263_v47, %v4201_v12  ;;  %v4205_v12 = vmul.f32 %v10336_v22, %v10336_v22 }
 0x713   :  { %v4265_v21 = vadd.f32 %v4264_v3, %v4202_v18  ;;  %v4206_v18 = vmul.f32 %v10342_v62, %v10342_v62 }
 0x715   :  { %v4266_v48 = vadd.f32 %v4265_v21, %v4203_v24  ;;  %v4207_v24 = vmul.f32 %v10348_v28, %v10348_v28 }
 0x717   :  { %v4267_v47 = vadd.f32 %v4266_v48, %v4204_v19  ;;  %v4208_v19 = vmul.f32 %v10354_v50, %v10354_v50 }
 0x719   :  { %v4268_v3 = vadd.f32 %v4267_v47, %v4205_v12  ;;  %v4209_v12 = vmul.f32 %v10360_v34, %v10360_v34 }
 0x71b   :  { %v4269_v21 = vadd.f32 %v4268_v3, %v4206_v18  ;;  %v4210_v18 = vmul.f32 %v10366_v35, %v10366_v35 }
 0x71d   :  { %v4270_v48 = vadd.f32 %v4269_v21, %v4207_v24  ;;  %v11860_v21 = vld [vmem:[#allocation113_spill] sm:$0xff] }
 0x71e   :  { %v10390_v14 = vsub.f32 %v11860_v21, %v10177_v30  ;;  %v10408_v21 = vsub.f32 %v10068_v0, %v10177_v30 }
 0x71f   :  { %v4271_v47 = vadd.f32 %v4270_v48, %v4208_v19  ;;  %v4212_v19 = vmul.f32 %v10378_v26, %v10378_v26 }
 0x720   :  { %v4217_v0 = vmul.f32 %v10408_v21, %v10408_v21 }
 0x721   :  { %v4272_v3 = vadd.f32 %v4271_v47, %v4209_v12  ;;  %v4213_v12 = vmul.f32 %v10384_v11, %v10384_v11 }
 0x723   :  { %v4273_v24 = vadd.f32 %v4272_v3, %v4210_v18  ;;  %v4214_v18 = vmul.f32 %v10390_v14, %v10390_v14 }
 0x725   :  { %v4274_v48 = vadd.f32 %v4273_v24, %v4211_v36  ;;  %v10414_v24 = vsub.f32 %v10073_v37, %v10177_v30 }
 0x727   :  { %v4275_v47 = vadd.f32 %v4274_v48, %v4212_v19  ;;  %v10420_v48 = vsub.f32 %v10078_v54, %v10177_v30  ;;  %v4218_v37 = vmul.f32 %v10414_v24, %v10414_v24 }
 0x729   :  { %v4276_v3 = vadd.f32 %v4275_v47, %v4213_v12  ;;  %v10426_v47 = vsub.f32 %v10083_v5, %v10177_v30  ;;  %v4219_v54 = vmul.f32 %v10420_v48, %v10420_v48 }
 0x72b   :  { %v4277_v36 = vadd.f32 %v4276_v3, %v4214_v18  ;;  %v10432_v3 = vsub.f32 %v10088_v25, %v10177_v30  ;;  %v4220_v5 = vmul.f32 %v10426_v47, %v10426_v47 }
 0x72d   :  { %v4278_v19 = vadd.f32 %v4277_v36, %v4215_v1  ;;  %v10438_v36 = vsub.f32 %v10093_v49, %v10177_v30  ;;  %v4221_v25 = vmul.f32 %v10432_v3, %v10432_v3 }
 0x72f   :  { %v4279_v12 = vadd.f32 %v4278_v19, %v4216_v9  ;;  %v10444_v19 = vsub.f32 %v10098_v20, %v10177_v30  ;;  %v4222_v49 = vmul.f32 %v10438_v36, %v10438_v36 }
 0x731   :  { %v4280_v18 = vadd.f32 %v4279_v12, %v4217_v0  ;;  %v10450_v12 = vsub.f32 %v10103_v31, %v10177_v30  ;;  %v4223_v20 = vmul.f32 %v10444_v19, %v10444_v19 }
 0x733   :  { %v4281_v1 = vadd.f32 %v4280_v18, %v4218_v37  ;;  %v10456_v18 = vsub.f32 %v10108_v56, %v10177_v30  ;;  %v4224_v31 = vmul.f32 %v10450_v12, %v10450_v12 }
 0x735   :  { %v4282_v9 = vadd.f32 %v4281_v1, %v4219_v54  ;;  %v10462_v1 = vsub.f32 %v10113_v61, %v10177_v30  ;;  %v4225_v56 = vmul.f32 %v10456_v18, %v10456_v18 }
 0x737   :  { %v4283_v0 = vadd.f32 %v4282_v9, %v4220_v5  ;;  %v10468_v9 = vsub.f32 %v10118_v7, %v10177_v30  ;;  %v4226_v61 = vmul.f32 %v10462_v1, %v10462_v1 }
 0x739   :  { %v4284_v37 = vadd.f32 %v4283_v0, %v4221_v25  ;;  %v10474_v0 = vsub.f32 %v10123_v55, %v10177_v30  ;;  %v4227_v7 = vmul.f32 %v10468_v9, %v10468_v9 }
 0x73b   :  { %v4285_v54 = vadd.f32 %v4284_v37, %v4222_v49  ;;  %v10480_v37 = vsub.f32 %v10128_v33, %v10177_v30  ;;  %v4228_v55 = vmul.f32 %v10474_v0, %v10474_v0 }
 0x73d   :  { %v4286_v5 = vadd.f32 %v4285_v54, %v4223_v20  ;;  %v10486_v54 = vsub.f32 %v10133_v58, %v10177_v30  ;;  %v4229_v33 = vmul.f32 %v10480_v37, %v10480_v37 }
 0x73f   :  { %v4287_v25 = vadd.f32 %v4286_v5, %v4224_v31  ;;  %v10492_v5 = vsub.f32 %v10138_v39, %v10177_v30  ;;  %v4230_v58 = vmul.f32 %v10486_v54, %v10486_v54 }
 0x741   :  { %v4288_v49 = vadd.f32 %v4287_v25, %v4225_v56  ;;  %v10498_v25 = vsub.f32 %v10143_v46, %v10177_v30  ;;  %v4231_v39 = vmul.f32 %v10492_v5, %v10492_v5 }
 0x743   :  { %v4289_v20 = vadd.f32 %v4288_v49, %v4226_v61  ;;  %v10504_v49 = vsub.f32 %v9970_v41, %v10177_v30  ;;  %v4232_v46 = vmul.f32 %v10498_v25, %v10498_v25 }
 0x745   :  { %v4290_v31 = vadd.f32 %v4289_v20, %v4227_v7  ;;  %v10510_v20 = vsub.f32 %v10152_v51, %v10177_v30  ;;  %v4233_v41 = vmul.f32 %v10504_v49, %v10504_v49 }
 0x747   :  { %v4291_v56 = vadd.f32 %v4290_v31, %v4228_v55  ;;  %v10516_v31 = vsub.f32 %v10158_v8, %v10177_v30  ;;  %v4234_v51 = vmul.f32 %v10510_v20, %v10510_v20 }
 0x749   :  { %v4292_v61 = vadd.f32 %v4291_v56, %v4229_v33  ;;  %v10522_v56 = vsub.f32 %v10162_v63, %v10177_v30  ;;  %v4235_v8 = vmul.f32 %v10516_v31, %v10516_v31 }
 0x74b   :  { %v4293_v7 = vadd.f32 %v4292_v61, %v4230_v58  ;;  %v10528_v61 = vsub.f32 %v10166_v4, %v10177_v30  ;;  %v4236_v63 = vmul.f32 %v10522_v56, %v10522_v56 }
 0x74d   :  { %v4294_v55 = vadd.f32 %v4293_v7, %v4231_v39  ;;  %v10534_v7 = vsub.f32 %v10170_v17, %v10177_v30  ;;  %v4237_v4 = vmul.f32 %v10528_v61, %v10528_v61 }
 0x74f   :  { %v4295_v33 = vadd.f32 %v4294_v55, %v4232_v46  ;;  %v10540_v55 = vsub.f32 %v10173_v43, %v10177_v30  ;;  %v4241_v43 = vmul.f32 %v10183_v29, %v10183_v29 }
 0x751   :  { %v4296_v58 = vadd.f32 %v4295_v33, %v4233_v41  ;;  %v4238_v33 = vmul.f32 %v10534_v7, %v10534_v7  ;;  %v4239_v17 = vmul.f32 %v10540_v55, %v10540_v55 }
 0x753   :  { %v4297_v39 = vadd.f32 %v4296_v58, %v4234_v51 }
 0x755   :  { %v4298_v46 = vadd.f32 %v4297_v39, %v4235_v8  ;;  %v4242_v39 = vmul.f32 %v10186_v23, %v10186_v23 }
 0x757   :  { %v4299_v41 = vadd.f32 %v4298_v46, %v4236_v63  ;;  %v4243_v46 = vmul.f32 %v10189_v59, %v10189_v59 }
 0x759   :  { %v4300_v51 = vadd.f32 %v4299_v41, %v4237_v4  ;;  %v4244_v41 = vmul.f32 %v10192_v6, %v10192_v6 }
 0x75b   :  { %v4301_v58 = vadd.f32 %v4300_v51, %v4238_v33 }
 0x75d   :  { %v4302_v8 = vadd.f32 %v4301_v58, %v4239_v17 }
 0x75f   :  { %v4303_v30 = vadd.f32 %v4302_v8, %v4240_v60 }
 0x761   :  { %v4304_v63 = vadd.f32 %v4303_v30, %v4241_v43 }
 0x763   :  { %v4305_v4 = vadd.f32 %v4304_v63, %v4242_v39  ;;  %v4045_v39 = vld [vmem:[%s10948_s5] sm:$0x1]  ;;  %s6044_s5 = smov [#allocation2]  }
 0x765   :  { %v4306_v33 = vadd.f32 %v4305_v4, %v4243_v46 }
 0x767   :  { %v4307_v51 = vadd.f32 %v4306_v33, %v4244_v41 }
 0x769   :  { %v4308_v44 = vrot.slane %v4307_v51, 4 }
 0x76b   :  { %v4309_v13 = vadd.f32 %v4308_v44, %v4307_v51 }
 0x76d   :  { %v4310_v17 = vrot.slane %v4309_v13, 2 }
 0x76f   :  { %v4311_v58 = vadd.f32 %v4310_v17, %v4309_v13 }
 0x771   :  { %v4312_v10 = vrot.slane %v4311_v58, 1 }
 0x773   :  { %v4313_v27 = vadd.f32 %v4312_v10, %v4311_v58 }
 0x775   :  { %v4314_v60 = vmul.f32 0.001953125, %v4313_v27  ;;  %v10564_v27 = vld [vmem:[%s10949_s6] ss:$0 sm:$0xff]  ;;  %s4655_s6 = sshll.u32 %s6044_s5, 4  ;;  %s4656_s6 = int_to_ptr.vmem [resolvable:$true] %s4655_s6 }
 0x777   :  { %v4315_v8 = vadd.f32 1e-05, %v4314_v60  ;;  %v11861_v60 = vld [vmem:[#allocation81_spill] sm:$0xff] }
 0x779   :  { %6011 = vrsqrt.f32 %v4315_v8  ;;  %vm4322_vm10 = vweird.f32 %v4315_v8 }
 0x77f   :  { %v6012_v38 = vpop.eup %6011 }
 0x780   :  { %v4317_v43 = vmul.f32 %v6012_v38, %v4315_v8  ;;  %vm4323_vm9 = vweird.f32 %v6012_v38  ;;  %v11862_v8 = vld [vmem:[#allocation60_spill] sm:$0xff] }
 0x781   :  { %vm4324_vm11 = vmor %vm4322_vm10, %vm4323_vm9 }
 0x782   :  { %v4318_v30 = vmul.f32 %v6012_v38, %v4317_v43 }
 0x784   :  { %v4319_v23 = vmul.f32 0.5, %v4318_v30 }
 0x786   :  { %v4320_v59 = vsub.f32 1.5, %v4319_v23 }
 0x788   :  { %v4321_v63 = vmul.f32 %v6012_v38, %v4320_v59 }
 0x78a   :  { %v4325_v44 = vsel %vm4324_vm11, %v6012_v38, %v4321_v63 }
 0x78b   :  { %v4326_v13 = vmul.f32 %v4325_v44, %v4045_v39 }
 0x78d   :  { %v10566_v10 = vperm.slane %v4326_v13, 0 }
 0x78f   :  { %v4391_v23 = vmul.f32 %v10566_v10, %v10192_v6  ;;  %v4346_v59 = vmul.f32 %v10566_v10, %v10300_v42  ;;  %v4347_v38 = vmul.f32 %v10566_v10, %v10306_v45  ;;  %v4348_v33 = vmul.f32 %v10566_v10, %v10312_v53 }
 0x790   :  { %v4349_v51 = vmul.f32 %v10566_v10, %v10318_v57  ;;  %v4350_v6 = vmul.f32 %v10566_v10, %v10324_v40  ;;  %v4351_v17 = vmul.f32 %v10566_v10, %v10330_v16  ;;  %v4352_v58 = vmul.f32 %v10566_v10, %v10336_v22 }
 0x791   :  { %v4458_v46 = vadd.f32 %v10564_v27, %v4391_v23  ;;  %v4353_v42 = vmul.f32 %v10566_v10, %v10342_v62  ;;  %v4354_v45 = vmul.f32 %v10566_v10, %v10348_v28  ;;  %v4355_v53 = vmul.f32 %v10566_v10, %v10354_v50 }
 0x792   :  { %v4356_v57 = vmul.f32 %v10566_v10, %v10360_v34  ;;  %v4357_v40 = vmul.f32 %v10566_v10, %v10366_v35  ;;  %v4358_v16 = vmul.f32 %v10566_v10, %v10372_v52  ;;  %v4359_v22 = vmul.f32 %v10566_v10, %v10378_v26 }
 0x793   :  { %v4522_v4 = vmul.f32 0.01, %v4458_v46  ;;  %v4360_v62 = vmul.f32 %v10566_v10, %v10384_v11  ;;  %v4361_v28 = vmul.f32 %v10566_v10, %v10390_v14  ;;  %v4362_v50 = vmul.f32 %v10566_v10, %v10396_v32 }
 0x794   :  { %v4363_v34 = vmul.f32 %v10566_v10, %v10402_v15  ;;  %v4364_v35 = vmul.f32 %v10566_v10, %v10408_v21  ;;  %v4365_v52 = vmul.f32 %v10566_v10, %v10414_v24  ;;  %v4366_v26 = vmul.f32 %v10566_v10, %v10420_v48 }
 0x795   :  { %v4586_v41 = vmax.f32 %v4458_v46, %v4522_v4  ;;  %v4367_v11 = vmul.f32 %v10566_v10, %v10426_v47  ;;  %v4368_v14 = vmul.f32 %v10566_v10, %v10432_v3  ;;  %v4369_v32 = vmul.f32 %v10566_v10, %v10438_v36 }
 0x796   :  { %v4370_v15 = vmul.f32 %v10566_v10, %v10444_v19  ;;  %v4371_v21 = vmul.f32 %v10566_v10, %v10450_v12  ;;  %v4372_v24 = vmul.f32 %v10566_v10, %v10456_v18  ;;  %v4373_v48 = vmul.f32 %v10566_v10, %v10462_v1 }
 0x797   :  { %4650 = vst [vmem:[#allocation2 + $0x1f8] sm:$0xff] %v4586_v41  ;;  %v4374_v47 = vmul.f32 %v10566_v10, %v10468_v9  ;;  %v4375_v3 = vmul.f32 %v10566_v10, %v10474_v0  ;;  %v4376_v36 = vmul.f32 %v10566_v10, %v10480_v37  ;;  %v4377_v19 = vmul.f32 %v10566_v10, %v10486_v54 }
 0x798   :  { %v4378_v12 = vmul.f32 %v10566_v10, %v10492_v5  ;;  %v4379_v18 = vmul.f32 %v10566_v10, %v10498_v25  ;;  %v4380_v1 = vmul.f32 %v10566_v10, %v10504_v49  ;;  %v4381_v9 = vmul.f32 %v10566_v10, %v10510_v20 }
 0x799   :  { %v4382_v0 = vmul.f32 %v10566_v10, %v10516_v31  ;;  %v4383_v37 = vmul.f32 %v10566_v10, %v10522_v56  ;;  %v4384_v54 = vmul.f32 %v10566_v10, %v10528_v61  ;;  %v4385_v5 = vmul.f32 %v10566_v10, %v10534_v7 }
 0x79a   :  { %v4386_v25 = vmul.f32 %v10566_v10, %v10540_v55  ;;  %v4387_v49 = vmul.f32 %v10566_v10, %v10180_v2  ;;  %v4388_v20 = vmul.f32 %v10566_v10, %v10183_v29  ;;  %v4389_v31 = vmul.f32 %v10566_v10, %v11861_v60 }
 0x79b   :  { %v4390_v56 = vmul.f32 %v10566_v10, %v11862_v8  ;;  %v10662_v61 = vadd.f32 %v10564_v27, %v4346_v59  ;;  %v10665_v7 = vadd.f32 %v10564_v27, %v4347_v38  ;;  %v10668_v55 = vadd.f32 %v10564_v27, %v4348_v33 }
 0x79c   :  { %v10671_v2 = vadd.f32 %v10564_v27, %v4349_v51  ;;  %v10674_v29 = vadd.f32 %v10564_v27, %v4350_v6  ;;  %v10677_v43 = vadd.f32 %v10564_v27, %v4351_v17  ;;  %v10680_v30 = vadd.f32 %v10564_v27, %v4352_v58 }
 0x79d   :  { %v10683_v39 = vadd.f32 %v10564_v27, %v4353_v42  ;;  %v10686_v63 = vadd.f32 %v10564_v27, %v4354_v45  ;;  %v10689_v44 = vadd.f32 %v10564_v27, %v4355_v53  ;;  %v10692_v13 = vadd.f32 %v10564_v27, %v4356_v57 }
 0x79e   :  { %v10695_v23 = vadd.f32 %v10564_v27, %v4357_v40  ;;  %v10698_v46 = vadd.f32 %v10564_v27, %v4358_v16  ;;  %v10701_v4 = vadd.f32 %v10564_v27, %v4359_v22  ;;  %v10704_v41 = vadd.f32 %v10564_v27, %v4360_v62 }
 0x79f   :  { %v10707_v59 = vadd.f32 %v10564_v27, %v4361_v28  ;;  %v10710_v38 = vadd.f32 %v10564_v27, %v4362_v50  ;;  %v10713_v33 = vadd.f32 %v10564_v27, %v4363_v34  ;;  %v10716_v51 = vadd.f32 %v10564_v27, %v4364_v35 }
 0x7a0   :  { %v10719_v6 = vadd.f32 %v10564_v27, %v4365_v52  ;;  %v10722_v17 = vadd.f32 %v10564_v27, %v4366_v26  ;;  %v10725_v58 = vadd.f32 %v10564_v27, %v4367_v11  ;;  %v10728_v42 = vadd.f32 %v10564_v27, %v4368_v14 }
 0x7a1   :  { %v10731_v45 = vadd.f32 %v10564_v27, %v4369_v32  ;;  %v10734_v53 = vadd.f32 %v10564_v27, %v4370_v15  ;;  %v10737_v57 = vadd.f32 %v10564_v27, %v4371_v21  ;;  %v10740_v40 = vadd.f32 %v10564_v27, %v4372_v24 }
 0x7a2   :  { %v10743_v16 = vadd.f32 %v10564_v27, %v4373_v48  ;;  %v10746_v22 = vadd.f32 %v10564_v27, %v4374_v47  ;;  %v10749_v62 = vadd.f32 %v10564_v27, %v4375_v3  ;;  %v10752_v28 = vadd.f32 %v10564_v27, %v4376_v36  ;;  %v11880_v36 = vld [vmem:[#allocation31_spill] sm:$0xff] }
 0x7a3   :  { %v10755_v50 = vadd.f32 %v10564_v27, %v4377_v19  ;;  %v10758_v34 = vadd.f32 %v10564_v27, %v4378_v12  ;;  %v10761_v35 = vadd.f32 %v10564_v27, %v4379_v18  ;;  %v10764_v52 = vadd.f32 %v10564_v27, %v4380_v1  ;;  %v11881_v12 = vld [vmem:[#allocation25_spill] sm:$0xff] }
 0x7a4   :  { %11863 = vst [vmem:[#allocation71_spill] sm:$0xff] %v10746_v22  ;;  %v10767_v26 = vadd.f32 %v10564_v27, %v4381_v9  ;;  %v10770_v11 = vadd.f32 %v10564_v27, %v4382_v0  ;;  %v10773_v14 = vadd.f32 %v10564_v27, %v4383_v37  ;;  %v10776_v32 = vadd.f32 %v10564_v27, %v4384_v54  ;;  %v11882_v1 = vld [vmem:[#allocation37_spill] sm:$0xff]  ;;  %v11883_v0 = vld [vmem:[#allocation99_spill] sm:$0xff]  ;;  %v11884_v54 = vld [vmem:[#allocation56_spill] sm:$0xff] }
 0x7a5   :  { %11864 = vst [vmem:[#allocation67_spill] sm:$0xff] %v10749_v62  ;;  %v10779_v15 = vadd.f32 %v10564_v27, %v4385_v5  ;;  %v10782_v21 = vadd.f32 %v10564_v27, %v4386_v25  ;;  %v10785_v24 = vadd.f32 %v10564_v27, %v4387_v49  ;;  %v10788_v48 = vadd.f32 %v10564_v27, %v4388_v20  ;;  %v11885_v49 = vld [vmem:[#allocation39_spill] sm:$0xff] }
 0x7a6   :  { %11865 = vst [vmem:[#allocation102_spill] sm:$0xff] %v10752_v28  ;;  %v10791_v47 = vadd.f32 %v10564_v27, %v4389_v31  ;;  %v10794_v3 = vadd.f32 %v10564_v27, %v4390_v56  ;;  %v4328_v19 = vmul.f32 %v10566_v10, %v11880_v36  ;;  %v4329_v18 = vmul.f32 %v10566_v10, %v11881_v12  ;;  %v11886_v31 = vld [vmem:[#allocation16_spill] sm:$0xff]  ;;  %v11887_v36 = vld [vmem:[#allocation61_spill] sm:$0xff]  ;;  %v11895_v28 = vld [vmem:[#allocation15_spill] sm:$0xff] }
 0x7a7   :  { %11866 = vst [vmem:[#allocation63_spill] sm:$0xff] %v10755_v50  ;;  %v4330_v9 = vmul.f32 %v10566_v10, %v11882_v1  ;;  %v4331_v37 = vmul.f32 %v10566_v10, %v11883_v0  ;;  %v4332_v5 = vmul.f32 %v10566_v10, %v11884_v54  ;;  %v4333_v20 = vmul.f32 %v10566_v10, %v11885_v49  ;;  %v11888_v0 = vld [vmem:[#allocation98_spill] sm:$0xff]  ;;  %v11896_v62 = vld [vmem:[#allocation103_spill] sm:$0xff] }
 0x7a8   :  { %11867 = vst [vmem:[#allocation89_spill] sm:$0xff] %v10758_v34  ;;  %v4395_v25 = vadd.f32 %v10564_v27, %v4328_v19  ;;  %v4396_v60 = vadd.f32 %v10564_v27, %v4329_v18  ;;  %v4334_v8 = vmul.f32 %v10566_v10, %v11886_v31  ;;  %v4335_v12 = vmul.f32 %v10566_v10, %v11887_v36  ;;  %v11890_v31 = vld [vmem:[#allocation73_spill] sm:$0xff] }
 0x7a9   :  { %11868 = vst [vmem:[#allocation96_spill] sm:$0xff] %v10761_v35  ;;  %v4397_v56 = vadd.f32 %v10564_v27, %v4330_v9  ;;  %v4398_v1 = vadd.f32 %v10564_v27, %v4331_v37  ;;  %v4336_v54 = vmul.f32 %v10566_v10, %v11888_v0  ;;  %v4399_v19 = vadd.f32 %v10564_v27, %v4332_v5  ;;  %v11892_v5 = vld [vmem:[#allocation66_spill] sm:$0xff] }
 0x7aa   :  { %11869 = vst [vmem:[#allocation65_spill] sm:$0xff] %v10764_v52  ;;  %v4400_v18 = vadd.f32 %v10564_v27, %v4333_v20  ;;  %v4338_v9 = vmul.f32 %v10566_v10, %v11890_v31  ;;  %v4402_v0 = vadd.f32 %v10564_v27, %v4335_v12  ;;  %v11894_v35 = vld [vmem:[#allocation10_spill] sm:$0xff] }
 0x7ab   :  { %11870 = vst [vmem:[#allocation108_spill] sm:$0xff] %v10767_v26  ;;  %v4461_v36 = vmul.f32 0.01, %v4397_v56 }
 0x7ac   :  { %11871 = vst [vmem:[#allocation107_spill] sm:$0xff] %v10770_v11  ;;  %v11893_v11 = vld [vmem:[#allocation59_spill] sm:$0xff]  ;;  %v4405_v12 = vadd.f32 %v10564_v27, %v4338_v9 }
 0x7ad   :  { %11872 = vst [vmem:[#allocation101_spill] sm:$0xff] %v10773_v14  ;;  %v4463_v14 = vmul.f32 0.01, %v4399_v19  ;;  %v4341_v26 = vmul.f32 %v10566_v10, %v11893_v11  ;;  %v4525_v50 = vmax.f32 %v4397_v56, %v4461_v36  ;;  %v4344_v11 = vmul.f32 %v10566_v10, %v11896_v62 }
 0x7ae   :  { %11873 = vst [vmem:[#allocation47_spill] sm:$0xff] %v10776_v32  ;;  %v4340_v32 = vmul.f32 %v10566_v10, %v11892_v5  ;;  %v4343_v5 = vmul.f32 %v10566_v10, %v11895_v28 }
 0x7af   :  { %11874 = vst [vmem:[#allocation48_spill] sm:$0xff] %v10779_v15  ;;  %v4462_v15 = vmul.f32 0.01, %v4398_v1  ;;  %v4408_v56 = vadd.f32 %v10564_v27, %v4341_v26 }
 0x7b0   :  { %11875 = vst [vmem:[#allocation79_spill] sm:$0xff] %v10782_v21  ;;  %v11891_v21 = vld [vmem:[#allocation90_spill] sm:$0xff]  ;;  %v4410_v62 = vadd.f32 %v10564_v27, %v4343_v5 }
 0x7b1   :  { %11876 = vst [vmem:[#allocation84_spill] sm:$0xff] %v10785_v24  ;;  %v4401_v24 = vadd.f32 %v10564_v27, %v4334_v8  ;;  %v4339_v37 = vmul.f32 %v10566_v10, %v11891_v21  ;;  %v4464_v8 = vmul.f32 0.01, %v4400_v18  ;;  %v4342_v21 = vmul.f32 %v10566_v10, %v11894_v35  ;;  %v11897_v35 = vld [vmem:[#allocation62_spill] sm:$0xff] }
 0x7b2   :  { %11877 = vst [vmem:[#allocation75_spill] sm:$0xff] %v10788_v48  ;;  %v4460_v48 = vmul.f32 0.01, %v4396_v60  ;;  %v4345_v9 = vmul.f32 %v10566_v10, %v11897_v35  ;;  %v4472_v26 = vmul.f32 0.01, %v4408_v56 }
 0x7b3   :  { %11878 = vst [vmem:[#allocation23_spill] sm:$0xff] %v10791_v47  ;;  %v11889_v47 = vld [vmem:[#allocation57_spill] sm:$0xff]  ;;  %v4465_v34 = vmul.f32 0.01, %v4401_v24  ;;  %v4528_v22 = vmax.f32 %v4400_v18, %v4464_v8  ;;  %v4409_v28 = vadd.f32 %v10564_v27, %v4342_v21  ;;  %v4483_v35 = vmul.f32 0.01, %v10680_v30 }
 0x7b4   :  { %11879 = vst [vmem:[#allocation85_spill] sm:$0xff] %v10794_v3  ;;  %v4459_v3 = vmul.f32 0.01, %v4395_v25  ;;  %v4337_v49 = vmul.f32 %v10566_v10, %v11889_v47  ;;  %v4403_v47 = vadd.f32 %v10564_v27, %v4336_v54  ;;  %v4524_v52 = vmax.f32 %v4396_v60, %v4460_v48 }
 0x7b5   :  { %v4406_v54 = vadd.f32 %v10564_v27, %v4339_v37  ;;  %v4527_v60 = vmax.f32 %v4399_v19, %v4463_v14  ;;  %v4469_v37 = vmul.f32 0.01, %v4405_v12  ;;  %4589 = vst [vmem:[#allocation2 + $0x10] sm:$0xff] %v4525_v50  ;;  %v4411_v14 = vadd.f32 %v10564_v27, %v4344_v11 }
 0x7b6   :  { %v4523_v20 = vmax.f32 %v4395_v25, %v4459_v3  ;;  %v4404_v31 = vadd.f32 %v10564_v27, %v4337_v49  ;;  %v4466_v3 = vmul.f32 0.01, %v4402_v0  ;;  %v4526_v25 = vmax.f32 %v4398_v1, %v4462_v15  ;;  %4588 = vst [vmem:[#allocation2 + $0x8] sm:$0xff] %v4524_v52 }
 0x7b7   :  { %v4407_v49 = vadd.f32 %v10564_v27, %v4340_v32  ;;  %v4467_v48 = vmul.f32 0.01, %v4403_v47  ;;  %v4529_v15 = vmax.f32 %v4401_v24, %v4465_v34  ;;  %v4470_v1 = vmul.f32 0.01, %v4406_v54  ;;  %4591 = vst [vmem:[#allocation2 + $0x20] sm:$0xff] %v4527_v60 }
 0x7b8   :  { %4587 = vst [vmem:[#allocation2] sm:$0xff] %v4523_v20  ;;  %v4468_v36 = vmul.f32 0.01, %v4404_v31  ;;  %v4530_v32 = vmax.f32 %v4402_v0, %v4466_v3  ;;  %v4412_v10 = vadd.f32 %v10564_v27, %v4345_v9  ;;  %v4473_v52 = vmul.f32 0.01, %v4409_v28 }
 0x7b9   :  { %4590 = vst [vmem:[#allocation2 + $0x18] sm:$0xff] %v4526_v25  ;;  %v4471_v19 = vmul.f32 0.01, %v4407_v49  ;;  %v4531_v20 = vmax.f32 %v4403_v47, %v4467_v48  ;;  %v4533_v8 = vmax.f32 %v4405_v12, %v4469_v37  ;;  %v4474_v34 = vmul.f32 0.01, %v4410_v62 }
 0x7ba   :  { %v4532_v18 = vmax.f32 %v4404_v31, %v4468_v36  ;;  %4592 = vst [vmem:[#allocation2 + $0x28] sm:$0xff] %v4528_v22  ;;  %v4534_v50 = vmax.f32 %v4406_v54, %v4470_v1  ;;  %v4475_v24 = vmul.f32 0.01, %v4411_v14  ;;  %v4476_v0 = vmul.f32 0.01, %v4412_v10 }
 0x7bb   :  { %4593 = vst [vmem:[#allocation2 + $0x30] sm:$0xff] %v4529_v15  ;;  %v4535_v21 = vmax.f32 %v4407_v49, %v4471_v19  ;;  %v4536_v5 = vmax.f32 %v4408_v56, %v4472_v26  ;;  %v4477_v47 = vmul.f32 0.01, %v10662_v61  ;;  %v4537_v3 = vmax.f32 %v4409_v28, %v4473_v52 }
 0x7bc   :  { %4594 = vst [vmem:[#allocation2 + $0x38] sm:$0xff] %v4530_v32  ;;  %v4478_v27 = vmul.f32 0.01, %v10665_v7  ;;  %v4538_v31 = vmax.f32 %v4410_v62, %v4474_v34  ;;  %v4479_v22 = vmul.f32 0.01, %v10668_v55  ;;  %v4539_v12 = vmax.f32 %v4411_v14, %v4475_v24 }
 0x7bd   :  { %4595 = vst [vmem:[#allocation2 + $0x40] sm:$0xff] %v4531_v20  ;;  %v4480_v54 = vmul.f32 0.01, %v10671_v2  ;;  %v4540_v25 = vmax.f32 %v4412_v10, %v4476_v0  ;;  %v4481_v11 = vmul.f32 0.01, %v10674_v29  ;;  %v4541_v49 = vmax.f32 %v10662_v61, %v4477_v47  ;;  %v11898_v47 = vld [vmem:[#allocation71_spill] sm:$0xff] }
 0x7be   :  { %4596 = vst [vmem:[#allocation2 + $0x48] sm:$0xff] %v4532_v18  ;;  %v4482_v48 = vmul.f32 0.01, %v10677_v43  ;;  %v4542_v60 = vmax.f32 %v10665_v7, %v4478_v27  ;;  %v4543_v9 = vmax.f32 %v10668_v55, %v4479_v22  ;;  %v4484_v56 = vmul.f32 0.01, %v10683_v39  ;;  %v11899_v27 = vld [vmem:[#allocation67_spill] sm:$0xff] }
 0x7bf   :  { %4597 = vst [vmem:[#allocation2 + $0x50] sm:$0xff] %v4533_v8  ;;  %v4544_v36 = vmax.f32 %v10671_v2, %v4480_v54  ;;  %v4485_v28 = vmul.f32 0.01, %v10686_v63  ;;  %v4545_v61 = vmax.f32 %v10674_v29, %v4481_v11  ;;  %v4486_v37 = vmul.f32 0.01, %v10689_v44  ;;  %v11900_v22 = vld [vmem:[#allocation102_spill] sm:$0xff] }
 0x7c0   :  { %4598 = vst [vmem:[#allocation2 + $0x58] sm:$0xff] %v4534_v50  ;;  %v4546_v7 = vmax.f32 %v10677_v43, %v4482_v48  ;;  %v4487_v15 = vmul.f32 0.01, %v10692_v13  ;;  %v4547_v55 = vmax.f32 %v10680_v30, %v4483_v35  ;;  %v4488_v62 = vmul.f32 0.01, %v10695_v23  ;;  %v11901_v54 = vld [vmem:[#allocation63_spill] sm:$0xff] }
 0x7c1   :  { %4599 = vst [vmem:[#allocation2 + $0x60] sm:$0xff] %v4535_v21  ;;  %v4548_v2 = vmax.f32 %v10683_v39, %v4484_v56  ;;  %v4489_v1 = vmul.f32 0.01, %v10698_v46  ;;  %v4549_v29 = vmax.f32 %v10686_v63, %v4485_v28  ;;  %v4490_v32 = vmul.f32 0.01, %v10701_v4  ;;  %v11902_v11 = vld [vmem:[#allocation89_spill] sm:$0xff] }
 0x7c2   :  { %4600 = vst [vmem:[#allocation2 + $0x68] sm:$0xff] %v4536_v5  ;;  %v4550_v43 = vmax.f32 %v10689_v44, %v4486_v37  ;;  %v4491_v14 = vmul.f32 0.01, %v10704_v41  ;;  %v4551_v30 = vmax.f32 %v10692_v13, %v4487_v15  ;;  %v4492_v19 = vmul.f32 0.01, %v10707_v59  ;;  %v11903_v48 = vld [vmem:[#allocation96_spill] sm:$0xff] }
 0x7c3   :  { %4601 = vst [vmem:[#allocation2 + $0x70] sm:$0xff] %v4537_v3  ;;  %v4552_v39 = vmax.f32 %v10695_v23, %v4488_v62  ;;  %v4493_v20 = vmul.f32 0.01, %v10710_v38  ;;  %v4553_v63 = vmax.f32 %v10698_v46, %v4489_v1  ;;  %v4494_v10 = vmul.f32 0.01, %v10713_v33  ;;  %v11904_v35 = vld [vmem:[#allocation65_spill] sm:$0xff] }
 0x7c4   :  { %4602 = vst [vmem:[#allocation2 + $0x78] sm:$0xff] %v4538_v31  ;;  %v4554_v44 = vmax.f32 %v10701_v4, %v4490_v32  ;;  %v4495_v26 = vmul.f32 0.01, %v10716_v51  ;;  %v4555_v13 = vmax.f32 %v10704_v41, %v4491_v14  ;;  %v4496_v18 = vmul.f32 0.01, %v10719_v6  ;;  %v11905_v56 = vld [vmem:[#allocation108_spill] sm:$0xff] }
 0x7c5   :  { %4603 = vst [vmem:[#allocation2 + $0x80] sm:$0xff] %v4539_v12  ;;  %v4556_v23 = vmax.f32 %v10707_v59, %v4492_v19  ;;  %v4497_v52 = vmul.f32 0.01, %v10722_v17  ;;  %v4557_v46 = vmax.f32 %v10710_v38, %v4493_v20  ;;  %v4498_v8 = vmul.f32 0.01, %v10725_v58  ;;  %v11906_v28 = vld [vmem:[#allocation107_spill] sm:$0xff] }
 0x7c6   :  { %4604 = vst [vmem:[#allocation2 + $0x88] sm:$0xff] %v4540_v25  ;;  %v4558_v4 = vmax.f32 %v10713_v33, %v4494_v10  ;;  %v4499_v34 = vmul.f32 0.01, %v10728_v42  ;;  %v4559_v41 = vmax.f32 %v10716_v51, %v4495_v26  ;;  %v4500_v50 = vmul.f32 0.01, %v10731_v45  ;;  %v11908_v62 = vld [vmem:[#allocation47_spill] sm:$0xff] }
 0x7c7   :  { %4605 = vst [vmem:[#allocation2 + $0x90] sm:$0xff] %v4541_v49  ;;  %v4560_v59 = vmax.f32 %v10719_v6, %v4496_v18  ;;  %v4501_v24 = vmul.f32 0.01, %v10734_v53  ;;  %v4561_v38 = vmax.f32 %v10722_v17, %v4497_v52  ;;  %v4502_v21 = vmul.f32 0.01, %v10737_v57  ;;  %v11910_v14 = vld [vmem:[#allocation79_spill] sm:$0xff] }
 0x7c8   :  { %4606 = vst [vmem:[#allocation2 + $0x98] sm:$0xff] %v4542_v60  ;;  %v4562_v33 = vmax.f32 %v10725_v58, %v4498_v8  ;;  %v4503_v0 = vmul.f32 0.01, %v10740_v40  ;;  %v4563_v51 = vmax.f32 %v10728_v42, %v4499_v34  ;;  %v4504_v5 = vmul.f32 0.01, %v10743_v16  ;;  %v11912_v10 = vld [vmem:[#allocation75_spill] sm:$0xff] }
 0x7c9   :  { %4607 = vst [vmem:[#allocation2 + $0xa0] sm:$0xff] %v4543_v9  ;;  %v4564_v6 = vmax.f32 %v10731_v45, %v4500_v50  ;;  %v4505_v3 = vmul.f32 0.01, %v11898_v47  ;;  %v4565_v17 = vmax.f32 %v10734_v53, %v4501_v24  ;;  %v4506_v31 = vmul.f32 0.01, %v11899_v27  ;;  %v11914_v52 = vld [vmem:[#allocation85_spill] sm:$0xff] }
 0x7ca   :  { %4608 = vst [vmem:[#allocation2 + $0xa8] sm:$0xff] %v4544_v36  ;;  %v4566_v58 = vmax.f32 %v10737_v57, %v4502_v21  ;;  %v4507_v12 = vmul.f32 0.01, %v11900_v22  ;;  %v4567_v42 = vmax.f32 %v10740_v40, %v4503_v0  ;;  %v4508_v25 = vmul.f32 0.01, %v11901_v54 }
 0x7cb   :  { %4609 = vst [vmem:[#allocation2 + $0xb0] sm:$0xff] %v4545_v61  ;;  %v4568_v45 = vmax.f32 %v10743_v16, %v4504_v5  ;;  %v4509_v49 = vmul.f32 0.01, %v11902_v11  ;;  %v4569_v53 = vmax.f32 %v11898_v47, %v4505_v3  ;;  %v4510_v60 = vmul.f32 0.01, %v11903_v48 }
 0x7cc   :  { %4610 = vst [vmem:[#allocation2 + $0xb8] sm:$0xff] %v4546_v7  ;;  %v4570_v57 = vmax.f32 %v11899_v27, %v4506_v31  ;;  %v4511_v9 = vmul.f32 0.01, %v11904_v35  ;;  %v4571_v40 = vmax.f32 %v11900_v22, %v4507_v12  ;;  %v4512_v36 = vmul.f32 0.01, %v11905_v56  ;;  %v11907_v7 = vld [vmem:[#allocation101_spill] sm:$0xff] }
 0x7cd   :  { %4611 = vst [vmem:[#allocation2 + $0xc0] sm:$0xff] %v4547_v55  ;;  %v4572_v16 = vmax.f32 %v11901_v54, %v4508_v25  ;;  %v4513_v61 = vmul.f32 0.01, %v11906_v28  ;;  %v4573_v37 = vmax.f32 %v11902_v11, %v4509_v49  ;;  %v4514_v15 = vmul.f32 0.01, %v11907_v7 }
 0x7ce   :  { %4612 = vst [vmem:[#allocation2 + $0xc8] sm:$0xff] %v4548_v2  ;;  %v4574_v55 = vmax.f32 %v11903_v48, %v4510_v60  ;;  %v4515_v2 = vmul.f32 0.01, %v11908_v62  ;;  %v4575_v1 = vmax.f32 %v11904_v35, %v4511_v9 }
 0x7cf   :  { %4613 = vst [vmem:[#allocation2 + $0xd0] sm:$0xff] %v4549_v29  ;;  %v11909_v29 = vld [vmem:[#allocation48_spill] sm:$0xff]  ;;  %v4577_v19 = vmax.f32 %v11906_v28, %v4513_v61 }
 0x7d0   :  { %4614 = vst [vmem:[#allocation2 + $0xd8] sm:$0xff] %v4550_v43  ;;  %v4516_v32 = vmul.f32 0.01, %v11909_v29  ;;  %v4576_v43 = vmax.f32 %v11905_v56, %v4512_v36  ;;  %v4579_v26 = vmax.f32 %v11908_v62, %v4515_v2 }
 0x7d1   :  { %4615 = vst [vmem:[#allocation2 + $0xe0] sm:$0xff] %v4551_v30  ;;  %v4517_v30 = vmul.f32 0.01, %v11910_v14 }
 0x7d2   :  { %4616 = vst [vmem:[#allocation2 + $0xe8] sm:$0xff] %v4552_v39  ;;  %v11911_v39 = vld [vmem:[#allocation84_spill] sm:$0xff] }
 0x7d3   :  { %4617 = vst [vmem:[#allocation2 + $0xf0] sm:$0xff] %v4553_v63  ;;  %v4518_v20 = vmul.f32 0.01, %v11911_v39  ;;  %v4578_v63 = vmax.f32 %v11907_v7, %v4514_v15  ;;  %v4581_v8 = vmax.f32 %v11910_v14, %v4517_v30 }
 0x7d4   :  { %4618 = vst [vmem:[#allocation2 + $0xf8] sm:$0xff] %v4554_v44  ;;  %v4519_v44 = vmul.f32 0.01, %v11912_v10 }
 0x7d5   :  { %4619 = vst [vmem:[#allocation2 + $0x100] sm:$0xff] %v4555_v13  ;;  %v11913_v13 = vld [vmem:[#allocation23_spill] sm:$0xff] }
 0x7d6   :  { %4620 = vst [vmem:[#allocation2 + $0x108] sm:$0xff] %v4556_v23  ;;  %v4520_v18 = vmul.f32 0.01, %v11913_v13  ;;  %v4580_v23 = vmax.f32 %v11909_v29, %v4516_v32  ;;  %v4583_v34 = vmax.f32 %v11912_v10, %v4519_v44 }
 0x7d7   :  { %4621 = vst [vmem:[#allocation2 + $0x110] sm:$0xff] %v4557_v46  ;;  %v4521_v46 = vmul.f32 0.01, %v11914_v52 }
 0x7d8   :  { %4622 = vst [vmem:[#allocation2 + $0x118] sm:$0xff] %v4558_v4  ;;  %v4582_v4 = vmax.f32 %v11911_v39, %v4518_v20 }
 0x7d9   :  { %4623 = vst [vmem:[#allocation2 + $0x120] sm:$0xff] %v4559_v41  ;;  %v4584_v41 = vmax.f32 %v11913_v13, %v4520_v18  ;;  %v4585_v50 = vmax.f32 %v11914_v52, %v4521_v46 }
 0x7da   :  { %4624 = vst [vmem:[#allocation2 + $0x128] sm:$0xff] %v4560_v59 }
 0x7db   :  { %4625 = vst [vmem:[#allocation2 + $0x130] sm:$0xff] %v4561_v38 }
 0x7dc   :  { %4626 = vst [vmem:[#allocation2 + $0x138] sm:$0xff] %v4562_v33 }
 0x7dd   :  { %4627 = vst [vmem:[#allocation2 + $0x140] sm:$0xff] %v4563_v51 }
 0x7de   :  { %4628 = vst [vmem:[#allocation2 + $0x148] sm:$0xff] %v4564_v6 }
 0x7df   :  { %4629 = vst [vmem:[#allocation2 + $0x150] sm:$0xff] %v4565_v17 }
 0x7e0   :  { %4630 = vst [vmem:[#allocation2 + $0x158] sm:$0xff] %v4566_v58 }
 0x7e1   :  { %4631 = vst [vmem:[#allocation2 + $0x160] sm:$0xff] %v4567_v42 }
 0x7e2   :  { %4632 = vst [vmem:[#allocation2 + $0x168] sm:$0xff] %v4568_v45 }
 0x7e3   :  { %4633 = vst [vmem:[#allocation2 + $0x170] sm:$0xff] %v4569_v53 }
 0x7e4   :  { %4634 = vst [vmem:[#allocation2 + $0x178] sm:$0xff] %v4570_v57 }
 0x7e5   :  { %4635 = vst [vmem:[#allocation2 + $0x180] sm:$0xff] %v4571_v40 }
 0x7e6   :  { %4636 = vst [vmem:[#allocation2 + $0x188] sm:$0xff] %v4572_v16 }
 0x7e7   :  { %4637 = vst [vmem:[#allocation2 + $0x190] sm:$0xff] %v4573_v37 }
 0x7e8   :  { %4638 = vst [vmem:[#allocation2 + $0x198] sm:$0xff] %v4574_v55 }
 0x7e9   :  { %4639 = vst [vmem:[#allocation2 + $0x1a0] sm:$0xff] %v4575_v1 }
 0x7ea   :  { %4640 = vst [vmem:[#allocation2 + $0x1a8] sm:$0xff] %v4576_v43 }
 0x7eb   :  { %4641 = vst [vmem:[#allocation2 + $0x1b0] sm:$0xff] %v4577_v19 }
 0x7ec   :  { %4642 = vst [vmem:[#allocation2 + $0x1b8] sm:$0xff] %v4578_v63 }
 0x7ed   :  { %4643 = vst [vmem:[#allocation2 + $0x1c0] sm:$0xff] %v4579_v26 }
 0x7ee   :  { %4644 = vst [vmem:[#allocation2 + $0x1c8] sm:$0xff] %v4580_v23 }
 0x7ef   :  { %4645 = vst [vmem:[#allocation2 + $0x1d0] sm:$0xff] %v4581_v8 }
 0x7f0   :  { %4646 = vst [vmem:[#allocation2 + $0x1d8] sm:$0xff] %v4582_v4 }
 0x7f1   :  { %4647 = vst [vmem:[#allocation2 + $0x1e0] sm:$0xff] %v4583_v34 }
 0x7f2   :  { %4648 = vst [vmem:[#allocation2 + $0x1e8] sm:$0xff] %v4584_v41 }
 0x7f3   :  { %4649 = vst [vmem:[#allocation2 + $0x1f0] sm:$0xff] %v4585_v50 }
 0x7f4   :  { %4663 = dma.vmem_to_hbm [thread:$0]  %s4656_s6, 8192, %s4658_s14, [#allocation3], %s6045_s15, %s6045_s15, %s6046_s16  }
 0x7f5   :  { %6037 = dma.done.wait [#allocation3], 8192  }
 0x7f6   :  { %6038 = vsyncadd [#allocation3], 4294959104 }
 0x7f7   :  { %4668 = vsyncpa [#allocation3], 1 }

</bundles_post_ra>
